<compile_context>
chip_gen: v6e
topology: v6e:2x2x1
jax: 0.10.0
libtpu: 0.0.40
codegen_flags: <defaults>
</compile_context>

<pallas_src>
from functools import partial

import numpy as np
import jax
import jax.numpy as jnp
from jax.experimental import pallas as pl
from jax.experimental.pallas import tpu as pltpu

# ----------------------------- config (small) --------------------------------
IMG = 16          # img_size
PATCH = 4         # patch_size
IN_CHANS = 3
EMBED = 32        # encoder embed_dim
DEPTH = 2         # encoder depth
NUM_HEADS = 4
DEC_EMBED = 32
DEC_DEPTH = 2
DEC_NUM_HEADS = 4
MLP_RATIO = 4.0
LN_EPS = 1e-5     # nn.LayerNorm default

GRID = IMG // PATCH
NUM_PATCHES = GRID * GRID
PATCH_DIM = PATCH * PATCH * IN_CHANS


# ------------------------ sincos pos-embed (numpy) ---------------------------
def get_1d_sincos_pos_embed_from_grid(embed_dim, pos):
    assert embed_dim % 2 == 0
    omega = np.arange(embed_dim // 2, dtype=np.float32)
    omega /= embed_dim / 2.0
    omega = 1.0 / 10000 ** omega
    pos = pos.reshape(-1)
    out = np.einsum('m,d->md', pos, omega)
    return np.concatenate([np.sin(out), np.cos(out)], axis=1)


def get_2d_sincos_pos_embed_from_grid(embed_dim, grid):
    assert embed_dim % 2 == 0
    emb_h = get_1d_sincos_pos_embed_from_grid(embed_dim // 2, grid[0])
    emb_w = get_1d_sincos_pos_embed_from_grid(embed_dim // 2, grid[1])
    return np.concatenate([emb_h, emb_w], axis=1)


def get_2d_sincos_pos_embed(embed_dim, grid_size, cls_token=False):
    grid_h = np.arange(grid_size, dtype=np.float32)
    grid_w = np.arange(grid_size, dtype=np.float32)
    grid = np.meshgrid(grid_w, grid_h)
    grid = np.stack(grid, axis=0).reshape([2, 1, grid_size, grid_size])
    pos_embed = get_2d_sincos_pos_embed_from_grid(embed_dim, grid)
    if cls_token:
        pos_embed = np.concatenate([np.zeros([1, embed_dim]), pos_embed], axis=0)
    return pos_embed


def _round_up(x, m):
    return ((x + m - 1) // m) * m


# ------------------------------ in-kernel helpers -----------------------------
def _ln(x, w, b):
    mean = jnp.mean(x, axis=-1, keepdims=True)
    var = jnp.mean((x - mean) ** 2, axis=-1, keepdims=True)
    return (x - mean) * jax.lax.rsqrt(var + LN_EPS) * w + b


def _key_bias(s_pad, s_valid):
    # additive bias that removes padded key columns from every softmax (f32 only)
    col = jax.lax.broadcasted_iota(jnp.int32, (1, 1, s_pad), 2)
    return jnp.where(col < s_valid, 0.0, -1e30).astype(jnp.float32)


def _head_masks(dim, num_heads):
    # static full-width lane masks, one per head (hoisted out of the depth loop)
    hd = dim // num_heads
    lane = jax.lax.broadcasted_iota(jnp.int32, (1, 1, dim), 2)
    return [jnp.where((lane >= h * hd) & (lane < (h + 1) * hd), 1.0, 0.0)
            for h in range(num_heads)]


def _block(x, attn_w, vec, fc1_w, fc1_b, fc2_w, num_heads, key_bias, head_masks):
    """One transformer block on the full padded batch x: (N, S, D).

    attn_w: (4, D, D) = [q_w, k_w, v_w, proj_w]
    vec:    (9, D)    = [ln1_w, ln1_b, q_b, k_b, v_b, proj_b, ln2_w, ln2_b, fc2_b]
    """
    N, S, D = x.shape
    hd = D // num_heads
    scale = hd ** -0.5
    ln1_w, ln1_b = vec[0:1], vec[1:2]
    q_b, k_b, v_b, proj_b = vec[2:3], vec[3:4], vec[4:5], vec[5:6]
    ln2_w, ln2_b, fc2_b = vec[6:7], vec[7:8], vec[8:9]

    # --- attention: full-width q/k/v (no in-kernel lane slicing of activations)
    h1 = _ln(x, ln1_w, ln1_b).reshape(N * S, D)
    q = (jnp.dot(h1, attn_w[0], preferred_element_type=jnp.float32) + q_b).reshape(N, S, D)
    k = (jnp.dot(h1, attn_w[1], preferred_element_type=jnp.float32) + k_b).reshape(N, S, D)
    v = (jnp.dot(h1, attn_w[2], preferred_element_type=jnp.float32) + v_b).reshape(N, S, D)

    ctx = jnp.zeros((N, S, D), jnp.float32)
    for hm in head_masks:
        # masking one operand restricts the contraction to this head's lanes;
        # masking v keeps per-head context in its own lanes so the sum over
        # heads lands directly in the full-width (n, s, h*hd+c) layout.
        s_h = jnp.einsum('nsd,ntd->nst', q * hm, k,
                         preferred_element_type=jnp.float32) * scale
        s_h = s_h + key_bias
        s_h = s_h - jnp.max(s_h, axis=-1, keepdims=True)
        e = jnp.exp(s_h)
        p = e * pl.reciprocal(jnp.sum(e, axis=-1, keepdims=True), approx=True)
        ctx = ctx + jnp.einsum('nst,ntd->nsd', p, v * hm,
                               preferred_element_type=jnp.float32)
    attn = jnp.dot(ctx.reshape(N * S, D), attn_w[3],
                   preferred_element_type=jnp.float32) + proj_b
    x = x + attn.reshape(N, S, D)

    # --- MLP ---
    h2 = _ln(x, ln2_w, ln2_b).reshape(N * S, D)
    z = jnp.dot(h2, fc1_w, preferred_element_type=jnp.float32) + fc1_b
    # TODO(synk): timm's nn.GELU is erf-exact; tanh approximation used for guaranteed Mosaic lowering.
    z = jax.nn.gelu(z, approximate=True)
    z = jnp.dot(z, fc2_w, preferred_element_type=jnp.float32) + fc2_b
    return x + z.reshape(N, S, D)


# ------------------------------ the fused kernel -------------------------------
def mae_kernel(patches_ref, target_ref, keep_src_ref, restore_src_ref,
               pe_w_ref, pos_patch_ref, enc_misc_ref,
               enc_attn_w_ref, enc_vec_ref, enc_fc1_w_ref, enc_fc1_b_ref, enc_fc2_w_ref,
               dec_embed_w_ref, dec_misc_ref, dec_pos_ref,
               dec_attn_w_ref, dec_vec_ref, dec_fc1_w_ref, dec_fc1_b_ref, dec_fc2_w_ref,
               pred_w_ref, pred_b_ref,
               pred_out_ref, loss_out_ref,
               *, enc_depth, dec_depth, enc_heads, dec_heads,
               s_enc_valid, s_dec_valid):
    N, L, K = patches_ref.shape
    E = pe_w_ref.shape[1]
    Dd = dec_embed_w_ref.shape[1]
    Se = keep_src_ref.shape[1]          # padded encoder seq length
    Sd = restore_src_ref.shape[1]       # padded decoder seq length
    P = pred_w_ref.shape[1]

    em = enc_misc_ref[...]              # (4, E): pe_b, cls(+pos), enc_norm_w, enc_norm_b
    pe_b, cls_tok = em[0:1], em[1:2]
    enc_norm_w, enc_norm_b = em[2:3], em[3:4]
    dm = dec_misc_ref[...]              # (4, Dd): dec_embed_b, mask_token, dec_norm_w/b
    dec_embed_b, mask_tok = dm[0:1], dm[1:2]
    dec_norm_w, dec_norm_b = dm[2:3], dm[3:4]

    # ---- patch embed (Conv2d stride=p == linear) + pos embed, all L patches ----
    x_emb = jnp.dot(patches_ref[...].reshape(N * L, K), pe_w_ref[...],
                    preferred_element_type=jnp.float32) + pe_b
    x_emb = x_emb.reshape(N, L, E) + pos_patch_ref[...]

    # ---- random-masking gather + cls prepend + pad, as a one-hot MXU matmul ----
    keep_src = keep_src_ref[...]                               # (N, Se) int32, -1 = empty
    gsel = jnp.where(
        jax.lax.broadcasted_iota(jnp.int32, (N, Se, L), 2) == keep_src[:, :, None],
        1.0, 0.0)
    x = jnp.einsum('nsl,nle->nse', gsel, x_emb, preferred_element_type=jnp.float32)
    row = jax.lax.broadcasted_iota(jnp.int32, (1, Se, 1), 1)
    x = x + jnp.where(row == 0, 1.0, 0.0) * cls_tok            # cls (+ its pos) on row 0

    # ---- encoder blocks + norm ----
    enc_bias = _key_bias(Se, s_enc_valid)
    enc_masks = _head_masks(E, enc_heads)
    for i in range(enc_depth):
        x = _block(x, enc_attn_w_ref[i], enc_vec_ref[i], enc_fc1_w_ref[i],
                   enc_fc1_b_ref[i], enc_fc2_w_ref[i], enc_heads, enc_bias, enc_masks)
    x = _ln(x, enc_norm_w, enc_norm_b)

    # ---- decoder embed ----
    xd = jnp.dot(x.reshape(N * Se, E), dec_embed_w_ref[...],
                 preferred_element_type=jnp.float32) + dec_embed_b
    xd = xd.reshape(N, Se, Dd)

    # ---- unshuffle + mask-token fill + dec pos embed, as one-hot MXU matmul ----
    restore_src = restore_src_ref[...]                         # (N, Sd) int32
    rsel = jnp.where(
        jax.lax.broadcasted_iota(jnp.int32, (N, Sd, Se), 2) == restore_src[:, :, None],
        1.0, 0.0)
    mask_rows = jnp.where(restore_src == -1, 1.0, 0.0)         # (N, Sd) 1 = removed patch
    y = jnp.einsum('nst,ntd->nsd', rsel, xd, preferred_element_type=jnp.float32)
    y = y + mask_rows[:, :, None] * mask_tok + dec_pos_ref[...]

    # ---- decoder blocks + norm ----
    dec_bias = _key_bias(Sd, s_dec_valid)
    dec_masks = _head_masks(Dd, dec_heads)
    for i in range(dec_depth):
        y = _block(y, dec_attn_w_ref[i], dec_vec_ref[i], dec_fc1_w_ref[i],
                   dec_fc1_b_ref[i], dec_fc2_w_ref[i], dec_heads, dec_bias, dec_masks)
    y = _ln(y, dec_norm_w, dec_norm_b)

    # ---- decoder pred ----
    pred = jnp.dot(y.reshape(N * Sd, Dd), pred_w_ref[...],
                   preferred_element_type=jnp.float32) + pred_b_ref[...]
    pred = pred.reshape(N, Sd, P)
    pred_out_ref[...] = pred

    # ---- masked MSE loss (cls / pad rows carry mask == 0) ----
    diff = pred - target_ref[...]
    per_patch = jnp.mean(diff * diff, axis=-1)                 # (N, Sd)
    num = jnp.sum(per_patch * mask_rows, keepdims=True)        # (1, 1)
    den = jnp.sum(mask_rows, keepdims=True)
    loss_out_ref[...] = num / den


# ------------------------------ parameters --------------------------------
def _xavier_uniform(key, shape):
    fan_in, fan_out = shape[0], shape[1]
    lim = float(np.sqrt(6.0 / (fan_in + fan_out)))
    return jax.random.uniform(key, shape, jnp.float32, -lim, lim)


def _init_block_stacks(keys, dim, hidden, depth):
    attn_ws, vecs, fc1_ws, fc1_bs, fc2_ws = [], [], [], [], []
    for i in range(depth):
        k = jax.random.split(keys[i], 4)
        qkv = _xavier_uniform(k[0], (dim, 3 * dim))            # fused init, split host-side
        q_w, k_w, v_w = qkv[:, :dim], qkv[:, dim:2 * dim], qkv[:, 2 * dim:]
        proj_w = _xavier_uniform(k[1], (dim, dim))
        attn_ws.append(jnp.stack([q_w, k_w, v_w, proj_w]))
        one = jnp.ones((dim,), jnp.float32)
        zero = jnp.zeros((dim,), jnp.float32)
        # rows: ln1_w, ln1_b, q_b, k_b, v_b, proj_b, ln2_w, ln2_b, fc2_b
        vecs.append(jnp.stack([one, zero, zero, zero, zero, zero, one, zero, zero]))
        fc1_ws.append(_xavier_uniform(k[2], (dim, hidden)))
        fc1_bs.append(jnp.zeros((1, hidden), jnp.float32))
        fc2_ws.append(_xavier_uniform(k[3], (hidden, dim)))
    return (jnp.stack(attn_ws), jnp.stack(vecs), jnp.stack(fc1_ws),
            jnp.stack(fc1_bs), jnp.stack(fc2_ws))


def init_params(key):
    ks = jax.random.split(key, 8)
    hidden_enc = int(EMBED * MLP_RATIO)
    hidden_dec = int(DEC_EMBED * MLP_RATIO)
    s_dec_pad = _round_up(NUM_PATCHES + 1, 8)

    params = {}
    params['pe_w'] = _xavier_uniform(ks[0], (IN_CHANS * PATCH * PATCH, EMBED))
    params['pe_b'] = jnp.zeros((1, EMBED), jnp.float32)
    # TODO(synk): reference uses trunc_normal(std=0.02); plain normal*0.02 kept.
    params['cls_token'] = 0.02 * jax.random.normal(ks[1], (1, 1, EMBED), jnp.float32)
    params['mask_token'] = 0.02 * jax.random.normal(ks[2], (1, 1, DEC_EMBED), jnp.float32)
    params['pos_embed'] = jnp.asarray(
        get_2d_sincos_pos_embed(EMBED, GRID, cls_token=True), jnp.float32)[None]
    dec_pos = np.asarray(get_2d_sincos_pos_embed(DEC_EMBED, GRID, cls_token=True),
                         np.float32)[None]
    dec_pos_pad = np.zeros((1, s_dec_pad, DEC_EMBED), np.float32)
    dec_pos_pad[:, :NUM_PATCHES + 1, :] = dec_pos
    params['dec_pos_embed_pad'] = jnp.asarray(dec_pos_pad)     # pre-padded at init

    enc_keys = jax.random.split(ks[3], DEPTH)
    (params['enc_attn_w'], params['enc_vec'], params['enc_fc1_w'],
     params['enc_fc1_b'], params['enc_fc2_w']) = _init_block_stacks(
        enc_keys, EMBED, hidden_enc, DEPTH)
    params['enc_norm_w'] = jnp.ones((1, EMBED), jnp.float32)
    params['enc_norm_b'] = jnp.zeros((1, EMBED), jnp.float32)

    params['dec_embed_w'] = _xavier_uniform(ks[4], (EMBED, DEC_EMBED))
    params['dec_embed_b'] = jnp.zeros((1, DEC_EMBED), jnp.float32)
    dec_keys = jax.random.split(ks[5], DEC_DEPTH)
    (params['dec_attn_w'], params['dec_vec'], params['dec_fc1_w'],
     params['dec_fc1_b'], params['dec_fc2_w']) = _init_block_stacks(
        dec_keys, DEC_EMBED, hidden_dec, DEC_DEPTH)
    params['dec_norm_w'] = jnp.ones((1, DEC_EMBED), jnp.float32)
    params['dec_norm_b'] = jnp.zeros((1, DEC_EMBED), jnp.float32)
    params['dec_pred_w'] = _xavier_uniform(ks[6], (DEC_EMBED, PATCH_DIM))
    params['dec_pred_b'] = jnp.zeros((1, PATCH_DIM), jnp.float32)
    return params


# ------------------------------ forward pass --------------------------------
def mae_forward(params, imgs, key, mask_ratio=0.75):
    N, C, H, W = imgs.shape
    p = PATCH
    h = w = H // p
    L = h * w
    E, Dd, P = EMBED, DEC_EMBED, PATCH_DIM
    len_keep = int(L * (1 - mask_ratio))
    S_enc = len_keep + 1
    S_enc_pad = _round_up(S_enc, 8)
    S_dec = L + 1
    S_dec_pad = _round_up(S_dec, 8)

    # patch extraction in Conv2d(stride=p) flattening order (c, ph, pw)
    patches = imgs.reshape(N, C, h, p, w, p).transpose(0, 2, 4, 1, 3, 5)
    patches = patches.reshape(N, L, C * p * p)
    # loss target in patchify order 'nchpwq->nhwpqc', laid out like the decoder seq
    target = imgs.reshape(N, C, h, p, w, p).transpose(0, 2, 4, 3, 5, 1)
    target = target.reshape(N, L, p * p * C)                   # norm_pix_loss=False
    target_pad = jnp.pad(target, ((0, 0), (1, S_dec_pad - 1 - L), (0, 0)))

    # random masking indices (argsort glue stays in plain JAX)
    noise = jax.random.uniform(key, (N, L))
    ids_shuffle = jnp.argsort(noise, axis=1)
    ids_restore = jnp.argsort(ids_shuffle, axis=1)
    ids_keep = ids_shuffle[:, :len_keep]
    mask = (ids_restore >= len_keep).astype(jnp.float32)       # (N, L), 1 = removed

    # int32 source-index arrays consumed by the in-kernel one-hot gathers
    keep_src = jnp.pad(ids_keep.astype(jnp.int32),
                       ((0, 0), (1, S_enc_pad - 1 - len_keep)), constant_values=-1)
    body = jnp.where(ids_restore < len_keep, ids_restore + 1, -1).astype(jnp.int32)
    restore_src = jnp.pad(body, ((0, 0), (1, S_dec_pad - 1 - L)),
                          constant_values=((0, 0), (0, -2)))

    # packed misc vectors (4 rows each) to cut DMA-descriptor count
    cls_tok = (params['cls_token'] + params['pos_embed'][:, :1, :]).reshape(1, E)
    enc_misc = jnp.concatenate([params['pe_b'], cls_tok,
                                params['enc_norm_w'], params['enc_norm_b']], axis=0)
    dec_misc = jnp.concatenate([params['dec_embed_b'],
                                params['mask_token'].reshape(1, Dd),
                                params['dec_norm_w'], params['dec_norm_b']], axis=0)
    pos_patch = params['pos_embed'][:, 1:, :]

    kernel_fn = partial(mae_kernel,
                        enc_depth=DEPTH, dec_depth=DEC_DEPTH,
                        enc_heads=NUM_HEADS, dec_heads=DEC_NUM_HEADS,
                        s_enc_valid=S_enc, s_dec_valid=S_dec)

    args = (patches, target_pad, keep_src, restore_src,
            params['pe_w'], pos_patch, enc_misc,
            params['enc_attn_w'], params['enc_vec'], params['enc_fc1_w'],
            params['enc_fc1_b'], params['enc_fc2_w'],
            params['dec_embed_w'], dec_misc, params['dec_pos_embed_pad'],
            params['dec_attn_w'], params['dec_vec'], params['dec_fc1_w'],
            params['dec_fc1_b'], params['dec_fc2_w'],
            params['dec_pred_w'], params['dec_pred_b'])

    # advisory cost estimate (helps XLA schedule the argsort/pad glue around the call)
    hid_e, hid_d = int(EMBED * MLP_RATIO), int(DEC_EMBED * MLP_RATIO)
    ntok_e, ntok_d = N * S_enc_pad, N * S_dec_pad
    flops = 2 * N * L * patches.shape[-1] * E
    flops += DEPTH * (2 * ntok_e * E * (4 * E + 2 * hid_e)
                      + 4 * NUM_HEADS * ntok_e * S_enc_pad * E)
    flops += 2 * ntok_e * E * Dd
    flops += DEC_DEPTH * (2 * ntok_d * Dd * (4 * Dd + 2 * hid_d)
                          + 4 * DEC_NUM_HEADS * ntok_d * S_dec_pad * Dd)
    flops += 2 * ntok_d * Dd * P
    transcend = (DEPTH * (NUM_HEADS * ntok_e * S_enc_pad + ntok_e * hid_e)
                 + DEC_DEPTH * (DEC_NUM_HEADS * ntok_d * S_dec_pad + ntok_d * hid_d))
    bytes_accessed = 4 * (sum(int(np.prod(a.shape)) for a in args)
                          + N * S_dec_pad * P + 1)

    pred_pad, loss = pl.pallas_call(
        kernel_fn,
        out_shape=(jax.ShapeDtypeStruct((N, S_dec_pad, P), jnp.float32),
                   jax.ShapeDtypeStruct((1, 1), jnp.float32)),
        compiler_params=pltpu.CompilerParams(vmem_limit_bytes=32 * 1024 * 1024),
        cost_estimate=pl.CostEstimate(flops=int(flops),
                                      transcendentals=int(transcend),
                                      bytes_accessed=int(bytes_accessed)),
    )(*args)

    pred = pred_pad[:, 1:L + 1, :]                             # drop cls + pad rows
    return loss[0, 0], pred, mask


mae_forward_jit = jax.jit(mae_forward, static_argnames=("mask_ratio",))


# ------------------------------ main --------------------------------
if __name__ == "__main__":
    root = jax.random.PRNGKey(0)
    pkey, ikey, mkey = jax.random.split(root, 3)

    params = init_params(pkey)
    imgs = jax.random.normal(ikey, (2, IN_CHANS, IMG, IMG), jnp.float32)

    loss, pred, mask = mae_forward_jit(params, imgs, mkey, mask_ratio=0.75)
    jax.block_until_ready((loss, pred, mask))

    assert pred.shape == (2, NUM_PATCHES, PATCH_DIM)
    assert mask.shape == (2, NUM_PATCHES)
    assert bool(jnp.isfinite(loss))
    print("KERNEL_OK")
</pallas_src>

<mosaic_0001>
module attributes {stable_mosaic.version = 11 : i64} {
  func.func @mae_kernel(%arg0: memref<2x16x48xf32, #tpu.memory_space<vmem>>, %arg1: memref<2x24x48xf32, #tpu.memory_space<vmem>>, %arg2: memref<2x8xi32, #tpu.memory_space<vmem>>, %arg3: memref<2x24xi32, #tpu.memory_space<vmem>>, %arg4: memref<48x32xf32, #tpu.memory_space<vmem>>, %arg5: memref<1x16x32xf32, #tpu.memory_space<vmem>>, %arg6: memref<4x32xf32, #tpu.memory_space<vmem>>, %arg7: memref<2x4x32x32xf32, #tpu.memory_space<vmem>>, %arg8: memref<2x9x32xf32, #tpu.memory_space<vmem>>, %arg9: memref<2x32x128xf32, #tpu.memory_space<vmem>>, %arg10: memref<2x1x128xf32, #tpu.memory_space<vmem>>, %arg11: memref<2x128x32xf32, #tpu.memory_space<vmem>>, %arg12: memref<32x32xf32, #tpu.memory_space<vmem>>, %arg13: memref<4x32xf32, #tpu.memory_space<vmem>>, %arg14: memref<1x24x32xf32, #tpu.memory_space<vmem>>, %arg15: memref<2x4x32x32xf32, #tpu.memory_space<vmem>>, %arg16: memref<2x9x32xf32, #tpu.memory_space<vmem>>, %arg17: memref<2x32x128xf32, #tpu.memory_space<vmem>>, %arg18: memref<2x1x128xf32, #tpu.memory_space<vmem>>, %arg19: memref<2x128x32xf32, #tpu.memory_space<vmem>>, %arg20: memref<32x48xf32, #tpu.memory_space<vmem>>, %arg21: memref<1x48xf32, #tpu.memory_space<vmem>>, %arg22: memref<2x24x48xf32, #tpu.memory_space<vmem>>, %arg23: memref<1x1xf32, #tpu.memory_space<vmem>>) attributes {dimension_semantics = [], scalar_prefetch = 0 : i64, scratch_operands = 0 : i64, tpu.core_type = #tpu.core_type<tc>} {
    %c0 = arith.constant 0 : index
    %c0_0 = arith.constant 0 : index
    %0 = vector.load %arg6[%c0, %c0_0] : memref<4x32xf32, #tpu.memory_space<vmem>>, vector<4x32xf32>
    %1 = vector.extract_strided_slice %0 {offsets = [0, 0], sizes = [1, 32], strides = [1, 1]} : vector<4x32xf32> to vector<1x32xf32>
    %2 = vector.extract_strided_slice %0 {offsets = [1, 0], sizes = [1, 32], strides = [1, 1]} : vector<4x32xf32> to vector<1x32xf32>
    %3 = vector.extract_strided_slice %0 {offsets = [2, 0], sizes = [1, 32], strides = [1, 1]} : vector<4x32xf32> to vector<1x32xf32>
    %4 = vector.extract_strided_slice %0 {offsets = [3, 0], sizes = [1, 32], strides = [1, 1]} : vector<4x32xf32> to vector<1x32xf32>
    %c0_1 = arith.constant 0 : index
    %c0_2 = arith.constant 0 : index
    %5 = vector.load %arg13[%c0_1, %c0_2] : memref<4x32xf32, #tpu.memory_space<vmem>>, vector<4x32xf32>
    %6 = vector.extract_strided_slice %5 {offsets = [0, 0], sizes = [1, 32], strides = [1, 1]} : vector<4x32xf32> to vector<1x32xf32>
    %7 = vector.extract_strided_slice %5 {offsets = [1, 0], sizes = [1, 32], strides = [1, 1]} : vector<4x32xf32> to vector<1x32xf32>
    %8 = vector.extract_strided_slice %5 {offsets = [2, 0], sizes = [1, 32], strides = [1, 1]} : vector<4x32xf32> to vector<1x32xf32>
    %9 = vector.extract_strided_slice %5 {offsets = [3, 0], sizes = [1, 32], strides = [1, 1]} : vector<4x32xf32> to vector<1x32xf32>
    %c0_3 = arith.constant 0 : index
    %c0_4 = arith.constant 0 : index
    %c0_5 = arith.constant 0 : index
    %10 = vector.load %arg0[%c0_3, %c0_4, %c0_5] : memref<2x16x48xf32, #tpu.memory_space<vmem>>, vector<2x16x48xf32>
    %11 = vector.shape_cast %10 : vector<2x16x48xf32> to vector<32x48xf32>
    %c0_6 = arith.constant 0 : index
    %c0_7 = arith.constant 0 : index
    %12 = vector.load %arg4[%c0_6, %c0_7] : memref<48x32xf32, #tpu.memory_space<vmem>>, vector<48x32xf32>
    %cst = arith.constant dense<0.000000e+00> : vector<32x32xf32>
    %13 = tpu.matmul %11, %12, %cst {dimension_numbers = #tpu.dot_dimension_numbers<[1], [0], [0], [1], [0, 0, 1, 1], [], []>} : vector<32x48xf32>, vector<48x32xf32>, vector<32x32xf32> -> vector<32x32xf32>
    %14 = vector.broadcast %1 : vector<1x32xf32> to vector<32x32xf32>
    %15 = arith.addf %13, %14 : vector<32x32xf32>
    %16 = vector.shape_cast %15 : vector<32x32xf32> to vector<2x16x32xf32>
    %c0_8 = arith.constant 0 : index
    %c0_9 = arith.constant 0 : index
    %c0_10 = arith.constant 0 : index
    %17 = vector.load %arg5[%c0_8, %c0_9, %c0_10] : memref<1x16x32xf32, #tpu.memory_space<vmem>>, vector<1x16x32xf32>
    %18 = vector.broadcast %17 : vector<1x16x32xf32> to vector<2x16x32xf32>
    %19 = arith.addf %16, %18 : vector<2x16x32xf32>
    %c0_11 = arith.constant 0 : index
    %c0_12 = arith.constant 0 : index
    %20 = vector.load %arg2[%c0_11, %c0_12] : memref<2x8xi32, #tpu.memory_space<vmem>>, vector<2x8xi32>
    %21 = tpu.iota {dimensions = array<i32: 2>} : vector<2x8x16xi32>
    %22 = vector.shape_cast %20 : vector<2x8xi32> to vector<2x8x1xi32>
    %23 = vector.broadcast %22 : vector<2x8x1xi32> to vector<2x8x16xi32>
    %24 = arith.cmpi eq, %21, %23 : vector<2x8x16xi32>
    %cst_13 = arith.constant 1.000000e+00 : f32
    %cst_14 = arith.constant 0.000000e+00 : f32
    %25 = vector.broadcast %cst_13 : f32 to vector<2x8x16xf32>
    %26 = vector.broadcast %cst_14 : f32 to vector<2x8x16xf32>
    %27 = arith.select %24, %25, %26 : vector<2x8x16xi1>, vector<2x8x16xf32>
    "tpu.trace_start"() <{level = 10 : i32, message = "nsl,nle->nse"}> : () -> ()
    %cst_15 = arith.constant dense<0.000000e+00> : vector<2x8x32xf32>
    %28 = tpu.matmul %27, %19, %cst_15 {dimension_numbers = #tpu.dot_dimension_numbers<[2], [1], [1], [2], [0, 0, 0, 1, 1, 2], [0], [0]>} : vector<2x8x16xf32>, vector<2x16x32xf32>, vector<2x8x32xf32> -> vector<2x8x32xf32>
    "tpu.trace_stop"() : () -> ()
    %29 = tpu.iota {dimensions = array<i32: 1>} : vector<1x8x1xi32>
    %c0_i32 = arith.constant 0 : i32
    %30 = vector.broadcast %c0_i32 : i32 to vector<1x8x1xi32>
    %31 = arith.cmpi eq, %29, %30 : vector<1x8x1xi32>
    %cst_16 = arith.constant 1.000000e+00 : f32
    %cst_17 = arith.constant 0.000000e+00 : f32
    %32 = vector.broadcast %cst_16 : f32 to vector<1x8x1xf32>
    %33 = vector.broadcast %cst_17 : f32 to vector<1x8x1xf32>
    %34 = arith.select %31, %32, %33 : vector<1x8x1xi1>, vector<1x8x1xf32>
    %35 = vector.shape_cast %2 : vector<1x32xf32> to vector<1x1x32xf32>
    %36 = vector.broadcast %34 : vector<1x8x1xf32> to vector<1x8x32xf32>
    %37 = vector.broadcast %35 : vector<1x1x32xf32> to vector<1x8x32xf32>
    %38 = arith.mulf %36, %37 : vector<1x8x32xf32>
    %39 = vector.broadcast %38 : vector<1x8x32xf32> to vector<2x8x32xf32>
    %40 = arith.addf %28, %39 : vector<2x8x32xf32>
    %41 = tpu.iota {dimensions = array<i32: 2>} : vector<1x1x8xi32>
    %c5_i32 = arith.constant 5 : i32
    %42 = vector.broadcast %c5_i32 : i32 to vector<1x1x8xi32>
    %43 = arith.cmpi slt, %41, %42 : vector<1x1x8xi32>
    %cst_18 = arith.constant 0.000000e+00 : f32
    %cst_19 = arith.constant -1.000000e+30 : f32
    %44 = vector.broadcast %cst_18 : f32 to vector<1x1x8xf32>
    %45 = vector.broadcast %cst_19 : f32 to vector<1x1x8xf32>
    %46 = arith.select %43, %44, %45 : vector<1x1x8xi1>, vector<1x1x8xf32>
    %47 = tpu.iota {dimensions = array<i32: 2>} : vector<1x1x32xi32>
    %c0_i32_20 = arith.constant 0 : i32
    %48 = vector.broadcast %c0_i32_20 : i32 to vector<1x1x32xi32>
    %49 = arith.cmpi sge, %47, %48 : vector<1x1x32xi32>
    %c8_i32 = arith.constant 8 : i32
    %50 = vector.broadcast %c8_i32 : i32 to vector<1x1x32xi32>
    %51 = arith.cmpi slt, %47, %50 : vector<1x1x32xi32>
    %52 = arith.andi %49, %51 : vector<1x1x32xi1>
    %cst_21 = arith.constant 1.000000e+00 : f32
    %cst_22 = arith.constant 0.000000e+00 : f32
    %53 = vector.broadcast %cst_21 : f32 to vector<1x1x32xf32>
    %54 = vector.broadcast %cst_22 : f32 to vector<1x1x32xf32>
    %55 = arith.select %52, %53, %54 : vector<1x1x32xi1>, vector<1x1x32xf32>
    %c8_i32_23 = arith.constant 8 : i32
    %56 = vector.broadcast %c8_i32_23 : i32 to vector<1x1x32xi32>
    %57 = arith.cmpi sge, %47, %56 : vector<1x1x32xi32>
    %c16_i32 = arith.constant 16 : i32
    %58 = vector.broadcast %c16_i32 : i32 to vector<1x1x32xi32>
    %59 = arith.cmpi slt, %47, %58 : vector<1x1x32xi32>
    %60 = arith.andi %57, %59 : vector<1x1x32xi1>
    %cst_24 = arith.constant 1.000000e+00 : f32
    %cst_25 = arith.constant 0.000000e+00 : f32
    %61 = vector.broadcast %cst_24 : f32 to vector<1x1x32xf32>
    %62 = vector.broadcast %cst_25 : f32 to vector<1x1x32xf32>
    %63 = arith.select %60, %61, %62 : vector<1x1x32xi1>, vector<1x1x32xf32>
    %c16_i32_26 = arith.constant 16 : i32
    %64 = vector.broadcast %c16_i32_26 : i32 to vector<1x1x32xi32>
    %65 = arith.cmpi sge, %47, %64 : vector<1x1x32xi32>
    %c24_i32 = arith.constant 24 : i32
    %66 = vector.broadcast %c24_i32 : i32 to vector<1x1x32xi32>
    %67 = arith.cmpi slt, %47, %66 : vector<1x1x32xi32>
    %68 = arith.andi %65, %67 : vector<1x1x32xi1>
    %cst_27 = arith.constant 1.000000e+00 : f32
    %cst_28 = arith.constant 0.000000e+00 : f32
    %69 = vector.broadcast %cst_27 : f32 to vector<1x1x32xf32>
    %70 = vector.broadcast %cst_28 : f32 to vector<1x1x32xf32>
    %71 = arith.select %68, %69, %70 : vector<1x1x32xi1>, vector<1x1x32xf32>
    %c24_i32_29 = arith.constant 24 : i32
    %72 = vector.broadcast %c24_i32_29 : i32 to vector<1x1x32xi32>
    %73 = arith.cmpi sge, %47, %72 : vector<1x1x32xi32>
    %c32_i32 = arith.constant 32 : i32
    %74 = vector.broadcast %c32_i32 : i32 to vector<1x1x32xi32>
    %75 = arith.cmpi slt, %47, %74 : vector<1x1x32xi32>
    %76 = arith.andi %73, %75 : vector<1x1x32xi1>
    %cst_30 = arith.constant 1.000000e+00 : f32
    %cst_31 = arith.constant 0.000000e+00 : f32
    %77 = vector.broadcast %cst_30 : f32 to vector<1x1x32xf32>
    %78 = vector.broadcast %cst_31 : f32 to vector<1x1x32xf32>
    %79 = arith.select %76, %77, %78 : vector<1x1x32xi1>, vector<1x1x32xf32>
    %c0_32 = arith.constant 0 : index
    %c0_33 = arith.constant 0 : index
    %c0_34 = arith.constant 0 : index
    %c0_35 = arith.constant 0 : index
    %80 = vector.load %arg7[%c0_32, %c0_33, %c0_34, %c0_35] : memref<2x4x32x32xf32, #tpu.memory_space<vmem>>, vector<1x4x32x32xf32>
    %81 = vector.shape_cast %80 : vector<1x4x32x32xf32> to vector<4x32x32xf32>
    %c0_36 = arith.constant 0 : index
    %c0_37 = arith.constant 0 : index
    %c0_38 = arith.constant 0 : index
    %82 = vector.load %arg8[%c0_36, %c0_37, %c0_38] : memref<2x9x32xf32, #tpu.memory_space<vmem>>, vector<1x9x32xf32>
    %83 = vector.shape_cast %82 : vector<1x9x32xf32> to vector<9x32xf32>
    %c0_39 = arith.constant 0 : index
    %c0_40 = arith.constant 0 : index
    %c0_41 = arith.constant 0 : index
    %84 = vector.load %arg9[%c0_39, %c0_40, %c0_41] : memref<2x32x128xf32, #tpu.memory_space<vmem>>, vector<1x32x128xf32>
    %85 = vector.shape_cast %84 : vector<1x32x128xf32> to vector<32x128xf32>
    %c0_42 = arith.constant 0 : index
    %c0_43 = arith.constant 0 : index
    %c0_44 = arith.constant 0 : index
    %86 = vector.load %arg10[%c0_42, %c0_43, %c0_44] : memref<2x1x128xf32, #tpu.memory_space<vmem>>, vector<1x1x128xf32>
    %87 = vector.shape_cast %86 : vector<1x1x128xf32> to vector<1x128xf32>
    %c0_45 = arith.constant 0 : index
    %c0_46 = arith.constant 0 : index
    %c0_47 = arith.constant 0 : index
    %88 = vector.load %arg11[%c0_45, %c0_46, %c0_47] : memref<2x128x32xf32, #tpu.memory_space<vmem>>, vector<1x128x32xf32>
    %89 = vector.shape_cast %88 : vector<1x128x32xf32> to vector<128x32xf32>
    %90 = vector.extract_strided_slice %83 {offsets = [0, 0], sizes = [1, 32], strides = [1, 1]} : vector<9x32xf32> to vector<1x32xf32>
    %91 = vector.extract_strided_slice %83 {offsets = [1, 0], sizes = [1, 32], strides = [1, 1]} : vector<9x32xf32> to vector<1x32xf32>
    %92 = vector.extract_strided_slice %83 {offsets = [2, 0], sizes = [1, 32], strides = [1, 1]} : vector<9x32xf32> to vector<1x32xf32>
    %93 = vector.extract_strided_slice %83 {offsets = [3, 0], sizes = [1, 32], strides = [1, 1]} : vector<9x32xf32> to vector<1x32xf32>
    %94 = vector.extract_strided_slice %83 {offsets = [4, 0], sizes = [1, 32], strides = [1, 1]} : vector<9x32xf32> to vector<1x32xf32>
    %95 = vector.extract_strided_slice %83 {offsets = [5, 0], sizes = [1, 32], strides = [1, 1]} : vector<9x32xf32> to vector<1x32xf32>
    %96 = vector.extract_strided_slice %83 {offsets = [6, 0], sizes = [1, 32], strides = [1, 1]} : vector<9x32xf32> to vector<1x32xf32>
    %97 = vector.extract_strided_slice %83 {offsets = [7, 0], sizes = [1, 32], strides = [1, 1]} : vector<9x32xf32> to vector<1x32xf32>
    %98 = vector.extract_strided_slice %83 {offsets = [8, 0], sizes = [1, 32], strides = [1, 1]} : vector<9x32xf32> to vector<1x32xf32>
    %cst_48 = arith.constant dense<0.000000e+00> : vector<2x8xf32>
    %99 = vector.multi_reduction <add>, %40, %cst_48 [2] : vector<2x8x32xf32> to vector<2x8xf32>
    %100 = vector.shape_cast %99 : vector<2x8xf32> to vector<2x8x1xf32>
    %cst_49 = arith.constant 3.200000e+01 : f32
    %101 = vector.broadcast %cst_49 : f32 to vector<2x8x1xf32>
    %102 = arith.divf %100, %101 : vector<2x8x1xf32>
    %103 = vector.broadcast %102 : vector<2x8x1xf32> to vector<2x8x32xf32>
    %104 = arith.subf %40, %103 : vector<2x8x32xf32>
    %105 = arith.mulf %104, %104 : vector<2x8x32xf32>
    %cst_50 = arith.constant dense<0.000000e+00> : vector<2x8xf32>
    %106 = vector.multi_reduction <add>, %105, %cst_50 [2] : vector<2x8x32xf32> to vector<2x8xf32>
    %107 = vector.shape_cast %106 : vector<2x8xf32> to vector<2x8x1xf32>
    %cst_51 = arith.constant 3.200000e+01 : f32
    %108 = vector.broadcast %cst_51 : f32 to vector<2x8x1xf32>
    %109 = arith.divf %107, %108 : vector<2x8x1xf32>
    %110 = vector.broadcast %102 : vector<2x8x1xf32> to vector<2x8x32xf32>
    %111 = arith.subf %40, %110 : vector<2x8x32xf32>
    %cst_52 = arith.constant 9.99999974E-6 : f32
    %112 = vector.broadcast %cst_52 : f32 to vector<2x8x1xf32>
    %113 = arith.addf %109, %112 : vector<2x8x1xf32>
    %114 = math.rsqrt %113 : vector<2x8x1xf32>
    %115 = vector.broadcast %114 : vector<2x8x1xf32> to vector<2x8x32xf32>
    %116 = arith.mulf %111, %115 : vector<2x8x32xf32>
    %117 = vector.shape_cast %90 : vector<1x32xf32> to vector<1x1x32xf32>
    %118 = vector.broadcast %117 : vector<1x1x32xf32> to vector<2x8x32xf32>
    %119 = arith.mulf %116, %118 : vector<2x8x32xf32>
    %120 = vector.shape_cast %91 : vector<1x32xf32> to vector<1x1x32xf32>
    %121 = vector.broadcast %120 : vector<1x1x32xf32> to vector<2x8x32xf32>
    %122 = arith.addf %119, %121 : vector<2x8x32xf32>
    %123 = vector.shape_cast %122 : vector<2x8x32xf32> to vector<16x32xf32>
    %124 = vector.extract_strided_slice %81 {offsets = [0, 0, 0], sizes = [1, 32, 32], strides = [1, 1, 1]} : vector<4x32x32xf32> to vector<1x32x32xf32>
    %125 = vector.shape_cast %124 : vector<1x32x32xf32> to vector<32x32xf32>
    %cst_53 = arith.constant dense<0.000000e+00> : vector<16x32xf32>
    %126 = tpu.matmul %123, %125, %cst_53 {dimension_numbers = #tpu.dot_dimension_numbers<[1], [0], [0], [1], [0, 0, 1, 1], [], []>} : vector<16x32xf32>, vector<32x32xf32>, vector<16x32xf32> -> vector<16x32xf32>
    %127 = vector.broadcast %92 : vector<1x32xf32> to vector<16x32xf32>
    %128 = arith.addf %126, %127 : vector<16x32xf32>
    %129 = vector.shape_cast %128 : vector<16x32xf32> to vector<2x8x32xf32>
    %130 = vector.extract_strided_slice %81 {offsets = [1, 0, 0], sizes = [1, 32, 32], strides = [1, 1, 1]} : vector<4x32x32xf32> to vector<1x32x32xf32>
    %131 = vector.shape_cast %130 : vector<1x32x32xf32> to vector<32x32xf32>
    %cst_54 = arith.constant dense<0.000000e+00> : vector<16x32xf32>
    %132 = tpu.matmul %123, %131, %cst_54 {dimension_numbers = #tpu.dot_dimension_numbers<[1], [0], [0], [1], [0, 0, 1, 1], [], []>} : vector<16x32xf32>, vector<32x32xf32>, vector<16x32xf32> -> vector<16x32xf32>
    %133 = vector.broadcast %93 : vector<1x32xf32> to vector<16x32xf32>
    %134 = arith.addf %132, %133 : vector<16x32xf32>
    %135 = vector.shape_cast %134 : vector<16x32xf32> to vector<2x8x32xf32>
    %136 = vector.extract_strided_slice %81 {offsets = [2, 0, 0], sizes = [1, 32, 32], strides = [1, 1, 1]} : vector<4x32x32xf32> to vector<1x32x32xf32>
    %137 = vector.shape_cast %136 : vector<1x32x32xf32> to vector<32x32xf32>
    %cst_55 = arith.constant dense<0.000000e+00> : vector<16x32xf32>
    %138 = tpu.matmul %123, %137, %cst_55 {dimension_numbers = #tpu.dot_dimension_numbers<[1], [0], [0], [1], [0, 0, 1, 1], [], []>} : vector<16x32xf32>, vector<32x32xf32>, vector<16x32xf32> -> vector<16x32xf32>
    %139 = vector.broadcast %94 : vector<1x32xf32> to vector<16x32xf32>
    %140 = arith.addf %138, %139 : vector<16x32xf32>
    %141 = vector.shape_cast %140 : vector<16x32xf32> to vector<2x8x32xf32>
    %cst_56 = arith.constant 0.000000e+00 : f32
    %142 = vector.broadcast %cst_56 : f32 to vector<2x8x32xf32>
    %143 = vector.broadcast %55 : vector<1x1x32xf32> to vector<2x8x32xf32>
    %144 = arith.mulf %129, %143 : vector<2x8x32xf32>
    "tpu.trace_start"() <{level = 10 : i32, message = "nsd,ntd->nst"}> : () -> ()
    %cst_57 = arith.constant dense<0.000000e+00> : vector<2x8x8xf32>
    %145 = tpu.matmul %144, %135, %cst_57 {dimension_numbers = #tpu.dot_dimension_numbers<[2], [2], [1], [1], [0, 0, 0, 1, 1, 1], [0], [0]>} : vector<2x8x32xf32>, vector<2x8x32xf32>, vector<2x8x8xf32> -> vector<2x8x8xf32>
    "tpu.trace_stop"() : () -> ()
    %cst_58 = arith.constant 0.353553385 : f32
    %146 = vector.broadcast %cst_58 : f32 to vector<2x8x8xf32>
    %147 = arith.mulf %145, %146 : vector<2x8x8xf32>
    %148 = vector.broadcast %46 : vector<1x1x8xf32> to vector<2x8x8xf32>
    %149 = arith.addf %147, %148 : vector<2x8x8xf32>
    %cst_59 = arith.constant dense<0xFF800000> : vector<2x8xf32>
    %150 = vector.multi_reduction <maximumf>, %149, %cst_59 [2] : vector<2x8x8xf32> to vector<2x8xf32>
    %151 = vector.shape_cast %150 : vector<2x8xf32> to vector<2x8x1xf32>
    %152 = vector.broadcast %151 : vector<2x8x1xf32> to vector<2x8x8xf32>
    %153 = arith.subf %149, %152 : vector<2x8x8xf32>
    %154 = math.exp %153 : vector<2x8x8xf32>
    %cst_60 = arith.constant dense<0.000000e+00> : vector<2x8xf32>
    %155 = vector.multi_reduction <add>, %154, %cst_60 [2] : vector<2x8x8xf32> to vector<2x8xf32>
    %156 = vector.shape_cast %155 : vector<2x8xf32> to vector<2x8x1xf32>
    %157 = tpu.reciprocal %156 {approx = true} : vector<2x8x1xf32> -> vector<2x8x1xf32>
    %158 = vector.broadcast %157 : vector<2x8x1xf32> to vector<2x8x8xf32>
    %159 = arith.mulf %154, %158 : vector<2x8x8xf32>
    %160 = vector.broadcast %55 : vector<1x1x32xf32> to vector<2x8x32xf32>
    %161 = arith.mulf %141, %160 : vector<2x8x32xf32>
    "tpu.trace_start"() <{level = 10 : i32, message = "nst,ntd->nsd"}> : () -> ()
    %cst_61 = arith.constant dense<0.000000e+00> : vector<2x8x32xf32>
    %162 = tpu.matmul %159, %161, %cst_61 {dimension_numbers = #tpu.dot_dimension_numbers<[2], [1], [1], [2], [0, 0, 0, 1, 1, 2], [0], [0]>} : vector<2x8x8xf32>, vector<2x8x32xf32>, vector<2x8x32xf32> -> vector<2x8x32xf32>
    "tpu.trace_stop"() : () -> ()
    %163 = arith.addf %142, %162 : vector<2x8x32xf32>
    %164 = vector.broadcast %63 : vector<1x1x32xf32> to vector<2x8x32xf32>
    %165 = arith.mulf %129, %164 : vector<2x8x32xf32>
    "tpu.trace_start"() <{level = 10 : i32, message = "nsd,ntd->nst"}> : () -> ()
    %cst_62 = arith.constant dense<0.000000e+00> : vector<2x8x8xf32>
    %166 = tpu.matmul %165, %135, %cst_62 {dimension_numbers = #tpu.dot_dimension_numbers<[2], [2], [1], [1], [0, 0, 0, 1, 1, 1], [0], [0]>} : vector<2x8x32xf32>, vector<2x8x32xf32>, vector<2x8x8xf32> -> vector<2x8x8xf32>
    "tpu.trace_stop"() : () -> ()
    %cst_63 = arith.constant 0.353553385 : f32
    %167 = vector.broadcast %cst_63 : f32 to vector<2x8x8xf32>
    %168 = arith.mulf %166, %167 : vector<2x8x8xf32>
    %169 = vector.broadcast %46 : vector<1x1x8xf32> to vector<2x8x8xf32>
    %170 = arith.addf %168, %169 : vector<2x8x8xf32>
    %cst_64 = arith.constant dense<0xFF800000> : vector<2x8xf32>
    %171 = vector.multi_reduction <maximumf>, %170, %cst_64 [2] : vector<2x8x8xf32> to vector<2x8xf32>
    %172 = vector.shape_cast %171 : vector<2x8xf32> to vector<2x8x1xf32>
    %173 = vector.broadcast %172 : vector<2x8x1xf32> to vector<2x8x8xf32>
    %174 = arith.subf %170, %173 : vector<2x8x8xf32>
    %175 = math.exp %174 : vector<2x8x8xf32>
    %cst_65 = arith.constant dense<0.000000e+00> : vector<2x8xf32>
    %176 = vector.multi_reduction <add>, %175, %cst_65 [2] : vector<2x8x8xf32> to vector<2x8xf32>
    %177 = vector.shape_cast %176 : vector<2x8xf32> to vector<2x8x1xf32>
    %178 = tpu.reciprocal %177 {approx = true} : vector<2x8x1xf32> -> vector<2x8x1xf32>
    %179 = vector.broadcast %178 : vector<2x8x1xf32> to vector<2x8x8xf32>
    %180 = arith.mulf %175, %179 : vector<2x8x8xf32>
    %181 = vector.broadcast %63 : vector<1x1x32xf32> to vector<2x8x32xf32>
    %182 = arith.mulf %141, %181 : vector<2x8x32xf32>
    "tpu.trace_start"() <{level = 10 : i32, message = "nst,ntd->nsd"}> : () -> ()
    %cst_66 = arith.constant dense<0.000000e+00> : vector<2x8x32xf32>
    %183 = tpu.matmul %180, %182, %cst_66 {dimension_numbers = #tpu.dot_dimension_numbers<[2], [1], [1], [2], [0, 0, 0, 1, 1, 2], [0], [0]>} : vector<2x8x8xf32>, vector<2x8x32xf32>, vector<2x8x32xf32> -> vector<2x8x32xf32>
    "tpu.trace_stop"() : () -> ()
    %184 = arith.addf %163, %183 : vector<2x8x32xf32>
    %185 = vector.broadcast %71 : vector<1x1x32xf32> to vector<2x8x32xf32>
    %186 = arith.mulf %129, %185 : vector<2x8x32xf32>
    "tpu.trace_start"() <{level = 10 : i32, message = "nsd,ntd->nst"}> : () -> ()
    %cst_67 = arith.constant dense<0.000000e+00> : vector<2x8x8xf32>
    %187 = tpu.matmul %186, %135, %cst_67 {dimension_numbers = #tpu.dot_dimension_numbers<[2], [2], [1], [1], [0, 0, 0, 1, 1, 1], [0], [0]>} : vector<2x8x32xf32>, vector<2x8x32xf32>, vector<2x8x8xf32> -> vector<2x8x8xf32>
    "tpu.trace_stop"() : () -> ()
    %cst_68 = arith.constant 0.353553385 : f32
    %188 = vector.broadcast %cst_68 : f32 to vector<2x8x8xf32>
    %189 = arith.mulf %187, %188 : vector<2x8x8xf32>
    %190 = vector.broadcast %46 : vector<1x1x8xf32> to vector<2x8x8xf32>
    %191 = arith.addf %189, %190 : vector<2x8x8xf32>
    %cst_69 = arith.constant dense<0xFF800000> : vector<2x8xf32>
    %192 = vector.multi_reduction <maximumf>, %191, %cst_69 [2] : vector<2x8x8xf32> to vector<2x8xf32>
    %193 = vector.shape_cast %192 : vector<2x8xf32> to vector<2x8x1xf32>
    %194 = vector.broadcast %193 : vector<2x8x1xf32> to vector<2x8x8xf32>
    %195 = arith.subf %191, %194 : vector<2x8x8xf32>
    %196 = math.exp %195 : vector<2x8x8xf32>
    %cst_70 = arith.constant dense<0.000000e+00> : vector<2x8xf32>
    %197 = vector.multi_reduction <add>, %196, %cst_70 [2] : vector<2x8x8xf32> to vector<2x8xf32>
    %198 = vector.shape_cast %197 : vector<2x8xf32> to vector<2x8x1xf32>
    %199 = tpu.reciprocal %198 {approx = true} : vector<2x8x1xf32> -> vector<2x8x1xf32>
    %200 = vector.broadcast %199 : vector<2x8x1xf32> to vector<2x8x8xf32>
    %201 = arith.mulf %196, %200 : vector<2x8x8xf32>
    %202 = vector.broadcast %71 : vector<1x1x32xf32> to vector<2x8x32xf32>
    %203 = arith.mulf %141, %202 : vector<2x8x32xf32>
    "tpu.trace_start"() <{level = 10 : i32, message = "nst,ntd->nsd"}> : () -> ()
    %cst_71 = arith.constant dense<0.000000e+00> : vector<2x8x32xf32>
    %204 = tpu.matmul %201, %203, %cst_71 {dimension_numbers = #tpu.dot_dimension_numbers<[2], [1], [1], [2], [0, 0, 0, 1, 1, 2], [0], [0]>} : vector<2x8x8xf32>, vector<2x8x32xf32>, vector<2x8x32xf32> -> vector<2x8x32xf32>
    "tpu.trace_stop"() : () -> ()
    %205 = arith.addf %184, %204 : vector<2x8x32xf32>
    %206 = vector.broadcast %79 : vector<1x1x32xf32> to vector<2x8x32xf32>
    %207 = arith.mulf %129, %206 : vector<2x8x32xf32>
    "tpu.trace_start"() <{level = 10 : i32, message = "nsd,ntd->nst"}> : () -> ()
    %cst_72 = arith.constant dense<0.000000e+00> : vector<2x8x8xf32>
    %208 = tpu.matmul %207, %135, %cst_72 {dimension_numbers = #tpu.dot_dimension_numbers<[2], [2], [1], [1], [0, 0, 0, 1, 1, 1], [0], [0]>} : vector<2x8x32xf32>, vector<2x8x32xf32>, vector<2x8x8xf32> -> vector<2x8x8xf32>
    "tpu.trace_stop"() : () -> ()
    %cst_73 = arith.constant 0.353553385 : f32
    %209 = vector.broadcast %cst_73 : f32 to vector<2x8x8xf32>
    %210 = arith.mulf %208, %209 : vector<2x8x8xf32>
    %211 = vector.broadcast %46 : vector<1x1x8xf32> to vector<2x8x8xf32>
    %212 = arith.addf %210, %211 : vector<2x8x8xf32>
    %cst_74 = arith.constant dense<0xFF800000> : vector<2x8xf32>
    %213 = vector.multi_reduction <maximumf>, %212, %cst_74 [2] : vector<2x8x8xf32> to vector<2x8xf32>
    %214 = vector.shape_cast %213 : vector<2x8xf32> to vector<2x8x1xf32>
    %215 = vector.broadcast %214 : vector<2x8x1xf32> to vector<2x8x8xf32>
    %216 = arith.subf %212, %215 : vector<2x8x8xf32>
    %217 = math.exp %216 : vector<2x8x8xf32>
    %cst_75 = arith.constant dense<0.000000e+00> : vector<2x8xf32>
    %218 = vector.multi_reduction <add>, %217, %cst_75 [2] : vector<2x8x8xf32> to vector<2x8xf32>
    %219 = vector.shape_cast %218 : vector<2x8xf32> to vector<2x8x1xf32>
    %220 = tpu.reciprocal %219 {approx = true} : vector<2x8x1xf32> -> vector<2x8x1xf32>
    %221 = vector.broadcast %220 : vector<2x8x1xf32> to vector<2x8x8xf32>
    %222 = arith.mulf %217, %221 : vector<2x8x8xf32>
    %223 = vector.broadcast %79 : vector<1x1x32xf32> to vector<2x8x32xf32>
    %224 = arith.mulf %141, %223 : vector<2x8x32xf32>
    "tpu.trace_start"() <{level = 10 : i32, message = "nst,ntd->nsd"}> : () -> ()
    %cst_76 = arith.constant dense<0.000000e+00> : vector<2x8x32xf32>
    %225 = tpu.matmul %222, %224, %cst_76 {dimension_numbers = #tpu.dot_dimension_numbers<[2], [1], [1], [2], [0, 0, 0, 1, 1, 2], [0], [0]>} : vector<2x8x8xf32>, vector<2x8x32xf32>, vector<2x8x32xf32> -> vector<2x8x32xf32>
    "tpu.trace_stop"() : () -> ()
    %226 = arith.addf %205, %225 : vector<2x8x32xf32>
    %227 = vector.shape_cast %226 : vector<2x8x32xf32> to vector<16x32xf32>
    %228 = vector.extract_strided_slice %81 {offsets = [3, 0, 0], sizes = [1, 32, 32], strides = [1, 1, 1]} : vector<4x32x32xf32> to vector<1x32x32xf32>
    %229 = vector.shape_cast %228 : vector<1x32x32xf32> to vector<32x32xf32>
    %cst_77 = arith.constant dense<0.000000e+00> : vector<16x32xf32>
    %230 = tpu.matmul %227, %229, %cst_77 {dimension_numbers = #tpu.dot_dimension_numbers<[1], [0], [0], [1], [0, 0, 1, 1], [], []>} : vector<16x32xf32>, vector<32x32xf32>, vector<16x32xf32> -> vector<16x32xf32>
    %231 = vector.broadcast %95 : vector<1x32xf32> to vector<16x32xf32>
    %232 = arith.addf %230, %231 : vector<16x32xf32>
    %233 = vector.shape_cast %232 : vector<16x32xf32> to vector<2x8x32xf32>
    %234 = arith.addf %40, %233 : vector<2x8x32xf32>
    %cst_78 = arith.constant dense<0.000000e+00> : vector<2x8xf32>
    %235 = vector.multi_reduction <add>, %234, %cst_78 [2] : vector<2x8x32xf32> to vector<2x8xf32>
    %236 = vector.shape_cast %235 : vector<2x8xf32> to vector<2x8x1xf32>
    %cst_79 = arith.constant 3.200000e+01 : f32
    %237 = vector.broadcast %cst_79 : f32 to vector<2x8x1xf32>
    %238 = arith.divf %236, %237 : vector<2x8x1xf32>
    %239 = vector.broadcast %238 : vector<2x8x1xf32> to vector<2x8x32xf32>
    %240 = arith.subf %234, %239 : vector<2x8x32xf32>
    %241 = arith.mulf %240, %240 : vector<2x8x32xf32>
    %cst_80 = arith.constant dense<0.000000e+00> : vector<2x8xf32>
    %242 = vector.multi_reduction <add>, %241, %cst_80 [2] : vector<2x8x32xf32> to vector<2x8xf32>
    %243 = vector.shape_cast %242 : vector<2x8xf32> to vector<2x8x1xf32>
    %cst_81 = arith.constant 3.200000e+01 : f32
    %244 = vector.broadcast %cst_81 : f32 to vector<2x8x1xf32>
    %245 = arith.divf %243, %244 : vector<2x8x1xf32>
    %246 = vector.broadcast %238 : vector<2x8x1xf32> to vector<2x8x32xf32>
    %247 = arith.subf %234, %246 : vector<2x8x32xf32>
    %cst_82 = arith.constant 9.99999974E-6 : f32
    %248 = vector.broadcast %cst_82 : f32 to vector<2x8x1xf32>
    %249 = arith.addf %245, %248 : vector<2x8x1xf32>
    %250 = math.rsqrt %249 : vector<2x8x1xf32>
    %251 = vector.broadcast %250 : vector<2x8x1xf32> to vector<2x8x32xf32>
    %252 = arith.mulf %247, %251 : vector<2x8x32xf32>
    %253 = vector.shape_cast %96 : vector<1x32xf32> to vector<1x1x32xf32>
    %254 = vector.broadcast %253 : vector<1x1x32xf32> to vector<2x8x32xf32>
    %255 = arith.mulf %252, %254 : vector<2x8x32xf32>
    %256 = vector.shape_cast %97 : vector<1x32xf32> to vector<1x1x32xf32>
    %257 = vector.broadcast %256 : vector<1x1x32xf32> to vector<2x8x32xf32>
    %258 = arith.addf %255, %257 : vector<2x8x32xf32>
    %259 = vector.shape_cast %258 : vector<2x8x32xf32> to vector<16x32xf32>
    %cst_83 = arith.constant dense<0.000000e+00> : vector<16x128xf32>
    %260 = tpu.matmul %259, %85, %cst_83 {dimension_numbers = #tpu.dot_dimension_numbers<[1], [0], [0], [1], [0, 0, 1, 1], [], []>} : vector<16x32xf32>, vector<32x128xf32>, vector<16x128xf32> -> vector<16x128xf32>
    %261 = vector.broadcast %87 : vector<1x128xf32> to vector<16x128xf32>
    %262 = arith.addf %260, %261 : vector<16x128xf32>
    %263 = arith.mulf %262, %262 : vector<16x128xf32>
    %264 = arith.mulf %262, %263 : vector<16x128xf32>
    %cst_84 = arith.constant 4.471500e-02 : f32
    %265 = vector.broadcast %cst_84 : f32 to vector<16x128xf32>
    %266 = arith.mulf %265, %264 : vector<16x128xf32>
    %267 = arith.addf %262, %266 : vector<16x128xf32>
    %cst_85 = arith.constant 0.797884583 : f32
    %268 = vector.broadcast %cst_85 : f32 to vector<16x128xf32>
    %269 = arith.mulf %268, %267 : vector<16x128xf32>
    %270 = math.tanh %269 : vector<16x128xf32>
    %cst_86 = arith.constant 1.000000e+00 : f32
    %271 = vector.broadcast %cst_86 : f32 to vector<16x128xf32>
    %272 = arith.addf %271, %270 : vector<16x128xf32>
    %cst_87 = arith.constant 5.000000e-01 : f32
    %273 = vector.broadcast %cst_87 : f32 to vector<16x128xf32>
    %274 = arith.mulf %273, %272 : vector<16x128xf32>
    %275 = arith.mulf %262, %274 : vector<16x128xf32>
    %cst_88 = arith.constant dense<0.000000e+00> : vector<16x32xf32>
    %276 = tpu.matmul %275, %89, %cst_88 {dimension_numbers = #tpu.dot_dimension_numbers<[1], [0], [0], [1], [0, 0, 1, 1], [], []>} : vector<16x128xf32>, vector<128x32xf32>, vector<16x32xf32> -> vector<16x32xf32>
    %277 = vector.broadcast %98 : vector<1x32xf32> to vector<16x32xf32>
    %278 = arith.addf %276, %277 : vector<16x32xf32>
    %279 = vector.shape_cast %278 : vector<16x32xf32> to vector<2x8x32xf32>
    %280 = arith.addf %234, %279 : vector<2x8x32xf32>
    %c1 = arith.constant 1 : index
    %c0_89 = arith.constant 0 : index
    %c0_90 = arith.constant 0 : index
    %c0_91 = arith.constant 0 : index
    %281 = vector.load %arg7[%c1, %c0_89, %c0_90, %c0_91] : memref<2x4x32x32xf32, #tpu.memory_space<vmem>>, vector<1x4x32x32xf32>
    %282 = vector.shape_cast %281 : vector<1x4x32x32xf32> to vector<4x32x32xf32>
    %c1_92 = arith.constant 1 : index
    %c0_93 = arith.constant 0 : index
    %c0_94 = arith.constant 0 : index
    %283 = vector.load %arg8[%c1_92, %c0_93, %c0_94] : memref<2x9x32xf32, #tpu.memory_space<vmem>>, vector<1x9x32xf32>
    %284 = vector.shape_cast %283 : vector<1x9x32xf32> to vector<9x32xf32>
    %c1_95 = arith.constant 1 : index
    %c0_96 = arith.constant 0 : index
    %c0_97 = arith.constant 0 : index
    %285 = vector.load %arg9[%c1_95, %c0_96, %c0_97] : memref<2x32x128xf32, #tpu.memory_space<vmem>>, vector<1x32x128xf32>
    %286 = vector.shape_cast %285 : vector<1x32x128xf32> to vector<32x128xf32>
    %c1_98 = arith.constant 1 : index
    %c0_99 = arith.constant 0 : index
    %c0_100 = arith.constant 0 : index
    %287 = vector.load %arg10[%c1_98, %c0_99, %c0_100] : memref<2x1x128xf32, #tpu.memory_space<vmem>>, vector<1x1x128xf32>
    %288 = vector.shape_cast %287 : vector<1x1x128xf32> to vector<1x128xf32>
    %c1_101 = arith.constant 1 : index
    %c0_102 = arith.constant 0 : index
    %c0_103 = arith.constant 0 : index
    %289 = vector.load %arg11[%c1_101, %c0_102, %c0_103] : memref<2x128x32xf32, #tpu.memory_space<vmem>>, vector<1x128x32xf32>
    %290 = vector.shape_cast %289 : vector<1x128x32xf32> to vector<128x32xf32>
    %291 = vector.extract_strided_slice %284 {offsets = [0, 0], sizes = [1, 32], strides = [1, 1]} : vector<9x32xf32> to vector<1x32xf32>
    %292 = vector.extract_strided_slice %284 {offsets = [1, 0], sizes = [1, 32], strides = [1, 1]} : vector<9x32xf32> to vector<1x32xf32>
    %293 = vector.extract_strided_slice %284 {offsets = [2, 0], sizes = [1, 32], strides = [1, 1]} : vector<9x32xf32> to vector<1x32xf32>
    %294 = vector.extract_strided_slice %284 {offsets = [3, 0], sizes = [1, 32], strides = [1, 1]} : vector<9x32xf32> to vector<1x32xf32>
    %295 = vector.extract_strided_slice %284 {offsets = [4, 0], sizes = [1, 32], strides = [1, 1]} : vector<9x32xf32> to vector<1x32xf32>
    %296 = vector.extract_strided_slice %284 {offsets = [5, 0], sizes = [1, 32], strides = [1, 1]} : vector<9x32xf32> to vector<1x32xf32>
    %297 = vector.extract_strided_slice %284 {offsets = [6, 0], sizes = [1, 32], strides = [1, 1]} : vector<9x32xf32> to vector<1x32xf32>
    %298 = vector.extract_strided_slice %284 {offsets = [7, 0], sizes = [1, 32], strides = [1, 1]} : vector<9x32xf32> to vector<1x32xf32>
    %299 = vector.extract_strided_slice %284 {offsets = [8, 0], sizes = [1, 32], strides = [1, 1]} : vector<9x32xf32> to vector<1x32xf32>
    %cst_104 = arith.constant dense<0.000000e+00> : vector<2x8xf32>
    %300 = vector.multi_reduction <add>, %280, %cst_104 [2] : vector<2x8x32xf32> to vector<2x8xf32>
    %301 = vector.shape_cast %300 : vector<2x8xf32> to vector<2x8x1xf32>
    %cst_105 = arith.constant 3.200000e+01 : f32
    %302 = vector.broadcast %cst_105 : f32 to vector<2x8x1xf32>
    %303 = arith.divf %301, %302 : vector<2x8x1xf32>
    %304 = vector.broadcast %303 : vector<2x8x1xf32> to vector<2x8x32xf32>
    %305 = arith.subf %280, %304 : vector<2x8x32xf32>
    %306 = arith.mulf %305, %305 : vector<2x8x32xf32>
    %cst_106 = arith.constant dense<0.000000e+00> : vector<2x8xf32>
    %307 = vector.multi_reduction <add>, %306, %cst_106 [2] : vector<2x8x32xf32> to vector<2x8xf32>
    %308 = vector.shape_cast %307 : vector<2x8xf32> to vector<2x8x1xf32>
    %cst_107 = arith.constant 3.200000e+01 : f32
    %309 = vector.broadcast %cst_107 : f32 to vector<2x8x1xf32>
    %310 = arith.divf %308, %309 : vector<2x8x1xf32>
    %311 = vector.broadcast %303 : vector<2x8x1xf32> to vector<2x8x32xf32>
    %312 = arith.subf %280, %311 : vector<2x8x32xf32>
    %cst_108 = arith.constant 9.99999974E-6 : f32
    %313 = vector.broadcast %cst_108 : f32 to vector<2x8x1xf32>
    %314 = arith.addf %310, %313 : vector<2x8x1xf32>
    %315 = math.rsqrt %314 : vector<2x8x1xf32>
    %316 = vector.broadcast %315 : vector<2x8x1xf32> to vector<2x8x32xf32>
    %317 = arith.mulf %312, %316 : vector<2x8x32xf32>
    %318 = vector.shape_cast %291 : vector<1x32xf32> to vector<1x1x32xf32>
    %319 = vector.broadcast %318 : vector<1x1x32xf32> to vector<2x8x32xf32>
    %320 = arith.mulf %317, %319 : vector<2x8x32xf32>
    %321 = vector.shape_cast %292 : vector<1x32xf32> to vector<1x1x32xf32>
    %322 = vector.broadcast %321 : vector<1x1x32xf32> to vector<2x8x32xf32>
    %323 = arith.addf %320, %322 : vector<2x8x32xf32>
    %324 = vector.shape_cast %323 : vector<2x8x32xf32> to vector<16x32xf32>
    %325 = vector.extract_strided_slice %282 {offsets = [0, 0, 0], sizes = [1, 32, 32], strides = [1, 1, 1]} : vector<4x32x32xf32> to vector<1x32x32xf32>
    %326 = vector.shape_cast %325 : vector<1x32x32xf32> to vector<32x32xf32>
    %cst_109 = arith.constant dense<0.000000e+00> : vector<16x32xf32>
    %327 = tpu.matmul %324, %326, %cst_109 {dimension_numbers = #tpu.dot_dimension_numbers<[1], [0], [0], [1], [0, 0, 1, 1], [], []>} : vector<16x32xf32>, vector<32x32xf32>, vector<16x32xf32> -> vector<16x32xf32>
    %328 = vector.broadcast %293 : vector<1x32xf32> to vector<16x32xf32>
    %329 = arith.addf %327, %328 : vector<16x32xf32>
    %330 = vector.shape_cast %329 : vector<16x32xf32> to vector<2x8x32xf32>
    %331 = vector.extract_strided_slice %282 {offsets = [1, 0, 0], sizes = [1, 32, 32], strides = [1, 1, 1]} : vector<4x32x32xf32> to vector<1x32x32xf32>
    %332 = vector.shape_cast %331 : vector<1x32x32xf32> to vector<32x32xf32>
    %cst_110 = arith.constant dense<0.000000e+00> : vector<16x32xf32>
    %333 = tpu.matmul %324, %332, %cst_110 {dimension_numbers = #tpu.dot_dimension_numbers<[1], [0], [0], [1], [0, 0, 1, 1], [], []>} : vector<16x32xf32>, vector<32x32xf32>, vector<16x32xf32> -> vector<16x32xf32>
    %334 = vector.broadcast %294 : vector<1x32xf32> to vector<16x32xf32>
    %335 = arith.addf %333, %334 : vector<16x32xf32>
    %336 = vector.shape_cast %335 : vector<16x32xf32> to vector<2x8x32xf32>
    %337 = vector.extract_strided_slice %282 {offsets = [2, 0, 0], sizes = [1, 32, 32], strides = [1, 1, 1]} : vector<4x32x32xf32> to vector<1x32x32xf32>
    %338 = vector.shape_cast %337 : vector<1x32x32xf32> to vector<32x32xf32>
    %cst_111 = arith.constant dense<0.000000e+00> : vector<16x32xf32>
    %339 = tpu.matmul %324, %338, %cst_111 {dimension_numbers = #tpu.dot_dimension_numbers<[1], [0], [0], [1], [0, 0, 1, 1], [], []>} : vector<16x32xf32>, vector<32x32xf32>, vector<16x32xf32> -> vector<16x32xf32>
    %340 = vector.broadcast %295 : vector<1x32xf32> to vector<16x32xf32>
    %341 = arith.addf %339, %340 : vector<16x32xf32>
    %342 = vector.shape_cast %341 : vector<16x32xf32> to vector<2x8x32xf32>
    %cst_112 = arith.constant 0.000000e+00 : f32
    %343 = vector.broadcast %cst_112 : f32 to vector<2x8x32xf32>
    %344 = vector.broadcast %55 : vector<1x1x32xf32> to vector<2x8x32xf32>
    %345 = arith.mulf %330, %344 : vector<2x8x32xf32>
    "tpu.trace_start"() <{level = 10 : i32, message = "nsd,ntd->nst"}> : () -> ()
    %cst_113 = arith.constant dense<0.000000e+00> : vector<2x8x8xf32>
    %346 = tpu.matmul %345, %336, %cst_113 {dimension_numbers = #tpu.dot_dimension_numbers<[2], [2], [1], [1], [0, 0, 0, 1, 1, 1], [0], [0]>} : vector<2x8x32xf32>, vector<2x8x32xf32>, vector<2x8x8xf32> -> vector<2x8x8xf32>
    "tpu.trace_stop"() : () -> ()
    %cst_114 = arith.constant 0.353553385 : f32
    %347 = vector.broadcast %cst_114 : f32 to vector<2x8x8xf32>
    %348 = arith.mulf %346, %347 : vector<2x8x8xf32>
    %349 = vector.broadcast %46 : vector<1x1x8xf32> to vector<2x8x8xf32>
    %350 = arith.addf %348, %349 : vector<2x8x8xf32>
    %cst_115 = arith.constant dense<0xFF800000> : vector<2x8xf32>
    %351 = vector.multi_reduction <maximumf>, %350, %cst_115 [2] : vector<2x8x8xf32> to vector<2x8xf32>
    %352 = vector.shape_cast %351 : vector<2x8xf32> to vector<2x8x1xf32>
    %353 = vector.broadcast %352 : vector<2x8x1xf32> to vector<2x8x8xf32>
    %354 = arith.subf %350, %353 : vector<2x8x8xf32>
    %355 = math.exp %354 : vector<2x8x8xf32>
    %cst_116 = arith.constant dense<0.000000e+00> : vector<2x8xf32>
    %356 = vector.multi_reduction <add>, %355, %cst_116 [2] : vector<2x8x8xf32> to vector<2x8xf32>
    %357 = vector.shape_cast %356 : vector<2x8xf32> to vector<2x8x1xf32>
    %358 = tpu.reciprocal %357 {approx = true} : vector<2x8x1xf32> -> vector<2x8x1xf32>
    %359 = vector.broadcast %358 : vector<2x8x1xf32> to vector<2x8x8xf32>
    %360 = arith.mulf %355, %359 : vector<2x8x8xf32>
    %361 = vector.broadcast %55 : vector<1x1x32xf32> to vector<2x8x32xf32>
    %362 = arith.mulf %342, %361 : vector<2x8x32xf32>
    "tpu.trace_start"() <{level = 10 : i32, message = "nst,ntd->nsd"}> : () -> ()
    %cst_117 = arith.constant dense<0.000000e+00> : vector<2x8x32xf32>
    %363 = tpu.matmul %360, %362, %cst_117 {dimension_numbers = #tpu.dot_dimension_numbers<[2], [1], [1], [2], [0, 0, 0, 1, 1, 2], [0], [0]>} : vector<2x8x8xf32>, vector<2x8x32xf32>, vector<2x8x32xf32> -> vector<2x8x32xf32>
    "tpu.trace_stop"() : () -> ()
    %364 = arith.addf %343, %363 : vector<2x8x32xf32>
    %365 = vector.broadcast %63 : vector<1x1x32xf32> to vector<2x8x32xf32>
    %366 = arith.mulf %330, %365 : vector<2x8x32xf32>
    "tpu.trace_start"() <{level = 10 : i32, message = "nsd,ntd->nst"}> : () -> ()
    %cst_118 = arith.constant dense<0.000000e+00> : vector<2x8x8xf32>
    %367 = tpu.matmul %366, %336, %cst_118 {dimension_numbers = #tpu.dot_dimension_numbers<[2], [2], [1], [1], [0, 0, 0, 1, 1, 1], [0], [0]>} : vector<2x8x32xf32>, vector<2x8x32xf32>, vector<2x8x8xf32> -> vector<2x8x8xf32>
    "tpu.trace_stop"() : () -> ()
    %cst_119 = arith.constant 0.353553385 : f32
    %368 = vector.broadcast %cst_119 : f32 to vector<2x8x8xf32>
    %369 = arith.mulf %367, %368 : vector<2x8x8xf32>
    %370 = vector.broadcast %46 : vector<1x1x8xf32> to vector<2x8x8xf32>
    %371 = arith.addf %369, %370 : vector<2x8x8xf32>
    %cst_120 = arith.constant dense<0xFF800000> : vector<2x8xf32>
    %372 = vector.multi_reduction <maximumf>, %371, %cst_120 [2] : vector<2x8x8xf32> to vector<2x8xf32>
    %373 = vector.shape_cast %372 : vector<2x8xf32> to vector<2x8x1xf32>
    %374 = vector.broadcast %373 : vector<2x8x1xf32> to vector<2x8x8xf32>
    %375 = arith.subf %371, %374 : vector<2x8x8xf32>
    %376 = math.exp %375 : vector<2x8x8xf32>
    %cst_121 = arith.constant dense<0.000000e+00> : vector<2x8xf32>
    %377 = vector.multi_reduction <add>, %376, %cst_121 [2] : vector<2x8x8xf32> to vector<2x8xf32>
    %378 = vector.shape_cast %377 : vector<2x8xf32> to vector<2x8x1xf32>
    %379 = tpu.reciprocal %378 {approx = true} : vector<2x8x1xf32> -> vector<2x8x1xf32>
    %380 = vector.broadcast %379 : vector<2x8x1xf32> to vector<2x8x8xf32>
    %381 = arith.mulf %376, %380 : vector<2x8x8xf32>
    %382 = vector.broadcast %63 : vector<1x1x32xf32> to vector<2x8x32xf32>
    %383 = arith.mulf %342, %382 : vector<2x8x32xf32>
    "tpu.trace_start"() <{level = 10 : i32, message = "nst,ntd->nsd"}> : () -> ()
    %cst_122 = arith.constant dense<0.000000e+00> : vector<2x8x32xf32>
    %384 = tpu.matmul %381, %383, %cst_122 {dimension_numbers = #tpu.dot_dimension_numbers<[2], [1], [1], [2], [0, 0, 0, 1, 1, 2], [0], [0]>} : vector<2x8x8xf32>, vector<2x8x32xf32>, vector<2x8x32xf32> -> vector<2x8x32xf32>
    "tpu.trace_stop"() : () -> ()
    %385 = arith.addf %364, %384 : vector<2x8x32xf32>
    %386 = vector.broadcast %71 : vector<1x1x32xf32> to vector<2x8x32xf32>
    %387 = arith.mulf %330, %386 : vector<2x8x32xf32>
    "tpu.trace_start"() <{level = 10 : i32, message = "nsd,ntd->nst"}> : () -> ()
    %cst_123 = arith.constant dense<0.000000e+00> : vector<2x8x8xf32>
    %388 = tpu.matmul %387, %336, %cst_123 {dimension_numbers = #tpu.dot_dimension_numbers<[2], [2], [1], [1], [0, 0, 0, 1, 1, 1], [0], [0]>} : vector<2x8x32xf32>, vector<2x8x32xf32>, vector<2x8x8xf32> -> vector<2x8x8xf32>
    "tpu.trace_stop"() : () -> ()
    %cst_124 = arith.constant 0.353553385 : f32
    %389 = vector.broadcast %cst_124 : f32 to vector<2x8x8xf32>
    %390 = arith.mulf %388, %389 : vector<2x8x8xf32>
    %391 = vector.broadcast %46 : vector<1x1x8xf32> to vector<2x8x8xf32>
    %392 = arith.addf %390, %391 : vector<2x8x8xf32>
    %cst_125 = arith.constant dense<0xFF800000> : vector<2x8xf32>
    %393 = vector.multi_reduction <maximumf>, %392, %cst_125 [2] : vector<2x8x8xf32> to vector<2x8xf32>
    %394 = vector.shape_cast %393 : vector<2x8xf32> to vector<2x8x1xf32>
    %395 = vector.broadcast %394 : vector<2x8x1xf32> to vector<2x8x8xf32>
    %396 = arith.subf %392, %395 : vector<2x8x8xf32>
    %397 = math.exp %396 : vector<2x8x8xf32>
    %cst_126 = arith.constant dense<0.000000e+00> : vector<2x8xf32>
    %398 = vector.multi_reduction <add>, %397, %cst_126 [2] : vector<2x8x8xf32> to vector<2x8xf32>
    %399 = vector.shape_cast %398 : vector<2x8xf32> to vector<2x8x1xf32>
    %400 = tpu.reciprocal %399 {approx = true} : vector<2x8x1xf32> -> vector<2x8x1xf32>
    %401 = vector.broadcast %400 : vector<2x8x1xf32> to vector<2x8x8xf32>
    %402 = arith.mulf %397, %401 : vector<2x8x8xf32>
    %403 = vector.broadcast %71 : vector<1x1x32xf32> to vector<2x8x32xf32>
    %404 = arith.mulf %342, %403 : vector<2x8x32xf32>
    "tpu.trace_start"() <{level = 10 : i32, message = "nst,ntd->nsd"}> : () -> ()
    %cst_127 = arith.constant dense<0.000000e+00> : vector<2x8x32xf32>
    %405 = tpu.matmul %402, %404, %cst_127 {dimension_numbers = #tpu.dot_dimension_numbers<[2], [1], [1], [2], [0, 0, 0, 1, 1, 2], [0], [0]>} : vector<2x8x8xf32>, vector<2x8x32xf32>, vector<2x8x32xf32> -> vector<2x8x32xf32>
    "tpu.trace_stop"() : () -> ()
    %406 = arith.addf %385, %405 : vector<2x8x32xf32>
    %407 = vector.broadcast %79 : vector<1x1x32xf32> to vector<2x8x32xf32>
    %408 = arith.mulf %330, %407 : vector<2x8x32xf32>
    "tpu.trace_start"() <{level = 10 : i32, message = "nsd,ntd->nst"}> : () -> ()
    %cst_128 = arith.constant dense<0.000000e+00> : vector<2x8x8xf32>
    %409 = tpu.matmul %408, %336, %cst_128 {dimension_numbers = #tpu.dot_dimension_numbers<[2], [2], [1], [1], [0, 0, 0, 1, 1, 1], [0], [0]>} : vector<2x8x32xf32>, vector<2x8x32xf32>, vector<2x8x8xf32> -> vector<2x8x8xf32>
    "tpu.trace_stop"() : () -> ()
    %cst_129 = arith.constant 0.353553385 : f32
    %410 = vector.broadcast %cst_129 : f32 to vector<2x8x8xf32>
    %411 = arith.mulf %409, %410 : vector<2x8x8xf32>
    %412 = vector.broadcast %46 : vector<1x1x8xf32> to vector<2x8x8xf32>
    %413 = arith.addf %411, %412 : vector<2x8x8xf32>
    %cst_130 = arith.constant dense<0xFF800000> : vector<2x8xf32>
    %414 = vector.multi_reduction <maximumf>, %413, %cst_130 [2] : vector<2x8x8xf32> to vector<2x8xf32>
    %415 = vector.shape_cast %414 : vector<2x8xf32> to vector<2x8x1xf32>
    %416 = vector.broadcast %415 : vector<2x8x1xf32> to vector<2x8x8xf32>
    %417 = arith.subf %413, %416 : vector<2x8x8xf32>
    %418 = math.exp %417 : vector<2x8x8xf32>
    %cst_131 = arith.constant dense<0.000000e+00> : vector<2x8xf32>
    %419 = vector.multi_reduction <add>, %418, %cst_131 [2] : vector<2x8x8xf32> to vector<2x8xf32>
    %420 = vector.shape_cast %419 : vector<2x8xf32> to vector<2x8x1xf32>
    %421 = tpu.reciprocal %420 {approx = true} : vector<2x8x1xf32> -> vector<2x8x1xf32>
    %422 = vector.broadcast %421 : vector<2x8x1xf32> to vector<2x8x8xf32>
    %423 = arith.mulf %418, %422 : vector<2x8x8xf32>
    %424 = vector.broadcast %79 : vector<1x1x32xf32> to vector<2x8x32xf32>
    %425 = arith.mulf %342, %424 : vector<2x8x32xf32>
    "tpu.trace_start"() <{level = 10 : i32, message = "nst,ntd->nsd"}> : () -> ()
    %cst_132 = arith.constant dense<0.000000e+00> : vector<2x8x32xf32>
    %426 = tpu.matmul %423, %425, %cst_132 {dimension_numbers = #tpu.dot_dimension_numbers<[2], [1], [1], [2], [0, 0, 0, 1, 1, 2], [0], [0]>} : vector<2x8x8xf32>, vector<2x8x32xf32>, vector<2x8x32xf32> -> vector<2x8x32xf32>
    "tpu.trace_stop"() : () -> ()
    %427 = arith.addf %406, %426 : vector<2x8x32xf32>
    %428 = vector.shape_cast %427 : vector<2x8x32xf32> to vector<16x32xf32>
    %429 = vector.extract_strided_slice %282 {offsets = [3, 0, 0], sizes = [1, 32, 32], strides = [1, 1, 1]} : vector<4x32x32xf32> to vector<1x32x32xf32>
    %430 = vector.shape_cast %429 : vector<1x32x32xf32> to vector<32x32xf32>
    %cst_133 = arith.constant dense<0.000000e+00> : vector<16x32xf32>
    %431 = tpu.matmul %428, %430, %cst_133 {dimension_numbers = #tpu.dot_dimension_numbers<[1], [0], [0], [1], [0, 0, 1, 1], [], []>} : vector<16x32xf32>, vector<32x32xf32>, vector<16x32xf32> -> vector<16x32xf32>
    %432 = vector.broadcast %296 : vector<1x32xf32> to vector<16x32xf32>
    %433 = arith.addf %431, %432 : vector<16x32xf32>
    %434 = vector.shape_cast %433 : vector<16x32xf32> to vector<2x8x32xf32>
    %435 = arith.addf %280, %434 : vector<2x8x32xf32>
    %cst_134 = arith.constant dense<0.000000e+00> : vector<2x8xf32>
    %436 = vector.multi_reduction <add>, %435, %cst_134 [2] : vector<2x8x32xf32> to vector<2x8xf32>
    %437 = vector.shape_cast %436 : vector<2x8xf32> to vector<2x8x1xf32>
    %cst_135 = arith.constant 3.200000e+01 : f32
    %438 = vector.broadcast %cst_135 : f32 to vector<2x8x1xf32>
    %439 = arith.divf %437, %438 : vector<2x8x1xf32>
    %440 = vector.broadcast %439 : vector<2x8x1xf32> to vector<2x8x32xf32>
    %441 = arith.subf %435, %440 : vector<2x8x32xf32>
    %442 = arith.mulf %441, %441 : vector<2x8x32xf32>
    %cst_136 = arith.constant dense<0.000000e+00> : vector<2x8xf32>
    %443 = vector.multi_reduction <add>, %442, %cst_136 [2] : vector<2x8x32xf32> to vector<2x8xf32>
    %444 = vector.shape_cast %443 : vector<2x8xf32> to vector<2x8x1xf32>
    %cst_137 = arith.constant 3.200000e+01 : f32
    %445 = vector.broadcast %cst_137 : f32 to vector<2x8x1xf32>
    %446 = arith.divf %444, %445 : vector<2x8x1xf32>
    %447 = vector.broadcast %439 : vector<2x8x1xf32> to vector<2x8x32xf32>
    %448 = arith.subf %435, %447 : vector<2x8x32xf32>
    %cst_138 = arith.constant 9.99999974E-6 : f32
    %449 = vector.broadcast %cst_138 : f32 to vector<2x8x1xf32>
    %450 = arith.addf %446, %449 : vector<2x8x1xf32>
    %451 = math.rsqrt %450 : vector<2x8x1xf32>
    %452 = vector.broadcast %451 : vector<2x8x1xf32> to vector<2x8x32xf32>
    %453 = arith.mulf %448, %452 : vector<2x8x32xf32>
    %454 = vector.shape_cast %297 : vector<1x32xf32> to vector<1x1x32xf32>
    %455 = vector.broadcast %454 : vector<1x1x32xf32> to vector<2x8x32xf32>
    %456 = arith.mulf %453, %455 : vector<2x8x32xf32>
    %457 = vector.shape_cast %298 : vector<1x32xf32> to vector<1x1x32xf32>
    %458 = vector.broadcast %457 : vector<1x1x32xf32> to vector<2x8x32xf32>
    %459 = arith.addf %456, %458 : vector<2x8x32xf32>
    %460 = vector.shape_cast %459 : vector<2x8x32xf32> to vector<16x32xf32>
    %cst_139 = arith.constant dense<0.000000e+00> : vector<16x128xf32>
    %461 = tpu.matmul %460, %286, %cst_139 {dimension_numbers = #tpu.dot_dimension_numbers<[1], [0], [0], [1], [0, 0, 1, 1], [], []>} : vector<16x32xf32>, vector<32x128xf32>, vector<16x128xf32> -> vector<16x128xf32>
    %462 = vector.broadcast %288 : vector<1x128xf32> to vector<16x128xf32>
    %463 = arith.addf %461, %462 : vector<16x128xf32>
    %464 = arith.mulf %463, %463 : vector<16x128xf32>
    %465 = arith.mulf %463, %464 : vector<16x128xf32>
    %cst_140 = arith.constant 4.471500e-02 : f32
    %466 = vector.broadcast %cst_140 : f32 to vector<16x128xf32>
    %467 = arith.mulf %466, %465 : vector<16x128xf32>
    %468 = arith.addf %463, %467 : vector<16x128xf32>
    %cst_141 = arith.constant 0.797884583 : f32
    %469 = vector.broadcast %cst_141 : f32 to vector<16x128xf32>
    %470 = arith.mulf %469, %468 : vector<16x128xf32>
    %471 = math.tanh %470 : vector<16x128xf32>
    %cst_142 = arith.constant 1.000000e+00 : f32
    %472 = vector.broadcast %cst_142 : f32 to vector<16x128xf32>
    %473 = arith.addf %472, %471 : vector<16x128xf32>
    %cst_143 = arith.constant 5.000000e-01 : f32
    %474 = vector.broadcast %cst_143 : f32 to vector<16x128xf32>
    %475 = arith.mulf %474, %473 : vector<16x128xf32>
    %476 = arith.mulf %463, %475 : vector<16x128xf32>
    %cst_144 = arith.constant dense<0.000000e+00> : vector<16x32xf32>
    %477 = tpu.matmul %476, %290, %cst_144 {dimension_numbers = #tpu.dot_dimension_numbers<[1], [0], [0], [1], [0, 0, 1, 1], [], []>} : vector<16x128xf32>, vector<128x32xf32>, vector<16x32xf32> -> vector<16x32xf32>
    %478 = vector.broadcast %299 : vector<1x32xf32> to vector<16x32xf32>
    %479 = arith.addf %477, %478 : vector<16x32xf32>
    %480 = vector.shape_cast %479 : vector<16x32xf32> to vector<2x8x32xf32>
    %481 = arith.addf %435, %480 : vector<2x8x32xf32>
    %cst_145 = arith.constant dense<0.000000e+00> : vector<2x8xf32>
    %482 = vector.multi_reduction <add>, %481, %cst_145 [2] : vector<2x8x32xf32> to vector<2x8xf32>
    %483 = vector.shape_cast %482 : vector<2x8xf32> to vector<2x8x1xf32>
    %cst_146 = arith.constant 3.200000e+01 : f32
    %484 = vector.broadcast %cst_146 : f32 to vector<2x8x1xf32>
    %485 = arith.divf %483, %484 : vector<2x8x1xf32>
    %486 = vector.broadcast %485 : vector<2x8x1xf32> to vector<2x8x32xf32>
    %487 = arith.subf %481, %486 : vector<2x8x32xf32>
    %488 = arith.mulf %487, %487 : vector<2x8x32xf32>
    %cst_147 = arith.constant dense<0.000000e+00> : vector<2x8xf32>
    %489 = vector.multi_reduction <add>, %488, %cst_147 [2] : vector<2x8x32xf32> to vector<2x8xf32>
    %490 = vector.shape_cast %489 : vector<2x8xf32> to vector<2x8x1xf32>
    %cst_148 = arith.constant 3.200000e+01 : f32
    %491 = vector.broadcast %cst_148 : f32 to vector<2x8x1xf32>
    %492 = arith.divf %490, %491 : vector<2x8x1xf32>
    %493 = vector.broadcast %485 : vector<2x8x1xf32> to vector<2x8x32xf32>
    %494 = arith.subf %481, %493 : vector<2x8x32xf32>
    %cst_149 = arith.constant 9.99999974E-6 : f32
    %495 = vector.broadcast %cst_149 : f32 to vector<2x8x1xf32>
    %496 = arith.addf %492, %495 : vector<2x8x1xf32>
    %497 = math.rsqrt %496 : vector<2x8x1xf32>
    %498 = vector.broadcast %497 : vector<2x8x1xf32> to vector<2x8x32xf32>
    %499 = arith.mulf %494, %498 : vector<2x8x32xf32>
    %500 = vector.shape_cast %3 : vector<1x32xf32> to vector<1x1x32xf32>
    %501 = vector.broadcast %500 : vector<1x1x32xf32> to vector<2x8x32xf32>
    %502 = arith.mulf %499, %501 : vector<2x8x32xf32>
    %503 = vector.shape_cast %4 : vector<1x32xf32> to vector<1x1x32xf32>
    %504 = vector.broadcast %503 : vector<1x1x32xf32> to vector<2x8x32xf32>
    %505 = arith.addf %502, %504 : vector<2x8x32xf32>
    %506 = vector.shape_cast %505 : vector<2x8x32xf32> to vector<16x32xf32>
    %c0_150 = arith.constant 0 : index
    %c0_151 = arith.constant 0 : index
    %507 = vector.load %arg12[%c0_150, %c0_151] : memref<32x32xf32, #tpu.memory_space<vmem>>, vector<32x32xf32>
    %cst_152 = arith.constant dense<0.000000e+00> : vector<16x32xf32>
    %508 = tpu.matmul %506, %507, %cst_152 {dimension_numbers = #tpu.dot_dimension_numbers<[1], [0], [0], [1], [0, 0, 1, 1], [], []>} : vector<16x32xf32>, vector<32x32xf32>, vector<16x32xf32> -> vector<16x32xf32>
    %509 = vector.broadcast %6 : vector<1x32xf32> to vector<16x32xf32>
    %510 = arith.addf %508, %509 : vector<16x32xf32>
    %511 = vector.shape_cast %510 : vector<16x32xf32> to vector<2x8x32xf32>
    %c0_153 = arith.constant 0 : index
    %c0_154 = arith.constant 0 : index
    %512 = vector.load %arg3[%c0_153, %c0_154] : memref<2x24xi32, #tpu.memory_space<vmem>>, vector<2x24xi32>
    %513 = tpu.iota {dimensions = array<i32: 2>} : vector<2x24x8xi32>
    %514 = vector.shape_cast %512 : vector<2x24xi32> to vector<2x24x1xi32>
    %515 = vector.broadcast %514 : vector<2x24x1xi32> to vector<2x24x8xi32>
    %516 = arith.cmpi eq, %513, %515 : vector<2x24x8xi32>
    %cst_155 = arith.constant 1.000000e+00 : f32
    %cst_156 = arith.constant 0.000000e+00 : f32
    %517 = vector.broadcast %cst_155 : f32 to vector<2x24x8xf32>
    %518 = vector.broadcast %cst_156 : f32 to vector<2x24x8xf32>
    %519 = arith.select %516, %517, %518 : vector<2x24x8xi1>, vector<2x24x8xf32>
    %c-1_i32 = arith.constant -1 : i32
    %520 = vector.broadcast %c-1_i32 : i32 to vector<2x24xi32>
    %521 = arith.cmpi eq, %512, %520 : vector<2x24xi32>
    %cst_157 = arith.constant 1.000000e+00 : f32
    %cst_158 = arith.constant 0.000000e+00 : f32
    %522 = vector.broadcast %cst_157 : f32 to vector<2x24xf32>
    %523 = vector.broadcast %cst_158 : f32 to vector<2x24xf32>
    %524 = arith.select %521, %522, %523 : vector<2x24xi1>, vector<2x24xf32>
    "tpu.trace_start"() <{level = 10 : i32, message = "nst,ntd->nsd"}> : () -> ()
    %cst_159 = arith.constant dense<0.000000e+00> : vector<2x24x32xf32>
    %525 = tpu.matmul %519, %511, %cst_159 {dimension_numbers = #tpu.dot_dimension_numbers<[2], [1], [1], [2], [0, 0, 0, 1, 1, 2], [0], [0]>} : vector<2x24x8xf32>, vector<2x8x32xf32>, vector<2x24x32xf32> -> vector<2x24x32xf32>
    "tpu.trace_stop"() : () -> ()
    %526 = vector.shape_cast %524 : vector<2x24xf32> to vector<2x24x1xf32>
    %527 = vector.shape_cast %7 : vector<1x32xf32> to vector<1x1x32xf32>
    %528 = vector.broadcast %526 : vector<2x24x1xf32> to vector<2x24x32xf32>
    %529 = vector.broadcast %527 : vector<1x1x32xf32> to vector<2x24x32xf32>
    %530 = arith.mulf %528, %529 : vector<2x24x32xf32>
    %531 = arith.addf %525, %530 : vector<2x24x32xf32>
    %c0_160 = arith.constant 0 : index
    %c0_161 = arith.constant 0 : index
    %c0_162 = arith.constant 0 : index
    %532 = vector.load %arg14[%c0_160, %c0_161, %c0_162] : memref<1x24x32xf32, #tpu.memory_space<vmem>>, vector<1x24x32xf32>
    %533 = vector.broadcast %532 : vector<1x24x32xf32> to vector<2x24x32xf32>
    %534 = arith.addf %531, %533 : vector<2x24x32xf32>
    %535 = tpu.iota {dimensions = array<i32: 2>} : vector<1x1x24xi32>
    %c17_i32 = arith.constant 17 : i32
    %536 = vector.broadcast %c17_i32 : i32 to vector<1x1x24xi32>
    %537 = arith.cmpi slt, %535, %536 : vector<1x1x24xi32>
    %cst_163 = arith.constant 0.000000e+00 : f32
    %cst_164 = arith.constant -1.000000e+30 : f32
    %538 = vector.broadcast %cst_163 : f32 to vector<1x1x24xf32>
    %539 = vector.broadcast %cst_164 : f32 to vector<1x1x24xf32>
    %540 = arith.select %537, %538, %539 : vector<1x1x24xi1>, vector<1x1x24xf32>
    %541 = tpu.iota {dimensions = array<i32: 2>} : vector<1x1x32xi32>
    %c0_i32_165 = arith.constant 0 : i32
    %542 = vector.broadcast %c0_i32_165 : i32 to vector<1x1x32xi32>
    %543 = arith.cmpi sge, %541, %542 : vector<1x1x32xi32>
    %c8_i32_166 = arith.constant 8 : i32
    %544 = vector.broadcast %c8_i32_166 : i32 to vector<1x1x32xi32>
    %545 = arith.cmpi slt, %541, %544 : vector<1x1x32xi32>
    %546 = arith.andi %543, %545 : vector<1x1x32xi1>
    %cst_167 = arith.constant 1.000000e+00 : f32
    %cst_168 = arith.constant 0.000000e+00 : f32
    %547 = vector.broadcast %cst_167 : f32 to vector<1x1x32xf32>
    %548 = vector.broadcast %cst_168 : f32 to vector<1x1x32xf32>
    %549 = arith.select %546, %547, %548 : vector<1x1x32xi1>, vector<1x1x32xf32>
    %c8_i32_169 = arith.constant 8 : i32
    %550 = vector.broadcast %c8_i32_169 : i32 to vector<1x1x32xi32>
    %551 = arith.cmpi sge, %541, %550 : vector<1x1x32xi32>
    %c16_i32_170 = arith.constant 16 : i32
    %552 = vector.broadcast %c16_i32_170 : i32 to vector<1x1x32xi32>
    %553 = arith.cmpi slt, %541, %552 : vector<1x1x32xi32>
    %554 = arith.andi %551, %553 : vector<1x1x32xi1>
    %cst_171 = arith.constant 1.000000e+00 : f32
    %cst_172 = arith.constant 0.000000e+00 : f32
    %555 = vector.broadcast %cst_171 : f32 to vector<1x1x32xf32>
    %556 = vector.broadcast %cst_172 : f32 to vector<1x1x32xf32>
    %557 = arith.select %554, %555, %556 : vector<1x1x32xi1>, vector<1x1x32xf32>
    %c16_i32_173 = arith.constant 16 : i32
    %558 = vector.broadcast %c16_i32_173 : i32 to vector<1x1x32xi32>
    %559 = arith.cmpi sge, %541, %558 : vector<1x1x32xi32>
    %c24_i32_174 = arith.constant 24 : i32
    %560 = vector.broadcast %c24_i32_174 : i32 to vector<1x1x32xi32>
    %561 = arith.cmpi slt, %541, %560 : vector<1x1x32xi32>
    %562 = arith.andi %559, %561 : vector<1x1x32xi1>
    %cst_175 = arith.constant 1.000000e+00 : f32
    %cst_176 = arith.constant 0.000000e+00 : f32
    %563 = vector.broadcast %cst_175 : f32 to vector<1x1x32xf32>
    %564 = vector.broadcast %cst_176 : f32 to vector<1x1x32xf32>
    %565 = arith.select %562, %563, %564 : vector<1x1x32xi1>, vector<1x1x32xf32>
    %c24_i32_177 = arith.constant 24 : i32
    %566 = vector.broadcast %c24_i32_177 : i32 to vector<1x1x32xi32>
    %567 = arith.cmpi sge, %541, %566 : vector<1x1x32xi32>
    %c32_i32_178 = arith.constant 32 : i32
    %568 = vector.broadcast %c32_i32_178 : i32 to vector<1x1x32xi32>
    %569 = arith.cmpi slt, %541, %568 : vector<1x1x32xi32>
    %570 = arith.andi %567, %569 : vector<1x1x32xi1>
    %cst_179 = arith.constant 1.000000e+00 : f32
    %cst_180 = arith.constant 0.000000e+00 : f32
    %571 = vector.broadcast %cst_179 : f32 to vector<1x1x32xf32>
    %572 = vector.broadcast %cst_180 : f32 to vector<1x1x32xf32>
    %573 = arith.select %570, %571, %572 : vector<1x1x32xi1>, vector<1x1x32xf32>
    %c0_181 = arith.constant 0 : index
    %c0_182 = arith.constant 0 : index
    %c0_183 = arith.constant 0 : index
    %c0_184 = arith.constant 0 : index
    %574 = vector.load %arg15[%c0_181, %c0_182, %c0_183, %c0_184] : memref<2x4x32x32xf32, #tpu.memory_space<vmem>>, vector<1x4x32x32xf32>
    %575 = vector.shape_cast %574 : vector<1x4x32x32xf32> to vector<4x32x32xf32>
    %c0_185 = arith.constant 0 : index
    %c0_186 = arith.constant 0 : index
    %c0_187 = arith.constant 0 : index
    %576 = vector.load %arg16[%c0_185, %c0_186, %c0_187] : memref<2x9x32xf32, #tpu.memory_space<vmem>>, vector<1x9x32xf32>
    %577 = vector.shape_cast %576 : vector<1x9x32xf32> to vector<9x32xf32>
    %c0_188 = arith.constant 0 : index
    %c0_189 = arith.constant 0 : index
    %c0_190 = arith.constant 0 : index
    %578 = vector.load %arg17[%c0_188, %c0_189, %c0_190] : memref<2x32x128xf32, #tpu.memory_space<vmem>>, vector<1x32x128xf32>
    %579 = vector.shape_cast %578 : vector<1x32x128xf32> to vector<32x128xf32>
    %c0_191 = arith.constant 0 : index
    %c0_192 = arith.constant 0 : index
    %c0_193 = arith.constant 0 : index
    %580 = vector.load %arg18[%c0_191, %c0_192, %c0_193] : memref<2x1x128xf32, #tpu.memory_space<vmem>>, vector<1x1x128xf32>
    %581 = vector.shape_cast %580 : vector<1x1x128xf32> to vector<1x128xf32>
    %c0_194 = arith.constant 0 : index
    %c0_195 = arith.constant 0 : index
    %c0_196 = arith.constant 0 : index
    %582 = vector.load %arg19[%c0_194, %c0_195, %c0_196] : memref<2x128x32xf32, #tpu.memory_space<vmem>>, vector<1x128x32xf32>
    %583 = vector.shape_cast %582 : vector<1x128x32xf32> to vector<128x32xf32>
    %584 = vector.extract_strided_slice %577 {offsets = [0, 0], sizes = [1, 32], strides = [1, 1]} : vector<9x32xf32> to vector<1x32xf32>
    %585 = vector.extract_strided_slice %577 {offsets = [1, 0], sizes = [1, 32], strides = [1, 1]} : vector<9x32xf32> to vector<1x32xf32>
    %586 = vector.extract_strided_slice %577 {offsets = [2, 0], sizes = [1, 32], strides = [1, 1]} : vector<9x32xf32> to vector<1x32xf32>
    %587 = vector.extract_strided_slice %577 {offsets = [3, 0], sizes = [1, 32], strides = [1, 1]} : vector<9x32xf32> to vector<1x32xf32>
    %588 = vector.extract_strided_slice %577 {offsets = [4, 0], sizes = [1, 32], strides = [1, 1]} : vector<9x32xf32> to vector<1x32xf32>
    %589 = vector.extract_strided_slice %577 {offsets = [5, 0], sizes = [1, 32], strides = [1, 1]} : vector<9x32xf32> to vector<1x32xf32>
    %590 = vector.extract_strided_slice %577 {offsets = [6, 0], sizes = [1, 32], strides = [1, 1]} : vector<9x32xf32> to vector<1x32xf32>
    %591 = vector.extract_strided_slice %577 {offsets = [7, 0], sizes = [1, 32], strides = [1, 1]} : vector<9x32xf32> to vector<1x32xf32>
    %592 = vector.extract_strided_slice %577 {offsets = [8, 0], sizes = [1, 32], strides = [1, 1]} : vector<9x32xf32> to vector<1x32xf32>
    %cst_197 = arith.constant dense<0.000000e+00> : vector<2x24xf32>
    %593 = vector.multi_reduction <add>, %534, %cst_197 [2] : vector<2x24x32xf32> to vector<2x24xf32>
    %594 = vector.shape_cast %593 : vector<2x24xf32> to vector<2x24x1xf32>
    %cst_198 = arith.constant 3.200000e+01 : f32
    %595 = vector.broadcast %cst_198 : f32 to vector<2x24x1xf32>
    %596 = arith.divf %594, %595 : vector<2x24x1xf32>
    %597 = vector.broadcast %596 : vector<2x24x1xf32> to vector<2x24x32xf32>
    %598 = arith.subf %534, %597 : vector<2x24x32xf32>
    %599 = arith.mulf %598, %598 : vector<2x24x32xf32>
    %cst_199 = arith.constant dense<0.000000e+00> : vector<2x24xf32>
    %600 = vector.multi_reduction <add>, %599, %cst_199 [2] : vector<2x24x32xf32> to vector<2x24xf32>
    %601 = vector.shape_cast %600 : vector<2x24xf32> to vector<2x24x1xf32>
    %cst_200 = arith.constant 3.200000e+01 : f32
    %602 = vector.broadcast %cst_200 : f32 to vector<2x24x1xf32>
    %603 = arith.divf %601, %602 : vector<2x24x1xf32>
    %604 = vector.broadcast %596 : vector<2x24x1xf32> to vector<2x24x32xf32>
    %605 = arith.subf %534, %604 : vector<2x24x32xf32>
    %cst_201 = arith.constant 9.99999974E-6 : f32
    %606 = vector.broadcast %cst_201 : f32 to vector<2x24x1xf32>
    %607 = arith.addf %603, %606 : vector<2x24x1xf32>
    %608 = math.rsqrt %607 : vector<2x24x1xf32>
    %609 = vector.broadcast %608 : vector<2x24x1xf32> to vector<2x24x32xf32>
    %610 = arith.mulf %605, %609 : vector<2x24x32xf32>
    %611 = vector.shape_cast %584 : vector<1x32xf32> to vector<1x1x32xf32>
    %612 = vector.broadcast %611 : vector<1x1x32xf32> to vector<2x24x32xf32>
    %613 = arith.mulf %610, %612 : vector<2x24x32xf32>
    %614 = vector.shape_cast %585 : vector<1x32xf32> to vector<1x1x32xf32>
    %615 = vector.broadcast %614 : vector<1x1x32xf32> to vector<2x24x32xf32>
    %616 = arith.addf %613, %615 : vector<2x24x32xf32>
    %617 = vector.shape_cast %616 : vector<2x24x32xf32> to vector<48x32xf32>
    %618 = vector.extract_strided_slice %575 {offsets = [0, 0, 0], sizes = [1, 32, 32], strides = [1, 1, 1]} : vector<4x32x32xf32> to vector<1x32x32xf32>
    %619 = vector.shape_cast %618 : vector<1x32x32xf32> to vector<32x32xf32>
    %cst_202 = arith.constant dense<0.000000e+00> : vector<48x32xf32>
    %620 = tpu.matmul %617, %619, %cst_202 {dimension_numbers = #tpu.dot_dimension_numbers<[1], [0], [0], [1], [0, 0, 1, 1], [], []>} : vector<48x32xf32>, vector<32x32xf32>, vector<48x32xf32> -> vector<48x32xf32>
    %621 = vector.broadcast %586 : vector<1x32xf32> to vector<48x32xf32>
    %622 = arith.addf %620, %621 : vector<48x32xf32>
    %623 = vector.shape_cast %622 : vector<48x32xf32> to vector<2x24x32xf32>
    %624 = vector.extract_strided_slice %575 {offsets = [1, 0, 0], sizes = [1, 32, 32], strides = [1, 1, 1]} : vector<4x32x32xf32> to vector<1x32x32xf32>
    %625 = vector.shape_cast %624 : vector<1x32x32xf32> to vector<32x32xf32>
    %cst_203 = arith.constant dense<0.000000e+00> : vector<48x32xf32>
    %626 = tpu.matmul %617, %625, %cst_203 {dimension_numbers = #tpu.dot_dimension_numbers<[1], [0], [0], [1], [0, 0, 1, 1], [], []>} : vector<48x32xf32>, vector<32x32xf32>, vector<48x32xf32> -> vector<48x32xf32>
    %627 = vector.broadcast %587 : vector<1x32xf32> to vector<48x32xf32>
    %628 = arith.addf %626, %627 : vector<48x32xf32>
    %629 = vector.shape_cast %628 : vector<48x32xf32> to vector<2x24x32xf32>
    %630 = vector.extract_strided_slice %575 {offsets = [2, 0, 0], sizes = [1, 32, 32], strides = [1, 1, 1]} : vector<4x32x32xf32> to vector<1x32x32xf32>
    %631 = vector.shape_cast %630 : vector<1x32x32xf32> to vector<32x32xf32>
    %cst_204 = arith.constant dense<0.000000e+00> : vector<48x32xf32>
    %632 = tpu.matmul %617, %631, %cst_204 {dimension_numbers = #tpu.dot_dimension_numbers<[1], [0], [0], [1], [0, 0, 1, 1], [], []>} : vector<48x32xf32>, vector<32x32xf32>, vector<48x32xf32> -> vector<48x32xf32>
    %633 = vector.broadcast %588 : vector<1x32xf32> to vector<48x32xf32>
    %634 = arith.addf %632, %633 : vector<48x32xf32>
    %635 = vector.shape_cast %634 : vector<48x32xf32> to vector<2x24x32xf32>
    %cst_205 = arith.constant 0.000000e+00 : f32
    %636 = vector.broadcast %cst_205 : f32 to vector<2x24x32xf32>
    %637 = vector.broadcast %549 : vector<1x1x32xf32> to vector<2x24x32xf32>
    %638 = arith.mulf %623, %637 : vector<2x24x32xf32>
    "tpu.trace_start"() <{level = 10 : i32, message = "nsd,ntd->nst"}> : () -> ()
    %cst_206 = arith.constant dense<0.000000e+00> : vector<2x24x24xf32>
    %639 = tpu.matmul %638, %629, %cst_206 {dimension_numbers = #tpu.dot_dimension_numbers<[2], [2], [1], [1], [0, 0, 0, 1, 1, 1], [0], [0]>} : vector<2x24x32xf32>, vector<2x24x32xf32>, vector<2x24x24xf32> -> vector<2x24x24xf32>
    "tpu.trace_stop"() : () -> ()
    %cst_207 = arith.constant 0.353553385 : f32
    %640 = vector.broadcast %cst_207 : f32 to vector<2x24x24xf32>
    %641 = arith.mulf %639, %640 : vector<2x24x24xf32>
    %642 = vector.broadcast %540 : vector<1x1x24xf32> to vector<2x24x24xf32>
    %643 = arith.addf %641, %642 : vector<2x24x24xf32>
    %cst_208 = arith.constant dense<0xFF800000> : vector<2x24xf32>
    %644 = vector.multi_reduction <maximumf>, %643, %cst_208 [2] : vector<2x24x24xf32> to vector<2x24xf32>
    %645 = vector.shape_cast %644 : vector<2x24xf32> to vector<2x24x1xf32>
    %646 = vector.broadcast %645 : vector<2x24x1xf32> to vector<2x24x24xf32>
    %647 = arith.subf %643, %646 : vector<2x24x24xf32>
    %648 = math.exp %647 : vector<2x24x24xf32>
    %cst_209 = arith.constant dense<0.000000e+00> : vector<2x24xf32>
    %649 = vector.multi_reduction <add>, %648, %cst_209 [2] : vector<2x24x24xf32> to vector<2x24xf32>
    %650 = vector.shape_cast %649 : vector<2x24xf32> to vector<2x24x1xf32>
    %651 = tpu.reciprocal %650 {approx = true} : vector<2x24x1xf32> -> vector<2x24x1xf32>
    %652 = vector.broadcast %651 : vector<2x24x1xf32> to vector<2x24x24xf32>
    %653 = arith.mulf %648, %652 : vector<2x24x24xf32>
    %654 = vector.broadcast %549 : vector<1x1x32xf32> to vector<2x24x32xf32>
    %655 = arith.mulf %635, %654 : vector<2x24x32xf32>
    "tpu.trace_start"() <{level = 10 : i32, message = "nst,ntd->nsd"}> : () -> ()
    %cst_210 = arith.constant dense<0.000000e+00> : vector<2x24x32xf32>
    %656 = tpu.matmul %653, %655, %cst_210 {dimension_numbers = #tpu.dot_dimension_numbers<[2], [1], [1], [2], [0, 0, 0, 1, 1, 2], [0], [0]>} : vector<2x24x24xf32>, vector<2x24x32xf32>, vector<2x24x32xf32> -> vector<2x24x32xf32>
    "tpu.trace_stop"() : () -> ()
    %657 = arith.addf %636, %656 : vector<2x24x32xf32>
    %658 = vector.broadcast %557 : vector<1x1x32xf32> to vector<2x24x32xf32>
    %659 = arith.mulf %623, %658 : vector<2x24x32xf32>
    "tpu.trace_start"() <{level = 10 : i32, message = "nsd,ntd->nst"}> : () -> ()
    %cst_211 = arith.constant dense<0.000000e+00> : vector<2x24x24xf32>
    %660 = tpu.matmul %659, %629, %cst_211 {dimension_numbers = #tpu.dot_dimension_numbers<[2], [2], [1], [1], [0, 0, 0, 1, 1, 1], [0], [0]>} : vector<2x24x32xf32>, vector<2x24x32xf32>, vector<2x24x24xf32> -> vector<2x24x24xf32>
    "tpu.trace_stop"() : () -> ()
    %cst_212 = arith.constant 0.353553385 : f32
    %661 = vector.broadcast %cst_212 : f32 to vector<2x24x24xf32>
    %662 = arith.mulf %660, %661 : vector<2x24x24xf32>
    %663 = vector.broadcast %540 : vector<1x1x24xf32> to vector<2x24x24xf32>
    %664 = arith.addf %662, %663 : vector<2x24x24xf32>
    %cst_213 = arith.constant dense<0xFF800000> : vector<2x24xf32>
    %665 = vector.multi_reduction <maximumf>, %664, %cst_213 [2] : vector<2x24x24xf32> to vector<2x24xf32>
    %666 = vector.shape_cast %665 : vector<2x24xf32> to vector<2x24x1xf32>
    %667 = vector.broadcast %666 : vector<2x24x1xf32> to vector<2x24x24xf32>
    %668 = arith.subf %664, %667 : vector<2x24x24xf32>
    %669 = math.exp %668 : vector<2x24x24xf32>
    %cst_214 = arith.constant dense<0.000000e+00> : vector<2x24xf32>
    %670 = vector.multi_reduction <add>, %669, %cst_214 [2] : vector<2x24x24xf32> to vector<2x24xf32>
    %671 = vector.shape_cast %670 : vector<2x24xf32> to vector<2x24x1xf32>
    %672 = tpu.reciprocal %671 {approx = true} : vector<2x24x1xf32> -> vector<2x24x1xf32>
    %673 = vector.broadcast %672 : vector<2x24x1xf32> to vector<2x24x24xf32>
    %674 = arith.mulf %669, %673 : vector<2x24x24xf32>
    %675 = vector.broadcast %557 : vector<1x1x32xf32> to vector<2x24x32xf32>
    %676 = arith.mulf %635, %675 : vector<2x24x32xf32>
    "tpu.trace_start"() <{level = 10 : i32, message = "nst,ntd->nsd"}> : () -> ()
    %cst_215 = arith.constant dense<0.000000e+00> : vector<2x24x32xf32>
    %677 = tpu.matmul %674, %676, %cst_215 {dimension_numbers = #tpu.dot_dimension_numbers<[2], [1], [1], [2], [0, 0, 0, 1, 1, 2], [0], [0]>} : vector<2x24x24xf32>, vector<2x24x32xf32>, vector<2x24x32xf32> -> vector<2x24x32xf32>
    "tpu.trace_stop"() : () -> ()
    %678 = arith.addf %657, %677 : vector<2x24x32xf32>
    %679 = vector.broadcast %565 : vector<1x1x32xf32> to vector<2x24x32xf32>
    %680 = arith.mulf %623, %679 : vector<2x24x32xf32>
    "tpu.trace_start"() <{level = 10 : i32, message = "nsd,ntd->nst"}> : () -> ()
    %cst_216 = arith.constant dense<0.000000e+00> : vector<2x24x24xf32>
    %681 = tpu.matmul %680, %629, %cst_216 {dimension_numbers = #tpu.dot_dimension_numbers<[2], [2], [1], [1], [0, 0, 0, 1, 1, 1], [0], [0]>} : vector<2x24x32xf32>, vector<2x24x32xf32>, vector<2x24x24xf32> -> vector<2x24x24xf32>
    "tpu.trace_stop"() : () -> ()
    %cst_217 = arith.constant 0.353553385 : f32
    %682 = vector.broadcast %cst_217 : f32 to vector<2x24x24xf32>
    %683 = arith.mulf %681, %682 : vector<2x24x24xf32>
    %684 = vector.broadcast %540 : vector<1x1x24xf32> to vector<2x24x24xf32>
    %685 = arith.addf %683, %684 : vector<2x24x24xf32>
    %cst_218 = arith.constant dense<0xFF800000> : vector<2x24xf32>
    %686 = vector.multi_reduction <maximumf>, %685, %cst_218 [2] : vector<2x24x24xf32> to vector<2x24xf32>
    %687 = vector.shape_cast %686 : vector<2x24xf32> to vector<2x24x1xf32>
    %688 = vector.broadcast %687 : vector<2x24x1xf32> to vector<2x24x24xf32>
    %689 = arith.subf %685, %688 : vector<2x24x24xf32>
    %690 = math.exp %689 : vector<2x24x24xf32>
    %cst_219 = arith.constant dense<0.000000e+00> : vector<2x24xf32>
    %691 = vector.multi_reduction <add>, %690, %cst_219 [2] : vector<2x24x24xf32> to vector<2x24xf32>
    %692 = vector.shape_cast %691 : vector<2x24xf32> to vector<2x24x1xf32>
    %693 = tpu.reciprocal %692 {approx = true} : vector<2x24x1xf32> -> vector<2x24x1xf32>
    %694 = vector.broadcast %693 : vector<2x24x1xf32> to vector<2x24x24xf32>
    %695 = arith.mulf %690, %694 : vector<2x24x24xf32>
    %696 = vector.broadcast %565 : vector<1x1x32xf32> to vector<2x24x32xf32>
    %697 = arith.mulf %635, %696 : vector<2x24x32xf32>
    "tpu.trace_start"() <{level = 10 : i32, message = "nst,ntd->nsd"}> : () -> ()
    %cst_220 = arith.constant dense<0.000000e+00> : vector<2x24x32xf32>
    %698 = tpu.matmul %695, %697, %cst_220 {dimension_numbers = #tpu.dot_dimension_numbers<[2], [1], [1], [2], [0, 0, 0, 1, 1, 2], [0], [0]>} : vector<2x24x24xf32>, vector<2x24x32xf32>, vector<2x24x32xf32> -> vector<2x24x32xf32>
    "tpu.trace_stop"() : () -> ()
    %699 = arith.addf %678, %698 : vector<2x24x32xf32>
    %700 = vector.broadcast %573 : vector<1x1x32xf32> to vector<2x24x32xf32>
    %701 = arith.mulf %623, %700 : vector<2x24x32xf32>
    "tpu.trace_start"() <{level = 10 : i32, message = "nsd,ntd->nst"}> : () -> ()
    %cst_221 = arith.constant dense<0.000000e+00> : vector<2x24x24xf32>
    %702 = tpu.matmul %701, %629, %cst_221 {dimension_numbers = #tpu.dot_dimension_numbers<[2], [2], [1], [1], [0, 0, 0, 1, 1, 1], [0], [0]>} : vector<2x24x32xf32>, vector<2x24x32xf32>, vector<2x24x24xf32> -> vector<2x24x24xf32>
    "tpu.trace_stop"() : () -> ()
    %cst_222 = arith.constant 0.353553385 : f32
    %703 = vector.broadcast %cst_222 : f32 to vector<2x24x24xf32>
    %704 = arith.mulf %702, %703 : vector<2x24x24xf32>
    %705 = vector.broadcast %540 : vector<1x1x24xf32> to vector<2x24x24xf32>
    %706 = arith.addf %704, %705 : vector<2x24x24xf32>
    %cst_223 = arith.constant dense<0xFF800000> : vector<2x24xf32>
    %707 = vector.multi_reduction <maximumf>, %706, %cst_223 [2] : vector<2x24x24xf32> to vector<2x24xf32>
    %708 = vector.shape_cast %707 : vector<2x24xf32> to vector<2x24x1xf32>
    %709 = vector.broadcast %708 : vector<2x24x1xf32> to vector<2x24x24xf32>
    %710 = arith.subf %706, %709 : vector<2x24x24xf32>
    %711 = math.exp %710 : vector<2x24x24xf32>
    %cst_224 = arith.constant dense<0.000000e+00> : vector<2x24xf32>
    %712 = vector.multi_reduction <add>, %711, %cst_224 [2] : vector<2x24x24xf32> to vector<2x24xf32>
    %713 = vector.shape_cast %712 : vector<2x24xf32> to vector<2x24x1xf32>
    %714 = tpu.reciprocal %713 {approx = true} : vector<2x24x1xf32> -> vector<2x24x1xf32>
    %715 = vector.broadcast %714 : vector<2x24x1xf32> to vector<2x24x24xf32>
    %716 = arith.mulf %711, %715 : vector<2x24x24xf32>
    %717 = vector.broadcast %573 : vector<1x1x32xf32> to vector<2x24x32xf32>
    %718 = arith.mulf %635, %717 : vector<2x24x32xf32>
    "tpu.trace_start"() <{level = 10 : i32, message = "nst,ntd->nsd"}> : () -> ()
    %cst_225 = arith.constant dense<0.000000e+00> : vector<2x24x32xf32>
    %719 = tpu.matmul %716, %718, %cst_225 {dimension_numbers = #tpu.dot_dimension_numbers<[2], [1], [1], [2], [0, 0, 0, 1, 1, 2], [0], [0]>} : vector<2x24x24xf32>, vector<2x24x32xf32>, vector<2x24x32xf32> -> vector<2x24x32xf32>
    "tpu.trace_stop"() : () -> ()
    %720 = arith.addf %699, %719 : vector<2x24x32xf32>
    %721 = vector.shape_cast %720 : vector<2x24x32xf32> to vector<48x32xf32>
    %722 = vector.extract_strided_slice %575 {offsets = [3, 0, 0], sizes = [1, 32, 32], strides = [1, 1, 1]} : vector<4x32x32xf32> to vector<1x32x32xf32>
    %723 = vector.shape_cast %722 : vector<1x32x32xf32> to vector<32x32xf32>
    %cst_226 = arith.constant dense<0.000000e+00> : vector<48x32xf32>
    %724 = tpu.matmul %721, %723, %cst_226 {dimension_numbers = #tpu.dot_dimension_numbers<[1], [0], [0], [1], [0, 0, 1, 1], [], []>} : vector<48x32xf32>, vector<32x32xf32>, vector<48x32xf32> -> vector<48x32xf32>
    %725 = vector.broadcast %589 : vector<1x32xf32> to vector<48x32xf32>
    %726 = arith.addf %724, %725 : vector<48x32xf32>
    %727 = vector.shape_cast %726 : vector<48x32xf32> to vector<2x24x32xf32>
    %728 = arith.addf %534, %727 : vector<2x24x32xf32>
    %cst_227 = arith.constant dense<0.000000e+00> : vector<2x24xf32>
    %729 = vector.multi_reduction <add>, %728, %cst_227 [2] : vector<2x24x32xf32> to vector<2x24xf32>
    %730 = vector.shape_cast %729 : vector<2x24xf32> to vector<2x24x1xf32>
    %cst_228 = arith.constant 3.200000e+01 : f32
    %731 = vector.broadcast %cst_228 : f32 to vector<2x24x1xf32>
    %732 = arith.divf %730, %731 : vector<2x24x1xf32>
    %733 = vector.broadcast %732 : vector<2x24x1xf32> to vector<2x24x32xf32>
    %734 = arith.subf %728, %733 : vector<2x24x32xf32>
    %735 = arith.mulf %734, %734 : vector<2x24x32xf32>
    %cst_229 = arith.constant dense<0.000000e+00> : vector<2x24xf32>
    %736 = vector.multi_reduction <add>, %735, %cst_229 [2] : vector<2x24x32xf32> to vector<2x24xf32>
    %737 = vector.shape_cast %736 : vector<2x24xf32> to vector<2x24x1xf32>
    %cst_230 = arith.constant 3.200000e+01 : f32
    %738 = vector.broadcast %cst_230 : f32 to vector<2x24x1xf32>
    %739 = arith.divf %737, %738 : vector<2x24x1xf32>
    %740 = vector.broadcast %732 : vector<2x24x1xf32> to vector<2x24x32xf32>
    %741 = arith.subf %728, %740 : vector<2x24x32xf32>
    %cst_231 = arith.constant 9.99999974E-6 : f32
    %742 = vector.broadcast %cst_231 : f32 to vector<2x24x1xf32>
    %743 = arith.addf %739, %742 : vector<2x24x1xf32>
    %744 = math.rsqrt %743 : vector<2x24x1xf32>
    %745 = vector.broadcast %744 : vector<2x24x1xf32> to vector<2x24x32xf32>
    %746 = arith.mulf %741, %745 : vector<2x24x32xf32>
    %747 = vector.shape_cast %590 : vector<1x32xf32> to vector<1x1x32xf32>
    %748 = vector.broadcast %747 : vector<1x1x32xf32> to vector<2x24x32xf32>
    %749 = arith.mulf %746, %748 : vector<2x24x32xf32>
    %750 = vector.shape_cast %591 : vector<1x32xf32> to vector<1x1x32xf32>
    %751 = vector.broadcast %750 : vector<1x1x32xf32> to vector<2x24x32xf32>
    %752 = arith.addf %749, %751 : vector<2x24x32xf32>
    %753 = vector.shape_cast %752 : vector<2x24x32xf32> to vector<48x32xf32>
    %cst_232 = arith.constant dense<0.000000e+00> : vector<48x128xf32>
    %754 = tpu.matmul %753, %579, %cst_232 {dimension_numbers = #tpu.dot_dimension_numbers<[1], [0], [0], [1], [0, 0, 1, 1], [], []>} : vector<48x32xf32>, vector<32x128xf32>, vector<48x128xf32> -> vector<48x128xf32>
    %755 = vector.broadcast %581 : vector<1x128xf32> to vector<48x128xf32>
    %756 = arith.addf %754, %755 : vector<48x128xf32>
    %757 = arith.mulf %756, %756 : vector<48x128xf32>
    %758 = arith.mulf %756, %757 : vector<48x128xf32>
    %cst_233 = arith.constant 4.471500e-02 : f32
    %759 = vector.broadcast %cst_233 : f32 to vector<48x128xf32>
    %760 = arith.mulf %759, %758 : vector<48x128xf32>
    %761 = arith.addf %756, %760 : vector<48x128xf32>
    %cst_234 = arith.constant 0.797884583 : f32
    %762 = vector.broadcast %cst_234 : f32 to vector<48x128xf32>
    %763 = arith.mulf %762, %761 : vector<48x128xf32>
    %764 = math.tanh %763 : vector<48x128xf32>
    %cst_235 = arith.constant 1.000000e+00 : f32
    %765 = vector.broadcast %cst_235 : f32 to vector<48x128xf32>
    %766 = arith.addf %765, %764 : vector<48x128xf32>
    %cst_236 = arith.constant 5.000000e-01 : f32
    %767 = vector.broadcast %cst_236 : f32 to vector<48x128xf32>
    %768 = arith.mulf %767, %766 : vector<48x128xf32>
    %769 = arith.mulf %756, %768 : vector<48x128xf32>
    %cst_237 = arith.constant dense<0.000000e+00> : vector<48x32xf32>
    %770 = tpu.matmul %769, %583, %cst_237 {dimension_numbers = #tpu.dot_dimension_numbers<[1], [0], [0], [1], [0, 0, 1, 1], [], []>} : vector<48x128xf32>, vector<128x32xf32>, vector<48x32xf32> -> vector<48x32xf32>
    %771 = vector.broadcast %592 : vector<1x32xf32> to vector<48x32xf32>
    %772 = arith.addf %770, %771 : vector<48x32xf32>
    %773 = vector.shape_cast %772 : vector<48x32xf32> to vector<2x24x32xf32>
    %774 = arith.addf %728, %773 : vector<2x24x32xf32>
    %c1_238 = arith.constant 1 : index
    %c0_239 = arith.constant 0 : index
    %c0_240 = arith.constant 0 : index
    %c0_241 = arith.constant 0 : index
    %775 = vector.load %arg15[%c1_238, %c0_239, %c0_240, %c0_241] : memref<2x4x32x32xf32, #tpu.memory_space<vmem>>, vector<1x4x32x32xf32>
    %776 = vector.shape_cast %775 : vector<1x4x32x32xf32> to vector<4x32x32xf32>
    %c1_242 = arith.constant 1 : index
    %c0_243 = arith.constant 0 : index
    %c0_244 = arith.constant 0 : index
    %777 = vector.load %arg16[%c1_242, %c0_243, %c0_244] : memref<2x9x32xf32, #tpu.memory_space<vmem>>, vector<1x9x32xf32>
    %778 = vector.shape_cast %777 : vector<1x9x32xf32> to vector<9x32xf32>
    %c1_245 = arith.constant 1 : index
    %c0_246 = arith.constant 0 : index
    %c0_247 = arith.constant 0 : index
    %779 = vector.load %arg17[%c1_245, %c0_246, %c0_247] : memref<2x32x128xf32, #tpu.memory_space<vmem>>, vector<1x32x128xf32>
    %780 = vector.shape_cast %779 : vector<1x32x128xf32> to vector<32x128xf32>
    %c1_248 = arith.constant 1 : index
    %c0_249 = arith.constant 0 : index
    %c0_250 = arith.constant 0 : index
    %781 = vector.load %arg18[%c1_248, %c0_249, %c0_250] : memref<2x1x128xf32, #tpu.memory_space<vmem>>, vector<1x1x128xf32>
    %782 = vector.shape_cast %781 : vector<1x1x128xf32> to vector<1x128xf32>
    %c1_251 = arith.constant 1 : index
    %c0_252 = arith.constant 0 : index
    %c0_253 = arith.constant 0 : index
    %783 = vector.load %arg19[%c1_251, %c0_252, %c0_253] : memref<2x128x32xf32, #tpu.memory_space<vmem>>, vector<1x128x32xf32>
    %784 = vector.shape_cast %783 : vector<1x128x32xf32> to vector<128x32xf32>
    %785 = vector.extract_strided_slice %778 {offsets = [0, 0], sizes = [1, 32], strides = [1, 1]} : vector<9x32xf32> to vector<1x32xf32>
    %786 = vector.extract_strided_slice %778 {offsets = [1, 0], sizes = [1, 32], strides = [1, 1]} : vector<9x32xf32> to vector<1x32xf32>
    %787 = vector.extract_strided_slice %778 {offsets = [2, 0], sizes = [1, 32], strides = [1, 1]} : vector<9x32xf32> to vector<1x32xf32>
    %788 = vector.extract_strided_slice %778 {offsets = [3, 0], sizes = [1, 32], strides = [1, 1]} : vector<9x32xf32> to vector<1x32xf32>
    %789 = vector.extract_strided_slice %778 {offsets = [4, 0], sizes = [1, 32], strides = [1, 1]} : vector<9x32xf32> to vector<1x32xf32>
    %790 = vector.extract_strided_slice %778 {offsets = [5, 0], sizes = [1, 32], strides = [1, 1]} : vector<9x32xf32> to vector<1x32xf32>
    %791 = vector.extract_strided_slice %778 {offsets = [6, 0], sizes = [1, 32], strides = [1, 1]} : vector<9x32xf32> to vector<1x32xf32>
    %792 = vector.extract_strided_slice %778 {offsets = [7, 0], sizes = [1, 32], strides = [1, 1]} : vector<9x32xf32> to vector<1x32xf32>
    %793 = vector.extract_strided_slice %778 {offsets = [8, 0], sizes = [1, 32], strides = [1, 1]} : vector<9x32xf32> to vector<1x32xf32>
    %cst_254 = arith.constant dense<0.000000e+00> : vector<2x24xf32>
    %794 = vector.multi_reduction <add>, %774, %cst_254 [2] : vector<2x24x32xf32> to vector<2x24xf32>
    %795 = vector.shape_cast %794 : vector<2x24xf32> to vector<2x24x1xf32>
    %cst_255 = arith.constant 3.200000e+01 : f32
    %796 = vector.broadcast %cst_255 : f32 to vector<2x24x1xf32>
    %797 = arith.divf %795, %796 : vector<2x24x1xf32>
    %798 = vector.broadcast %797 : vector<2x24x1xf32> to vector<2x24x32xf32>
    %799 = arith.subf %774, %798 : vector<2x24x32xf32>
    %800 = arith.mulf %799, %799 : vector<2x24x32xf32>
    %cst_256 = arith.constant dense<0.000000e+00> : vector<2x24xf32>
    %801 = vector.multi_reduction <add>, %800, %cst_256 [2] : vector<2x24x32xf32> to vector<2x24xf32>
    %802 = vector.shape_cast %801 : vector<2x24xf32> to vector<2x24x1xf32>
    %cst_257 = arith.constant 3.200000e+01 : f32
    %803 = vector.broadcast %cst_257 : f32 to vector<2x24x1xf32>
    %804 = arith.divf %802, %803 : vector<2x24x1xf32>
    %805 = vector.broadcast %797 : vector<2x24x1xf32> to vector<2x24x32xf32>
    %806 = arith.subf %774, %805 : vector<2x24x32xf32>
    %cst_258 = arith.constant 9.99999974E-6 : f32
    %807 = vector.broadcast %cst_258 : f32 to vector<2x24x1xf32>
    %808 = arith.addf %804, %807 : vector<2x24x1xf32>
    %809 = math.rsqrt %808 : vector<2x24x1xf32>
    %810 = vector.broadcast %809 : vector<2x24x1xf32> to vector<2x24x32xf32>
    %811 = arith.mulf %806, %810 : vector<2x24x32xf32>
    %812 = vector.shape_cast %785 : vector<1x32xf32> to vector<1x1x32xf32>
    %813 = vector.broadcast %812 : vector<1x1x32xf32> to vector<2x24x32xf32>
    %814 = arith.mulf %811, %813 : vector<2x24x32xf32>
    %815 = vector.shape_cast %786 : vector<1x32xf32> to vector<1x1x32xf32>
    %816 = vector.broadcast %815 : vector<1x1x32xf32> to vector<2x24x32xf32>
    %817 = arith.addf %814, %816 : vector<2x24x32xf32>
    %818 = vector.shape_cast %817 : vector<2x24x32xf32> to vector<48x32xf32>
    %819 = vector.extract_strided_slice %776 {offsets = [0, 0, 0], sizes = [1, 32, 32], strides = [1, 1, 1]} : vector<4x32x32xf32> to vector<1x32x32xf32>
    %820 = vector.shape_cast %819 : vector<1x32x32xf32> to vector<32x32xf32>
    %cst_259 = arith.constant dense<0.000000e+00> : vector<48x32xf32>
    %821 = tpu.matmul %818, %820, %cst_259 {dimension_numbers = #tpu.dot_dimension_numbers<[1], [0], [0], [1], [0, 0, 1, 1], [], []>} : vector<48x32xf32>, vector<32x32xf32>, vector<48x32xf32> -> vector<48x32xf32>
    %822 = vector.broadcast %787 : vector<1x32xf32> to vector<48x32xf32>
    %823 = arith.addf %821, %822 : vector<48x32xf32>
    %824 = vector.shape_cast %823 : vector<48x32xf32> to vector<2x24x32xf32>
    %825 = vector.extract_strided_slice %776 {offsets = [1, 0, 0], sizes = [1, 32, 32], strides = [1, 1, 1]} : vector<4x32x32xf32> to vector<1x32x32xf32>
    %826 = vector.shape_cast %825 : vector<1x32x32xf32> to vector<32x32xf32>
    %cst_260 = arith.constant dense<0.000000e+00> : vector<48x32xf32>
    %827 = tpu.matmul %818, %826, %cst_260 {dimension_numbers = #tpu.dot_dimension_numbers<[1], [0], [0], [1], [0, 0, 1, 1], [], []>} : vector<48x32xf32>, vector<32x32xf32>, vector<48x32xf32> -> vector<48x32xf32>
    %828 = vector.broadcast %788 : vector<1x32xf32> to vector<48x32xf32>
    %829 = arith.addf %827, %828 : vector<48x32xf32>
    %830 = vector.shape_cast %829 : vector<48x32xf32> to vector<2x24x32xf32>
    %831 = vector.extract_strided_slice %776 {offsets = [2, 0, 0], sizes = [1, 32, 32], strides = [1, 1, 1]} : vector<4x32x32xf32> to vector<1x32x32xf32>
    %832 = vector.shape_cast %831 : vector<1x32x32xf32> to vector<32x32xf32>
    %cst_261 = arith.constant dense<0.000000e+00> : vector<48x32xf32>
    %833 = tpu.matmul %818, %832, %cst_261 {dimension_numbers = #tpu.dot_dimension_numbers<[1], [0], [0], [1], [0, 0, 1, 1], [], []>} : vector<48x32xf32>, vector<32x32xf32>, vector<48x32xf32> -> vector<48x32xf32>
    %834 = vector.broadcast %789 : vector<1x32xf32> to vector<48x32xf32>
    %835 = arith.addf %833, %834 : vector<48x32xf32>
    %836 = vector.shape_cast %835 : vector<48x32xf32> to vector<2x24x32xf32>
    %cst_262 = arith.constant 0.000000e+00 : f32
    %837 = vector.broadcast %cst_262 : f32 to vector<2x24x32xf32>
    %838 = vector.broadcast %549 : vector<1x1x32xf32> to vector<2x24x32xf32>
    %839 = arith.mulf %824, %838 : vector<2x24x32xf32>
    "tpu.trace_start"() <{level = 10 : i32, message = "nsd,ntd->nst"}> : () -> ()
    %cst_263 = arith.constant dense<0.000000e+00> : vector<2x24x24xf32>
    %840 = tpu.matmul %839, %830, %cst_263 {dimension_numbers = #tpu.dot_dimension_numbers<[2], [2], [1], [1], [0, 0, 0, 1, 1, 1], [0], [0]>} : vector<2x24x32xf32>, vector<2x24x32xf32>, vector<2x24x24xf32> -> vector<2x24x24xf32>
    "tpu.trace_stop"() : () -> ()
    %cst_264 = arith.constant 0.353553385 : f32
    %841 = vector.broadcast %cst_264 : f32 to vector<2x24x24xf32>
    %842 = arith.mulf %840, %841 : vector<2x24x24xf32>
    %843 = vector.broadcast %540 : vector<1x1x24xf32> to vector<2x24x24xf32>
    %844 = arith.addf %842, %843 : vector<2x24x24xf32>
    %cst_265 = arith.constant dense<0xFF800000> : vector<2x24xf32>
    %845 = vector.multi_reduction <maximumf>, %844, %cst_265 [2] : vector<2x24x24xf32> to vector<2x24xf32>
    %846 = vector.shape_cast %845 : vector<2x24xf32> to vector<2x24x1xf32>
    %847 = vector.broadcast %846 : vector<2x24x1xf32> to vector<2x24x24xf32>
    %848 = arith.subf %844, %847 : vector<2x24x24xf32>
    %849 = math.exp %848 : vector<2x24x24xf32>
    %cst_266 = arith.constant dense<0.000000e+00> : vector<2x24xf32>
    %850 = vector.multi_reduction <add>, %849, %cst_266 [2] : vector<2x24x24xf32> to vector<2x24xf32>
    %851 = vector.shape_cast %850 : vector<2x24xf32> to vector<2x24x1xf32>
    %852 = tpu.reciprocal %851 {approx = true} : vector<2x24x1xf32> -> vector<2x24x1xf32>
    %853 = vector.broadcast %852 : vector<2x24x1xf32> to vector<2x24x24xf32>
    %854 = arith.mulf %849, %853 : vector<2x24x24xf32>
    %855 = vector.broadcast %549 : vector<1x1x32xf32> to vector<2x24x32xf32>
    %856 = arith.mulf %836, %855 : vector<2x24x32xf32>
    "tpu.trace_start"() <{level = 10 : i32, message = "nst,ntd->nsd"}> : () -> ()
    %cst_267 = arith.constant dense<0.000000e+00> : vector<2x24x32xf32>
    %857 = tpu.matmul %854, %856, %cst_267 {dimension_numbers = #tpu.dot_dimension_numbers<[2], [1], [1], [2], [0, 0, 0, 1, 1, 2], [0], [0]>} : vector<2x24x24xf32>, vector<2x24x32xf32>, vector<2x24x32xf32> -> vector<2x24x32xf32>
    "tpu.trace_stop"() : () -> ()
    %858 = arith.addf %837, %857 : vector<2x24x32xf32>
    %859 = vector.broadcast %557 : vector<1x1x32xf32> to vector<2x24x32xf32>
    %860 = arith.mulf %824, %859 : vector<2x24x32xf32>
    "tpu.trace_start"() <{level = 10 : i32, message = "nsd,ntd->nst"}> : () -> ()
    %cst_268 = arith.constant dense<0.000000e+00> : vector<2x24x24xf32>
    %861 = tpu.matmul %860, %830, %cst_268 {dimension_numbers = #tpu.dot_dimension_numbers<[2], [2], [1], [1], [0, 0, 0, 1, 1, 1], [0], [0]>} : vector<2x24x32xf32>, vector<2x24x32xf32>, vector<2x24x24xf32> -> vector<2x24x24xf32>
    "tpu.trace_stop"() : () -> ()
    %cst_269 = arith.constant 0.353553385 : f32
    %862 = vector.broadcast %cst_269 : f32 to vector<2x24x24xf32>
    %863 = arith.mulf %861, %862 : vector<2x24x24xf32>
    %864 = vector.broadcast %540 : vector<1x1x24xf32> to vector<2x24x24xf32>
    %865 = arith.addf %863, %864 : vector<2x24x24xf32>
    %cst_270 = arith.constant dense<0xFF800000> : vector<2x24xf32>
    %866 = vector.multi_reduction <maximumf>, %865, %cst_270 [2] : vector<2x24x24xf32> to vector<2x24xf32>
    %867 = vector.shape_cast %866 : vector<2x24xf32> to vector<2x24x1xf32>
    %868 = vector.broadcast %867 : vector<2x24x1xf32> to vector<2x24x24xf32>
    %869 = arith.subf %865, %868 : vector<2x24x24xf32>
    %870 = math.exp %869 : vector<2x24x24xf32>
    %cst_271 = arith.constant dense<0.000000e+00> : vector<2x24xf32>
    %871 = vector.multi_reduction <add>, %870, %cst_271 [2] : vector<2x24x24xf32> to vector<2x24xf32>
    %872 = vector.shape_cast %871 : vector<2x24xf32> to vector<2x24x1xf32>
    %873 = tpu.reciprocal %872 {approx = true} : vector<2x24x1xf32> -> vector<2x24x1xf32>
    %874 = vector.broadcast %873 : vector<2x24x1xf32> to vector<2x24x24xf32>
    %875 = arith.mulf %870, %874 : vector<2x24x24xf32>
    %876 = vector.broadcast %557 : vector<1x1x32xf32> to vector<2x24x32xf32>
    %877 = arith.mulf %836, %876 : vector<2x24x32xf32>
    "tpu.trace_start"() <{level = 10 : i32, message = "nst,ntd->nsd"}> : () -> ()
    %cst_272 = arith.constant dense<0.000000e+00> : vector<2x24x32xf32>
    %878 = tpu.matmul %875, %877, %cst_272 {dimension_numbers = #tpu.dot_dimension_numbers<[2], [1], [1], [2], [0, 0, 0, 1, 1, 2], [0], [0]>} : vector<2x24x24xf32>, vector<2x24x32xf32>, vector<2x24x32xf32> -> vector<2x24x32xf32>
    "tpu.trace_stop"() : () -> ()
    %879 = arith.addf %858, %878 : vector<2x24x32xf32>
    %880 = vector.broadcast %565 : vector<1x1x32xf32> to vector<2x24x32xf32>
    %881 = arith.mulf %824, %880 : vector<2x24x32xf32>
    "tpu.trace_start"() <{level = 10 : i32, message = "nsd,ntd->nst"}> : () -> ()
    %cst_273 = arith.constant dense<0.000000e+00> : vector<2x24x24xf32>
    %882 = tpu.matmul %881, %830, %cst_273 {dimension_numbers = #tpu.dot_dimension_numbers<[2], [2], [1], [1], [0, 0, 0, 1, 1, 1], [0], [0]>} : vector<2x24x32xf32>, vector<2x24x32xf32>, vector<2x24x24xf32> -> vector<2x24x24xf32>
    "tpu.trace_stop"() : () -> ()
    %cst_274 = arith.constant 0.353553385 : f32
    %883 = vector.broadcast %cst_274 : f32 to vector<2x24x24xf32>
    %884 = arith.mulf %882, %883 : vector<2x24x24xf32>
    %885 = vector.broadcast %540 : vector<1x1x24xf32> to vector<2x24x24xf32>
    %886 = arith.addf %884, %885 : vector<2x24x24xf32>
    %cst_275 = arith.constant dense<0xFF800000> : vector<2x24xf32>
    %887 = vector.multi_reduction <maximumf>, %886, %cst_275 [2] : vector<2x24x24xf32> to vector<2x24xf32>
    %888 = vector.shape_cast %887 : vector<2x24xf32> to vector<2x24x1xf32>
    %889 = vector.broadcast %888 : vector<2x24x1xf32> to vector<2x24x24xf32>
    %890 = arith.subf %886, %889 : vector<2x24x24xf32>
    %891 = math.exp %890 : vector<2x24x24xf32>
    %cst_276 = arith.constant dense<0.000000e+00> : vector<2x24xf32>
    %892 = vector.multi_reduction <add>, %891, %cst_276 [2] : vector<2x24x24xf32> to vector<2x24xf32>
    %893 = vector.shape_cast %892 : vector<2x24xf32> to vector<2x24x1xf32>
    %894 = tpu.reciprocal %893 {approx = true} : vector<2x24x1xf32> -> vector<2x24x1xf32>
    %895 = vector.broadcast %894 : vector<2x24x1xf32> to vector<2x24x24xf32>
    %896 = arith.mulf %891, %895 : vector<2x24x24xf32>
    %897 = vector.broadcast %565 : vector<1x1x32xf32> to vector<2x24x32xf32>
    %898 = arith.mulf %836, %897 : vector<2x24x32xf32>
    "tpu.trace_start"() <{level = 10 : i32, message = "nst,ntd->nsd"}> : () -> ()
    %cst_277 = arith.constant dense<0.000000e+00> : vector<2x24x32xf32>
    %899 = tpu.matmul %896, %898, %cst_277 {dimension_numbers = #tpu.dot_dimension_numbers<[2], [1], [1], [2], [0, 0, 0, 1, 1, 2], [0], [0]>} : vector<2x24x24xf32>, vector<2x24x32xf32>, vector<2x24x32xf32> -> vector<2x24x32xf32>
    "tpu.trace_stop"() : () -> ()
    %900 = arith.addf %879, %899 : vector<2x24x32xf32>
    %901 = vector.broadcast %573 : vector<1x1x32xf32> to vector<2x24x32xf32>
    %902 = arith.mulf %824, %901 : vector<2x24x32xf32>
    "tpu.trace_start"() <{level = 10 : i32, message = "nsd,ntd->nst"}> : () -> ()
    %cst_278 = arith.constant dense<0.000000e+00> : vector<2x24x24xf32>
    %903 = tpu.matmul %902, %830, %cst_278 {dimension_numbers = #tpu.dot_dimension_numbers<[2], [2], [1], [1], [0, 0, 0, 1, 1, 1], [0], [0]>} : vector<2x24x32xf32>, vector<2x24x32xf32>, vector<2x24x24xf32> -> vector<2x24x24xf32>
    "tpu.trace_stop"() : () -> ()
    %cst_279 = arith.constant 0.353553385 : f32
    %904 = vector.broadcast %cst_279 : f32 to vector<2x24x24xf32>
    %905 = arith.mulf %903, %904 : vector<2x24x24xf32>
    %906 = vector.broadcast %540 : vector<1x1x24xf32> to vector<2x24x24xf32>
    %907 = arith.addf %905, %906 : vector<2x24x24xf32>
    %cst_280 = arith.constant dense<0xFF800000> : vector<2x24xf32>
    %908 = vector.multi_reduction <maximumf>, %907, %cst_280 [2] : vector<2x24x24xf32> to vector<2x24xf32>
    %909 = vector.shape_cast %908 : vector<2x24xf32> to vector<2x24x1xf32>
    %910 = vector.broadcast %909 : vector<2x24x1xf32> to vector<2x24x24xf32>
    %911 = arith.subf %907, %910 : vector<2x24x24xf32>
    %912 = math.exp %911 : vector<2x24x24xf32>
    %cst_281 = arith.constant dense<0.000000e+00> : vector<2x24xf32>
    %913 = vector.multi_reduction <add>, %912, %cst_281 [2] : vector<2x24x24xf32> to vector<2x24xf32>
    %914 = vector.shape_cast %913 : vector<2x24xf32> to vector<2x24x1xf32>
    %915 = tpu.reciprocal %914 {approx = true} : vector<2x24x1xf32> -> vector<2x24x1xf32>
    %916 = vector.broadcast %915 : vector<2x24x1xf32> to vector<2x24x24xf32>
    %917 = arith.mulf %912, %916 : vector<2x24x24xf32>
    %918 = vector.broadcast %573 : vector<1x1x32xf32> to vector<2x24x32xf32>
    %919 = arith.mulf %836, %918 : vector<2x24x32xf32>
    "tpu.trace_start"() <{level = 10 : i32, message = "nst,ntd->nsd"}> : () -> ()
    %cst_282 = arith.constant dense<0.000000e+00> : vector<2x24x32xf32>
    %920 = tpu.matmul %917, %919, %cst_282 {dimension_numbers = #tpu.dot_dimension_numbers<[2], [1], [1], [2], [0, 0, 0, 1, 1, 2], [0], [0]>} : vector<2x24x24xf32>, vector<2x24x32xf32>, vector<2x24x32xf32> -> vector<2x24x32xf32>
    "tpu.trace_stop"() : () -> ()
    %921 = arith.addf %900, %920 : vector<2x24x32xf32>
    %922 = vector.shape_cast %921 : vector<2x24x32xf32> to vector<48x32xf32>
    %923 = vector.extract_strided_slice %776 {offsets = [3, 0, 0], sizes = [1, 32, 32], strides = [1, 1, 1]} : vector<4x32x32xf32> to vector<1x32x32xf32>
    %924 = vector.shape_cast %923 : vector<1x32x32xf32> to vector<32x32xf32>
    %cst_283 = arith.constant dense<0.000000e+00> : vector<48x32xf32>
    %925 = tpu.matmul %922, %924, %cst_283 {dimension_numbers = #tpu.dot_dimension_numbers<[1], [0], [0], [1], [0, 0, 1, 1], [], []>} : vector<48x32xf32>, vector<32x32xf32>, vector<48x32xf32> -> vector<48x32xf32>
    %926 = vector.broadcast %790 : vector<1x32xf32> to vector<48x32xf32>
    %927 = arith.addf %925, %926 : vector<48x32xf32>
    %928 = vector.shape_cast %927 : vector<48x32xf32> to vector<2x24x32xf32>
    %929 = arith.addf %774, %928 : vector<2x24x32xf32>
    %cst_284 = arith.constant dense<0.000000e+00> : vector<2x24xf32>
    %930 = vector.multi_reduction <add>, %929, %cst_284 [2] : vector<2x24x32xf32> to vector<2x24xf32>
    %931 = vector.shape_cast %930 : vector<2x24xf32> to vector<2x24x1xf32>
    %cst_285 = arith.constant 3.200000e+01 : f32
    %932 = vector.broadcast %cst_285 : f32 to vector<2x24x1xf32>
    %933 = arith.divf %931, %932 : vector<2x24x1xf32>
    %934 = vector.broadcast %933 : vector<2x24x1xf32> to vector<2x24x32xf32>
    %935 = arith.subf %929, %934 : vector<2x24x32xf32>
    %936 = arith.mulf %935, %935 : vector<2x24x32xf32>
    %cst_286 = arith.constant dense<0.000000e+00> : vector<2x24xf32>
    %937 = vector.multi_reduction <add>, %936, %cst_286 [2] : vector<2x24x32xf32> to vector<2x24xf32>
    %938 = vector.shape_cast %937 : vector<2x24xf32> to vector<2x24x1xf32>
    %cst_287 = arith.constant 3.200000e+01 : f32
    %939 = vector.broadcast %cst_287 : f32 to vector<2x24x1xf32>
    %940 = arith.divf %938, %939 : vector<2x24x1xf32>
    %941 = vector.broadcast %933 : vector<2x24x1xf32> to vector<2x24x32xf32>
    %942 = arith.subf %929, %941 : vector<2x24x32xf32>
    %cst_288 = arith.constant 9.99999974E-6 : f32
    %943 = vector.broadcast %cst_288 : f32 to vector<2x24x1xf32>
    %944 = arith.addf %940, %943 : vector<2x24x1xf32>
    %945 = math.rsqrt %944 : vector<2x24x1xf32>
    %946 = vector.broadcast %945 : vector<2x24x1xf32> to vector<2x24x32xf32>
    %947 = arith.mulf %942, %946 : vector<2x24x32xf32>
    %948 = vector.shape_cast %791 : vector<1x32xf32> to vector<1x1x32xf32>
    %949 = vector.broadcast %948 : vector<1x1x32xf32> to vector<2x24x32xf32>
    %950 = arith.mulf %947, %949 : vector<2x24x32xf32>
    %951 = vector.shape_cast %792 : vector<1x32xf32> to vector<1x1x32xf32>
    %952 = vector.broadcast %951 : vector<1x1x32xf32> to vector<2x24x32xf32>
    %953 = arith.addf %950, %952 : vector<2x24x32xf32>
    %954 = vector.shape_cast %953 : vector<2x24x32xf32> to vector<48x32xf32>
    %cst_289 = arith.constant dense<0.000000e+00> : vector<48x128xf32>
    %955 = tpu.matmul %954, %780, %cst_289 {dimension_numbers = #tpu.dot_dimension_numbers<[1], [0], [0], [1], [0, 0, 1, 1], [], []>} : vector<48x32xf32>, vector<32x128xf32>, vector<48x128xf32> -> vector<48x128xf32>
    %956 = vector.broadcast %782 : vector<1x128xf32> to vector<48x128xf32>
    %957 = arith.addf %955, %956 : vector<48x128xf32>
    %958 = arith.mulf %957, %957 : vector<48x128xf32>
    %959 = arith.mulf %957, %958 : vector<48x128xf32>
    %cst_290 = arith.constant 4.471500e-02 : f32
    %960 = vector.broadcast %cst_290 : f32 to vector<48x128xf32>
    %961 = arith.mulf %960, %959 : vector<48x128xf32>
    %962 = arith.addf %957, %961 : vector<48x128xf32>
    %cst_291 = arith.constant 0.797884583 : f32
    %963 = vector.broadcast %cst_291 : f32 to vector<48x128xf32>
    %964 = arith.mulf %963, %962 : vector<48x128xf32>
    %965 = math.tanh %964 : vector<48x128xf32>
    %cst_292 = arith.constant 1.000000e+00 : f32
    %966 = vector.broadcast %cst_292 : f32 to vector<48x128xf32>
    %967 = arith.addf %966, %965 : vector<48x128xf32>
    %cst_293 = arith.constant 5.000000e-01 : f32
    %968 = vector.broadcast %cst_293 : f32 to vector<48x128xf32>
    %969 = arith.mulf %968, %967 : vector<48x128xf32>
    %970 = arith.mulf %957, %969 : vector<48x128xf32>
    %cst_294 = arith.constant dense<0.000000e+00> : vector<48x32xf32>
    %971 = tpu.matmul %970, %784, %cst_294 {dimension_numbers = #tpu.dot_dimension_numbers<[1], [0], [0], [1], [0, 0, 1, 1], [], []>} : vector<48x128xf32>, vector<128x32xf32>, vector<48x32xf32> -> vector<48x32xf32>
    %972 = vector.broadcast %793 : vector<1x32xf32> to vector<48x32xf32>
    %973 = arith.addf %971, %972 : vector<48x32xf32>
    %974 = vector.shape_cast %973 : vector<48x32xf32> to vector<2x24x32xf32>
    %975 = arith.addf %929, %974 : vector<2x24x32xf32>
    %cst_295 = arith.constant dense<0.000000e+00> : vector<2x24xf32>
    %976 = vector.multi_reduction <add>, %975, %cst_295 [2] : vector<2x24x32xf32> to vector<2x24xf32>
    %977 = vector.shape_cast %976 : vector<2x24xf32> to vector<2x24x1xf32>
    %cst_296 = arith.constant 3.200000e+01 : f32
    %978 = vector.broadcast %cst_296 : f32 to vector<2x24x1xf32>
    %979 = arith.divf %977, %978 : vector<2x24x1xf32>
    %980 = vector.broadcast %979 : vector<2x24x1xf32> to vector<2x24x32xf32>
    %981 = arith.subf %975, %980 : vector<2x24x32xf32>
    %982 = arith.mulf %981, %981 : vector<2x24x32xf32>
    %cst_297 = arith.constant dense<0.000000e+00> : vector<2x24xf32>
    %983 = vector.multi_reduction <add>, %982, %cst_297 [2] : vector<2x24x32xf32> to vector<2x24xf32>
    %984 = vector.shape_cast %983 : vector<2x24xf32> to vector<2x24x1xf32>
    %cst_298 = arith.constant 3.200000e+01 : f32
    %985 = vector.broadcast %cst_298 : f32 to vector<2x24x1xf32>
    %986 = arith.divf %984, %985 : vector<2x24x1xf32>
    %987 = vector.broadcast %979 : vector<2x24x1xf32> to vector<2x24x32xf32>
    %988 = arith.subf %975, %987 : vector<2x24x32xf32>
    %cst_299 = arith.constant 9.99999974E-6 : f32
    %989 = vector.broadcast %cst_299 : f32 to vector<2x24x1xf32>
    %990 = arith.addf %986, %989 : vector<2x24x1xf32>
    %991 = math.rsqrt %990 : vector<2x24x1xf32>
    %992 = vector.broadcast %991 : vector<2x24x1xf32> to vector<2x24x32xf32>
    %993 = arith.mulf %988, %992 : vector<2x24x32xf32>
    %994 = vector.shape_cast %8 : vector<1x32xf32> to vector<1x1x32xf32>
    %995 = vector.broadcast %994 : vector<1x1x32xf32> to vector<2x24x32xf32>
    %996 = arith.mulf %993, %995 : vector<2x24x32xf32>
    %997 = vector.shape_cast %9 : vector<1x32xf32> to vector<1x1x32xf32>
    %998 = vector.broadcast %997 : vector<1x1x32xf32> to vector<2x24x32xf32>
    %999 = arith.addf %996, %998 : vector<2x24x32xf32>
    %1000 = vector.shape_cast %999 : vector<2x24x32xf32> to vector<48x32xf32>
    %c0_300 = arith.constant 0 : index
    %c0_301 = arith.constant 0 : index
    %1001 = vector.load %arg20[%c0_300, %c0_301] : memref<32x48xf32, #tpu.memory_space<vmem>>, vector<32x48xf32>
    %cst_302 = arith.constant dense<0.000000e+00> : vector<48x48xf32>
    %1002 = tpu.matmul %1000, %1001, %cst_302 {dimension_numbers = #tpu.dot_dimension_numbers<[1], [0], [0], [1], [0, 0, 1, 1], [], []>} : vector<48x32xf32>, vector<32x48xf32>, vector<48x48xf32> -> vector<48x48xf32>
    %c0_303 = arith.constant 0 : index
    %c0_304 = arith.constant 0 : index
    %1003 = vector.load %arg21[%c0_303, %c0_304] : memref<1x48xf32, #tpu.memory_space<vmem>>, vector<1x48xf32>
    %1004 = vector.broadcast %1003 : vector<1x48xf32> to vector<48x48xf32>
    %1005 = arith.addf %1002, %1004 : vector<48x48xf32>
    %1006 = vector.shape_cast %1005 : vector<48x48xf32> to vector<2x24x48xf32>
    %c0_305 = arith.constant 0 : index
    %c0_306 = arith.constant 0 : index
    %c0_307 = arith.constant 0 : index
    %1007 = vector.load %arg22[%c0_305, %c0_306, %c0_307] : memref<2x24x48xf32, #tpu.memory_space<vmem>>, vector<2x24x48xf32>
    tpu.vector_store %arg22[%c0_305, %c0_306, %c0_307], %1006 {strides = array<i32>} : memref<2x24x48xf32, #tpu.memory_space<vmem>>, vector<2x24x48xf32>,
    %c0_308 = arith.constant 0 : index
    %c0_309 = arith.constant 0 : index
    %c0_310 = arith.constant 0 : index
    %1008 = vector.load %arg1[%c0_308, %c0_309, %c0_310] : memref<2x24x48xf32, #tpu.memory_space<vmem>>, vector<2x24x48xf32>
    %1009 = arith.subf %1006, %1008 : vector<2x24x48xf32>
    %1010 = arith.mulf %1009, %1009 : vector<2x24x48xf32>
    %cst_311 = arith.constant dense<0.000000e+00> : vector<2x24xf32>
    %1011 = vector.multi_reduction <add>, %1010, %cst_311 [2] : vector<2x24x48xf32> to vector<2x24xf32>
    %cst_312 = arith.constant 4.800000e+01 : f32
    %1012 = vector.broadcast %cst_312 : f32 to vector<2x24xf32>
    %1013 = arith.divf %1011, %1012 : vector<2x24xf32>
    %1014 = arith.mulf %1013, %524 : vector<2x24xf32>
    %1015 = vector.shape_cast %1014 : vector<2x24xf32> to vector<1x2x24xf32>
    %cst_313 = arith.constant dense<0.000000e+00> : vector<1xf32>
    %1016 = vector.multi_reduction <add>, %1015, %cst_313 [1, 2] : vector<1x2x24xf32> to vector<1xf32>
    %1017 = vector.shape_cast %1016 : vector<1xf32> to vector<1x1x1xf32>
    %1018 = vector.extract %1017[0, 0, 0] : f32 from vector<1x1x1xf32>
    %1019 = vector.broadcast %1018 : f32 to vector<1x1xf32>
    %1020 = vector.shape_cast %524 : vector<2x24xf32> to vector<1x2x24xf32>
    %cst_314 = arith.constant dense<0.000000e+00> : vector<1xf32>
    %1021 = vector.multi_reduction <add>, %1020, %cst_314 [1, 2] : vector<1x2x24xf32> to vector<1xf32>
    %1022 = vector.shape_cast %1021 : vector<1xf32> to vector<1x1x1xf32>
    %1023 = vector.extract %1022[0, 0, 0] : f32 from vector<1x1x1xf32>
    %1024 = vector.broadcast %1023 : f32 to vector<1x1xf32>
    %1025 = arith.divf %1019, %1024 : vector<1x1xf32>
    %c0_315 = arith.constant 0 : index
    %c0_316 = arith.constant 0 : index
    %1026 = vector.load %arg23[%c0_315, %c0_316] : memref<1x1xf32, #tpu.memory_space<vmem>>, vector<1x1xf32>
    tpu.vector_store %arg23[%c0_315, %c0_316], %1025 {strides = array<i32>} : memref<1x1xf32, #tpu.memory_space<vmem>>, vector<1x1xf32>,
    return
  }
}

</mosaic_0001>

<bundles_post_ra>
// kernel: mae_forward.1
= control target key start
LH: loop header
LB: loop body
LE: loop exit
PB: predicated region body
PF: predicated region fallthrough
CT: control target
= control target key end

     0   :  { %s15888_s0 = inlined_call_operand.vmem [shape: f32[2,16,48], index: 0, kind: input, shape index: {}]   ;;  %s15889_s1 = inlined_call_operand.vmem [shape: f32[2,24,48], index: 1, kind: input, shape index: {}]   ;;  %s15890_s2 = inlined_call_operand.vmem [shape: s32[2,8], index: 2, kind: input, shape index: {}]   ;;  %s15891_s3 = inlined_call_operand.vmem [shape: s32[2,24], index: 3, kind: input, shape index: {}]   ;;  %s15892_s4 = inlined_call_operand.vmem [shape: f32[48,32], index: 4, kind: input, shape index: {}]   ;;  %s15893_s5 = inlined_call_operand.vmem [shape: f32[1,16,32], index: 5, kind: input, shape index: {}]   ;;  %s15894_s6 = inlined_call_operand.vmem [shape: f32[4,32], index: 6, kind: input, shape index: {}]   ;;  %s15895_s7 = inlined_call_operand.vmem [shape: f32[2,4,32,32], index: 7, kind: input, shape index: {}]   ;;  %s15896_s8 = inlined_call_operand.vmem [shape: f32[2,9,32], index: 8, kind: input, shape index: {}]   ;;  %s15897_s9 = inlined_call_operand.vmem [shape: f32[2,32,128], index: 9, kind: input, shape index: {}]   ;;  %s15898_s10 = inlined_call_operand.vmem [shape: f32[2,1,128], index: 10, kind: input, shape index: {}]   ;;  %s15899_s11 = inlined_call_operand.vmem [shape: f32[2,128,32], index: 11, kind: input, shape index: {}]   ;;  %s15900_s12 = inlined_call_operand.vmem [shape: f32[32,32], index: 12, kind: input, shape index: {}]   ;;  %s15901_s13 = inlined_call_operand.vmem [shape: f32[4,32], index: 13, kind: input, shape index: {}]   ;;  %s15902_s14 = inlined_call_operand.vmem [shape: f32[1,24,32], index: 14, kind: input, shape index: {}]   ;;  %s15903_s15 = inlined_call_operand.vmem [shape: f32[2,4,32,32], index: 15, kind: input, shape index: {}]   ;;  %s15904_s16 = inlined_call_operand.vmem [shape: f32[2,9,32], index: 16, kind: input, shape index: {}]   ;;  %s15905_s17 = inlined_call_operand.vmem [shape: f32[2,32,128], index: 17, kind: input, shape index: {}]   ;;  %s15906_s18 = inlined_call_operand.vmem [shape: f32[2,1,128], index: 18, kind: input, shape index: {}]   ;;  %s15907_s19 = inlined_call_operand.vmem [shape: f32[2,128,32], index: 19, kind: input, shape index: {}]   ;;  %s15908_s20 = inlined_call_operand.vmem [shape: f32[32,48], index: 20, kind: input, shape index: {}]   ;;  %s15909_s21 = inlined_call_operand.vmem [shape: f32[1,48], index: 21, kind: input, shape index: {}]   ;;  %s15910_s22 = inlined_call_operand.vmem [shape: f32[2,24,48], index: 22, kind: output, shape index: {0}]   ;;  %s15911_s23 = inlined_call_operand.hbm [shape: f32[1,1], index: 23, kind: output, shape index: {1}]  }
   0x1   :  { %15932 = sst [smem:[#allocation12_spill]] %s15888_s0 }
   0x2   :  { %15933 = sst [smem:[#allocation13_spill]] %s15889_s1 }
   0x3   :  { %15934 = sst [smem:[#allocation14_spill]] %s15890_s2 }
   0x4   :  { %15935 = sst [smem:[#allocation15_spill]] %s15891_s3 }
   0x5   :  { %15936 = sst [smem:[#allocation16_spill]] %s15892_s4 }
   0x6   :  { %15937 = sst [smem:[#allocation17_spill]] %s15893_s5 }
   0x7   :  { %15938 = sst [smem:[#allocation18_spill]] %s15894_s6 }
   0x8   :  { %15939 = sst [smem:[#allocation19_spill]] %s15895_s7 }
   0x9   :  { %s15940_s24 = sld [smem:[#allocation16_spill]]  ;;  %vm90_vm0 = vcmask 392192   ;;  %v86_v2 = vlaneseq }
   0xa   :  { %s15941_s27 = sld [smem:[#allocation12_spill]] }
   0xb   :  { %v13225_v5 = vshrl.u32 %v86_v2, 7  ;;  %s15943_s29 = sld [smem:[#allocation14_spill]] }
   0xd   :  { %15942 = vst [vmem:[#allocation5_spill] sm:$0xff] %v13225_v5  ;;  %v13235_v8 = vsub.s32 0, %v13225_v5  ;;  %v13238_v9 = vsub.s32 1, %v13225_v5 }
   0xf   :  { %v85_v0 = vld [vmem:[%s15940_s24 + $0x28] sm:$0xff]  ;;  %v84_v1 = vld [vmem:[%s15940_s24 + $0x20] sm:$0xff]  ;;  %v83_v3 = vld [vmem:[%s15940_s24 + $0x18] sm:$0xff] }
  0x10   :  { %11525 = vmatprep.subr.mxu0 %v85_v0  ;;  %v76_v4 = vld [vmem:[%s15941_s27] sm:$0xff]  ;;  %v82_v7 = vld [vmem:[%s15940_s24 + $0x10] sm:$0xff] }
  0x11   :  { %11526 = vmatpush3.msra.mxu0 %v85_v0  ;;  %11537 = vmatprep.mubr.msk.f32.mxu0 %vm90_vm0, %v76_v4  ;;  %v194_v6 = vld [vmem:[%s15943_s29] sm:$0x3] }
  0x12   :  { %11527 = vmatprep.subr.mxu0 %v84_v1 }
  0x13   :  { %11528 = vmatpush3.msra.mxu0 %v84_v1 }
  0x14   :  { %29 = vsyncpa [#allocation3], 0  ;;  %11529 = vmatprep.subr.mxu0 %v83_v3  ;;  %v81_v10 = vld [vmem:[%s15940_s24 + $0x8] sm:$0xff]  ;;  %v200_v11 = vrot.slane %v194_v6, %v13235_v8  ;;  %v80_v12 = vld [vmem:[%s15940_s24] sm:$0xff]  ;;  %v207_v13 = vrot.slane %v194_v6, %v13238_v9  ;;  %v15918_v17 = vmov 0.0   ;;  %vm13089_vm1 = vmmov 0  }
  0x15   :  { %11530 = vmatpush3.msra.mxu0 %v83_v3  ;;  %v77_v14 = vld [vmem:[%s15941_s27 + $0x8] sm:$0xff]  ;;  %v78_v15 = vld [vmem:[%s15941_s27 + $0x10] sm:$0xff]  ;;  %v79_v16 = vld [vmem:[%s15941_s27 + $0x18] sm:$0xff]  ;;  %11543 = vmatprep.subr.mxu1 %v15918_v17  ;;  %s15944_s3 = sld [smem:[#allocation18_spill]]  ;;  %v13267_v21 = vand.u32 127, %v86_v2  ;;  %vm224_vm3 = vcmask 130048  }
  0x16   :  { %11531 = vmatprep.subr.mxu0 %v82_v7  ;;  %202 = vbcast.lane.b32.xlu0 %v200_v11, 256  ;;  %s15946_s4 = sld [smem:[#allocation17_spill]]  ;;  %vm217_vm5 = vcmp.eq.s32.totalorder %v13225_v5, 0  ;;  %vm428_vm6 = vcmask 261120   ;;  %vm869_vm12 = vcmask 64512  }
  0x17   :  { %11532 = vmatpush3.msra.mxu0 %v82_v7  ;;  %11547 = vmatprep.mubr.msk.f32.mxu1 %vm13089_vm1, %v15918_v17  ;;  %15945 = vst [vmem:[#allocation6_spill] sm:$0xff] %v13267_v21  ;;  %v218_v40 = vsel %vm217_vm5, 1.0, %v15918_v17  ;;  %s15947_s26 = sld [smem:[#allocation19_spill]]  ;;  %vm377_vm7 = vcmp.ge.s32.totalorder %v13267_v21, 8  ;;  %vm378_vm8 = vcmp.lt.s32.totalorder %v13267_v21, 16  ;;  %vm374_vm9 = vcmp.lt.s32.totalorder %v13267_v21, 8 }
  0x18   :  { %11533 = vmatprep.subr.mxu0 %v81_v10  ;;  %vm379_vm10 = vmand %vm377_vm7, %vm378_vm8  ;;  %vm371_vm11 = vcmp.lt.s32.totalorder %v13267_v21, 5  ;;  %vm381_vm13 = vcmp.ge.s32.totalorder %v13267_v21, 16  ;;  %vm382_vm14 = vcmp.lt.s32.totalorder %v13267_v21, 24  ;;  %s15950_s5 = sld [smem:[#allocation15_spill]] }
  0x19   :  { %11534 = vmatpush3.msra.mxu0 %v81_v10  ;;  %vm383_vm15 = vmand %vm381_vm13, %vm382_vm14  ;;  %vm5322_vm14 = vcmask 195584   ;;  %s15959_s24 = sld [smem:[#allocation13_spill]] }
  0x1a   :  { %11535 = vmatprep.subr.mxu0 %v80_v12  ;;  %209 = vbcast.lane.b32.xlu0 %v207_v13, 256 }
  0x1b   :  { %11536 = vmatpush3.msra.mxu0 %v80_v12  ;;  %v74_v18 = vld [vmem:[%s15944_s3] sm:$0xf] }
  0x1c   :  { %11538 = vmatmul.mubr.msk.f32.vlgmr.msra.gmra.mxu0 %vm90_vm0, %v77_v14  ;;  %v89_v19 = vrot.slane %v74_v18, %v13235_v8  ;;  %v189_v23 = vld [vmem:[%s15946_s4 + $0x8] sm:$0xff]  ;;  %v188_v26 = vld [vmem:[%s15946_s4] sm:$0xff]  ;;  %v222_v39 = vrot.slane %v74_v18, %v13238_v9 }
  0x1d   :  { %11540 = vmatprep.mubr.msk.f32.mxu0 %vm90_vm0, %v78_v15  ;;  %v392_v60 = vld [vmem:[%s15947_s26 + $0x18] sm:$0xff]  ;;  %v391_v62 = vld [vmem:[%s15947_s26 + $0x10] sm:$0xff]  ;;  %v390_v0 = vld [vmem:[%s15947_s26 + $0x8] sm:$0xff] }
  0x1e   :  { %v223_v41 = vmul.f32 %v222_v39, %v218_v40  ;;  %v396_v61 = vld [vmem:[%s15947_s26 + $0x38] sm:$0xff]  ;;  %v395_v63 = vld [vmem:[%s15947_s26 + $0x30] sm:$0xff]  ;;  %v394_v1 = vld [vmem:[%s15947_s26 + $0x28] sm:$0xff]  ;;  %v13374_v40 = vsub.s32 4, %v13225_v5 }
  0x1f   :  { %11568 = vmatprep.subr.mxu0 %v396_v61  ;;  %v389_v2 = vld [vmem:[%s15947_s26] sm:$0xff]  ;;  %v400_v4 = vld [vmem:[%s15947_s26 + $0x58] sm:$0xff] }
  0x20   :  { %11541 = vmatmul.mubr.msk.f32.gmra.mxu0 %vm90_vm0, %v79_v16  ;;  %v393_v3 = vld [vmem:[%s15947_s26 + $0x20] sm:$0xff]  ;;  %15948 = vst [vmem:[#allocation7_spill] sm:$0xff] %v13374_v40 }
  0x21   :  { %11569 = vmatpush3.msra.mxu0 %v396_v61  ;;  %v13330_v14 = vld [vmem:[%s15896_s8] sm:$0xff] }
  0x22   :  { %11570 = vmatprep.subr.mxu0 %v395_v63  ;;  %v459_v15 = vrot.slane %v13330_v14, %v13235_v8 }
  0x23   :  { %11571 = vmatpush3.msra.mxu0 %v395_v63 }
  0x24   :  { %11572 = vmatprep.subr.mxu0 %v394_v1 }
  0x25   :  { %11573 = vmatpush3.msra.mxu0 %v394_v1 }
  0x26   :  { %11574 = vmatprep.subr.mxu0 %v393_v3 }
  0x27   :  { %11575 = vmatpush3.msra.mxu0 %v393_v3 }
  0x28   :  { %11590 = vmatprep.subr.mxu0 %v15918_v17 }
  0x88   :  { %v203_v20 = vpop.permute.xlu0 %202 }
  0x89   :  { %vm211_vm2 = vcmp.eq.s32.totalorder %v13267_v21, %v203_v20 }
  0x8a   :  { %v213_v33 = vsel %vm211_vm2, 1.0, %v15918_v17  ;;  %vm385_vm2 = vcmp.ge.s32.totalorder %v13267_v21, 24 }
  0x8c   :  { %v210_v29 = vpop.permute.xlu0 %209 }
  0x8d   :  { %vm212_vm4 = vcmp.eq.s32.totalorder %v13267_v21, %v210_v29  ;;  %v397_v29 = vld [vmem:[%s15947_s26 + $0x40] sm:$0xff] }
  0x8e   :  { %v214_v38 = vsel %vm212_vm4, 1.0, %v15918_v17 }
  0xdc   :  { %v11539_v22 = vpop.f32.mrf.mxu0 }
  0xdd   :  { %v175_v24 = vadd.f32 %v11539_v22, %v89_v19 }
  0xde   :  { %v169_v25 = vpop.f32.mrf.mxu0 }
  0xdf   :  { %v170_v27 = vadd.f32 %v169_v25, %v89_v19  ;;  %v191_v28 = vadd.f32 %v189_v23, %v175_v24 }
  0xe0   :  { %v11542_v30 = vpop.f32.mrf.mxu0 }
  0xe1   :  { %v190_v31 = vadd.f32 %v188_v26, %v170_v27  ;;  %v185_v32 = vadd.f32 %v11542_v30, %v89_v19  ;;  %11544 = vmatpush3.msra.mxu1 %v191_v28  ;;  %v399_v27 = vld [vmem:[%s15947_s26 + $0x50] sm:$0xff]  ;;  %v398_v28 = vld [vmem:[%s15947_s26 + $0x48] sm:$0xff]  ;;  %v13357_v30 = vsub.s32 2, %v13225_v5 }
  0xe2   :  { %v179_v34 = vpop.f32.mrf.mxu0  ;;  %11545 = vmatprep.subr.mxu1 %v15918_v17 }
  0xe3   :  { %v193_v35 = vadd.f32 %v189_v23, %v185_v32  ;;  %v180_v36 = vadd.f32 %v179_v34, %v89_v19  ;;  %11546 = vmatpush3.msra.mxu1 %v190_v31  ;;  %v465_v19 = vrot.slane %v13330_v14, %v13238_v9  ;;  %v13360_v31 = vsub.s32 3, %v13225_v5 }
  0xe4   :  { %11548 = vmatmul.mubr.msk.f32.vlgmr.msra.gmra.mxu1 %vm224_vm3, %v213_v33  ;;  %11550 = vmatprep.subr.mxu1 %v15918_v17  ;;  %v471_v34 = vrot.slane %v13330_v14, %v13357_v30 }
  0xe5   :  { %v192_v37 = vadd.f32 %v188_v26, %v180_v36  ;;  %11551 = vmatpush3.msra.mxu1 %v193_v35  ;;  %11554 = vmatprep.mubr.msk.f32.mxu1 %vm13089_vm1, %v15918_v17  ;;  %v556_v35 = vrot.slane %v13330_v14, %v13360_v31 }
  0xe6   :  { %11552 = vmatprep.subr.mxu1 %v15918_v17 }
  0xe7   :  { %11553 = vmatpush3.msra.mxu1 %v192_v37 }
  0xe8   :  { %11555 = vmatmul.mubr.msk.f32.vlgmr.msra.gmra.mxu1 %vm224_vm3, %v214_v38  ;;  %11557 = vmatprep.subr.mxu1 %v392_v60  ;;  %vm386_vm3 = vcmp.lt.s32.totalorder %v13267_v21, 32 }
  0xe9   :  { %11558 = vmatpush3.msra.mxu1 %v392_v60  ;;  %v13090_v60 = vmov -1e+30   ;;  %vm387_vm4 = vmand %vm385_vm2, %vm386_vm3  ;;  %vm10590_vm2 = vcmask 0  }
  0xea   :  { %11559 = vmatprep.subr.mxu1 %v391_v62  ;;  %v13432_v61 = vsel %vm371_vm11, 0.0, %v13090_v60 }
  0xeb   :  { %11560 = vmatpush3.msra.mxu1 %v391_v62 }
  0xec   :  { %11561 = vmatprep.subr.mxu1 %v390_v0 }
  0xed   :  { %11562 = vmatpush3.msra.mxu1 %v390_v0 }
  0xee   :  { %11563 = vmatprep.subr.mxu1 %v389_v2 }
  0xef   :  { %11564 = vmatpush3.msra.mxu1 %v389_v2 }
  0xf0   :  { %11579 = vmatprep.subr.mxu1 %v400_v4 }
 0x1a4   :  { %v294_v42 = vpop.f32.mrf.mxu1 }
 0x1a5   :  { %v13287_v43 = vadd.f32 %v294_v42, %v223_v41  ;;  %v13380_v42 = vsel %vm379_vm10, 1.0, %v15918_v17 }
 0x1a6   :  { %v11549_v44 = vpop.f32.mrf.mxu1  ;;  %15949 = vst [vmem:[#allocation8_spill] sm:$0xff] %v13380_v42 }
 0x1a7   :  { %v429_v45 = vsel %vm428_vm6, %v13287_v43, 0.0 }
 0x1a8   :  { %430 = vadd.xlane.f32.xlu1 %v429_v45  ;;  %v367_v46 = vpop.f32.mrf.mxu1 }
 0x1a9   :  { %v13291_v47 = vadd.f32 %v367_v46, %v223_v41  ;;  %v13377_v41 = vsel %vm374_vm9, 1.0, %v15918_v17 }
 0x1aa   :  { %v11556_v48 = vpop.f32.mrf.mxu1 }
 0x1ab   :  { %v432_v49 = vsel %vm428_vm6, %v13291_v47, 0.0 }
 0x1ac   :  { %433 = vadd.xlane.f32.xlu1 %v432_v49  ;;  %v635_v49 = vrot.slane %v13330_v14, %v13374_v40 }
 0x231   :  { %v431_v50 = vpop.xlane.xlu1 %430 }
 0x232   :  { %v436_v51 = vmul.f32 0.03125, %v431_v50 }
 0x234   :  { %v438_v52 = vsub.f32 %v13287_v43, %v436_v51 }
 0x235   :  { %v434_v53 = vpop.xlane.xlu1 %433 }
 0x236   :  { %v437_v54 = vmul.f32 0.03125, %v434_v53  ;;  %v440_v55 = vmul.f32 %v438_v52, %v438_v52 }
 0x238   :  { %v439_v56 = vsub.f32 %v13291_v47, %v437_v54  ;;  %v442_v57 = vsel %vm428_vm6, %v440_v55, 0.0 }
 0x239   :  { %443 = vadd.xlane.f32.xlu0 %v442_v57 }
 0x23a   :  { %v441_v58 = vmul.f32 %v439_v56, %v439_v56 }
 0x23c   :  { %v445_v59 = vsel %vm428_vm6, %v441_v58, 0.0 }
 0x23d   :  { %446 = vadd.xlane.f32.xlu1 %v445_v59 }
 0x2c2   :  { %v444_v6 = vpop.xlane.xlu0 %443 }
 0x2c3   :  { %v448_v7 = vmul.f32 0.03125, %v444_v6 }
 0x2c5   :  { %v450_v10 = vadd.f32 1e-05, %v448_v7 }
 0x2c6   :  { %v447_v11 = vpop.xlane.xlu1 %446 }
 0x2c7   :  { %12692 = vrsqrt.f32 %v450_v10  ;;  %v449_v12 = vmul.f32 0.03125, %v447_v11 }
 0x2c9   :  { %v451_v13 = vadd.f32 1e-05, %v449_v12 }
 0x2cb   :  { %12694 = vrsqrt.f32 %v451_v13 }
 0x2d4   :  { %v12693_v16 = vpop.eup %12692 }
 0x2d5   :  { %v454_v18 = vmul.f32 %v12693_v16, %v438_v52 }
 0x2d7   :  { %v460_v20 = vmul.f32 %v459_v15, %v454_v18 }
 0x2d8   :  { %v12695_v22 = vpop.eup %12694 }
 0x2d9   :  { %v455_v23 = vmul.f32 %v12695_v22, %v439_v56  ;;  %v466_v24 = vadd.f32 %v465_v19, %v460_v20 }
 0x2db   :  { %v461_v25 = vmul.f32 %v459_v15, %v455_v23  ;;  %11565 = vmatprep.mubr.msk.f32.mxu1 %vm428_vm6, %v466_v24  ;;  %11576 = vmatprep.mubr.msk.f32.mxu0 %vm428_vm6, %v466_v24 }
 0x2dd   :  { %v467_v26 = vadd.f32 %v465_v19, %v461_v25 }
 0x2df   :  { %11566 = vmatmul.mubr.msk.f32.vlgmr.msra.gmra.mxu1 %vm428_vm6, %v467_v26  ;;  %11577 = vmatmul.mubr.msk.f32.vlgmr.msra.gmra.mxu0 %vm428_vm6, %v467_v26 }
 0x2e0   :  { %11580 = vmatpush3.msra.mxu1 %v400_v4  ;;  %11587 = vmatprep.mubr.msk.f32.mxu1 %vm428_vm6, %v466_v24 }
 0x2e1   :  { %11581 = vmatprep.subr.mxu1 %v399_v27  ;;  %11592 = vmatprep.mubr.msk.f32.mxu0 %vm13089_vm1, %v15918_v17 }
 0x2e2   :  { %11582 = vmatpush3.msra.mxu1 %v399_v27 }
 0x2e3   :  { %11583 = vmatprep.subr.mxu1 %v398_v28 }
 0x2e4   :  { %11584 = vmatpush3.msra.mxu1 %v398_v28 }
 0x2e5   :  { %11585 = vmatprep.subr.mxu1 %v397_v29 }
 0x2e6   :  { %11586 = vmatpush3.msra.mxu1 %v397_v29 }
 0x2e7   :  { %11588 = vmatmul.mubr.msk.f32.vlgmr.msra.gmra.mxu1 %vm428_vm6, %v467_v26  ;;  %11600 = vmatprep.subr.mxu1 %v15918_v17 }
 0x2e8   :  { %11602 = vmatprep.mubr.msk.f32.mxu1 %vm13089_vm1, %v15918_v17 }
 0x39f   :  { %v11567_v32 = vpop.f32.mrf.mxu1  ;;  %v11578_v33 = vpop.f32.mrf.mxu0 }
 0x3a0   :  { %v13388_v46 = vadd.f32 %v11567_v32, %v471_v34  ;;  %v13393_v48 = vadd.f32 %v11578_v33, %v556_v35 }
 0x3a1   :  { %v544_v36 = vpop.f32.mrf.mxu1  ;;  %v623_v37 = vpop.f32.mrf.mxu0 }
 0x3a2   :  { %v13369_v38 = vadd.f32 %v544_v36, %v471_v34  ;;  %v13371_v39 = vadd.f32 %v623_v37, %v556_v35  ;;  %v712_v52 = vmul.f32 %v13388_v46, %v13377_v41  ;;  %v895_v56 = vmul.f32 %v13388_v46, %v13380_v42 }
 0x3a4   :  { %v711_v44 = vmul.f32 %v13369_v38, %v13377_v41  ;;  %v894_v45 = vmul.f32 %v13369_v38, %v13380_v42  ;;  %11591 = vmatpush3.xpose.msk.msra.mxu0 %vm428_vm6, %v13371_v39  ;;  %11601 = vmatpush3.xpose.msk.msra.mxu1 %vm428_vm6, %v13371_v39 }
 0x3a5   :  { %11595 = vmatprep.subr.mxu0 %v15918_v17  ;;  %11610 = vmatprep.subr.mxu1 %v15918_v17 }
 0x3a7   :  { %v11589_v50 = vpop.f32.mrf.mxu1  ;;  %11593 = vmatmul.mubr.msk.f32.vlgmr.msra.gmra.mxu0 %vm428_vm6, %v711_v44  ;;  %11603 = vmatmul.mubr.msk.f32.vlgmr.msra.gmra.mxu1 %vm428_vm6, %v894_v45 }
 0x3a8   :  { %11596 = vmatpush3.xpose.msk.msra.mxu0 %vm428_vm6, %v13393_v48  ;;  %11597 = vmatprep.mubr.msk.f32.mxu0 %vm13089_vm1, %v15918_v17  ;;  %v13409_v54 = vadd.f32 %v11589_v50, %v635_v49 }
 0x3a9   :  { %v702_v51 = vpop.f32.mrf.mxu1  ;;  %11605 = vmatprep.subr.mxu0 %v15918_v17  ;;  %11612 = vmatprep.mubr.msk.f32.mxu1 %vm13089_vm1, %v15918_v17 }
 0x3aa   :  { %v13404_v53 = vadd.f32 %v702_v51, %v635_v49  ;;  %v1069_v57 = vmul.f32 %v13409_v54, %v13380_v42 }
 0x3ab   :  { %11598 = vmatmul.mubr.msk.f32.vlgmr.msra.gmra.mxu0 %vm428_vm6, %v712_v52 }
 0x3ac   :  { %v1068_v55 = vmul.f32 %v13404_v53, %v13380_v42  ;;  %11606 = vmatpush3.xpose.msk.msra.mxu0 %vm428_vm6, %v13393_v48  ;;  %11607 = vmatprep.mubr.msk.f32.mxu0 %vm13089_vm1, %v15918_v17 }
 0x3ad   :  { %11615 = vmatprep.subr.mxu0 %v15918_v17 }
 0x3ae   :  { %11611 = vmatpush3.msra.mxu1 %v1068_v55 }
 0x3af   :  { %11620 = vmatprep.subr.mxu1 %v15918_v17  ;;  %11608 = vmatmul.mubr.msk.f32.vlgmr.msra.gmra.mxu0 %vm428_vm6, %v895_v56 }
 0x3b0   :  { %11616 = vmatpush3.msra.mxu0 %v1069_v57  ;;  %11617 = vmatprep.mubr.msk.f32.mxu0 %vm13089_vm1, %v15918_v17 }
 0x3b1   :  { %11625 = vmatprep.subr.mxu0 %v15918_v17 }
 0x467   :  { %v785_v58 = vpop.f32.mrf.mxu0  ;;  %v965_v59 = vpop.f32.mrf.mxu1 }
 0x468   :  { %v865_v62 = vmul.f32 0.35355338, %v785_v58  ;;  %v1042_v63 = vmul.f32 0.35355338, %v965_v59 }
 0x469   :  { %v11594_v0 = vpop.f32.mrf.mxu0  ;;  %v11604_v1 = vpop.f32.mrf.mxu1 }
 0x46a   :  { %v1044_v3 = vadd.f32 %v1042_v63, %v13432_v61  ;;  %v867_v7 = vadd.f32 %v865_v62, %v13432_v61  ;;  %v892_v63 = vmul.f32 %v13404_v53, %v13377_v41 }
 0x46b   :  { %v861_v2 = vpop.f32.mrf.mxu0 }
 0x46c   :  { %v1046_v4 = vsel %vm869_vm12, %v1044_v3, -inf  ;;  %v866_v12 = vmul.f32 0.35355338, %v861_v2  ;;  %v870_v13 = vsel %vm869_vm12, %v867_v7, -inf  ;;  %v893_v2 = vmul.f32 %v13409_v54, %v13377_v41 }
 0x46d   :  { %v11599_v6 = vpop.f32.mrf.mxu0  ;;  %1047 = vmax.xlane.f32.xlu1 %v1046_v4 }
 0x46e   :  { %v868_v19 = vadd.f32 %v866_v12, %v13432_v61 }
 0x46f   :  { %v1038_v10 = vpop.f32.mrf.mxu0 }
 0x470   :  { %v1043_v11 = vmul.f32 0.35355338, %v1038_v10  ;;  %v873_v20 = vsel %vm869_vm12, %v868_v19, -inf }
 0x471   :  { %v11609_v15 = vpop.f32.mrf.mxu0  ;;  %871 = vmax.xlane.f32.xlu1 %v870_v13 }
 0x472   :  { %v1045_v16 = vadd.f32 %v1043_v11, %v13432_v61 }
 0x474   :  { %v1049_v18 = vsel %vm869_vm12, %v1045_v16, -inf }
 0x475   :  { %1050 = vmax.xlane.f32.xlu1 %v1049_v18 }
 0x479   :  { %874 = vmax.xlane.f32.xlu1 %v873_v20 }
 0x4f6   :  { %v1048_v22 = vpop.xlane.xlu1 %1047 }
 0x4f7   :  { %v1052_v23 = vsub.f32 %v1044_v3, %v1048_v22 }
 0x4f9   :  { %v1054_v24 = vmul.f32 1.442695, %v1052_v23 }
 0x4fa   :  { %v872_v25 = vpop.xlane.xlu1 %871 }
 0x4fb   :  { %12696 = vpow2.f32 %v1054_v24  ;;  %v876_v26 = vsub.f32 %v867_v7, %v872_v25  ;;  %v13461_v7 = vsel %vm383_vm15, 1.0, %v15918_v17  ;;  %vm10562_vm15 = vcmask 1041409  }
 0x4fc   :  { %v1363_v11 = vmul.f32 %v13388_v46, %v13461_v7  ;;  %v1362_v12 = vmul.f32 %v13369_v38, %v13461_v7  ;;  %v1537_v13 = vmul.f32 %v13409_v54, %v13461_v7  ;;  %v1536_v15 = vmul.f32 %v13404_v53, %v13461_v7 }
 0x4fd   :  { %v878_v29 = vmul.f32 1.442695, %v876_v26 }
 0x4fe   :  { %v1051_v27 = vpop.xlane.xlu1 %1050 }
 0x4ff   :  { %v1053_v28 = vsub.f32 %v1045_v16, %v1051_v27 }
 0x501   :  { %v1056_v32 = vmul.f32 1.442695, %v1053_v28 }
 0x502   :  { %v875_v33 = vpop.xlane.xlu1 %874 }
 0x503   :  { %12698 = vpow2.f32 %v1056_v32  ;;  %v877_v34 = vsub.f32 %v868_v19, %v875_v33 }
 0x504   :  { %12700 = vpow2.f32 %v878_v29 }
 0x505   :  { %v880_v35 = vmul.f32 1.442695, %v877_v34 }
 0x507   :  { %12702 = vpow2.f32 %v880_v35 }
 0x508   :  { %v12697_v36 = vpop.eup %12696 }
 0x509   :  { %v1058_v37 = vsel %vm869_vm12, %v12697_v36, 0.0 }
 0x50a   :  { %1059 = vadd.xlane.f32.xlu1 %v1058_v37 }
 0x510   :  { %v12699_v44 = vpop.eup %12698 }
 0x511   :  { %v1061_v45 = vsel %vm869_vm12, %v12699_v44, 0.0  ;;  %v12701_v49 = vpop.eup %12700 }
 0x512   :  { %1062 = vadd.xlane.f32.xlu1 %v1061_v45  ;;  %v882_v51 = vsel %vm869_vm12, %v12701_v49, 0.0 }
 0x514   :  { %v12703_v50 = vpop.eup %12702 }
 0x515   :  { %v885_v52 = vsel %vm869_vm12, %v12703_v50, 0.0 }
 0x516   :  { %883 = vadd.xlane.f32.xlu1 %v882_v51  ;;  %886 = vadd.xlane.f32.xlu0 %v885_v52 }
 0x593   :  { %v1060_v55 = vpop.xlane.xlu1 %1059 }
 0x594   :  { %12704 = vrcp.f32 %v1060_v55 }
 0x59b   :  { %v1063_v56 = vpop.xlane.xlu1 %1062 }
 0x59c   :  { %12706 = vrcp.f32 %v1063_v56 }
 0x59f   :  { %v887_v57 = vpop.xlane.xlu0 %886  ;;  %v884_v58 = vpop.xlane.xlu1 %883 }
 0x5a0   :  { %12708 = vrcp.f32 %v887_v57 }
 0x5a1   :  { %v12705_v59 = vpop.eup %12704  ;;  %12710 = vrcp.f32 %v884_v58 }
 0x5a2   :  { %v1066_v62 = vmul.f32 %v12705_v59, %v12697_v36 }
 0x5a4   :  { %11613 = vmatmul.mubr.msk.f32.vlgmr.msra.gmra.mxu1 %vm869_vm12, %v1066_v62 }
 0x5a5   :  { %11621 = vmatpush3.msra.mxu1 %v892_v63  ;;  %11622 = vmatprep.mubr.msk.f32.mxu1 %vm13089_vm1, %v15918_v17 }
 0x5a6   :  { %11630 = vmatprep.subr.mxu1 %v15918_v17 }
 0x5a9   :  { %v12707_v0 = vpop.eup %12706 }
 0x5aa   :  { %v1067_v1 = vmul.f32 %v12707_v0, %v12699_v44 }
 0x5ac   :  { %11618 = vmatmul.mubr.msk.f32.vlgmr.msra.gmra.mxu0 %vm869_vm12, %v1067_v1 }
 0x5ad   :  { %v12709_v3 = vpop.eup %12708  ;;  %11626 = vmatpush3.msra.mxu0 %v893_v2  ;;  %11627 = vmatprep.mubr.msk.f32.mxu0 %vm13089_vm1, %v15918_v17 }
 0x5ae   :  { %v12711_v4 = vpop.eup %12710  ;;  %11635 = vmatprep.subr.mxu0 %v15918_v17  ;;  %v891_v6 = vmul.f32 %v12709_v3, %v12703_v50 }
 0x5af   :  { %v890_v10 = vmul.f32 %v12711_v4, %v12701_v49  ;;  %v13500_v4 = vsel %vm387_vm4, 1.0, %v15918_v17 }
 0x5b0   :  { %11628 = vmatmul.mubr.msk.f32.vlgmr.msra.gmra.mxu0 %vm869_vm12, %v891_v6 }
 0x5b1   :  { %11623 = vmatmul.mubr.msk.f32.vlgmr.msra.gmra.mxu1 %vm869_vm12, %v890_v10  ;;  %11636 = vmatpush3.xpose.msk.msra.mxu0 %vm428_vm6, %v13393_v48  ;;  %v1687_v10 = vmul.f32 %v13388_v46, %v13500_v4 }
 0x5b2   :  { %11631 = vmatpush3.xpose.msk.msra.mxu1 %vm428_vm6, %v13371_v39  ;;  %11632 = vmatprep.mubr.msk.f32.mxu1 %vm13089_vm1, %v15918_v17 }
 0x5b3   :  { %11637 = vmatprep.mubr.msk.f32.mxu0 %vm13089_vm1, %v15918_v17  ;;  %11640 = vmatprep.subr.mxu1 %v15918_v17 }
 0x5b4   :  { %11645 = vmatprep.subr.mxu0 %v15918_v17  ;;  %11638 = vmatmul.mubr.msk.f32.vlgmr.msra.gmra.mxu0 %vm428_vm6, %v1363_v11  ;;  %v1686_v11 = vmul.f32 %v13369_v38, %v13500_v4 }
 0x5b5   :  { %11633 = vmatmul.mubr.msk.f32.vlgmr.msra.gmra.mxu1 %vm428_vm6, %v1362_v12  ;;  %11646 = vmatpush3.msra.mxu0 %v1537_v13 }
 0x5b6   :  { %11641 = vmatpush3.msra.mxu1 %v1536_v15  ;;  %11642 = vmatprep.mubr.msk.f32.mxu1 %vm13089_vm1, %v15918_v17 }
 0x5b7   :  { %11647 = vmatprep.mubr.msk.f32.mxu0 %vm13089_vm1, %v15918_v17  ;;  %11650 = vmatprep.subr.mxu1 %v15918_v17 }
 0x5b8   :  { %11655 = vmatprep.subr.mxu0 %v15918_v17 }
 0x664   :  { %v1139_v16 = vpop.f32.mrf.mxu1 }
 0x666   :  { %v11614_v18 = vpop.f32.mrf.mxu1 }
 0x66c   :  { %v1212_v19 = vpop.f32.mrf.mxu0 }
 0x66e   :  { %v11619_v20 = vpop.f32.mrf.mxu0 }
 0x670   :  { %v1358_v22 = vpop.f32.mrf.mxu0 }
 0x671   :  { %v1285_v23 = vpop.f32.mrf.mxu1  ;;  %v1359_v24 = vadd.f32 %v1358_v22, %v1212_v19 }
 0x672   :  { %v1286_v25 = vadd.f32 %v1285_v23, %v1139_v16  ;;  %v11629_v26 = vpop.f32.mrf.mxu0 }
 0x673   :  { %v11624_v27 = vpop.f32.mrf.mxu1 }
 0x674   :  { %v1506_v28 = vpop.f32.mrf.mxu0 }
 0x675   :  { %v1433_v29 = vpop.f32.mrf.mxu1  ;;  %v1511_v32 = vmul.f32 0.35355338, %v1506_v28 }
 0x676   :  { %v1510_v33 = vmul.f32 0.35355338, %v1433_v29  ;;  %v11639_v34 = vpop.f32.mrf.mxu0 }
 0x677   :  { %v11634_v35 = vpop.f32.mrf.mxu1  ;;  %v1513_v36 = vadd.f32 %v1511_v32, %v13432_v61 }
 0x678   :  { %v1512_v37 = vadd.f32 %v1510_v33, %v13432_v61 }
 0x679   :  { %v1517_v44 = vsel %vm869_vm12, %v1513_v36, -inf }
 0x67a   :  { %v1514_v45 = vsel %vm869_vm12, %v1512_v37, -inf  ;;  %1518 = vmax.xlane.f32.xlu0 %v1517_v44 }
 0x67b   :  { %1515 = vmax.xlane.f32.xlu1 %v1514_v45  ;;  %v404_v45 = vld [vmem:[%s15947_s26 + $0x78] sm:$0xff] }
 0x703   :  { %v1519_v49 = vpop.xlane.xlu0 %1518 }
 0x704   :  { %v1516_v50 = vpop.xlane.xlu1 %1515  ;;  %v1521_v51 = vsub.f32 %v1513_v36, %v1519_v49 }
 0x705   :  { %v1520_v52 = vsub.f32 %v1512_v37, %v1516_v50 }
 0x706   :  { %v1524_v55 = vmul.f32 1.442695, %v1521_v51 }
 0x707   :  { %v1522_v56 = vmul.f32 1.442695, %v1520_v52 }
 0x708   :  { %12712 = vpow2.f32 %v1524_v55 }
 0x709   :  { %12714 = vpow2.f32 %v1522_v56 }
 0x715   :  { %v12713_v57 = vpop.eup %12712 }
 0x716   :  { %v12715_v58 = vpop.eup %12714  ;;  %v1529_v59 = vsel %vm869_vm12, %v12713_v57, 0.0 }
 0x717   :  { %v1526_v62 = vsel %vm869_vm12, %v12715_v58, 0.0  ;;  %1530 = vadd.xlane.f32.xlu0 %v1529_v59  ;;  %v401_v59 = vld [vmem:[%s15947_s26 + $0x60] sm:$0xff] }
 0x718   :  { %1527 = vadd.xlane.f32.xlu1 %v1526_v62 }
 0x7a0   :  { %v1531_v63 = vpop.xlane.xlu0 %1530 }
 0x7a1   :  { %v1528_v0 = vpop.xlane.xlu1 %1527  ;;  %12716 = vrcp.f32 %v1531_v63 }
 0x7a2   :  { %12718 = vrcp.f32 %v1528_v0 }
 0x7ae   :  { %v12717_v1 = vpop.eup %12716 }
 0x7af   :  { %v12719_v2 = vpop.eup %12718  ;;  %v1535_v3 = vmul.f32 %v12717_v1, %v12713_v57  ;;  %v403_v57 = vld [vmem:[%s15947_s26 + $0x70] sm:$0xff] }
 0x7b0   :  { %v1534_v6 = vmul.f32 %v12719_v2, %v12715_v58  ;;  %v402_v58 = vld [vmem:[%s15947_s26 + $0x68] sm:$0xff] }
 0x7b1   :  { %11648 = vmatmul.mubr.msk.f32.vlgmr.msra.gmra.mxu0 %vm869_vm12, %v1535_v3 }
 0x7b2   :  { %11643 = vmatmul.mubr.msk.f32.vlgmr.msra.gmra.mxu1 %vm869_vm12, %v1534_v6  ;;  %11656 = vmatpush3.xpose.msk.msra.mxu0 %vm428_vm6, %v13393_v48  ;;  %v1861_v48 = vmul.f32 %v13409_v54, %v13500_v4  ;;  %v13551_v6 = vsub.s32 5, %v13225_v5 }
 0x7b3   :  { %11651 = vmatpush3.xpose.msk.msra.mxu1 %vm428_vm6, %v13371_v39  ;;  %11652 = vmatprep.mubr.msk.f32.mxu1 %vm13089_vm1, %v15918_v17  ;;  %v1860_v39 = vmul.f32 %v13404_v53, %v13500_v4 }
 0x7b4   :  { %11657 = vmatprep.mubr.msk.f32.mxu0 %vm13089_vm1, %v15918_v17  ;;  %11660 = vmatprep.subr.mxu1 %v15918_v17 }
 0x7b5   :  { %11665 = vmatprep.subr.mxu0 %v15918_v17  ;;  %11658 = vmatmul.mubr.msk.f32.vlgmr.msra.gmra.mxu0 %vm428_vm6, %v1687_v10  ;;  %v2013_v10 = vrot.slane %v13330_v14, %v13551_v6 }
 0x7b6   :  { %11653 = vmatmul.mubr.msk.f32.vlgmr.msra.gmra.mxu1 %vm428_vm6, %v1686_v11  ;;  %11666 = vmatpush3.msra.mxu0 %v1861_v48 }
 0x7b7   :  { %11661 = vmatpush3.msra.mxu1 %v1860_v39  ;;  %11662 = vmatprep.mubr.msk.f32.mxu1 %vm13089_vm1, %v15918_v17 }
 0x7b8   :  { %11667 = vmatprep.mubr.msk.f32.mxu0 %vm13089_vm1, %v15918_v17  ;;  %11670 = vmatprep.subr.mxu1 %v404_v45 }
 0x871   :  { %v1680_v38 = vpop.f32.mrf.mxu0 }
 0x872   :  { %v1607_v46 = vpop.f32.mrf.mxu1  ;;  %v1685_v54 = vadd.f32 %v1680_v38, %v1359_v24 }
 0x873   :  { %v1684_v12 = vadd.f32 %v1607_v46, %v1286_v25  ;;  %v11649_v13 = vpop.f32.mrf.mxu0 }
 0x874   :  { %v11644_v15 = vpop.f32.mrf.mxu1 }
 0x875   :  { %v1830_v16 = vpop.f32.mrf.mxu0 }
 0x876   :  { %v1757_v18 = vpop.f32.mrf.mxu1  ;;  %v1835_v19 = vmul.f32 0.35355338, %v1830_v16 }
 0x877   :  { %v1834_v53 = vmul.f32 0.35355338, %v1757_v18  ;;  %v11659_v20 = vpop.f32.mrf.mxu0 }
 0x878   :  { %v11654_v22 = vpop.f32.mrf.mxu1  ;;  %v1837_v23 = vadd.f32 %v1835_v19, %v13432_v61 }
 0x879   :  { %v1836_v26 = vadd.f32 %v1834_v53, %v13432_v61 }
 0x87a   :  { %v1841_v27 = vsel %vm869_vm12, %v1837_v23, -inf }
 0x87b   :  { %v1838_v28 = vsel %vm869_vm12, %v1836_v26, -inf  ;;  %1842 = vmax.xlane.f32.xlu0 %v1841_v27  ;;  %v409_v27 = vld [vmem:[%s15897_s9 + $0x10] sm:$0xff] }
 0x87c   :  { %1839 = vmax.xlane.f32.xlu1 %v1838_v28  ;;  %v408_v28 = vld [vmem:[%s15897_s9 + $0x8] sm:$0xff] }
 0x904   :  { %v1843_v24 = vpop.xlane.xlu0 %1842 }
 0x905   :  { %v1840_v25 = vpop.xlane.xlu1 %1839  ;;  %v1845_v29 = vsub.f32 %v1837_v23, %v1843_v24  ;;  %v407_v24 = vld [vmem:[%s15897_s9] sm:$0xff] }
 0x906   :  { %v1844_v32 = vsub.f32 %v1836_v26, %v1840_v25  ;;  %v410_v26 = vld [vmem:[%s15897_s9 + $0x18] sm:$0xff] }
 0x907   :  { %v1848_v33 = vmul.f32 1.442695, %v1845_v29  ;;  %11681 = vmatprep.subr.mxu0 %v410_v26 }
 0x908   :  { %v1846_v34 = vmul.f32 1.442695, %v1844_v32 }
 0x909   :  { %12720 = vpow2.f32 %v1848_v33 }
 0x90a   :  { %12722 = vpow2.f32 %v1846_v34 }
 0x916   :  { %v12721_v35 = vpop.eup %12720 }
 0x917   :  { %v12723_v36 = vpop.eup %12722  ;;  %v1853_v37 = vsel %vm869_vm12, %v12721_v35, 0.0 }
 0x918   :  { %v1850_v44 = vsel %vm869_vm12, %v12723_v36, 0.0  ;;  %1854 = vadd.xlane.f32.xlu0 %v1853_v37 }
 0x919   :  { %1851 = vadd.xlane.f32.xlu1 %v1850_v44 }
 0x9a1   :  { %v1855_v49 = vpop.xlane.xlu0 %1854 }
 0x9a2   :  { %v1852_v50 = vpop.xlane.xlu1 %1851  ;;  %12724 = vrcp.f32 %v1855_v49 }
 0x9a3   :  { %12726 = vrcp.f32 %v1852_v50 }
 0x9af   :  { %v12725_v51 = vpop.eup %12724 }
 0x9b0   :  { %v12727_v52 = vpop.eup %12726  ;;  %v1859_v55 = vmul.f32 %v12725_v51, %v12721_v35 }
 0x9b1   :  { %v1858_v56 = vmul.f32 %v12727_v52, %v12723_v36  ;;  %v13582_v36 = vsub.s32 6, %v13225_v5 }
 0x9b2   :  { %11668 = vmatmul.mubr.msk.f32.vlgmr.msra.gmra.mxu0 %vm869_vm12, %v1859_v55 }
 0x9b3   :  { %11663 = vmatmul.mubr.msk.f32.vlgmr.msra.gmra.mxu1 %vm869_vm12, %v1858_v56  ;;  %11682 = vmatpush3.msra.mxu0 %v410_v26  ;;  %v2126_v44 = vrot.slane %v13330_v14, %v13582_v36 }
 0x9b4   :  { %11671 = vmatpush3.msra.mxu1 %v404_v45  ;;  %11683 = vmatprep.subr.mxu0 %v409_v27  ;;  %v13587_v45 = vsub.s32 7, %v13225_v5 }
 0x9b5   :  { %11672 = vmatprep.subr.mxu1 %v403_v57  ;;  %11684 = vmatpush3.msra.mxu0 %v409_v27 }
 0x9b6   :  { %11673 = vmatpush3.msra.mxu1 %v403_v57  ;;  %11685 = vmatprep.subr.mxu0 %v408_v28  ;;  %v2132_v55 = vrot.slane %v13330_v14, %v13587_v45  ;;  %v425_v14 = vld [vmem:[%s15899_s11 + $0x68] sm:$0xff] }
 0x9b7   :  { %11674 = vmatprep.subr.mxu1 %v402_v58  ;;  %11686 = vmatpush3.msra.mxu0 %v408_v28 }
 0x9b8   :  { %11675 = vmatpush3.msra.mxu1 %v402_v58  ;;  %11687 = vmatprep.subr.mxu0 %v407_v24 }
 0x9b9   :  { %11676 = vmatprep.subr.mxu1 %v401_v59  ;;  %11688 = vmatpush3.msra.mxu0 %v407_v24 }
 0x9ba   :  { %11677 = vmatpush3.msra.mxu1 %v401_v59  ;;  %v427_v59 = vld [vmem:[%s15899_s11 + $0x78] sm:$0xff] }
 0x9bb   :  { %11692 = vmatprep.subr.mxu1 %v427_v59 }
 0xa72   :  { %v2004_v62 = vpop.f32.mrf.mxu0 }
 0xa73   :  { %v1931_v63 = vpop.f32.mrf.mxu1  ;;  %v2009_v0 = vadd.f32 %v2004_v62, %v1685_v54  ;;  %v426_v62 = vld [vmem:[%s15899_s11 + $0x70] sm:$0xff] }
 0xa74   :  { %v2008_v1 = vadd.f32 %v1931_v63, %v1684_v12  ;;  %v11669_v2 = vpop.f32.mrf.mxu0  ;;  %v424_v63 = vld [vmem:[%s15899_s11 + $0x60] sm:$0xff] }
 0xa75   :  { %v11664_v3 = vpop.f32.mrf.mxu1  ;;  %v421_v2 = vld [vmem:[%s15899_s11 + $0x48] sm:$0xff] }
 0xa76   :  { %11678 = vmatprep.mubr.msk.f32.mxu1 %vm428_vm6, %v2008_v1  ;;  %v422_v1 = vld [vmem:[%s15899_s11 + $0x50] sm:$0xff]  ;;  %v420_v3 = vld [vmem:[%s15899_s11 + $0x40] sm:$0xff] }
 0xa77   :  { %11679 = vmatmul.mubr.msk.f32.vlgmr.msra.gmra.mxu1 %vm428_vm6, %v2009_v0  ;;  %v423_v0 = vld [vmem:[%s15899_s11 + $0x58] sm:$0xff] }
 0xa78   :  { %11693 = vmatpush3.msra.mxu1 %v427_v59 }
 0xa79   :  { %11694 = vmatprep.subr.mxu1 %v426_v62 }
 0xa7a   :  { %11695 = vmatpush3.msra.mxu1 %v426_v62 }
 0xa7b   :  { %11696 = vmatprep.subr.mxu1 %v425_v14 }
 0xa7c   :  { %11697 = vmatpush3.msra.mxu1 %v425_v14 }
 0xa7d   :  { %11698 = vmatprep.subr.mxu1 %v424_v63 }
 0xa7e   :  { %11699 = vmatpush3.msra.mxu1 %v424_v63 }
 0xa7f   :  { %11700 = vmatprep.subr.mxu1 %v423_v0 }
 0xa80   :  { %11701 = vmatpush3.msra.mxu1 %v423_v0 }
 0xa81   :  { %11702 = vmatprep.subr.mxu1 %v422_v1 }
 0xa82   :  { %11703 = vmatpush3.msra.mxu1 %v422_v1 }
 0xa83   :  { %11704 = vmatprep.subr.mxu1 %v421_v2 }
 0xa84   :  { %11705 = vmatpush3.msra.mxu1 %v421_v2 }
 0xa85   :  { %11706 = vmatprep.subr.mxu1 %v420_v3 }
 0xa86   :  { %11707 = vmatpush3.msra.mxu1 %v420_v3 }
 0xb37   :  { %v11680_v11 = vpop.f32.mrf.mxu1 }
 0xb38   :  { %v2092_v48 = vadd.f32 %v11680_v11, %v2013_v10  ;;  %v418_v11 = vld [vmem:[%s15899_s11 + $0x30] sm:$0xff] }
 0xb39   :  { %v2086_v39 = vpop.f32.mrf.mxu1 }
 0xb3a   :  { %v13556_v38 = vadd.f32 %v2092_v48, %v13291_v47  ;;  %v2087_v46 = vadd.f32 %v2086_v39, %v2013_v10  ;;  %v419_v10 = vld [vmem:[%s15899_s11 + $0x38] sm:$0xff]  ;;  %v417_v48 = vld [vmem:[%s15899_s11 + $0x28] sm:$0xff]  ;;  %v416_v39 = vld [vmem:[%s15899_s11 + $0x20] sm:$0xff] }
 0xb3b   :  { %11708 = vmatprep.subr.mxu1 %v419_v10 }
 0xb3c   :  { %v13559_v54 = vadd.f32 %v2087_v46, %v13287_v43  ;;  %v2100_v12 = vsel %vm428_vm6, %v13556_v38, 0.0  ;;  %11709 = vmatpush3.msra.mxu1 %v419_v10  ;;  %v415_v46 = vld [vmem:[%s15899_s11 + $0x18] sm:$0xff] }
 0xb3d   :  { %2101 = vadd.xlane.f32.xlu0 %v2100_v12  ;;  %11710 = vmatprep.subr.mxu1 %v418_v11  ;;  %v414_v12 = vld [vmem:[%s15899_s11 + $0x10] sm:$0xff] }
 0xb3e   :  { %v2097_v13 = vsel %vm428_vm6, %v13559_v54, 0.0  ;;  %11711 = vmatpush3.msra.mxu1 %v418_v11 }
 0xb3f   :  { %2098 = vadd.xlane.f32.xlu1 %v2097_v13  ;;  %11712 = vmatprep.subr.mxu1 %v417_v48  ;;  %v413_v13 = vld [vmem:[%s15899_s11 + $0x8] sm:$0xff] }
 0xb40   :  { %11713 = vmatpush3.msra.mxu1 %v417_v48 }
 0xb41   :  { %11714 = vmatprep.subr.mxu1 %v416_v39 }
 0xb42   :  { %11715 = vmatpush3.msra.mxu1 %v416_v39  ;;  %v10655_v39 = vld [vmem:[%s15947_s26 + $0x98] sm:$0xff] }
 0xb43   :  { %11716 = vmatprep.subr.mxu1 %v415_v46  ;;  %11727 = vmatprep.subr.mxu0 %v10655_v39 }
 0xb44   :  { %11717 = vmatpush3.msra.mxu1 %v415_v46  ;;  %v10654_v46 = vld [vmem:[%s15947_s26 + $0x90] sm:$0xff] }
 0xb45   :  { %11718 = vmatprep.subr.mxu1 %v414_v12 }
 0xb46   :  { %11719 = vmatpush3.msra.mxu1 %v414_v12  ;;  %v10653_v12 = vld [vmem:[%s15947_s26 + $0x88] sm:$0xff] }
 0xb47   :  { %11720 = vmatprep.subr.mxu1 %v413_v13 }
 0xb48   :  { %11721 = vmatpush3.msra.mxu1 %v413_v13  ;;  %v10652_v13 = vld [vmem:[%s15947_s26 + $0x80] sm:$0xff] }
 0xbc6   :  { %v2102_v15 = vpop.xlane.xlu0 %2101 }
 0xbc7   :  { %v2104_v16 = vmul.f32 0.03125, %v2102_v15  ;;  %v412_v15 = vld [vmem:[%s15899_s11] sm:$0xff] }
 0xbc8   :  { %v2099_v18 = vpop.xlane.xlu1 %2098  ;;  %11722 = vmatprep.subr.mxu1 %v412_v15 }
 0xbc9   :  { %v2106_v19 = vsub.f32 %v13556_v38, %v2104_v16  ;;  %v2103_v53 = vmul.f32 0.03125, %v2099_v18  ;;  %11723 = vmatpush3.msra.mxu1 %v412_v15  ;;  %v10648_v16 = vld [vmem:[%s15898_s10] ss:$0 sm:$0xff]  ;;  %v10659_v15 = vld [vmem:[%s15947_s26 + $0xb8] sm:$0xff] }
 0xbca   :  { %11770 = vmatprep.subr.mxu1 %v15918_v17 }
 0xbcb   :  { %v2105_v47 = vsub.f32 %v13559_v54, %v2103_v53  ;;  %v2108_v20 = vmul.f32 %v2106_v19, %v2106_v19 }
 0xbcd   :  { %v2112_v43 = vsel %vm428_vm6, %v2108_v20, 0.0  ;;  %v2107_v22 = vmul.f32 %v2105_v47, %v2105_v47 }
 0xbce   :  { %2113 = vadd.xlane.f32.xlu0 %v2112_v43 }
 0xbcf   :  { %v2109_v23 = vsel %vm428_vm6, %v2107_v22, 0.0 }
 0xbd0   :  { %2110 = vadd.xlane.f32.xlu1 %v2109_v23 }
 0xc57   :  { %v2114_v25 = vpop.xlane.xlu0 %2113 }
 0xc58   :  { %v2116_v29 = vmul.f32 0.03125, %v2114_v25 }
 0xc59   :  { %v2111_v32 = vpop.xlane.xlu1 %2110 }
 0xc5a   :  { %v2118_v33 = vadd.f32 1e-05, %v2116_v29  ;;  %v2115_v34 = vmul.f32 0.03125, %v2111_v32 }
 0xc5c   :  { %12728 = vrsqrt.f32 %v2118_v33  ;;  %v2117_v35 = vadd.f32 1e-05, %v2115_v34 }
 0xc5e   :  { %12730 = vrsqrt.f32 %v2117_v35 }
 0xc69   :  { %v12729_v37 = vpop.eup %12728 }
 0xc6a   :  { %v2122_v49 = vmul.f32 %v12729_v37, %v2106_v19 }
 0xc6b   :  { %v12731_v50 = vpop.eup %12730 }
 0xc6c   :  { %v2121_v51 = vmul.f32 %v12731_v50, %v2105_v47  ;;  %v2128_v52 = vmul.f32 %v2126_v44, %v2122_v49 }
 0xc6e   :  { %v2127_v56 = vmul.f32 %v2126_v44, %v2121_v51  ;;  %v2134_v58 = vadd.f32 %v2132_v55, %v2128_v52  ;;  %v10651_v51 = vld [vmem:[%s15896_s8 + $0x8] ss:$0 sm:$0xff] }
 0xc70   :  { %v2133_v57 = vadd.f32 %v2132_v55, %v2127_v56 }
 0xc72   :  { %11689 = vmatprep.mubr.msk.f32.mxu0 %vm428_vm6, %v2133_v57 }
 0xc73   :  { %11690 = vmatmul.mubr.msk.f32.vlgmr.msra.gmra.mxu0 %vm428_vm6, %v2134_v58 }
 0xc74   :  { %11728 = vmatpush3.msra.mxu0 %v10655_v39 }
 0xc75   :  { %11729 = vmatprep.subr.mxu0 %v10654_v46 }
 0xc76   :  { %11730 = vmatpush3.msra.mxu0 %v10654_v46 }
 0xc77   :  { %11731 = vmatprep.subr.mxu0 %v10653_v12 }
 0xc78   :  { %11732 = vmatpush3.msra.mxu0 %v10653_v12 }
 0xc79   :  { %11733 = vmatprep.subr.mxu0 %v10652_v13 }
 0xc7a   :  { %11734 = vmatpush3.msra.mxu0 %v10652_v13 }
 0xc7b   :  { %11738 = vmatprep.subr.mxu0 %v10659_v15 }
 0xd33   :  { %v11691_v18 = vpop.f32.mrf.mxu0 }
 0xd34   :  { %v2219_v19 = vadd.f32 %v11691_v18, %v10648_v16 }
 0xd35   :  { %v2213_v53 = vpop.f32.mrf.mxu0 }
 0xd36   :  { %v2223_v47 = vmul.f32 %v2219_v19, %v2219_v19  ;;  %v2214_v20 = vadd.f32 %v10648_v16, %v2213_v53 }
 0xd38   :  { %v2225_v43 = vmul.f32 %v2223_v47, %v2219_v19  ;;  %v2222_v22 = vmul.f32 %v2214_v20, %v2214_v20 }
 0xd3a   :  { %v2227_v23 = vmul.f32 0.044715, %v2225_v43  ;;  %v2224_v26 = vmul.f32 %v2222_v22, %v2214_v20  ;;  %v13682_v43 = vld [vmem:[%s15896_s8 + $0x10] sm:$0xff] }
 0xd3c   :  { %v2229_v27 = vadd.f32 %v2227_v23, %v2219_v19  ;;  %v2226_v28 = vmul.f32 0.044715, %v2224_v26  ;;  %v2394_v23 = vrot.slane %v13682_v43, %v13235_v8 }
 0xd3e   :  { %v2231_v24 = vmul.f32 0.7978846, %v2229_v27  ;;  %v2228_v25 = vadd.f32 %v2226_v28, %v2214_v20 }
 0xd40   :  { %12732 = vtanh.f32 %v2231_v24  ;;  %v2230_v29 = vmul.f32 0.7978846, %v2228_v25  ;;  %v2400_v25 = vrot.slane %v13682_v43, %v13238_v9 }
 0xd42   :  { %12734 = vtanh.f32 %v2230_v29 }
 0xd4d   :  { %v12733_v32 = vpop.eup %12732 }
 0xd4e   :  { %v2235_v33 = vadd.f32 1.0, %v12733_v32 }
 0xd4f   :  { %v12735_v34 = vpop.eup %12734 }
 0xd50   :  { %v2234_v35 = vadd.f32 1.0, %v12735_v34  ;;  %v2237_v37 = vmul.f32 0.5, %v2235_v33  ;;  %v10658_v34 = vld [vmem:[%s15947_s26 + $0xb0] sm:$0xff] }
 0xd52   :  { %v2236_v44 = vmul.f32 0.5, %v2234_v35  ;;  %v2239_v50 = vmul.f32 %v2237_v37, %v2219_v19  ;;  %v10657_v35 = vld [vmem:[%s15947_s26 + $0xa8] sm:$0xff]  ;;  %v10656_v37 = vld [vmem:[%s15947_s26 + $0xa0] sm:$0xff] }
 0xd54   :  { %v2238_v49 = vmul.f32 %v2236_v44, %v2214_v20  ;;  %v10663_v44 = vld [vmem:[%s15947_s26 + $0xd8] sm:$0xff] }
 0xd56   :  { %11724 = vmatprep.mubr.f32.mxu1 %v2238_v49  ;;  %v10662_v49 = vld [vmem:[%s15947_s26 + $0xd0] sm:$0xff] }
 0xd57   :  { %11725 = vmatmul.mubr.f32.vlgmr.msra.gmra.mxu1 %v2239_v50  ;;  %v10661_v50 = vld [vmem:[%s15947_s26 + $0xc8] sm:$0xff] }
 0xd58   :  { %11772 = vmatprep.mubr.msk.f32.mxu1 %vm13089_vm1, %v15918_v17 }
 0xe17   :  { %v11726_v52 = vpop.f32.mrf.mxu1 }
 0xe18   :  { %v2316_v55 = vadd.f32 %v11726_v52, %v10651_v51 }
 0xe19   :  { %v2310_v56 = vpop.f32.mrf.mxu1 }
 0xe1a   :  { %v13651_v57 = vadd.f32 %v2316_v55, %v13556_v38  ;;  %v2311_v58 = vadd.f32 %v10651_v51, %v2310_v56  ;;  %v10660_v51 = vld [vmem:[%s15947_s26 + $0xc0] sm:$0xff]  ;;  %v2406_v56 = vrot.slane %v13682_v43, %v13357_v30 }
 0xe1c   :  { %v13654_v59 = vadd.f32 %v2311_v58, %v13559_v54  ;;  %v2368_v62 = vsel %vm428_vm6, %v13651_v57, 0.0 }
 0xe1d   :  { %2369 = vadd.xlane.f32.xlu0 %v2368_v62  ;;  %v2491_v62 = vrot.slane %v13682_v43, %v13360_v31 }
 0xe1e   :  { %v2365_v14 = vsel %vm428_vm6, %v13654_v59, 0.0 }
 0xe1f   :  { %2366 = vadd.xlane.f32.xlu1 %v2365_v14 }
 0xea6   :  { %v2370_v63 = vpop.xlane.xlu0 %2369 }
 0xea7   :  { %v2372_v0 = vmul.f32 0.03125, %v2370_v63 }
 0xea8   :  { %v2367_v1 = vpop.xlane.xlu1 %2366 }
 0xea9   :  { %v2374_v2 = vsub.f32 %v13651_v57, %v2372_v0  ;;  %v2371_v3 = vmul.f32 0.03125, %v2367_v1 }
 0xeab   :  { %v2373_v38 = vsub.f32 %v13654_v59, %v2371_v3  ;;  %v2376_v10 = vmul.f32 %v2374_v2, %v2374_v2 }
 0xead   :  { %v2380_v54 = vsel %vm428_vm6, %v2376_v10, 0.0  ;;  %v2375_v11 = vmul.f32 %v2373_v38, %v2373_v38  ;;  %v2570_v10 = vrot.slane %v13682_v43, %v13374_v40 }
 0xeae   :  { %2381 = vadd.xlane.f32.xlu0 %v2380_v54 }
 0xeaf   :  { %v2377_v48 = vsel %vm428_vm6, %v2375_v11, 0.0 }
 0xeb0   :  { %2378 = vadd.xlane.f32.xlu1 %v2377_v48 }
 0xf37   :  { %v2382_v16 = vpop.xlane.xlu0 %2381 }
 0xf38   :  { %v2384_v18 = vmul.f32 0.03125, %v2382_v16 }
 0xf39   :  { %v2379_v19 = vpop.xlane.xlu1 %2378 }
 0xf3a   :  { %v2386_v53 = vadd.f32 1e-05, %v2384_v18  ;;  %v2383_v47 = vmul.f32 0.03125, %v2379_v19 }
 0xf3c   :  { %12736 = vrsqrt.f32 %v2386_v53  ;;  %v2385_v20 = vadd.f32 1e-05, %v2383_v47 }
 0xf3e   :  { %12738 = vrsqrt.f32 %v2385_v20 }
 0xf49   :  { %v12737_v22 = vpop.eup %12736 }
 0xf4a   :  { %v2390_v26 = vmul.f32 %v12737_v22, %v2374_v2 }
 0xf4b   :  { %v12739_v27 = vpop.eup %12738 }
 0xf4c   :  { %v2389_v28 = vmul.f32 %v12739_v27, %v2373_v38  ;;  %v2396_v24 = vmul.f32 %v2394_v23, %v2390_v26 }
 0xf4e   :  { %v2395_v29 = vmul.f32 %v2394_v23, %v2389_v28  ;;  %v2402_v33 = vadd.f32 %v2400_v25, %v2396_v24 }
 0xf50   :  { %v2401_v32 = vadd.f32 %v2400_v25, %v2395_v29 }
 0xf52   :  { %11735 = vmatprep.mubr.msk.f32.mxu0 %vm428_vm6, %v2401_v32 }
 0xf53   :  { %11736 = vmatmul.mubr.msk.f32.vlgmr.msra.gmra.mxu0 %vm428_vm6, %v2402_v33 }
 0xf54   :  { %11739 = vmatpush3.msra.mxu0 %v10659_v15  ;;  %11746 = vmatprep.mubr.msk.f32.mxu0 %vm428_vm6, %v2401_v32 }
 0xf55   :  { %11740 = vmatprep.subr.mxu0 %v10658_v34 }
 0xf56   :  { %11741 = vmatpush3.msra.mxu0 %v10658_v34 }
 0xf57   :  { %11742 = vmatprep.subr.mxu0 %v10657_v35 }
 0xf58   :  { %11743 = vmatpush3.msra.mxu0 %v10657_v35 }
 0xf59   :  { %11744 = vmatprep.subr.mxu0 %v10656_v37 }
 0xf5a   :  { %11745 = vmatpush3.msra.mxu0 %v10656_v37 }
 0xf5b   :  { %11747 = vmatmul.mubr.msk.f32.vlgmr.msra.gmra.mxu0 %vm428_vm6, %v2402_v33  ;;  %11749 = vmatprep.subr.mxu0 %v10663_v44 }
 0xf5c   :  { %11750 = vmatpush3.msra.mxu0 %v10663_v44  ;;  %11757 = vmatprep.mubr.msk.f32.mxu0 %vm428_vm6, %v2401_v32 }
 0xf5d   :  { %11751 = vmatprep.subr.mxu0 %v10662_v49 }
 0xf5e   :  { %11752 = vmatpush3.msra.mxu0 %v10662_v49 }
 0xf5f   :  { %11753 = vmatprep.subr.mxu0 %v10661_v50 }
 0xf60   :  { %11754 = vmatpush3.msra.mxu0 %v10661_v50 }
 0xf61   :  { %11755 = vmatprep.subr.mxu0 %v10660_v51 }
 0xf62   :  { %11756 = vmatpush3.msra.mxu0 %v10660_v51 }
 0xf63   :  { %11758 = vmatmul.mubr.msk.f32.vlgmr.msra.gmra.mxu0 %vm428_vm6, %v2402_v33  ;;  %11760 = vmatprep.subr.mxu0 %v15918_v17 }
 0xf64   :  { %11762 = vmatprep.mubr.msk.f32.mxu0 %vm13089_vm1, %v15918_v17 }
0x1013   :  { %v11737_v52 = vpop.f32.mrf.mxu0 }
0x1014   :  { %v13730_v1 = vadd.f32 %v11737_v52, %v2406_v56 }
0x1015   :  { %v2479_v55 = vpop.f32.mrf.mxu0 }
0x1016   :  { %v13722_v14 = vadd.f32 %v2479_v55, %v2406_v56  ;;  %v2647_v11 = vmul.f32 %v13730_v1, %v13377_v41  ;;  %v2829_v13 = vmul.f32 %v13730_v1, %v13380_v42 }
0x1018   :  { %v2646_v2 = vmul.f32 %v13722_v14, %v13377_v41  ;;  %v2828_v3 = vmul.f32 %v13722_v14, %v13380_v42 }
0x101b   :  { %v11748_v58 = vpop.f32.mrf.mxu0 }
0x101c   :  { %v13738_v38 = vadd.f32 %v11748_v58, %v2491_v62 }
0x101d   :  { %v2558_v63 = vpop.f32.mrf.mxu0 }
0x101e   :  { %v13724_v0 = vadd.f32 %v2558_v63, %v2491_v62 }
0x1020   :  { %11761 = vmatpush3.xpose.msk.msra.mxu0 %vm428_vm6, %v13724_v0  ;;  %11771 = vmatpush3.xpose.msk.msra.mxu1 %vm428_vm6, %v13724_v0 }
0x1021   :  { %11765 = vmatprep.subr.mxu0 %v15918_v17  ;;  %11780 = vmatprep.subr.mxu1 %v15918_v17 }
0x1023   :  { %v11759_v54 = vpop.f32.mrf.mxu0  ;;  %11763 = vmatmul.mubr.msk.f32.vlgmr.msra.gmra.mxu0 %vm428_vm6, %v2646_v2  ;;  %11773 = vmatmul.mubr.msk.f32.vlgmr.msra.gmra.mxu1 %vm428_vm6, %v2828_v3 }
0x1024   :  { %11766 = vmatpush3.xpose.msk.msra.mxu0 %vm428_vm6, %v13738_v38  ;;  %11767 = vmatprep.mubr.msk.f32.mxu0 %vm13089_vm1, %v15918_v17  ;;  %v13753_v39 = vadd.f32 %v11759_v54, %v2570_v10 }
0x1025   :  { %v2637_v48 = vpop.f32.mrf.mxu0  ;;  %11775 = vmatprep.subr.mxu0 %v15918_v17  ;;  %11782 = vmatprep.mubr.msk.f32.mxu1 %vm13089_vm1, %v15918_v17 }
0x1026   :  { %v13755_v46 = vadd.f32 %v2637_v48, %v2570_v10  ;;  %v3003_v15 = vmul.f32 %v13753_v39, %v13380_v42 }
0x1027   :  { %11768 = vmatmul.mubr.msk.f32.vlgmr.msra.gmra.mxu0 %vm428_vm6, %v2647_v11 }
0x1028   :  { %11776 = vmatpush3.xpose.msk.msra.mxu0 %vm428_vm6, %v13738_v38  ;;  %11777 = vmatprep.mubr.msk.f32.mxu0 %vm13089_vm1, %v15918_v17  ;;  %v3002_v12 = vmul.f32 %v13755_v46, %v13380_v42 }
0x1029   :  { %11785 = vmatprep.subr.mxu0 %v15918_v17 }
0x102a   :  { %11781 = vmatpush3.msra.mxu1 %v3002_v12 }
0x102b   :  { %11778 = vmatmul.mubr.msk.f32.vlgmr.msra.gmra.mxu0 %vm428_vm6, %v2829_v13  ;;  %11790 = vmatprep.subr.mxu1 %v15918_v17 }
0x102c   :  { %11786 = vmatpush3.msra.mxu0 %v3003_v15  ;;  %11787 = vmatprep.mubr.msk.f32.mxu0 %vm13089_vm1, %v15918_v17 }
0x102d   :  { %11795 = vmatprep.subr.mxu0 %v15918_v17 }
0x10e3   :  { %v2720_v16 = vpop.f32.mrf.mxu0  ;;  %v2899_v18 = vpop.f32.mrf.mxu1 }
0x10e4   :  { %v2800_v19 = vmul.f32 0.35355338, %v2720_v16  ;;  %v2976_v53 = vmul.f32 0.35355338, %v2899_v18 }
0x10e5   :  { %v11764_v47 = vpop.f32.mrf.mxu0  ;;  %v11774_v20 = vpop.f32.mrf.mxu1 }
0x10e6   :  { %v2978_v22 = vadd.f32 %v2976_v53, %v13432_v61  ;;  %v2802_v27 = vadd.f32 %v2800_v19, %v13432_v61 }
0x10e7   :  { %v2796_v23 = vpop.f32.mrf.mxu0 }
0x10e8   :  { %v2980_v26 = vsel %vm869_vm12, %v2978_v22, -inf  ;;  %v2801_v25 = vmul.f32 0.35355338, %v2796_v23  ;;  %v2804_v32 = vsel %vm869_vm12, %v2802_v27, -inf }
0x10e9   :  { %2981 = vmax.xlane.f32.xlu1 %v2980_v26  ;;  %v11769_v28 = vpop.f32.mrf.mxu0  ;;  %v2826_v26 = vmul.f32 %v13755_v46, %v13377_v41 }
0x10ea   :  { %v2803_v37 = vadd.f32 %v2801_v25, %v13432_v61  ;;  %v3296_v25 = vmul.f32 %v13722_v14, %v13461_v7 }
0x10eb   :  { %v2972_v24 = vpop.f32.mrf.mxu0 }
0x10ec   :  { %v2977_v29 = vmul.f32 0.35355338, %v2972_v24  ;;  %v2807_v44 = vsel %vm869_vm12, %v2803_v37, -inf }
0x10ed   :  { %2805 = vmax.xlane.f32.xlu1 %v2804_v32  ;;  %v11779_v33 = vpop.f32.mrf.mxu0  ;;  %v2827_v32 = vmul.f32 %v13753_v39, %v13377_v41 }
0x10ee   :  { %v2979_v34 = vadd.f32 %v2977_v29, %v13432_v61  ;;  %v3470_v33 = vmul.f32 %v13755_v46, %v13461_v7 }
0x10f0   :  { %v2983_v35 = vsel %vm869_vm12, %v2979_v34, -inf }
0x10f1   :  { %2984 = vmax.xlane.f32.xlu0 %v2983_v35 }
0x10f5   :  { %2808 = vmax.xlane.f32.xlu0 %v2807_v44  ;;  %v3471_v44 = vmul.f32 %v13753_v39, %v13461_v7 }
0x1172   :  { %v2982_v49 = vpop.xlane.xlu1 %2981 }
0x1173   :  { %v2986_v50 = vsub.f32 %v2978_v22, %v2982_v49 }
0x1175   :  { %v2988_v51 = vmul.f32 1.442695, %v2986_v50 }
0x1176   :  { %v2806_v52 = vpop.xlane.xlu1 %2805 }
0x1177   :  { %12740 = vpow2.f32 %v2988_v51  ;;  %v2810_v55 = vsub.f32 %v2802_v27, %v2806_v52 }
0x1179   :  { %v2812_v56 = vmul.f32 1.442695, %v2810_v55 }
0x117a   :  { %v2985_v58 = vpop.xlane.xlu0 %2984 }
0x117b   :  { %12742 = vpow2.f32 %v2812_v56  ;;  %v2987_v62 = vsub.f32 %v2979_v34, %v2985_v58 }
0x117d   :  { %v2990_v63 = vmul.f32 1.442695, %v2987_v62 }
0x117e   :  { %v2809_v2 = vpop.xlane.xlu0 %2808 }
0x117f   :  { %12744 = vpow2.f32 %v2990_v63  ;;  %v2811_v3 = vsub.f32 %v2803_v37, %v2809_v2  ;;  %v3297_v37 = vmul.f32 %v13730_v1, %v13461_v7 }
0x1181   :  { %v2814_v10 = vmul.f32 1.442695, %v2811_v3 }
0x1183   :  { %12746 = vpow2.f32 %v2814_v10 }
0x1184   :  { %v12741_v54 = vpop.eup %12740 }
0x1185   :  { %v2992_v11 = vsel %vm869_vm12, %v12741_v54, 0.0 }
0x1186   :  { %2993 = vadd.xlane.f32.xlu1 %v2992_v11 }
0x1188   :  { %v12743_v48 = vpop.eup %12742 }
0x1189   :  { %v2816_v12 = vsel %vm869_vm12, %v12743_v48, 0.0 }
0x118a   :  { %2817 = vadd.xlane.f32.xlu1 %v2816_v12 }
0x118c   :  { %v12745_v13 = vpop.eup %12744 }
0x118d   :  { %v2995_v15 = vsel %vm869_vm12, %v12745_v13, 0.0 }
0x118e   :  { %2996 = vadd.xlane.f32.xlu0 %v2995_v15 }
0x1190   :  { %v12747_v16 = vpop.eup %12746 }
0x1191   :  { %v2819_v18 = vsel %vm869_vm12, %v12747_v16, 0.0 }
0x1192   :  { %2820 = vadd.xlane.f32.xlu0 %v2819_v18 }
0x120f   :  { %v2994_v19 = vpop.xlane.xlu1 %2993 }
0x1210   :  { %12748 = vrcp.f32 %v2994_v19 }
0x1213   :  { %v2818_v53 = vpop.xlane.xlu1 %2817 }
0x1214   :  { %12750 = vrcp.f32 %v2818_v53 }
0x1217   :  { %v2997_v47 = vpop.xlane.xlu0 %2996 }
0x1218   :  { %12752 = vrcp.f32 %v2997_v47 }
0x121b   :  { %v2821_v20 = vpop.xlane.xlu0 %2820 }
0x121c   :  { %12754 = vrcp.f32 %v2821_v20 }
0x121d   :  { %v12749_v22 = vpop.eup %12748 }
0x121e   :  { %v3000_v23 = vmul.f32 %v12749_v22, %v12741_v54 }
0x1220   :  { %11783 = vmatmul.mubr.msk.f32.vlgmr.msra.gmra.mxu1 %vm869_vm12, %v3000_v23 }
0x1221   :  { %v12751_v27 = vpop.eup %12750  ;;  %11791 = vmatpush3.msra.mxu1 %v2826_v26  ;;  %11792 = vmatprep.mubr.msk.f32.mxu1 %vm13089_vm1, %v15918_v17 }
0x1222   :  { %11800 = vmatprep.subr.mxu1 %v15918_v17  ;;  %v2824_v28 = vmul.f32 %v12751_v27, %v12743_v48 }
0x1224   :  { %11793 = vmatmul.mubr.msk.f32.vlgmr.msra.gmra.mxu1 %vm869_vm12, %v2824_v28 }
0x1225   :  { %v12753_v24 = vpop.eup %12752  ;;  %11801 = vmatpush3.xpose.msk.msra.mxu1 %vm428_vm6, %v13724_v0  ;;  %11802 = vmatprep.mubr.msk.f32.mxu1 %vm13089_vm1, %v15918_v17 }
0x1226   :  { %11810 = vmatprep.subr.mxu1 %v15918_v17  ;;  %v3001_v29 = vmul.f32 %v12753_v24, %v12745_v13 }
0x1228   :  { %11788 = vmatmul.mubr.msk.f32.vlgmr.msra.gmra.mxu0 %vm869_vm12, %v3001_v29  ;;  %11803 = vmatmul.mubr.msk.f32.vlgmr.msra.gmra.mxu1 %vm428_vm6, %v3296_v25 }
0x1229   :  { %v12755_v34 = vpop.eup %12754  ;;  %11796 = vmatpush3.msra.mxu0 %v2827_v32  ;;  %11811 = vmatpush3.msra.mxu1 %v3470_v33 }
0x122a   :  { %11797 = vmatprep.mubr.msk.f32.mxu0 %vm13089_vm1, %v15918_v17  ;;  %11805 = vmatprep.subr.mxu0 %v15918_v17  ;;  %v2825_v35 = vmul.f32 %v12755_v34, %v12747_v16  ;;  %v3620_v34 = vmul.f32 %v13722_v14, %v13500_v4  ;;  %v3621_v14 = vmul.f32 %v13730_v1, %v13500_v4 }
0x122b   :  { %11812 = vmatprep.mubr.msk.f32.mxu1 %vm13089_vm1, %v15918_v17  ;;  %11820 = vmatprep.subr.mxu1 %v15918_v17 }
0x122c   :  { %11798 = vmatmul.mubr.msk.f32.vlgmr.msra.gmra.mxu0 %vm869_vm12, %v2825_v35  ;;  %v3794_v35 = vmul.f32 %v13755_v46, %v13500_v4 }
0x122d   :  { %11806 = vmatpush3.xpose.msk.msra.mxu0 %vm428_vm6, %v13738_v38  ;;  %11807 = vmatprep.mubr.msk.f32.mxu0 %vm13089_vm1, %v15918_v17 }
0x122e   :  { %11815 = vmatprep.subr.mxu0 %v15918_v17 }
0x1230   :  { %11808 = vmatmul.mubr.msk.f32.vlgmr.msra.gmra.mxu0 %vm428_vm6, %v3297_v37 }
0x1231   :  { %11816 = vmatpush3.msra.mxu0 %v3471_v44  ;;  %11817 = vmatprep.mubr.msk.f32.mxu0 %vm13089_vm1, %v15918_v17 }
0x1232   :  { %11825 = vmatprep.subr.mxu0 %v15918_v17 }
0x12e0   :  { %v3073_v49 = vpop.f32.mrf.mxu1 }
0x12e2   :  { %v11784_v50 = vpop.f32.mrf.mxu1 }
0x12e4   :  { %v3219_v51 = vpop.f32.mrf.mxu1 }
0x12e5   :  { %v3220_v52 = vadd.f32 %v3219_v51, %v3073_v49 }
0x12e6   :  { %v11794_v55 = vpop.f32.mrf.mxu1 }
0x12e8   :  { %v3146_v56 = vpop.f32.mrf.mxu0  ;;  %v3367_v58 = vpop.f32.mrf.mxu1 }
0x12e9   :  { %v3444_v62 = vmul.f32 0.35355338, %v3367_v58 }
0x12ea   :  { %v11789_v63 = vpop.f32.mrf.mxu0  ;;  %v11804_v2 = vpop.f32.mrf.mxu1 }
0x12eb   :  { %v3446_v3 = vadd.f32 %v3444_v62, %v13432_v61 }
0x12ec   :  { %v3292_v10 = vpop.f32.mrf.mxu0 }
0x12ed   :  { %v3293_v54 = vadd.f32 %v3292_v10, %v3146_v56  ;;  %v3448_v11 = vsel %vm869_vm12, %v3446_v3, -inf }
0x12ee   :  { %3449 = vmax.xlane.f32.xlu1 %v3448_v11  ;;  %v11799_v48 = vpop.f32.mrf.mxu0 }
0x12f0   :  { %v3440_v12 = vpop.f32.mrf.mxu0 }
0x12f1   :  { %v3445_v13 = vmul.f32 0.35355338, %v3440_v12 }
0x12f2   :  { %v11809_v15 = vpop.f32.mrf.mxu0 }
0x12f3   :  { %v3447_v16 = vadd.f32 %v3445_v13, %v13432_v61 }
0x12f5   :  { %v3451_v18 = vsel %vm869_vm12, %v3447_v16, -inf }
0x12f6   :  { %3452 = vmax.xlane.f32.xlu0 %v3451_v18 }
0x1377   :  { %v3450_v19 = vpop.xlane.xlu1 %3449 }
0x1378   :  { %v3454_v53 = vsub.f32 %v3446_v3, %v3450_v19 }
0x137a   :  { %v3456_v47 = vmul.f32 1.442695, %v3454_v53 }
0x137c   :  { %12756 = vpow2.f32 %v3456_v47 }
0x137f   :  { %v3453_v20 = vpop.xlane.xlu0 %3452 }
0x1380   :  { %v3455_v22 = vsub.f32 %v3447_v16, %v3453_v20 }
0x1382   :  { %v3458_v23 = vmul.f32 1.442695, %v3455_v22 }
0x1384   :  { %12758 = vpow2.f32 %v3458_v23 }
0x1389   :  { %v12757_v26 = vpop.eup %12756 }
0x138a   :  { %v3460_v27 = vsel %vm869_vm12, %v12757_v26, 0.0 }
0x138b   :  { %3461 = vadd.xlane.f32.xlu1 %v3460_v27  ;;  %v10667_v27 = vld [vmem:[%s15947_s26 + $0xf8] sm:$0xff] }
0x1391   :  { %v12759_v28 = vpop.eup %12758 }
0x1392   :  { %v3463_v24 = vsel %vm869_vm12, %v12759_v28, 0.0 }
0x1393   :  { %3464 = vadd.xlane.f32.xlu0 %v3463_v24  ;;  %v10665_v24 = vld [vmem:[%s15947_s26 + $0xe8] sm:$0xff] }
0x1414   :  { %v3462_v25 = vpop.xlane.xlu1 %3461 }
0x1415   :  { %12760 = vrcp.f32 %v3462_v25  ;;  %v10664_v25 = vld [vmem:[%s15947_s26 + $0xe0] sm:$0xff] }
0x141c   :  { %v3465_v29 = vpop.xlane.xlu0 %3464 }
0x141d   :  { %12762 = vrcp.f32 %v3465_v29 }
0x1422   :  { %v12761_v32 = vpop.eup %12760 }
0x1423   :  { %v3468_v33 = vmul.f32 %v12761_v32, %v12757_v26 }
0x1425   :  { %11813 = vmatmul.mubr.msk.f32.vlgmr.msra.gmra.mxu1 %vm869_vm12, %v3468_v33 }
0x1426   :  { %11821 = vmatpush3.xpose.msk.msra.mxu1 %vm428_vm6, %v13724_v0  ;;  %11822 = vmatprep.mubr.msk.f32.mxu1 %vm13089_vm1, %v15918_v17  ;;  %v3795_v0 = vmul.f32 %v13753_v39, %v13500_v4 }
0x1427   :  { %11830 = vmatprep.subr.mxu1 %v15918_v17 }
0x1429   :  { %11823 = vmatmul.mubr.msk.f32.vlgmr.msra.gmra.mxu1 %vm428_vm6, %v3620_v34 }
0x142a   :  { %v12763_v37 = vpop.eup %12762  ;;  %11831 = vmatpush3.msra.mxu1 %v3794_v35  ;;  %11832 = vmatprep.mubr.msk.f32.mxu1 %vm13089_vm1, %v15918_v17 }
0x142b   :  { %v3469_v44 = vmul.f32 %v12763_v37, %v12759_v28  ;;  %11840 = vmatprep.subr.mxu1 %v10667_v27  ;;  %v10666_v28 = vld [vmem:[%s15947_s26 + $0xf0] sm:$0xff] }
0x142d   :  { %11818 = vmatmul.mubr.msk.f32.vlgmr.msra.gmra.mxu0 %vm869_vm12, %v3469_v44  ;;  %v3947_v44 = vrot.slane %v13682_v43, %v13551_v6 }
0x142e   :  { %11826 = vmatpush3.xpose.msk.msra.mxu0 %vm428_vm6, %v13738_v38  ;;  %11827 = vmatprep.mubr.msk.f32.mxu0 %vm13089_vm1, %v15918_v17 }
0x142f   :  { %11835 = vmatprep.subr.mxu0 %v15918_v17 }
0x1431   :  { %11828 = vmatmul.mubr.msk.f32.vlgmr.msra.gmra.mxu0 %vm428_vm6, %v3621_v14 }
0x1432   :  { %11836 = vmatpush3.msra.mxu0 %v3795_v0  ;;  %11837 = vmatprep.mubr.msk.f32.mxu0 %vm13089_vm1, %v15918_v17 }
0x14e5   :  { %v3541_v46 = vpop.f32.mrf.mxu1 }
0x14e6   :  { %v3618_v49 = vadd.f32 %v3541_v46, %v3220_v52 }
0x14e7   :  { %v11814_v38 = vpop.f32.mrf.mxu1 }
0x14e9   :  { %v3691_v50 = vpop.f32.mrf.mxu1 }
0x14ea   :  { %v3768_v51 = vmul.f32 0.35355338, %v3691_v50 }
0x14eb   :  { %v11824_v55 = vpop.f32.mrf.mxu1 }
0x14ec   :  { %v3770_v56 = vadd.f32 %v3768_v51, %v13432_v61 }
0x14ed   :  { %v3614_v1 = vpop.f32.mrf.mxu0 }
0x14ee   :  { %v3619_v58 = vadd.f32 %v3614_v1, %v3293_v54  ;;  %v3772_v62 = vsel %vm869_vm12, %v3770_v56, -inf }
0x14ef   :  { %3773 = vmax.xlane.f32.xlu1 %v3772_v62  ;;  %v11819_v39 = vpop.f32.mrf.mxu0 }
0x14f1   :  { %v3764_v63 = vpop.f32.mrf.mxu0 }
0x14f2   :  { %v3769_v2 = vmul.f32 0.35355338, %v3764_v63 }
0x14f3   :  { %v11829_v3 = vpop.f32.mrf.mxu0 }
0x14f4   :  { %v3771_v10 = vadd.f32 %v3769_v2, %v13432_v61 }
0x14f6   :  { %v3775_v11 = vsel %vm869_vm12, %v3771_v10, -inf }
0x14f7   :  { %3776 = vmax.xlane.f32.xlu0 %v3775_v11  ;;  %v10672_v11 = vld [vmem:[%s15897_s9 + $0x30] sm:$0xff] }
0x1578   :  { %v3774_v52 = vpop.xlane.xlu1 %3773 }
0x1579   :  { %v3778_v48 = vsub.f32 %v3770_v56, %v3774_v52  ;;  %v10671_v52 = vld [vmem:[%s15897_s9 + $0x28] sm:$0xff] }
0x157b   :  { %v3780_v12 = vmul.f32 1.442695, %v3778_v48  ;;  %v10670_v48 = vld [vmem:[%s15897_s9 + $0x20] sm:$0xff] }
0x157d   :  { %12764 = vpow2.f32 %v3780_v12 }
0x1580   :  { %v3777_v13 = vpop.xlane.xlu0 %3776 }
0x1581   :  { %v3779_v15 = vsub.f32 %v3771_v10, %v3777_v13  ;;  %v10673_v10 = vld [vmem:[%s15897_s9 + $0x38] sm:$0xff] }
0x1582   :  { %11851 = vmatprep.subr.mxu0 %v10673_v10 }
0x1583   :  { %v3782_v16 = vmul.f32 1.442695, %v3779_v15 }
0x1585   :  { %12766 = vpow2.f32 %v3782_v16 }
0x158a   :  { %v12765_v54 = vpop.eup %12764 }
0x158b   :  { %v3784_v18 = vsel %vm869_vm12, %v12765_v54, 0.0 }
0x158c   :  { %3785 = vadd.xlane.f32.xlu1 %v3784_v18 }
0x1592   :  { %v12767_v19 = vpop.eup %12766 }
0x1593   :  { %v3787_v53 = vsel %vm869_vm12, %v12767_v19, 0.0 }
0x1594   :  { %3788 = vadd.xlane.f32.xlu0 %v3787_v53  ;;  %v4060_v53 = vrot.slane %v13682_v43, %v13582_v36 }
0x1615   :  { %v3786_v61 = vpop.xlane.xlu1 %3785 }
0x1616   :  { %12768 = vrcp.f32 %v3786_v61 }
0x161d   :  { %v3789_v47 = vpop.xlane.xlu0 %3788 }
0x161e   :  { %12770 = vrcp.f32 %v3789_v47 }
0x1623   :  { %v12769_v20 = vpop.eup %12768 }
0x1624   :  { %v3792_v22 = vmul.f32 %v12769_v20, %v12765_v54 }
0x1626   :  { %11833 = vmatmul.mubr.msk.f32.vlgmr.msra.gmra.mxu1 %vm869_vm12, %v3792_v22 }
0x1627   :  { %11841 = vmatpush3.msra.mxu1 %v10667_v27 }
0x1628   :  { %11842 = vmatprep.subr.mxu1 %v10666_v28 }
0x1629   :  { %11843 = vmatpush3.msra.mxu1 %v10666_v28 }
0x162a   :  { %11844 = vmatprep.subr.mxu1 %v10665_v24 }
0x162b   :  { %v12771_v23 = vpop.eup %12770  ;;  %11845 = vmatpush3.msra.mxu1 %v10665_v24  ;;  %v10690_v24 = vld [vmem:[%s15899_s11 + $0xf8] sm:$0xff] }
0x162c   :  { %v3793_v26 = vmul.f32 %v12771_v23, %v12767_v19  ;;  %11846 = vmatprep.subr.mxu1 %v10664_v25  ;;  %v4066_v23 = vrot.slane %v13682_v43, %v13587_v45  ;;  %v10688_v43 = vld [vmem:[%s15899_s11 + $0xe8] sm:$0xff] }
0x162d   :  { %11847 = vmatpush3.msra.mxu1 %v10664_v25  ;;  %v10689_v25 = vld [vmem:[%s15899_s11 + $0xf0] sm:$0xff] }
0x162e   :  { %11838 = vmatmul.mubr.msk.f32.vlgmr.msra.gmra.mxu0 %vm869_vm12, %v3793_v26  ;;  %11862 = vmatprep.subr.mxu1 %v10690_v24 }
0x162f   :  { %11852 = vmatpush3.msra.mxu0 %v10673_v10 }
0x1630   :  { %11853 = vmatprep.subr.mxu0 %v10672_v11 }
0x1631   :  { %11854 = vmatpush3.msra.mxu0 %v10672_v11 }
0x1632   :  { %11855 = vmatprep.subr.mxu0 %v10671_v52 }
0x1633   :  { %11856 = vmatpush3.msra.mxu0 %v10671_v52 }
0x1634   :  { %11857 = vmatprep.subr.mxu0 %v10670_v48 }
0x1635   :  { %11858 = vmatpush3.msra.mxu0 %v10670_v48 }
0x16e6   :  { %v3865_v29 = vpop.f32.mrf.mxu1 }
0x16e7   :  { %v3942_v32 = vadd.f32 %v3865_v29, %v3618_v49  ;;  %v10687_v29 = vld [vmem:[%s15899_s11 + $0xe0] sm:$0xff] }
0x16e8   :  { %v11834_v33 = vpop.f32.mrf.mxu1 }
0x16e9   :  { %11848 = vmatprep.mubr.msk.f32.mxu1 %vm428_vm6, %v3942_v32  ;;  %v10686_v32 = vld [vmem:[%s15899_s11 + $0xd8] sm:$0xff]  ;;  %v10685_v33 = vld [vmem:[%s15899_s11 + $0xd0] sm:$0xff] }
0x16ee   :  { %v3938_v34 = vpop.f32.mrf.mxu0 }
0x16ef   :  { %v3943_v35 = vadd.f32 %v3938_v34, %v3619_v58  ;;  %v10684_v34 = vld [vmem:[%s15899_s11 + $0xc8] sm:$0xff] }
0x16f0   :  { %v11839_v37 = vpop.f32.mrf.mxu0 }
0x16f1   :  { %11849 = vmatmul.mubr.msk.f32.vlgmr.msra.gmra.mxu1 %vm428_vm6, %v3943_v35  ;;  %v10683_v35 = vld [vmem:[%s15899_s11 + $0xc0] sm:$0xff]  ;;  %v10682_v37 = vld [vmem:[%s15899_s11 + $0xb8] sm:$0xff] }
0x16f2   :  { %11863 = vmatpush3.msra.mxu1 %v10690_v24 }
0x16f3   :  { %11864 = vmatprep.subr.mxu1 %v10689_v25 }
0x16f4   :  { %11865 = vmatpush3.msra.mxu1 %v10689_v25 }
0x16f5   :  { %11866 = vmatprep.subr.mxu1 %v10688_v43 }
0x16f6   :  { %11867 = vmatpush3.msra.mxu1 %v10688_v43 }
0x16f7   :  { %11868 = vmatprep.subr.mxu1 %v10687_v29 }
0x16f8   :  { %11869 = vmatpush3.msra.mxu1 %v10687_v29 }
0x16f9   :  { %11870 = vmatprep.subr.mxu1 %v10686_v32 }
0x16fa   :  { %11871 = vmatpush3.msra.mxu1 %v10686_v32 }
0x16fb   :  { %11872 = vmatprep.subr.mxu1 %v10685_v33 }
0x16fc   :  { %11873 = vmatpush3.msra.mxu1 %v10685_v33 }
0x16fd   :  { %11874 = vmatprep.subr.mxu1 %v10684_v34 }
0x16fe   :  { %11875 = vmatpush3.msra.mxu1 %v10684_v34 }
0x16ff   :  { %11876 = vmatprep.subr.mxu1 %v10683_v35 }
0x1700   :  { %11877 = vmatpush3.msra.mxu1 %v10683_v35 }
0x1701   :  { %11878 = vmatprep.subr.mxu1 %v10682_v37 }
0x1702   :  { %11879 = vmatpush3.msra.mxu1 %v10682_v37 }
0x17b1   :  { %v11850_v14 = vpop.f32.mrf.mxu1 }
0x17b2   :  { %v4026_v0 = vadd.f32 %v11850_v14, %v3947_v44  ;;  %v10680_v14 = vld [vmem:[%s15899_s11 + $0xa8] sm:$0xff] }
0x17b3   :  { %v4020_v46 = vpop.f32.mrf.mxu1 }
0x17b4   :  { %v13883_v38 = vadd.f32 %v4026_v0, %v13651_v57  ;;  %v4021_v50 = vadd.f32 %v4020_v46, %v3947_v44  ;;  %v10681_v44 = vld [vmem:[%s15899_s11 + $0xb0] sm:$0xff]  ;;  %v10679_v0 = vld [vmem:[%s15899_s11 + $0xa0] sm:$0xff]  ;;  %v10678_v46 = vld [vmem:[%s15899_s11 + $0x98] sm:$0xff] }
0x17b5   :  { %11880 = vmatprep.subr.mxu1 %v10681_v44 }
0x17b6   :  { %v13886_v49 = vadd.f32 %v4021_v50, %v13654_v59  ;;  %v4034_v51 = vsel %vm428_vm6, %v13883_v38, 0.0  ;;  %11881 = vmatpush3.msra.mxu1 %v10681_v44  ;;  %v10677_v50 = vld [vmem:[%s15899_s11 + $0x90] sm:$0xff] }
0x17b7   :  { %4035 = vadd.xlane.f32.xlu0 %v4034_v51  ;;  %11882 = vmatprep.subr.mxu1 %v10680_v14  ;;  %v10676_v51 = vld [vmem:[%s15899_s11 + $0x88] sm:$0xff] }
0x17b8   :  { %v4031_v55 = vsel %vm428_vm6, %v13886_v49, 0.0  ;;  %11883 = vmatpush3.msra.mxu1 %v10680_v14 }
0x17b9   :  { %4032 = vadd.xlane.f32.xlu1 %v4031_v55  ;;  %11884 = vmatprep.subr.mxu1 %v10679_v0  ;;  %v10675_v55 = vld [vmem:[%s15899_s11 + $0x80] sm:$0xff] }
0x17ba   :  { %11885 = vmatpush3.msra.mxu1 %v10679_v0  ;;  %v4295_v0 = vld [vmem:[%s15900_s12 + $0x10] sm:$0xff] }
0x17bb   :  { %11886 = vmatprep.subr.mxu1 %v10678_v46 }
0x17bc   :  { %11887 = vmatpush3.msra.mxu1 %v10678_v46  ;;  %v4294_v46 = vld [vmem:[%s15900_s12 + $0x8] sm:$0xff] }
0x17bd   :  { %11888 = vmatprep.subr.mxu1 %v10677_v50 }
0x17be   :  { %11889 = vmatpush3.msra.mxu1 %v10677_v50  ;;  %v4293_v50 = vld [vmem:[%s15900_s12] sm:$0xff] }
0x17bf   :  { %11890 = vmatprep.subr.mxu1 %v10676_v51 }
0x17c0   :  { %11891 = vmatpush3.msra.mxu1 %v10676_v51  ;;  %v4382_v51 = vld [vmem:[%s15950_s5] sm:$0x3] }
0x17c1   :  { %11892 = vmatprep.subr.mxu1 %v10675_v55  ;;  %vm4425_vm5 = vcmp.eq.s32.totalorder %v4382_v51, 4294967295 }
0x17c2   :  { %11893 = vmatpush3.msra.mxu1 %v10675_v55  ;;  %v4386_v55 = vrot.slane %v4382_v51, %v13235_v8 }
0x17c3   :  { %12679 = vmatprep.subr.mxu1 %v15918_v17 }
0x1840   :  { %v4036_v56 = vpop.xlane.xlu0 %4035 }
0x1841   :  { %v4038_v1 = vmul.f32 0.03125, %v4036_v56  ;;  %v10723_v56 = vld [vmem:[%s15898_s10 + $0x1] ss:$0 sm:$0xff] }
0x1842   :  { %v4033_v58 = vpop.xlane.xlu1 %4032 }
0x1843   :  { %v4040_v62 = vsub.f32 %v13883_v38, %v4038_v1  ;;  %v4037_v39 = vmul.f32 0.03125, %v4033_v58 }
0x1845   :  { %v4039_v57 = vsub.f32 %v13886_v49, %v4037_v39  ;;  %v4042_v63 = vmul.f32 %v4040_v62, %v4040_v62 }
0x1847   :  { %v4046_v59 = vsel %vm428_vm6, %v4042_v63, 0.0  ;;  %v4041_v2 = vmul.f32 %v4039_v57, %v4039_v57 }
0x1848   :  { %4047 = vadd.xlane.f32.xlu0 %v4046_v59 }
0x1849   :  { %v4043_v3 = vsel %vm428_vm6, %v4041_v2, 0.0 }
0x184a   :  { %4044 = vadd.xlane.f32.xlu1 %v4043_v3 }
0x18d1   :  { %v4048_v12 = vpop.xlane.xlu0 %4047 }
0x18d2   :  { %v4050_v13 = vmul.f32 0.03125, %v4048_v12 }
0x18d3   :  { %v4045_v15 = vpop.xlane.xlu1 %4044 }
0x18d4   :  { %v4052_v16 = vadd.f32 1e-05, %v4050_v13  ;;  %v4049_v54 = vmul.f32 0.03125, %v4045_v15 }
0x18d6   :  { %12772 = vrsqrt.f32 %v4052_v16  ;;  %v4051_v18 = vadd.f32 1e-05, %v4049_v54 }
0x18d8   :  { %12774 = vrsqrt.f32 %v4051_v18 }
0x18e3   :  { %v12773_v19 = vpop.eup %12772 }
0x18e4   :  { %v4056_v61 = vmul.f32 %v12773_v19, %v4040_v62 }
0x18e5   :  { %v12775_v47 = vpop.eup %12774 }
0x18e6   :  { %v4055_v20 = vmul.f32 %v12775_v47, %v4039_v57  ;;  %v4062_v22 = vmul.f32 %v4060_v53, %v4056_v61  ;;  %v10726_v47 = vld [vmem:[%s15896_s8 + $0x18] ss:$0 sm:$0xff] }
0x18e8   :  { %v4061_v26 = vmul.f32 %v4060_v53, %v4055_v20  ;;  %v4068_v28 = vadd.f32 %v4066_v23, %v4062_v22 }
0x18ea   :  { %v4067_v27 = vadd.f32 %v4066_v23, %v4061_v26 }
0x18ec   :  { %11859 = vmatprep.mubr.msk.f32.mxu0 %vm428_vm6, %v4067_v27 }
0x18ed   :  { %11860 = vmatmul.mubr.msk.f32.vlgmr.msra.gmra.mxu0 %vm428_vm6, %v4068_v28 }
0x19ad   :  { %v11861_v1 = vpop.f32.mrf.mxu0 }
0x19ae   :  { %v4153_v58 = vadd.f32 %v11861_v1, %v10723_v56  ;;  %v4401_v1 = vrot.slane %v4382_v51, %v13238_v9 }
0x19af   :  { %v4147_v62 = vpop.f32.mrf.mxu0 }
0x19b0   :  { %v4157_v39 = vmul.f32 %v4153_v58, %v4153_v58  ;;  %v4148_v57 = vadd.f32 %v10723_v56, %v4147_v62  ;;  %v13995_v56 = vsel %vm4425_vm5, 1.0, %v15918_v17 }
0x19b1   :  { %15951 = vst [vmem:[#allocation9_spill] sm:$0xff] %v13995_v56  ;;  %v14005_v62 = vrot.slane %v13995_v56, %v13238_v9 }
0x19b2   :  { %v4159_v63 = vmul.f32 %v4157_v39, %v4153_v58  ;;  %v4156_v59 = vmul.f32 %v4148_v57, %v4148_v57 }
0x19b3   :  { %15953 = vst [vmem:[#allocation11_spill] sm:$0xff] %v14005_v62 }
0x19b4   :  { %v4161_v2 = vmul.f32 0.044715, %v4159_v63  ;;  %v4158_v3 = vmul.f32 %v4156_v59, %v4148_v57 }
0x19b6   :  { %v4163_v10 = vadd.f32 %v4161_v2, %v4153_v58  ;;  %v4160_v11 = vmul.f32 0.044715, %v4158_v3 }
0x19b8   :  { %v4165_v52 = vmul.f32 0.7978846, %v4163_v10  ;;  %v4162_v48 = vadd.f32 %v4160_v11, %v4148_v57  ;;  %v13062_v11 = vld [vmem:[%s15944_s3] sm:$0xf]  ;;  %s13092_s3 = smov [#allocation2]  }
0x19ba   :  { %12776 = vtanh.f32 %v4165_v52  ;;  %v4164_v12 = vmul.f32 0.7978846, %v4162_v48  ;;  %v4284_v52 = vrot.slane %v13062_v11, %v13357_v30 }
0x19bc   :  { %12778 = vtanh.f32 %v4164_v12 }
0x19c7   :  { %v12777_v13 = vpop.eup %12776 }
0x19c8   :  { %v4169_v15 = vadd.f32 1.0, %v12777_v13 }
0x19c9   :  { %v12779_v16 = vpop.eup %12778 }
0x19ca   :  { %v4168_v54 = vadd.f32 1.0, %v12779_v16  ;;  %v4171_v18 = vmul.f32 0.5, %v4169_v15  ;;  %v4290_v16 = vrot.slane %v13062_v11, %v13360_v31 }
0x19cc   :  { %v4170_v19 = vmul.f32 0.5, %v4168_v54  ;;  %v4173_v61 = vmul.f32 %v4171_v18, %v4153_v58  ;;  %v14000_v58 = vrot.slane %v13995_v56, %v13235_v8 }
0x19ce   :  { %v4172_v53 = vmul.f32 %v4170_v19, %v4148_v57  ;;  %15952 = vst [vmem:[#allocation10_spill] sm:$0xff] %v14000_v58 }
0x19d0   :  { %11894 = vmatprep.mubr.f32.mxu1 %v4172_v53 }
0x19d1   :  { %11895 = vmatmul.mubr.f32.vlgmr.msra.gmra.mxu1 %v4173_v61 }
0x19d2   :  { %11913 = vmatprep.mubr.msk.f32.mxu1 %vm13089_vm1, %v15918_v17 }
0x1a91   :  { %v11896_v20 = vpop.f32.mrf.mxu1 }
0x1a92   :  { %v4250_v22 = vadd.f32 %v11896_v20, %v10726_v47  ;;  %v75_v20 = vld [vmem:[%s15901_s13] sm:$0xf] }
0x1a93   :  { %v4244_v23 = vpop.f32.mrf.mxu1 }
0x1a94   :  { %v4245_v26 = vadd.f32 %v10726_v47, %v4244_v23  ;;  %v4254_v27 = vadd.f32 %v4250_v22, %v13883_v38  ;;  %v4300_v23 = vrot.slane %v75_v20, %v13235_v8 }
0x1a96   :  { %v4258_v28 = vsel %vm428_vm6, %v4254_v27, 0.0  ;;  %v4253_v24 = vadd.f32 %v4245_v26, %v13886_v49  ;;  %v4296_v49 = vld [vmem:[%s15900_s12 + $0x18] sm:$0xff] }
0x1a97   :  { %4259 = vadd.xlane.f32.xlu0 %v4258_v28  ;;  %11897 = vmatprep.subr.mxu0 %v4296_v49 }
0x1a98   :  { %v4255_v25 = vsel %vm428_vm6, %v4253_v24, 0.0  ;;  %11898 = vmatpush3.msra.mxu0 %v4296_v49 }
0x1a99   :  { %4256 = vadd.xlane.f32.xlu1 %v4255_v25  ;;  %11899 = vmatprep.subr.mxu0 %v4295_v0 }
0x1a9a   :  { %11900 = vmatpush3.msra.mxu0 %v4295_v0 }
0x1a9b   :  { %11901 = vmatprep.subr.mxu0 %v4294_v46 }
0x1a9c   :  { %11902 = vmatpush3.msra.mxu0 %v4294_v46 }
0x1a9d   :  { %11903 = vmatprep.subr.mxu0 %v4293_v50 }
0x1a9e   :  { %11904 = vmatpush3.msra.mxu0 %v4293_v50 }
0x1a9f   :  { %11908 = vmatprep.subr.mxu0 %v15918_v17 }
0x1b20   :  { %v4260_v43 = vpop.xlane.xlu0 %4259 }
0x1b21   :  { %v4262_v29 = vmul.f32 0.03125, %v4260_v43 }
0x1b22   :  { %v4257_v32 = vpop.xlane.xlu1 %4256 }
0x1b23   :  { %v4264_v33 = vsub.f32 %v4254_v27, %v4262_v29  ;;  %v4261_v34 = vmul.f32 0.03125, %v4257_v32 }
0x1b25   :  { %v4263_v35 = vsub.f32 %v4253_v24, %v4261_v34  ;;  %v4266_v37 = vmul.f32 %v4264_v33, %v4264_v33 }
0x1b27   :  { %v4270_v44 = vsel %vm428_vm6, %v4266_v37, 0.0  ;;  %v4265_v14 = vmul.f32 %v4263_v35, %v4263_v35 }
0x1b28   :  { %4271 = vadd.xlane.f32.xlu0 %v4270_v44 }
0x1b29   :  { %v4267_v38 = vsel %vm428_vm6, %v4265_v14, 0.0  ;;  %v4460_v14 = vrot.slane %v75_v20, %v13238_v9 }
0x1b2a   :  { %4268 = vadd.xlane.f32.xlu1 %v4267_v38 }
0x1b3b   :  { %4388 = vbcast.lane.b32.xlu1 %v4386_v55, 256 }
0x1b3e   :  { %4392 = vbcast.lane.b32.xlu0 %v4386_v55, 264 }
0x1b3f   :  { %4396 = vbcast.lane.b32.xlu1 %v4386_v55, 272  ;;  %v4645_v55 = vld [vmem:[%s15902_s14] sm:$0xff] }
0x1b42   :  { %4407 = vbcast.lane.b32.xlu0 %v4401_v1, 264 }
0x1b43   :  { %4403 = vbcast.lane.b32.xlu1 %v4401_v1, 256 }
0x1b46   :  { %4432 = vbcast.lane.b32.xlu0 %v14000_v58, 256 }
0x1b47   :  { %4411 = vbcast.lane.b32.xlu1 %v4401_v1, 272 }
0x1b4a   :  { %4440 = vbcast.lane.b32.xlu0 %v14000_v58, 272 }
0x1b4b   :  { %4436 = vbcast.lane.b32.xlu1 %v14000_v58, 264 }
0x1b4e   :  { %4451 = vbcast.lane.b32.xlu0 %v14005_v62, 264 }
0x1b4f   :  { %4447 = vbcast.lane.b32.xlu1 %v14005_v62, 256 }
0x1b53   :  { %4455 = vbcast.lane.b32.xlu1 %v14005_v62, 272 }
0x1bb1   :  { %v4272_v39 = vpop.xlane.xlu0 %4271 }
0x1bb2   :  { %v4274_v57 = vmul.f32 0.03125, %v4272_v39  ;;  %v4646_v39 = vld [vmem:[%s15902_s14 + $0x8] sm:$0xff] }
0x1bb3   :  { %v4269_v63 = vpop.xlane.xlu1 %4268 }
0x1bb4   :  { %v4276_v59 = vadd.f32 1e-05, %v4274_v57  ;;  %v4273_v2 = vmul.f32 0.03125, %v4269_v63 }
0x1bb5   :  { %v4393_v47 = vpop.permute.xlu0 %4392 }
0x1bb6   :  { %12780 = vrsqrt.f32 %v4276_v59  ;;  %v4275_v3 = vadd.f32 1e-05, %v4273_v2  ;;  %vm4414_vm8 = vcmp.eq.s32.totalorder %v13267_v21, %v4393_v47 }
0x1bb7   :  { %v4389_v53 = vpop.permute.xlu1 %4388  ;;  %v4420_v25 = vsel %vm4414_vm8, 1.0, %v15918_v17 }
0x1bb8   :  { %12782 = vrsqrt.f32 %v4275_v3  ;;  %vm4413_vm7 = vcmp.eq.s32.totalorder %v13267_v21, %v4389_v53 }
0x1bb9   :  { %v4419_v28 = vsel %vm4413_vm7, 1.0, %v15918_v17  ;;  %v4408_v43 = vpop.permute.xlu0 %4407 }
0x1bba   :  { %vm4417_vm11 = vcmp.eq.s32.totalorder %v13267_v21, %v4408_v43 }
0x1bbb   :  { %v4397_v61 = vpop.permute.xlu1 %4396 }
0x1bbc   :  { %vm4415_vm9 = vcmp.eq.s32.totalorder %v13267_v21, %v4397_v61 }
0x1bbd   :  { %v4421_v32 = vsel %vm4415_vm9, 1.0, %v15918_v17  ;;  %v4433_v44 = vpop.permute.xlu0 %4432 }
0x1bbe   :  { %v4461_v0 = vmul.f32 %v4460_v14, %v4433_v44 }
0x1bbf   :  { %v4404_v26 = vpop.permute.xlu1 %4403 }
0x1bc0   :  { %vm4416_vm10 = vcmp.eq.s32.totalorder %v13267_v21, %v4404_v26 }
0x1bc1   :  { %v4441_v49 = vpop.permute.xlu0 %4440 }
0x1bc2   :  { %v4463_v59 = vmul.f32 %v4460_v14, %v4441_v49 }
0x1bc3   :  { %v12781_v10 = vpop.eup %12780  ;;  %v4412_v34 = vpop.permute.xlu1 %4411 }
0x1bc4   :  { %v4280_v48 = vmul.f32 %v12781_v10, %v4264_v33  ;;  %v4422_v33 = vsel %vm4416_vm10, 1.0, %v15918_v17  ;;  %vm4418_vm13 = vcmp.eq.s32.totalorder %v13267_v21, %v4412_v34 }
0x1bc5   :  { %v12783_v12 = vpop.eup %12782  ;;  %v4424_v37 = vsel %vm4418_vm13, 1.0, %v15918_v17  ;;  %v4452_v2 = vpop.permute.xlu0 %4451 }
0x1bc6   :  { %v4279_v13 = vmul.f32 %v12783_v12, %v4263_v35  ;;  %v4286_v15 = vmul.f32 %v4284_v52, %v4280_v48  ;;  %v4423_v35 = vsel %vm4417_vm11, 1.0, %v15918_v17 }
0x1bc7   :  { %v4437_v38 = vpop.permute.xlu1 %4436 }
0x1bc8   :  { %v4285_v54 = vmul.f32 %v4284_v52, %v4279_v13  ;;  %v4292_v19 = vadd.f32 %v4290_v16, %v4286_v15  ;;  %v4462_v46 = vmul.f32 %v4460_v14, %v4437_v38  ;;  %v4647_v13 = vld [vmem:[%s15902_s14 + $0x10] sm:$0xff] }
0x1bca   :  { %v4291_v18 = vadd.f32 %v4290_v16, %v4285_v54  ;;  %v4465_v16 = vmul.f32 %v4460_v14, %v4452_v2 }
0x1bcb   :  { %v4448_v50 = vpop.permute.xlu1 %4447 }
0x1bcc   :  { %11905 = vmatprep.mubr.msk.f32.mxu0 %vm428_vm6, %v4291_v18  ;;  %v4464_v3 = vmul.f32 %v4460_v14, %v4448_v50 }
0x1bcd   :  { %11906 = vmatmul.mubr.msk.f32.vlgmr.msra.gmra.mxu0 %vm428_vm6, %v4292_v19 }
0x1bce   :  { %11910 = vmatprep.mubr.msk.f32.mxu0 %vm13089_vm1, %v15918_v17 }
0x1bcf   :  { %v4456_v61 = vpop.permute.xlu1 %4455 }
0x1c8d   :  { %v11907_v22 = vpop.f32.mrf.mxu0 }
0x1c8e   :  { %v4379_v29 = vadd.f32 %v11907_v22, %v4300_v23 }
0x1c8f   :  { %v4373_v27 = vpop.f32.mrf.mxu0 }
0x1c90   :  { %v4374_v24 = vadd.f32 %v4373_v27, %v4300_v23 }
0x1c92   :  { %11909 = vmatpush3.msra.mxu0 %v4374_v24  ;;  %12680 = vmatpush3.msra.mxu1 %v4374_v24  ;;  %v4466_v24 = vmul.f32 %v4460_v14, %v4456_v61 }
0x1c93   :  { %11911 = vmatmul.mubr.msk.f32.vlgmr.msra.gmra.mxu0 %vm869_vm12, %v4419_v28  ;;  %11914 = vmatmul.mubr.msk.f32.vlgmr.msra.gmra.mxu1 %vm869_vm12, %v4420_v25 }
0x1c94   :  { %11919 = vmatprep.subr.mxu0 %v15918_v17  ;;  %11916 = vmatprep.mubr.msk.f32.mxu1 %vm13089_vm1, %v15918_v17 }
0x1c95   :  { %11920 = vmatpush3.msra.mxu0 %v4379_v29  ;;  %11921 = vmatprep.mubr.msk.f32.mxu0 %vm13089_vm1, %v15918_v17 }
0x1c97   :  { %11917 = vmatmul.mubr.msk.f32.gmra.mxu1 %vm869_vm12, %v4421_v32  ;;  %11922 = vmatmul.mubr.msk.f32.vlgmr.msra.gmra.mxu0 %vm869_vm12, %v4422_v33 }
0x1c98   :  { %11924 = vmatprep.mubr.msk.f32.mxu0 %vm13089_vm1, %v15918_v17 }
0x1c9b   :  { %11925 = vmatmul.mubr.msk.f32.gmra.mxu0 %vm869_vm12, %v4423_v35 }
0x1c9c   :  { %11927 = vmatprep.mubr.msk.f32.mxu0 %vm13089_vm1, %v15918_v17 }
0x1c9f   :  { %11928 = vmatmul.mubr.msk.f32.gmra.mxu0 %vm869_vm12, %v4424_v37  ;;  %vm4654_vm12 = vcmp.lt.s32.totalorder %v13267_v21, 17 }
0x1d53   :  { %v4542_v51 = vpop.f32.mrf.mxu0  ;;  %v4547_v1 = vpop.f32.mrf.mxu1 }
0x1d54   :  { %v4543_v57 = vadd.f32 %v4542_v51, %v4461_v0  ;;  %v4548_v63 = vadd.f32 %v4547_v1, %v4462_v46 }
0x1d55   :  { %v11912_v10 = vpop.f32.mrf.mxu0  ;;  %v11915_v11 = vpop.f32.mrf.mxu1 }
0x1d56   :  { %v14059_v52 = vadd.f32 %v4645_v55, %v4543_v57  ;;  %v14061_v48 = vadd.f32 %v4646_v39, %v4548_v63 }
0x1d57   :  { %v4552_v12 = vpop.f32.mrf.mxu1  ;;  %v4631_v15 = vpop.f32.mrf.mxu0 }
0x1d58   :  { %v4553_v54 = vadd.f32 %v4552_v12, %v4463_v59  ;;  %v4695_v18 = vsel %vm428_vm6, %v14059_v52, 0.0  ;;  %v4698_v19 = vsel %vm428_vm6, %v14061_v48, 0.0  ;;  %v4632_v53 = vadd.f32 %v4631_v15, %v4464_v3 }
0x1d59   :  { %4696 = vadd.xlane.f32.xlu0 %v4695_v18  ;;  %v11918_v47 = vpop.f32.mrf.mxu1  ;;  %v11923_v20 = vpop.f32.mrf.mxu0  ;;  %4699 = vadd.xlane.f32.xlu1 %v4698_v19 }
0x1d5a   :  { %v14070_v22 = vadd.f32 %v4647_v13, %v4553_v54  ;;  %v14072_v23 = vadd.f32 %v4645_v55, %v4632_v53 }
0x1d5b   :  { %v4636_v26 = vpop.f32.mrf.mxu0 }
0x1d5c   :  { %v4637_v27 = vadd.f32 %v4636_v26, %v4465_v16  ;;  %v4701_v28 = vsel %vm428_vm6, %v14070_v22, 0.0  ;;  %v4704_v29 = vsel %vm428_vm6, %v14072_v23, 0.0 }
0x1d5d   :  { %4702 = vadd.xlane.f32.xlu0 %v4701_v28  ;;  %v11926_v25 = vpop.f32.mrf.mxu0  ;;  %v4659_v28 = vld [vmem:[%s15903_s15 + $0x18] sm:$0xff] }
0x1d5e   :  { %v14076_v43 = vadd.f32 %v4646_v39, %v4637_v27  ;;  %11930 = vmatprep.subr.mxu0 %v4659_v28  ;;  %v4658_v25 = vld [vmem:[%s15903_s15 + $0x10] sm:$0xff] }
0x1d5f   :  { %v4641_v32 = vpop.f32.mrf.mxu0  ;;  %11931 = vmatpush3.msra.mxu0 %v4659_v28 }
0x1d60   :  { %v4642_v33 = vadd.f32 %v4641_v32, %v4466_v24  ;;  %v4707_v34 = vsel %vm428_vm6, %v14076_v43, 0.0  ;;  %v4663_v24 = vld [vmem:[%s15903_s15 + $0x38] sm:$0xff]  ;;  %11932 = vmatprep.subr.mxu0 %v4658_v25  ;;  %v4657_v32 = vld [vmem:[%s15903_s15 + $0x8] sm:$0xff] }
0x1d61   :  { %4708 = vadd.xlane.f32.xlu1 %v4707_v34  ;;  %4705 = vadd.xlane.f32.xlu0 %v4704_v29  ;;  %v11929_v35 = vpop.f32.mrf.mxu0  ;;  %v4662_v29 = vld [vmem:[%s15903_s15 + $0x30] sm:$0xff]  ;;  %v4656_v34 = vld [vmem:[%s15903_s15] sm:$0xff] }
0x1d62   :  { %v14082_v37 = vadd.f32 %v4647_v13, %v4642_v33  ;;  %11947 = vmatprep.subr.mxu1 %v4663_v24  ;;  %v4661_v33 = vld [vmem:[%s15903_s15 + $0x28] sm:$0xff]  ;;  %11933 = vmatpush3.msra.mxu0 %v4658_v25  ;;  %v4660_v35 = vld [vmem:[%s15903_s15 + $0x20] sm:$0xff] }
0x1d63   :  { %11948 = vmatpush3.msra.mxu1 %v4663_v24  ;;  %11934 = vmatprep.subr.mxu0 %v4657_v32 }
0x1d64   :  { %v4710_v44 = vsel %vm428_vm6, %v14082_v37, 0.0  ;;  %11949 = vmatprep.subr.mxu1 %v4662_v29  ;;  %11935 = vmatpush3.msra.mxu0 %v4657_v32 }
0x1d65   :  { %4711 = vadd.xlane.f32.xlu0 %v4710_v44  ;;  %11950 = vmatpush3.msra.mxu1 %v4662_v29  ;;  %v4667_v44 = vld [vmem:[%s15903_s15 + $0x58] sm:$0xff] }
0x1d66   :  { %11951 = vmatprep.subr.mxu1 %v4661_v33  ;;  %11936 = vmatprep.subr.mxu0 %v4656_v34 }
0x1d67   :  { %11952 = vmatpush3.msra.mxu1 %v4661_v33  ;;  %11937 = vmatpush3.msra.mxu0 %v4656_v34 }
0x1d68   :  { %11953 = vmatprep.subr.mxu1 %v4660_v35  ;;  %11964 = vmatprep.subr.mxu0 %v4667_v44 }
0x1d69   :  { %11954 = vmatpush3.msra.mxu1 %v4660_v35 }
0x1d6a   :  { %11981 = vmatprep.subr.mxu1 %v15918_v17 }
0x1de2   :  { %v4697_v14 = vpop.xlane.xlu0 %4696  ;;  %v4700_v38 = vpop.xlane.xlu1 %4699 }
0x1de3   :  { %v4713_v49 = vmul.f32 0.03125, %v4697_v14  ;;  %v4714_v0 = vmul.f32 0.03125, %v4700_v38 }
0x1de5   :  { %v14087_v46 = vsub.f32 %v14059_v52, %v4713_v49  ;;  %v14090_v50 = vsub.f32 %v14061_v48, %v4714_v0 }
0x1de6   :  { %v4703_v51 = vpop.xlane.xlu0 %4702 }
0x1de7   :  { %v4715_v55 = vmul.f32 0.03125, %v4703_v51  ;;  %v4725_v1 = vmul.f32 %v14087_v46, %v14087_v46  ;;  %v4726_v39 = vmul.f32 %v14090_v50, %v14090_v50 }
0x1de9   :  { %v14097_v57 = vsub.f32 %v14070_v22, %v4715_v55  ;;  %v4731_v63 = vsel %vm428_vm6, %v4725_v1, 0.0  ;;  %v4734_v59 = vsel %vm428_vm6, %v4726_v39, 0.0 }
0x1dea   :  { %4732 = vadd.xlane.f32.xlu1 %v4731_v63  ;;  %v4706_v2 = vpop.xlane.xlu0 %4705  ;;  %4735 = vadd.xlane.f32.xlu0 %v4734_v59  ;;  %v4709_v3 = vpop.xlane.xlu1 %4708 }
0x1deb   :  { %v4716_v10 = vmul.f32 0.03125, %v4706_v2  ;;  %v4717_v11 = vmul.f32 0.03125, %v4709_v3  ;;  %v4727_v12 = vmul.f32 %v14097_v57, %v14097_v57 }
0x1ded   :  { %v14104_v13 = vsub.f32 %v14072_v23, %v4716_v10  ;;  %v14107_v15 = vsub.f32 %v14076_v43, %v4717_v11  ;;  %v4737_v16 = vsel %vm428_vm6, %v4727_v12, 0.0 }
0x1dee   :  { %4738 = vadd.xlane.f32.xlu1 %v4737_v16  ;;  %v4712_v54 = vpop.xlane.xlu0 %4711 }
0x1def   :  { %v4718_v18 = vmul.f32 0.03125, %v4712_v54  ;;  %v4728_v19 = vmul.f32 %v14104_v13, %v14104_v13  ;;  %v4729_v53 = vmul.f32 %v14107_v15, %v14107_v15 }
0x1df1   :  { %v14115_v61 = vsub.f32 %v14082_v37, %v4718_v18  ;;  %v4740_v47 = vsel %vm428_vm6, %v4728_v19, 0.0  ;;  %v4743_v20 = vsel %vm428_vm6, %v4729_v53, 0.0  ;;  %v14153_v18 = vld [vmem:[%s15904_s16] sm:$0xff] }
0x1df2   :  { %4741 = vadd.xlane.f32.xlu0 %v4740_v47  ;;  %4744 = vadd.xlane.f32.xlu1 %v4743_v20  ;;  %v4776_v53 = vrot.slane %v14153_v18, %v13235_v8 }
0x1df3   :  { %v4730_v26 = vmul.f32 %v14115_v61, %v14115_v61 }
0x1df5   :  { %v4746_v27 = vsel %vm428_vm6, %v4730_v26, 0.0 }
0x1df6   :  { %4747 = vadd.xlane.f32.xlu0 %v4746_v27  ;;  %v4786_v27 = vrot.slane %v14153_v18, %v13238_v9 }
0x1e73   :  { %v4736_v14 = vpop.xlane.xlu0 %4735  ;;  %v4733_v38 = vpop.xlane.xlu1 %4732 }
0x1e74   :  { %v4750_v49 = vmul.f32 0.03125, %v4736_v14  ;;  %v4749_v0 = vmul.f32 0.03125, %v4733_v38 }
0x1e76   :  { %v4756_v51 = vadd.f32 1e-05, %v4750_v49  ;;  %v4755_v55 = vadd.f32 1e-05, %v4749_v0  ;;  %v4666_v49 = vld [vmem:[%s15903_s15 + $0x50] sm:$0xff] }
0x1e77   :  { %v4739_v1 = vpop.xlane.xlu1 %4738 }
0x1e78   :  { %12784 = vrsqrt.f32 %v4756_v51  ;;  %v4751_v39 = vmul.f32 0.03125, %v4739_v1  ;;  %v4665_v51 = vld [vmem:[%s15903_s15 + $0x48] sm:$0xff] }
0x1e79   :  { %12786 = vrsqrt.f32 %v4755_v55 }
0x1e7a   :  { %v4757_v63 = vadd.f32 1e-05, %v4751_v39 }
0x1e7b   :  { %v4742_v59 = vpop.xlane.xlu0 %4741  ;;  %v4745_v2 = vpop.xlane.xlu1 %4744 }
0x1e7c   :  { %12788 = vrsqrt.f32 %v4757_v63  ;;  %v4752_v3 = vmul.f32 0.03125, %v4742_v59  ;;  %v4753_v10 = vmul.f32 0.03125, %v4745_v2 }
0x1e7e   :  { %v4758_v11 = vadd.f32 1e-05, %v4752_v3  ;;  %v4759_v12 = vadd.f32 1e-05, %v4753_v10 }
0x1e7f   :  { %v4748_v16 = vpop.xlane.xlu0 %4747 }
0x1e80   :  { %12790 = vrsqrt.f32 %v4758_v11  ;;  %v4754_v54 = vmul.f32 0.03125, %v4748_v16  ;;  %v4913_v16 = vrot.slane %v14153_v18, %v13360_v31 }
0x1e81   :  { %12792 = vrsqrt.f32 %v4759_v12 }
0x1e82   :  { %v4760_v19 = vadd.f32 1e-05, %v4754_v54 }
0x1e84   :  { %12794 = vrsqrt.f32 %v4760_v19 }
0x1e85   :  { %v12785_v47 = vpop.eup %12784 }
0x1e86   :  { %v12787_v20 = vpop.eup %12786  ;;  %v4768_v26 = vmul.f32 %v12785_v47, %v14090_v50 }
0x1e87   :  { %v4767_v28 = vmul.f32 %v12787_v20, %v14087_v46 }
0x1e88   :  { %v4778_v24 = vmul.f32 %v4776_v53, %v4768_v26 }
0x1e89   :  { %v12789_v25 = vpop.eup %12788  ;;  %v4777_v29 = vmul.f32 %v4776_v53, %v4767_v28 }
0x1e8a   :  { %v4788_v32 = vadd.f32 %v4786_v27, %v4778_v24  ;;  %v4769_v33 = vmul.f32 %v12789_v25, %v14097_v57 }
0x1e8b   :  { %v4787_v34 = vadd.f32 %v4786_v27, %v4777_v29  ;;  %v4796_v29 = vrot.slane %v14153_v18, %v13357_v30 }
0x1e8c   :  { %v4779_v35 = vmul.f32 %v4776_v53, %v4769_v33 }
0x1e8d   :  { %v12791_v14 = vpop.eup %12790  ;;  %11938 = vmatprep.mubr.msk.f32.mxu0 %vm428_vm6, %v4787_v34  ;;  %11955 = vmatprep.mubr.msk.f32.mxu1 %vm428_vm6, %v4787_v34 }
0x1e8e   :  { %v12793_v38 = vpop.eup %12792  ;;  %11939 = vmatmul.mubr.msk.f32.vlgmr.msra.gmra.mxu0 %vm428_vm6, %v4788_v32  ;;  %11956 = vmatmul.mubr.msk.f32.vlgmr.msra.gmra.mxu1 %vm428_vm6, %v4788_v32  ;;  %v4789_v50 = vadd.f32 %v4786_v27, %v4779_v35  ;;  %v4770_v46 = vmul.f32 %v12791_v14, %v14104_v13 }
0x1e8f   :  { %v4771_v57 = vmul.f32 %v12793_v38, %v14107_v15  ;;  %11965 = vmatpush3.msra.mxu0 %v4667_v44  ;;  %v4664_v44 = vld [vmem:[%s15903_s15 + $0x40] sm:$0xff] }
0x1e90   :  { %11941 = vmatprep.mubr.msk.f32.mxu0 %vm428_vm6, %v4789_v50  ;;  %11958 = vmatprep.mubr.msk.f32.mxu1 %vm428_vm6, %v4789_v50  ;;  %v4780_v0 = vmul.f32 %v4776_v53, %v4770_v46 }
0x1e91   :  { %v12795_v55 = vpop.eup %12794  ;;  %v4781_v1 = vmul.f32 %v4776_v53, %v4771_v57  ;;  %11966 = vmatprep.subr.mxu0 %v4666_v49 }
0x1e92   :  { %v4790_v13 = vadd.f32 %v4786_v27, %v4780_v0  ;;  %11967 = vmatpush3.msra.mxu0 %v4666_v49  ;;  %v4772_v39 = vmul.f32 %v12795_v55, %v14115_v61 }
0x1e93   :  { %v4791_v63 = vadd.f32 %v4786_v27, %v4781_v1  ;;  %11968 = vmatprep.subr.mxu0 %v4665_v51 }
0x1e94   :  { %11942 = vmatmul.mubr.msk.f32.gmra.mxu0 %vm428_vm6, %v4790_v13  ;;  %11959 = vmatmul.mubr.msk.f32.gmra.mxu1 %vm428_vm6, %v4790_v13  ;;  %v4782_v15 = vmul.f32 %v4776_v53, %v4772_v39 }
0x1e95   :  { %11944 = vmatprep.mubr.msk.f32.mxu0 %vm428_vm6, %v4791_v63  ;;  %11961 = vmatprep.mubr.msk.f32.mxu1 %vm428_vm6, %v4791_v63 }
0x1e96   :  { %v4792_v59 = vadd.f32 %v4786_v27, %v4782_v15  ;;  %11969 = vmatpush3.msra.mxu0 %v4665_v51 }
0x1e97   :  { %11970 = vmatprep.subr.mxu0 %v4664_v44 }
0x1e98   :  { %11945 = vmatmul.mubr.msk.f32.gmra.mxu0 %vm428_vm6, %v4792_v59  ;;  %11962 = vmatmul.mubr.msk.f32.gmra.mxu1 %vm428_vm6, %v4792_v59 }
0x1e99   :  { %11972 = vmatprep.mubr.msk.f32.mxu0 %vm428_vm6, %v4787_v34  ;;  %11971 = vmatpush3.msra.mxu0 %v4664_v44 }
0x1e9a   :  { %11996 = vmatprep.subr.mxu0 %v15918_v17  ;;  %11987 = vmatprep.mubr.msk.f32.mxu1 %vm13089_vm1, %v15918_v17 }
0x1e9c   :  { %11973 = vmatmul.mubr.msk.f32.vlgmr.msra.gmra.mxu0 %vm428_vm6, %v4788_v32 }
0x1e9d   :  { %11975 = vmatprep.mubr.msk.f32.mxu0 %vm428_vm6, %v4789_v50 }
0x1ea0   :  { %11976 = vmatmul.mubr.msk.f32.gmra.mxu0 %vm428_vm6, %v4790_v13 }
0x1ea1   :  { %11978 = vmatprep.mubr.msk.f32.mxu0 %vm428_vm6, %v4791_v63  ;;  %v5012_v63 = vrot.slane %v14153_v18, %v13374_v40 }
0x1ea4   :  { %11979 = vmatmul.mubr.msk.f32.gmra.mxu0 %vm428_vm6, %v4792_v59 }
0x1ea5   :  { %12002 = vmatprep.mubr.msk.f32.mxu0 %vm13089_vm1, %v15918_v17 }
0x1f4e   :  { %v11940_v61 = vpop.f32.mrf.mxu0  ;;  %v11957_v2 = vpop.f32.mrf.mxu1 }
0x1f4f   :  { %v14208_v24 = vadd.f32 %v11957_v2, %v4913_v16  ;;  %v14231_v46 = vadd.f32 %v11940_v61, %v4796_v29 }
0x1f50   :  { %v4881_v3 = vpop.f32.mrf.mxu0  ;;  %v4980_v10 = vpop.f32.mrf.mxu1 }
0x1f51   :  { %v14217_v34 = vadd.f32 %v4881_v3, %v4796_v29  ;;  %v14222_v35 = vadd.f32 %v4980_v10, %v4913_v16  ;;  %v5109_v1 = vmul.f32 %v14231_v46, %v13377_v41 }
0x1f53   :  { %v5108_v49 = vmul.f32 %v14217_v34, %v13377_v41  ;;  %v5395_v10 = vmul.f32 %v14217_v34, %v13380_v42 }
0x1f54   :  { %v11943_v11 = vpop.f32.mrf.mxu0  ;;  %v11960_v12 = vpop.f32.mrf.mxu1 }
0x1f55   :  { %v14224_v14 = vadd.f32 %v11943_v11, %v4796_v29  ;;  %v14227_v38 = vadd.f32 %v11960_v12, %v4913_v16 }
0x1f56   :  { %v4891_v54 = vpop.f32.mrf.mxu0  ;;  %v4990_v19 = vpop.f32.mrf.mxu1 }
0x1f57   :  { %v14199_v53 = vadd.f32 %v4990_v19, %v4913_v16  ;;  %v5111_v57 = vmul.f32 %v14224_v14, %v13377_v41  ;;  %v14247_v55 = vadd.f32 %v4891_v54, %v4796_v29  ;;  %v5398_v11 = vmul.f32 %v14224_v14, %v13380_v42 }
0x1f58   :  { %v11946_v47 = vpop.f32.mrf.mxu0  ;;  %v11963_v20 = vpop.f32.mrf.mxu1 }
0x1f59   :  { %v14201_v26 = vadd.f32 %v11963_v20, %v4913_v16  ;;  %11982 = vmatpush3.xpose.msk.msra.mxu1 %vm428_vm6, %v14199_v53  ;;  %v14255_v13 = vadd.f32 %v11946_v47, %v4796_v29  ;;  %v5110_v44 = vmul.f32 %v14247_v55, %v13377_v41 }
0x1f5a   :  { %v4901_v27 = vpop.f32.mrf.mxu0  ;;  %v5000_v28 = vpop.f32.mrf.mxu1  ;;  %11983 = vmatprep.subr.mxu1 %v15918_v17 }
0x1f5b   :  { %11997 = vmatpush3.xpose.msk.msra.mxu0 %vm428_vm6, %v14201_v26  ;;  %v14213_v32 = vadd.f32 %v5000_v28, %v4913_v16  ;;  %v14240_v0 = vadd.f32 %v4901_v27, %v4796_v29  ;;  %v5113_v18 = vmul.f32 %v14255_v13, %v13377_v41  ;;  %v5396_v27 = vmul.f32 %v14231_v46, %v13380_v42 }
0x1f5c   :  { %v11974_v25 = vpop.f32.mrf.mxu0  ;;  %11998 = vmatprep.subr.mxu0 %v15918_v17 }
0x1f5d   :  { %11984 = vmatpush3.xpose.msk.msra.mxu1 %vm428_vm6, %v14208_v24  ;;  %v5112_v39 = vmul.f32 %v14240_v0, %v13377_v41  ;;  %v14284_v61 = vadd.f32 %v11974_v25, %v5012_v63  ;;  %v5399_v29 = vmul.f32 %v14240_v0, %v13380_v42 }
0x1f5e   :  { %v5079_v33 = vpop.f32.mrf.mxu0  ;;  %11985 = vmatprep.subr.mxu1 %v15918_v17 }
0x1f5f   :  { %11999 = vmatpush3.xpose.msk.msra.mxu0 %vm428_vm6, %v14213_v32  ;;  %v14304_v16 = vadd.f32 %v5079_v33, %v5012_v63  ;;  %v5658_v19 = vmul.f32 %v14284_v61, %v13380_v42 }
0x1f60   :  { %12000 = vmatprep.subr.mxu0 %v15918_v17  ;;  %v11977_v50 = vpop.f32.mrf.mxu0 }
0x1f61   :  { %11986 = vmatpush3.xpose.msk.msra.mxu1 %vm428_vm6, %v14222_v35  ;;  %v14315_v20 = vadd.f32 %v11977_v50, %v5012_v63  ;;  %v5657_v28 = vmul.f32 %v14304_v16, %v13380_v42  ;;  %v5397_v50 = vmul.f32 %v14247_v55, %v13380_v42 }
0x1f62   :  { %12011 = vmatprep.subr.mxu1 %v15918_v17  ;;  %v5089_v51 = vpop.f32.mrf.mxu0 }
0x1f63   :  { %12001 = vmatpush3.xpose.msk.msra.mxu0 %vm428_vm6, %v14227_v38  ;;  %v14275_v59 = vadd.f32 %v5089_v51, %v5012_v63  ;;  %v5660_v33 = vmul.f32 %v14315_v20, %v13380_v42 }
0x1f64   :  { %12026 = vmatprep.subr.mxu0 %v15918_v17  ;;  %11988 = vmatmul.mubr.msk.f32.vlgmr.msra.gmra.mxu1 %vm428_vm6, %v5108_v49  ;;  %v11980_v15 = vpop.f32.mrf.mxu0  ;;  %v5400_v49 = vmul.f32 %v14255_v13, %v13380_v42 }
0x1f65   :  { %12012 = vmatpush3.xpose.msk.msra.mxu1 %vm428_vm6, %v14199_v53  ;;  %11990 = vmatprep.mubr.msk.f32.mxu1 %vm13089_vm1, %v15918_v17  ;;  %v14286_v2 = vadd.f32 %v11980_v15, %v5012_v63  ;;  %v5659_v12 = vmul.f32 %v14275_v59, %v13380_v42 }
0x1f66   :  { %12003 = vmatmul.mubr.msk.f32.vlgmr.msra.gmra.mxu0 %vm428_vm6, %v5111_v57  ;;  %12013 = vmatprep.subr.mxu1 %v15918_v17  ;;  %v5099_v3 = vpop.f32.mrf.mxu0 }
0x1f67   :  { %12027 = vmatpush3.xpose.msk.msra.mxu0 %vm428_vm6, %v14201_v26  ;;  %12005 = vmatprep.mubr.msk.f32.mxu0 %vm13089_vm1, %v15918_v17  ;;  %v14306_v54 = vadd.f32 %v5099_v3, %v5012_v63  ;;  %v5662_v47 = vmul.f32 %v14286_v2, %v13380_v42 }
0x1f68   :  { %11991 = vmatmul.mubr.msk.f32.gmra.mxu1 %vm428_vm6, %v5109_v1  ;;  %12028 = vmatprep.subr.mxu0 %v15918_v17 }
0x1f69   :  { %12014 = vmatpush3.xpose.msk.msra.mxu1 %vm428_vm6, %v14208_v24  ;;  %11993 = vmatprep.mubr.msk.f32.mxu1 %vm13089_vm1, %v15918_v17  ;;  %v5661_v25 = vmul.f32 %v14306_v54, %v13380_v42 }
0x1f6a   :  { %12006 = vmatmul.mubr.msk.f32.gmra.mxu0 %vm428_vm6, %v5112_v39  ;;  %12015 = vmatprep.subr.mxu1 %v15918_v17 }
0x1f6b   :  { %12029 = vmatpush3.xpose.msk.msra.mxu0 %vm428_vm6, %v14213_v32  ;;  %12008 = vmatprep.mubr.msk.f32.mxu0 %vm13089_vm1, %v15918_v17 }
0x1f6c   :  { %11994 = vmatmul.mubr.msk.f32.gmra.mxu1 %vm428_vm6, %v5110_v44  ;;  %12030 = vmatprep.subr.mxu0 %v15918_v17 }
0x1f6d   :  { %12016 = vmatpush3.xpose.msk.msra.mxu1 %vm428_vm6, %v14222_v35  ;;  %12017 = vmatprep.mubr.msk.f32.mxu1 %vm13089_vm1, %v15918_v17 }
0x1f6e   :  { %12009 = vmatmul.mubr.msk.f32.gmra.mxu0 %vm428_vm6, %v5113_v18  ;;  %12041 = vmatprep.subr.mxu1 %v15918_v17 }
0x1f6f   :  { %12031 = vmatpush3.xpose.msk.msra.mxu0 %vm428_vm6, %v14227_v38  ;;  %12032 = vmatprep.mubr.msk.f32.mxu0 %vm13089_vm1, %v15918_v17 }
0x1f70   :  { %12018 = vmatmul.mubr.msk.f32.vlgmr.msra.gmra.mxu1 %vm428_vm6, %v5395_v10  ;;  %12056 = vmatprep.subr.mxu0 %v15918_v17 }
0x1f71   :  { %12042 = vmatpush3.msra.mxu1 %v5659_v12  ;;  %12020 = vmatprep.mubr.msk.f32.mxu1 %vm13089_vm1, %v15918_v17 }
0x1f72   :  { %12033 = vmatmul.mubr.msk.f32.vlgmr.msra.gmra.mxu0 %vm428_vm6, %v5398_v11  ;;  %12043 = vmatprep.subr.mxu1 %v15918_v17 }
0x1f73   :  { %12044 = vmatpush3.msra.mxu1 %v5658_v19  ;;  %12057 = vmatpush3.msra.mxu0 %v5662_v47 }
0x1f74   :  { %12021 = vmatmul.mubr.msk.f32.gmra.mxu1 %vm428_vm6, %v5396_v27  ;;  %12045 = vmatprep.subr.mxu1 %v15918_v17 }
0x1f75   :  { %12058 = vmatprep.subr.mxu0 %v15918_v17  ;;  %12035 = vmatprep.mubr.msk.f32.mxu0 %vm13089_vm1, %v15918_v17 }
0x1f76   :  { %12046 = vmatpush3.msra.mxu1 %v5657_v28  ;;  %12059 = vmatpush3.msra.mxu0 %v5661_v25  ;;  %v14355_v28 = vsel %vm4654_vm12, 0.0, %v13090_v60 }
0x1f77   :  { %12036 = vmatmul.mubr.msk.f32.gmra.mxu0 %vm428_vm6, %v5399_v29  ;;  %12060 = vmatprep.subr.mxu0 %v15918_v17 }
0x1f78   :  { %12023 = vmatprep.mubr.msk.f32.mxu1 %vm13089_vm1, %v15918_v17  ;;  %12061 = vmatpush3.msra.mxu0 %v5660_v33 }
0x1f79   :  { %12024 = vmatmul.mubr.msk.f32.gmra.mxu1 %vm428_vm6, %v5397_v50  ;;  %12038 = vmatprep.mubr.msk.f32.mxu0 %vm13089_vm1, %v15918_v17 }
0x1f7a   :  { %12047 = vmatprep.mubr.msk.f32.mxu1 %vm13089_vm1, %v15918_v17  ;;  %12071 = vmatprep.subr.mxu1 %v15918_v17 }
0x1f7b   :  { %12039 = vmatmul.mubr.msk.f32.gmra.mxu0 %vm428_vm6, %v5400_v49  ;;  %12086 = vmatprep.subr.mxu0 %v15918_v17 }
0x1f7c   :  { %12062 = vmatprep.mubr.msk.f32.mxu0 %vm13089_vm1, %v15918_v17 }
0x2024   :  { %v5198_v57 = vpop.f32.mrf.mxu1 }
0x2026   :  { %v5296_v51 = vpop.f32.mrf.mxu0  ;;  %v11989_v1 = vpop.f32.mrf.mxu1 }
0x2027   :  { %v5313_v21 = vmul.f32 0.35355338, %v5296_v51 }
0x2028   :  { %v12004_v39 = vpop.f32.mrf.mxu0  ;;  %v5203_v63 = vpop.f32.mrf.mxu1 }
0x202a   :  { %v5301_v15 = vpop.f32.mrf.mxu0  ;;  %v11992_v44 = vpop.f32.mrf.mxu1 }
0x202c   :  { %v12007_v18 = vpop.f32.mrf.mxu0  ;;  %v5208_v3 = vpop.f32.mrf.mxu1 }
0x202e   :  { %v5306_v10 = vpop.f32.mrf.mxu0  ;;  %v11995_v11 = vpop.f32.mrf.mxu1 }
0x2030   :  { %v12010_v12 = vpop.f32.mrf.mxu0  ;;  %v5476_v19 = vpop.f32.mrf.mxu1 }
0x2031   :  { %v5579_v47 = vmul.f32 0.35355338, %v5476_v19 }
0x2032   :  { %v5565_v27 = vpop.f32.mrf.mxu0  ;;  %v12019_v25 = vpop.f32.mrf.mxu1 }
0x2033   :  { %v5582_v29 = vmul.f32 0.35355338, %v5565_v27  ;;  %v5585_v50 = vadd.f32 %v5579_v47, %v14355_v28  ;;  %v5310_v47 = vmul.f32 0.35355338, %v5198_v57 }
0x2034   :  { %v12034_v33 = vpop.f32.mrf.mxu0  ;;  %v5481_v49 = vpop.f32.mrf.mxu1 }
0x2035   :  { %v5580_v1 = vmul.f32 0.35355338, %v5481_v49  ;;  %v5591_v39 = vsel %vm5322_vm14, %v5585_v50, -inf  ;;  %v5588_v44 = vadd.f32 %v5582_v29, %v14355_v28  ;;  %v5316_v57 = vadd.f32 %v5310_v47, %v14355_v28 }
0x2036   :  { %5592 = vmax.xlane.f32.xlu1 %v5591_v39  ;;  %v12022_v18 = vpop.f32.mrf.mxu1  ;;  %v5315_v47 = vmul.f32 0.35355338, %v5306_v10 }
0x2037   :  { %v5570_v11 = vpop.f32.mrf.mxu0  ;;  %v5586_v12 = vadd.f32 %v5580_v1, %v14355_v28  ;;  %v5600_v25 = vsel %vm5322_vm14, %v5588_v44, -inf  ;;  %v5323_v51 = vsel %vm5322_vm14, %v5316_v57, -inf }
0x2038   :  { %v5583_v19 = vmul.f32 0.35355338, %v5570_v11 }
0x2039   :  { %v5486_v60 = vpop.f32.mrf.mxu1  ;;  %v12037_v17 = vpop.f32.mrf.mxu0  ;;  %v5594_v27 = vsel %vm5322_vm14, %v5586_v12, -inf }
0x203a   :  { %v5581_v33 = vmul.f32 0.35355338, %v5486_v60  ;;  %5595 = vmax.xlane.f32.xlu0 %v5594_v27  ;;  %5601 = vmax.xlane.f32.xlu1 %v5600_v25  ;;  %v5589_v49 = vadd.f32 %v5583_v19, %v14355_v28  ;;  %v5311_v17 = vmul.f32 0.35355338, %v5203_v63  ;;  %v5314_v27 = vmul.f32 0.35355338, %v5301_v15 }
0x203b   :  { %v12025_v5 = vpop.f32.mrf.mxu1  ;;  %v5575_v29 = vpop.f32.mrf.mxu0  ;;  %v5319_v19 = vadd.f32 %v5313_v21, %v14355_v28  ;;  %v5312_v25 = vmul.f32 0.35355338, %v5208_v3  ;;  %v5321_v3 = vadd.f32 %v5315_v47, %v14355_v28 }
0x203c   :  { %v5584_v39 = vmul.f32 0.35355338, %v5575_v29  ;;  %v5587_v18 = vadd.f32 %v5581_v33, %v14355_v28  ;;  %v5603_v11 = vsel %vm5322_vm14, %v5589_v49, -inf  ;;  %v5317_v33 = vadd.f32 %v5311_v17, %v14355_v28 }
0x203d   :  { %v12040_v1 = vpop.f32.mrf.mxu0  ;;  %v5332_v63 = vsel %vm5322_vm14, %v5319_v19, -inf  ;;  %v5320_v29 = vadd.f32 %v5314_v27, %v14355_v28 }
0x203e   :  { %v5597_v56 = vsel %vm5322_vm14, %v5587_v18, -inf  ;;  %5604 = vmax.xlane.f32.xlu1 %v5603_v11  ;;  %v5590_v60 = vadd.f32 %v5584_v39, %v14355_v28  ;;  %v5326_v39 = vsel %vm5322_vm14, %v5317_v33, -inf  ;;  %v5338_v1 = vsel %vm5322_vm14, %v5321_v3, -inf }
0x203f   :  { %5598 = vmax.xlane.f32.xlu0 %v5597_v56  ;;  %v5318_v56 = vadd.f32 %v5312_v25, %v14355_v28  ;;  %v5335_v21 = vsel %vm5322_vm14, %v5320_v29, -inf }
0x2040   :  { %v5606_v5 = vsel %vm5322_vm14, %v5590_v60, -inf }
0x2041   :  { %v5329_v15 = vsel %vm5322_vm14, %v5318_v56, -inf }
0x2042   :  { %5607 = vmax.xlane.f32.xlu1 %v5606_v5 }
0x2043   :  { %5324 = vmax.xlane.f32.xlu0 %v5323_v51 }
0x2046   :  { %5333 = vmax.xlane.f32.xlu1 %v5332_v63 }
0x2047   :  { %5327 = vmax.xlane.f32.xlu0 %v5326_v39 }
0x204a   :  { %5336 = vmax.xlane.f32.xlu1 %v5335_v21 }
0x204b   :  { %5330 = vmax.xlane.f32.xlu0 %v5329_v15 }
0x204f   :  { %5339 = vmax.xlane.f32.xlu0 %v5338_v1 }
0x20bf   :  { %v5593_v11 = vpop.xlane.xlu1 %5592 }
0x20c0   :  { %v5609_v17 = vsub.f32 %v5585_v50, %v5593_v11 }
0x20c2   :  { %v5615_v10 = vmul.f32 1.442695, %v5609_v17 }
0x20c3   :  { %v5596_v27 = vpop.xlane.xlu0 %5595  ;;  %v5602_v5 = vpop.xlane.xlu1 %5601 }
0x20c4   :  { %12796 = vpow2.f32 %v5615_v10  ;;  %v5610_v51 = vsub.f32 %v5586_v12, %v5596_v27  ;;  %v5612_v25 = vsub.f32 %v5588_v44, %v5602_v5 }
0x20c6   :  { %v5617_v63 = vmul.f32 1.442695, %v5610_v51  ;;  %v5621_v39 = vmul.f32 1.442695, %v5612_v25 }
0x20c7   :  { %v5605_v62 = vpop.xlane.xlu1 %5604 }
0x20c8   :  { %12798 = vpow2.f32 %v5617_v63  ;;  %v5599_v58 = vpop.xlane.xlu0 %5598  ;;  %v5613_v21 = vsub.f32 %v5589_v49, %v5605_v62 }
0x20c9   :  { %12800 = vpow2.f32 %v5621_v39  ;;  %v5611_v47 = vsub.f32 %v5587_v18, %v5599_v58 }
0x20ca   :  { %v5623_v15 = vmul.f32 1.442695, %v5613_v21 }
0x20cb   :  { %v5619_v42 = vmul.f32 1.442695, %v5611_v47  ;;  %v5608_v40 = vpop.xlane.xlu1 %5607 }
0x20cc   :  { %12802 = vpow2.f32 %v5623_v15  ;;  %v5325_v1 = vpop.xlane.xlu0 %5324  ;;  %v5614_v50 = vsub.f32 %v5590_v60, %v5608_v40 }
0x20cd   :  { %12804 = vpow2.f32 %v5619_v42  ;;  %v5341_v11 = vsub.f32 %v5316_v57, %v5325_v1 }
0x20ce   :  { %v5625_v17 = vmul.f32 1.442695, %v5614_v50 }
0x20cf   :  { %v5347_v10 = vmul.f32 1.442695, %v5341_v11  ;;  %v5334_v12 = vpop.xlane.xlu1 %5333 }
0x20d0   :  { %12806 = vpow2.f32 %v5625_v17  ;;  %v5328_v44 = vpop.xlane.xlu0 %5327  ;;  %v5344_v27 = vsub.f32 %v5319_v19, %v5334_v12 }
0x20d1   :  { %v14381_v5 = vpop.eup %12796  ;;  %12808 = vpow2.f32 %v5347_v10  ;;  %v5342_v62 = vsub.f32 %v5317_v33, %v5328_v44 }
0x20d2   :  { %v5353_v49 = vmul.f32 1.442695, %v5344_v27  ;;  %v5627_v58 = vsel %vm5322_vm14, %v14381_v5, 0.0 }
0x20d3   :  { %v5349_v18 = vmul.f32 1.442695, %v5342_v62  ;;  %5628 = vadd.xlane.f32.xlu1 %v5627_v58  ;;  %v5337_v51 = vpop.xlane.xlu1 %5336 }
0x20d4   :  { %12810 = vpow2.f32 %v5353_v49  ;;  %v5331_v40 = vpop.xlane.xlu0 %5330  ;;  %v5345_v42 = vsub.f32 %v5320_v29, %v5337_v51 }
0x20d5   :  { %v14385_v57 = vpop.eup %12798  ;;  %12812 = vpow2.f32 %v5349_v18  ;;  %v5343_v60 = vsub.f32 %v5318_v56, %v5331_v40 }
0x20d6   :  { %v14387_v25 = vpop.eup %12800  ;;  %v5355_v19 = vmul.f32 1.442695, %v5345_v42  ;;  %v5630_v33 = vsel %vm5322_vm14, %v14385_v57, 0.0 }
0x20d7   :  { %v5351_v63 = vmul.f32 1.442695, %v5343_v60  ;;  %5631 = vadd.xlane.f32.xlu0 %v5630_v33  ;;  %v5636_v39 = vsel %vm5322_vm14, %v14387_v25, 0.0 }
0x20d8   :  { %12814 = vpow2.f32 %v5355_v19  ;;  %v5340_v21 = vpop.xlane.xlu0 %5339  ;;  %5637 = vadd.xlane.f32.xlu1 %v5636_v39 }
0x20d9   :  { %v14393_v47 = vpop.eup %12802  ;;  %12816 = vpow2.f32 %v5351_v63  ;;  %v5346_v29 = vsub.f32 %v5321_v3, %v5340_v21 }
0x20da   :  { %v14395_v15 = vpop.eup %12804  ;;  %v5639_v56 = vsel %vm5322_vm14, %v14393_v47, 0.0 }
0x20db   :  { %v5357_v1 = vmul.f32 1.442695, %v5346_v29  ;;  %v5633_v50 = vsel %vm5322_vm14, %v14395_v15, 0.0 }
0x20dc   :  { %5634 = vadd.xlane.f32.xlu0 %v5633_v50  ;;  %5640 = vadd.xlane.f32.xlu1 %v5639_v56  ;;  %v5391_v50 = vmul.f32 %v14275_v59, %v13377_v41 }
0x20dd   :  { %v14401_v11 = vpop.eup %12806  ;;  %12818 = vpow2.f32 %v5357_v1 }
0x20de   :  { %v14403_v17 = vpop.eup %12808  ;;  %v5642_v10 = vsel %vm5322_vm14, %v14401_v11, 0.0 }
0x20df   :  { %v5359_v3 = vsel %vm5322_vm14, %v14403_v17, 0.0 }
0x20e0   :  { %5360 = vadd.xlane.f32.xlu0 %v5359_v3  ;;  %5643 = vadd.xlane.f32.xlu1 %v5642_v10 }
0x20e1   :  { %v14409_v12 = vpop.eup %12810 }
0x20e2   :  { %v14411_v44 = vpop.eup %12812  ;;  %v5368_v27 = vsel %vm5322_vm14, %v14409_v12, 0.0 }
0x20e3   :  { %v5362_v62 = vsel %vm5322_vm14, %v14411_v44, 0.0 }
0x20e4   :  { %5363 = vadd.xlane.f32.xlu0 %v5362_v62  ;;  %5369 = vadd.xlane.f32.xlu1 %v5368_v27  ;;  %v5390_v62 = vmul.f32 %v14284_v61, %v13377_v41 }
0x20e5   :  { %v14417_v49 = vpop.eup %12814 }
0x20e6   :  { %v14419_v58 = vpop.eup %12816  ;;  %v5371_v18 = vsel %vm5322_vm14, %v14417_v49, 0.0 }
0x20e7   :  { %v5365_v51 = vsel %vm5322_vm14, %v14419_v58, 0.0 }
0x20e8   :  { %5366 = vadd.xlane.f32.xlu0 %v5365_v51  ;;  %5372 = vadd.xlane.f32.xlu1 %v5371_v18  ;;  %v15954_v18 = vmov 0.0  }
0x20ea   :  { %v14425_v40 = vpop.eup %12818 }
0x20eb   :  { %v5374_v42 = vsel %vm5322_vm14, %v14425_v40, 0.0 }
0x20ec   :  { %5375 = vadd.xlane.f32.xlu0 %v5374_v42 }
0x215c   :  { %v5629_v60 = vpop.xlane.xlu1 %5628 }
0x215d   :  { %12820 = vrcp.f32 %v5629_v60  ;;  %v5389_v60 = vmul.f32 %v14304_v16, %v13377_v41 }
0x2160   :  { %v5632_v19 = vpop.xlane.xlu0 %5631 }
0x2161   :  { %12822 = vrcp.f32 %v5632_v19  ;;  %v5638_v33 = vpop.xlane.xlu1 %5637 }
0x2162   :  { %12824 = vrcp.f32 %v5638_v33 }
0x2165   :  { %v5635_v63 = vpop.xlane.xlu0 %5634  ;;  %v5641_v39 = vpop.xlane.xlu1 %5640 }
0x2166   :  { %12826 = vrcp.f32 %v5635_v63  ;;  %v5394_v63 = vmul.f32 %v14286_v2, %v13377_v41 }
0x2167   :  { %12828 = vrcp.f32 %v5641_v39 }
0x2169   :  { %v5361_v21 = vpop.xlane.xlu0 %5360  ;;  %v5644_v29 = vpop.xlane.xlu1 %5643 }
0x216a   :  { %v12821_v56 = vpop.eup %12820  ;;  %12830 = vrcp.f32 %v5361_v21 }
0x216b   :  { %v5651_v1 = vmul.f32 %v12821_v56, %v14381_v5  ;;  %12832 = vrcp.f32 %v5644_v29 }
0x216d   :  { %v5364_v10 = vpop.xlane.xlu0 %5363  ;;  %v5370_v3 = vpop.xlane.xlu1 %5369  ;;  %12048 = vmatmul.mubr.msk.f32.vlgmr.msra.gmra.mxu1 %vm5322_vm14, %v5651_v1  ;;  %v5392_v1 = vmul.f32 %v14315_v20, %v13377_v41 }
0x216e   :  { %v12823_v27 = vpop.eup %12822  ;;  %12834 = vrcp.f32 %v5364_v10  ;;  %12072 = vmatpush3.msra.mxu1 %v5391_v50  ;;  %12050 = vmatprep.mubr.msk.f32.mxu1 %vm13089_vm1, %v15954_v18 }
0x216f   :  { %v12825_v51 = vpop.eup %12824  ;;  %12836 = vrcp.f32 %v5370_v3  ;;  %12073 = vmatprep.subr.mxu1 %v15954_v18  ;;  %v5652_v5 = vmul.f32 %v12823_v27, %v14385_v57 }
0x2170   :  { %v5654_v42 = vmul.f32 %v12825_v51, %v14387_v25  ;;  %12074 = vmatpush3.msra.mxu1 %v5390_v62  ;;  %v5393_v25 = vmul.f32 %v14306_v54, %v13377_v41 }
0x2171   :  { %v5367_v19 = vpop.xlane.xlu0 %5366  ;;  %12075 = vmatprep.subr.mxu1 %v15954_v18  ;;  %v5373_v33 = vpop.xlane.xlu1 %5372  ;;  %12051 = vmatmul.mubr.msk.f32.gmra.mxu1 %vm5322_vm14, %v5652_v5 }
0x2172   :  { %12838 = vrcp.f32 %v5367_v19  ;;  %12063 = vmatmul.mubr.msk.f32.vlgmr.msra.gmra.mxu0 %vm5322_vm14, %v5654_v42  ;;  %12076 = vmatpush3.msra.mxu1 %v5389_v60  ;;  %v6283_v42 = vmul.f32 %v14275_v59, %v13461_v7  ;;  %v6282_v60 = vmul.f32 %v14284_v61, %v13461_v7  ;;  %v6022_v19 = vmul.f32 %v14224_v14, %v13461_v7 }
0x2173   :  { %v12827_v57 = vpop.eup %12826  ;;  %12840 = vrcp.f32 %v5373_v33  ;;  %12087 = vmatpush3.msra.mxu0 %v5394_v63  ;;  %12053 = vmatprep.mubr.msk.f32.mxu1 %vm13089_vm1, %v15954_v18  ;;  %v6281_v33 = vmul.f32 %v14304_v16, %v13461_v7  ;;  %v6286_v63 = vmul.f32 %v14286_v2, %v13461_v7 }
0x2174   :  { %v12829_v39 = vpop.eup %12828  ;;  %12088 = vmatprep.subr.mxu0 %v15954_v18  ;;  %12065 = vmatprep.mubr.msk.f32.mxu0 %vm13089_vm1, %v15954_v18  ;;  %v5653_v21 = vmul.f32 %v12827_v57, %v14395_v15  ;;  %v6285_v57 = vmul.f32 %v14306_v54, %v13461_v7 }
0x2175   :  { %12089 = vmatpush3.msra.mxu0 %v5393_v25  ;;  %v5376_v29 = vpop.xlane.xlu0 %5375  ;;  %v5655_v56 = vmul.f32 %v12829_v39, %v14393_v47  ;;  %12101 = vmatprep.subr.mxu1 %v15954_v18  ;;  %v6021_v25 = vmul.f32 %v14247_v55, %v13461_v7  ;;  %v6023_v39 = vmul.f32 %v14240_v0, %v13461_v7 }
0x2176   :  { %12842 = vrcp.f32 %v5376_v29  ;;  %12090 = vmatprep.subr.mxu0 %v15954_v18  ;;  %12054 = vmatmul.mubr.msk.f32.gmra.mxu1 %vm5322_vm14, %v5653_v21  ;;  %v6284_v21 = vmul.f32 %v14315_v20, %v13461_v7  ;;  %v6024_v29 = vmul.f32 %v14255_v13, %v13461_v7 }
0x2177   :  { %v12831_v50 = vpop.eup %12830  ;;  %12066 = vmatmul.mubr.msk.f32.gmra.mxu0 %vm5322_vm14, %v5655_v56  ;;  %12077 = vmatprep.mubr.msk.f32.mxu1 %vm13089_vm1, %v15954_v18 }
0x2178   :  { %v12833_v15 = vpop.eup %12832  ;;  %v5383_v10 = vmul.f32 %v12831_v50, %v14403_v17  ;;  %12091 = vmatpush3.msra.mxu0 %v5392_v1  ;;  %12068 = vmatprep.mubr.msk.f32.mxu0 %vm13089_vm1, %v15954_v18 }
0x2179   :  { %v5656_v47 = vmul.f32 %v12833_v15, %v14401_v11  ;;  %12116 = vmatprep.subr.mxu0 %v15954_v18 }
0x217a   :  { %12078 = vmatmul.mubr.msk.f32.vlgmr.msra.gmra.mxu1 %vm5322_vm14, %v5383_v10 }
0x217b   :  { %v12835_v3 = vpop.eup %12834  ;;  %12069 = vmatmul.mubr.msk.f32.gmra.mxu0 %vm5322_vm14, %v5656_v47  ;;  %12102 = vmatpush3.xpose.msk.msra.mxu1 %vm428_vm6, %v14199_v53 }
0x217c   :  { %v12837_v27 = vpop.eup %12836  ;;  %12080 = vmatprep.mubr.msk.f32.mxu1 %vm13089_vm1, %v15954_v18  ;;  %12092 = vmatprep.mubr.msk.f32.mxu0 %vm13089_vm1, %v15954_v18  ;;  %v5384_v17 = vmul.f32 %v12835_v3, %v14411_v44 }
0x217d   :  { %v5386_v11 = vmul.f32 %v12837_v27, %v14409_v12  ;;  %12103 = vmatprep.subr.mxu1 %v15954_v18 }
0x217e   :  { %12081 = vmatmul.mubr.msk.f32.gmra.mxu1 %vm5322_vm14, %v5384_v17 }
0x217f   :  { %v12839_v62 = vpop.eup %12838  ;;  %12093 = vmatmul.mubr.msk.f32.vlgmr.msra.gmra.mxu0 %vm5322_vm14, %v5386_v11  ;;  %12104 = vmatpush3.xpose.msk.msra.mxu1 %vm428_vm6, %v14208_v24 }
0x2180   :  { %v12841_v51 = vpop.eup %12840  ;;  %12117 = vmatpush3.xpose.msk.msra.mxu0 %vm428_vm6, %v14201_v26  ;;  %12083 = vmatprep.mubr.msk.f32.mxu1 %vm13089_vm1, %v15954_v18  ;;  %v5385_v44 = vmul.f32 %v12839_v62, %v14419_v58  ;;  %v6019_v58 = vmul.f32 %v14217_v34, %v13461_v7 }
0x2181   :  { %12095 = vmatprep.mubr.msk.f32.mxu0 %vm13089_vm1, %v15954_v18  ;;  %12105 = vmatprep.subr.mxu1 %v15954_v18  ;;  %v5387_v12 = vmul.f32 %v12841_v51, %v14417_v49 }
0x2182   :  { %12118 = vmatprep.subr.mxu0 %v15954_v18  ;;  %12084 = vmatmul.mubr.msk.f32.gmra.mxu1 %vm5322_vm14, %v5385_v44 }
0x2183   :  { %v12843_v5 = vpop.eup %12842  ;;  %12096 = vmatmul.mubr.msk.f32.gmra.mxu0 %vm5322_vm14, %v5387_v12  ;;  %12106 = vmatpush3.xpose.msk.msra.mxu1 %vm428_vm6, %v14222_v35 }
0x2184   :  { %12119 = vmatpush3.xpose.msk.msra.mxu0 %vm428_vm6, %v14213_v32  ;;  %12098 = vmatprep.mubr.msk.f32.mxu0 %vm13089_vm1, %v15954_v18  ;;  %v5388_v49 = vmul.f32 %v12843_v5, %v14425_v40  ;;  %v6020_v40 = vmul.f32 %v14231_v46, %v13461_v7 }
0x2185   :  { %12107 = vmatprep.mubr.msk.f32.mxu1 %vm13089_vm1, %v15954_v18  ;;  %12120 = vmatprep.subr.mxu0 %v15954_v18 }
0x2186   :  { %12131 = vmatprep.subr.mxu1 %v15954_v18  ;;  %12108 = vmatmul.mubr.msk.f32.vlgmr.msra.gmra.mxu1 %vm428_vm6, %v6019_v58 }
0x2187   :  { %12099 = vmatmul.mubr.msk.f32.gmra.mxu0 %vm5322_vm14, %v5388_v49  ;;  %12132 = vmatpush3.msra.mxu1 %v6283_v42 }
0x2188   :  { %12121 = vmatpush3.xpose.msk.msra.mxu0 %vm428_vm6, %v14227_v38  ;;  %12133 = vmatprep.subr.mxu1 %v15954_v18 }
0x2189   :  { %12134 = vmatpush3.msra.mxu1 %v6282_v60  ;;  %12110 = vmatprep.mubr.msk.f32.mxu1 %vm13089_vm1, %v15954_v18 }
0x218a   :  { %12122 = vmatprep.mubr.msk.f32.mxu0 %vm13089_vm1, %v15954_v18  ;;  %12135 = vmatprep.subr.mxu1 %v15954_v18 }
0x218b   :  { %12146 = vmatprep.subr.mxu0 %v15954_v18  ;;  %12111 = vmatmul.mubr.msk.f32.gmra.mxu1 %vm428_vm6, %v6020_v40 }
0x218c   :  { %12123 = vmatmul.mubr.msk.f32.vlgmr.msra.gmra.mxu0 %vm428_vm6, %v6022_v19  ;;  %12136 = vmatpush3.msra.mxu1 %v6281_v33 }
0x218d   :  { %12147 = vmatpush3.msra.mxu0 %v6286_v63  ;;  %12113 = vmatprep.mubr.msk.f32.mxu1 %vm13089_vm1, %v15954_v18 }
0x218e   :  { %12148 = vmatprep.subr.mxu0 %v15954_v18  ;;  %12125 = vmatprep.mubr.msk.f32.mxu0 %vm13089_vm1, %v15954_v18 }
0x218f   :  { %12149 = vmatpush3.msra.mxu0 %v6285_v57  ;;  %12114 = vmatmul.mubr.msk.f32.gmra.mxu1 %vm428_vm6, %v6021_v25 }
0x2190   :  { %12150 = vmatprep.subr.mxu0 %v15954_v18  ;;  %12126 = vmatmul.mubr.msk.f32.gmra.mxu0 %vm428_vm6, %v6023_v39 }
0x2191   :  { %12151 = vmatpush3.msra.mxu0 %v6284_v21  ;;  %12128 = vmatprep.mubr.msk.f32.mxu0 %vm13089_vm1, %v15954_v18 }
0x2192   :  { %12137 = vmatprep.mubr.msk.f32.mxu1 %vm13089_vm1, %v15954_v18  ;;  %12161 = vmatprep.subr.mxu1 %v15954_v18 }
0x2193   :  { %12176 = vmatprep.subr.mxu0 %v15954_v18 }
0x2194   :  { %12129 = vmatmul.mubr.msk.f32.gmra.mxu0 %vm428_vm6, %v6024_v29 }
0x2195   :  { %12152 = vmatprep.mubr.msk.f32.mxu0 %vm13089_vm1, %v15954_v18 }
0x222d   :  { %v5738_v56 = vpop.f32.mrf.mxu1 }
0x222f   :  { %v12049_v1 = vpop.f32.mrf.mxu1 }
0x2231   :  { %v5743_v50 = vpop.f32.mrf.mxu1 }
0x2232   :  { %v5827_v15 = vpop.f32.mrf.mxu0 }
0x2233   :  { %v12052_v10 = vpop.f32.mrf.mxu1 }
0x2234   :  { %v12064_v47 = vpop.f32.mrf.mxu0 }
0x2236   :  { %v5748_v3 = vpop.f32.mrf.mxu1 }
0x2237   :  { %v5832_v27 = vpop.f32.mrf.mxu0 }
0x2238   :  { %v12055_v17 = vpop.f32.mrf.mxu1 }
0x2239   :  { %v12067_v11 = vpop.f32.mrf.mxu0 }
0x223a   :  { %v5916_v62 = vpop.f32.mrf.mxu1 }
0x223b   :  { %v5837_v51 = vpop.f32.mrf.mxu0  ;;  %v14561_v44 = vadd.f32 %v5916_v62, %v5738_v56 }
0x223c   :  { %v12079_v12 = vpop.f32.mrf.mxu1 }
0x223d   :  { %v12070_v5 = vpop.f32.mrf.mxu0 }
0x223e   :  { %v5921_v58 = vpop.f32.mrf.mxu1 }
0x223f   :  { %v14563_v49 = vadd.f32 %v5921_v58, %v5743_v50  ;;  %v6005_v42 = vpop.f32.mrf.mxu0 }
0x2240   :  { %v14565_v60 = vadd.f32 %v6005_v42, %v5827_v15  ;;  %v12082_v40 = vpop.f32.mrf.mxu1 }
0x2241   :  { %v12094_v19 = vpop.f32.mrf.mxu0 }
0x2242   :  { %v5926_v33 = vpop.f32.mrf.mxu1 }
0x2243   :  { %v14567_v63 = vadd.f32 %v5926_v33, %v5748_v3  ;;  %v6010_v57 = vpop.f32.mrf.mxu0 }
0x2244   :  { %v14569_v25 = vadd.f32 %v6010_v57, %v5832_v27  ;;  %v12085_v39 = vpop.f32.mrf.mxu1 }
0x2245   :  { %v12097_v21 = vpop.f32.mrf.mxu0 }
0x2246   :  { %v6100_v29 = vpop.f32.mrf.mxu1 }
0x2247   :  { %v6015_v56 = vpop.f32.mrf.mxu0  ;;  %v6203_v1 = vmul.f32 0.35355338, %v6100_v29 }
0x2248   :  { %v14571_v10 = vadd.f32 %v6015_v56, %v5837_v51  ;;  %v12109_v50 = vpop.f32.mrf.mxu1 }
0x2249   :  { %v6209_v47 = vadd.f32 %v6203_v1, %v14355_v28  ;;  %v12100_v15 = vpop.f32.mrf.mxu0 }
0x224b   :  { %v6105_v17 = vpop.f32.mrf.mxu1  ;;  %v6215_v11 = vsel %vm5322_vm14, %v6209_v47, -inf }
0x224c   :  { %v6204_v62 = vmul.f32 0.35355338, %v6105_v17  ;;  %v6189_v3 = vpop.f32.mrf.mxu0  ;;  %6216 = vmax.xlane.f32.xlu1 %v6215_v11 }
0x224d   :  { %v6206_v12 = vmul.f32 0.35355338, %v6189_v3  ;;  %v12112_v27 = vpop.f32.mrf.mxu1 }
0x224e   :  { %v12124_v5 = vpop.f32.mrf.mxu0  ;;  %v6210_v58 = vadd.f32 %v6204_v62, %v14355_v28 }
0x224f   :  { %v6212_v42 = vadd.f32 %v6206_v12, %v14355_v28  ;;  %v6110_v40 = vpop.f32.mrf.mxu1 }
0x2250   :  { %v6205_v51 = vmul.f32 0.35355338, %v6110_v40  ;;  %v6194_v19 = vpop.f32.mrf.mxu0  ;;  %v6218_v33 = vsel %vm5322_vm14, %v6210_v58, -inf }
0x2251   :  { %v6207_v57 = vmul.f32 0.35355338, %v6194_v19  ;;  %6219 = vmax.xlane.f32.xlu0 %v6218_v33  ;;  %v12115_v39 = vpop.f32.mrf.mxu1  ;;  %v6224_v21 = vsel %vm5322_vm14, %v6212_v42, -inf }
0x2252   :  { %v6211_v29 = vadd.f32 %v6205_v51, %v14355_v28  ;;  %6225 = vmax.xlane.f32.xlu1 %v6224_v21  ;;  %v12127_v56 = vpop.f32.mrf.mxu0 }
0x2253   :  { %v6213_v1 = vadd.f32 %v6207_v57, %v14355_v28 }
0x2254   :  { %v6199_v50 = vpop.f32.mrf.mxu0  ;;  %v6221_v15 = vsel %vm5322_vm14, %v6211_v29, -inf }
0x2255   :  { %v6208_v17 = vmul.f32 0.35355338, %v6199_v50  ;;  %6222 = vmax.xlane.f32.xlu0 %v6221_v15  ;;  %v6227_v11 = vsel %vm5322_vm14, %v6213_v1, -inf }
0x2256   :  { %6228 = vmax.xlane.f32.xlu1 %v6227_v11  ;;  %v12130_v62 = vpop.f32.mrf.mxu0 }
0x2257   :  { %v6214_v3 = vadd.f32 %v6208_v17, %v14355_v28 }
0x2259   :  { %v6230_v12 = vsel %vm5322_vm14, %v6214_v3, -inf }
0x225a   :  { %6231 = vmax.xlane.f32.xlu0 %v6230_v12 }
0x22d5   :  { %v6217_v27 = vpop.xlane.xlu1 %6216 }
0x22d6   :  { %v6233_v5 = vsub.f32 %v6209_v47, %v6217_v27 }
0x22d8   :  { %v6239_v40 = vmul.f32 1.442695, %v6233_v5 }
0x22da   :  { %12844 = vpow2.f32 %v6239_v40  ;;  %v6220_v51 = vpop.xlane.xlu0 %6219 }
0x22db   :  { %v6234_v19 = vsub.f32 %v6210_v58, %v6220_v51  ;;  %v6226_v33 = vpop.xlane.xlu1 %6225 }
0x22dc   :  { %v6236_v57 = vsub.f32 %v6212_v42, %v6226_v33 }
0x22dd   :  { %v6241_v39 = vmul.f32 1.442695, %v6234_v19 }
0x22de   :  { %v6245_v21 = vmul.f32 1.442695, %v6236_v57  ;;  %v6223_v56 = vpop.xlane.xlu0 %6222 }
0x22df   :  { %12846 = vpow2.f32 %v6241_v39  ;;  %v6235_v50 = vsub.f32 %v6211_v29, %v6223_v56  ;;  %v6229_v15 = vpop.xlane.xlu1 %6228 }
0x22e0   :  { %12848 = vpow2.f32 %v6245_v21  ;;  %v6237_v11 = vsub.f32 %v6213_v1, %v6229_v15 }
0x22e1   :  { %v6243_v17 = vmul.f32 1.442695, %v6235_v50 }
0x22e2   :  { %v6247_v62 = vmul.f32 1.442695, %v6237_v11 }
0x22e3   :  { %12850 = vpow2.f32 %v6243_v17  ;;  %v6232_v12 = vpop.xlane.xlu0 %6231 }
0x22e4   :  { %12852 = vpow2.f32 %v6247_v62  ;;  %v6238_v47 = vsub.f32 %v6214_v3, %v6232_v12 }
0x22e6   :  { %v6249_v27 = vmul.f32 1.442695, %v6238_v47 }
0x22e7   :  { %v12845_v5 = vpop.eup %12844 }
0x22e8   :  { %12854 = vpow2.f32 %v6249_v27  ;;  %v6251_v58 = vsel %vm5322_vm14, %v12845_v5, 0.0 }
0x22e9   :  { %6252 = vadd.xlane.f32.xlu1 %v6251_v58 }
0x22ec   :  { %v12847_v42 = vpop.eup %12846 }
0x22ed   :  { %v12849_v40 = vpop.eup %12848  ;;  %v6254_v51 = vsel %vm5322_vm14, %v12847_v42, 0.0 }
0x22ee   :  { %v6260_v29 = vsel %vm5322_vm14, %v12849_v40, 0.0  ;;  %6255 = vadd.xlane.f32.xlu0 %v6254_v51 }
0x22ef   :  { %6261 = vadd.xlane.f32.xlu1 %v6260_v29 }
0x22f0   :  { %v12851_v1 = vpop.eup %12850 }
0x22f1   :  { %v12853_v19 = vpop.eup %12852  ;;  %v6257_v33 = vsel %vm5322_vm14, %v12851_v1, 0.0 }
0x22f2   :  { %v6263_v3 = vsel %vm5322_vm14, %v12853_v19, 0.0  ;;  %6258 = vadd.xlane.f32.xlu0 %v6257_v33 }
0x22f3   :  { %6264 = vadd.xlane.f32.xlu1 %v6263_v3 }
0x22f5   :  { %v12855_v57 = vpop.eup %12854 }
0x22f6   :  { %v6266_v39 = vsel %vm5322_vm14, %v12855_v57, 0.0 }
0x22f7   :  { %6267 = vadd.xlane.f32.xlu0 %v6266_v39 }
0x2372   :  { %v6253_v21 = vpop.xlane.xlu1 %6252 }
0x2373   :  { %12856 = vrcp.f32 %v6253_v21 }
0x2377   :  { %v6256_v56 = vpop.xlane.xlu0 %6255 }
0x2378   :  { %v6262_v50 = vpop.xlane.xlu1 %6261  ;;  %12858 = vrcp.f32 %v6256_v56 }
0x2379   :  { %12860 = vrcp.f32 %v6262_v50 }
0x237b   :  { %v6259_v15 = vpop.xlane.xlu0 %6258 }
0x237c   :  { %v6265_v11 = vpop.xlane.xlu1 %6264  ;;  %12862 = vrcp.f32 %v6259_v15 }
0x237d   :  { %12864 = vrcp.f32 %v6265_v11 }
0x2380   :  { %v12857_v17 = vpop.eup %12856  ;;  %v6268_v62 = vpop.xlane.xlu0 %6267 }
0x2381   :  { %v6275_v12 = vmul.f32 %v12857_v17, %v12845_v5  ;;  %12866 = vrcp.f32 %v6268_v62 }
0x2383   :  { %12138 = vmatmul.mubr.msk.f32.vlgmr.msra.gmra.mxu1 %vm5322_vm14, %v6275_v12 }
0x2384   :  { %12162 = vmatpush3.xpose.msk.msra.mxu1 %vm428_vm6, %v14199_v53  ;;  %12140 = vmatprep.mubr.msk.f32.mxu1 %vm13089_vm1, %v15954_v18 }
0x2385   :  { %v12859_v47 = vpop.eup %12858  ;;  %12163 = vmatprep.subr.mxu1 %v15954_v18 }
0x2386   :  { %v12861_v27 = vpop.eup %12860  ;;  %v6276_v58 = vmul.f32 %v12859_v47, %v12847_v42 }
0x2387   :  { %v6278_v51 = vmul.f32 %v12861_v27, %v12849_v40 }
0x2388   :  { %12141 = vmatmul.mubr.msk.f32.gmra.mxu1 %vm5322_vm14, %v6276_v58 }
0x2389   :  { %v12863_v29 = vpop.eup %12862  ;;  %12153 = vmatmul.mubr.msk.f32.vlgmr.msra.gmra.mxu0 %vm5322_vm14, %v6278_v51  ;;  %12164 = vmatpush3.xpose.msk.msra.mxu1 %vm428_vm6, %v14208_v24  ;;  %v6471_v24 = vmul.f32 %v14217_v34, %v13500_v4  ;;  %v6472_v34 = vmul.f32 %v14231_v46, %v13500_v4  ;;  %v6473_v46 = vmul.f32 %v14247_v55, %v13500_v4 }
0x238a   :  { %v12865_v5 = vpop.eup %12864  ;;  %12177 = vmatpush3.xpose.msk.msra.mxu0 %vm428_vm6, %v14201_v26  ;;  %12143 = vmatprep.mubr.msk.f32.mxu1 %vm13089_vm1, %v15954_v18  ;;  %v6277_v53 = vmul.f32 %v12863_v29, %v12851_v1  ;;  %v6735_v1 = vmul.f32 %v14275_v59, %v13500_v4  ;;  %v6738_v59 = vmul.f32 %v14286_v2, %v13500_v4 }
0x238b   :  { %12155 = vmatprep.mubr.msk.f32.mxu0 %vm13089_vm1, %v15954_v18  ;;  %12165 = vmatprep.subr.mxu1 %v15954_v18  ;;  %v6279_v42 = vmul.f32 %v12865_v5, %v12853_v19  ;;  %v6736_v2 = vmul.f32 %v14315_v20, %v13500_v4 }
0x238c   :  { %12178 = vmatprep.subr.mxu0 %v15954_v18  ;;  %12144 = vmatmul.mubr.msk.f32.gmra.mxu1 %vm5322_vm14, %v6277_v53 }
0x238d   :  { %12156 = vmatmul.mubr.msk.f32.gmra.mxu0 %vm5322_vm14, %v6279_v42  ;;  %12166 = vmatpush3.xpose.msk.msra.mxu1 %vm428_vm6, %v14222_v35  ;;  %v6474_v35 = vmul.f32 %v14224_v14, %v13500_v4  ;;  %v6737_v14 = vmul.f32 %v14306_v54, %v13500_v4 }
0x238e   :  { %v12867_v26 = vpop.eup %12866  ;;  %12179 = vmatpush3.xpose.msk.msra.mxu0 %vm428_vm6, %v14213_v32  ;;  %12158 = vmatprep.mubr.msk.f32.mxu0 %vm13089_vm1, %v15954_v18  ;;  %v6734_v32 = vmul.f32 %v14284_v61, %v13500_v4  ;;  %v6475_v61 = vmul.f32 %v14240_v0, %v13500_v4  ;;  %v6476_v0 = vmul.f32 %v14255_v13, %v13500_v4 }
0x238f   :  { %12167 = vmatprep.mubr.msk.f32.mxu1 %vm13089_vm1, %v15954_v18  ;;  %12180 = vmatprep.subr.mxu0 %v15954_v18  ;;  %v6280_v40 = vmul.f32 %v12867_v26, %v12855_v57 }
0x2390   :  { %12191 = vmatprep.subr.mxu1 %v15954_v18  ;;  %12168 = vmatmul.mubr.msk.f32.vlgmr.msra.gmra.mxu1 %vm428_vm6, %v6471_v24 }
0x2391   :  { %12159 = vmatmul.mubr.msk.f32.gmra.mxu0 %vm5322_vm14, %v6280_v40  ;;  %12192 = vmatpush3.msra.mxu1 %v6735_v1 }
0x2392   :  { %12181 = vmatpush3.xpose.msk.msra.mxu0 %vm428_vm6, %v14227_v38  ;;  %12193 = vmatprep.subr.mxu1 %v15954_v18  ;;  %v6733_v38 = vmul.f32 %v14304_v16, %v13500_v4 }
0x2393   :  { %12194 = vmatpush3.msra.mxu1 %v6734_v32  ;;  %12170 = vmatprep.mubr.msk.f32.mxu1 %vm13089_vm1, %v15954_v18 }
0x2394   :  { %12182 = vmatprep.mubr.msk.f32.mxu0 %vm13089_vm1, %v15954_v18  ;;  %12195 = vmatprep.subr.mxu1 %v15954_v18 }
0x2395   :  { %12206 = vmatprep.subr.mxu0 %v15954_v18  ;;  %12171 = vmatmul.mubr.msk.f32.gmra.mxu1 %vm428_vm6, %v6472_v34 }
0x2396   :  { %12183 = vmatmul.mubr.msk.f32.vlgmr.msra.gmra.mxu0 %vm428_vm6, %v6474_v35  ;;  %12196 = vmatpush3.msra.mxu1 %v6733_v38 }
0x2397   :  { %12207 = vmatpush3.msra.mxu0 %v6738_v59  ;;  %12173 = vmatprep.mubr.msk.f32.mxu1 %vm13089_vm1, %v15954_v18 }
0x2398   :  { %12208 = vmatprep.subr.mxu0 %v15954_v18  ;;  %12185 = vmatprep.mubr.msk.f32.mxu0 %vm13089_vm1, %v15954_v18 }
0x2399   :  { %12209 = vmatpush3.msra.mxu0 %v6737_v14  ;;  %12174 = vmatmul.mubr.msk.f32.gmra.mxu1 %vm428_vm6, %v6473_v46 }
0x239a   :  { %12210 = vmatprep.subr.mxu0 %v15954_v18  ;;  %12186 = vmatmul.mubr.msk.f32.gmra.mxu0 %vm428_vm6, %v6475_v61 }
0x239b   :  { %12211 = vmatpush3.msra.mxu0 %v6736_v2  ;;  %12188 = vmatprep.mubr.msk.f32.mxu0 %vm13089_vm1, %v15954_v18 }
0x239c   :  { %12197 = vmatprep.mubr.msk.f32.mxu1 %vm13089_vm1, %v15954_v18 }
0x239e   :  { %12189 = vmatmul.mubr.msk.f32.gmra.mxu0 %vm428_vm6, %v6476_v0 }
0x239f   :  { %12212 = vmatprep.mubr.msk.f32.mxu0 %vm13089_vm1, %v15954_v18 }
0x2443   :  { %v6362_v55 = vpop.f32.mrf.mxu1 }
0x2444   :  { %v14674_v16 = vadd.f32 %v6362_v55, %v14561_v44 }
0x2445   :  { %v12139_v54 = vpop.f32.mrf.mxu1 }
0x2448   :  { %v6367_v20 = vpop.f32.mrf.mxu1 }
0x2449   :  { %v14677_v19 = vadd.f32 %v6367_v20, %v14563_v49  ;;  %v6451_v33 = vpop.f32.mrf.mxu0 }
0x244a   :  { %v14680_v13 = vadd.f32 %v6451_v33, %v14565_v60  ;;  %v12142_v3 = vpop.f32.mrf.mxu1 }
0x244b   :  { %v12154_v57 = vpop.f32.mrf.mxu0 }
0x244c   :  { %v6372_v39 = vpop.f32.mrf.mxu1 }
0x244d   :  { %v14683_v21 = vadd.f32 %v6372_v39, %v14567_v63  ;;  %v6456_v56 = vpop.f32.mrf.mxu0 }
0x244e   :  { %v14686_v50 = vadd.f32 %v6456_v56, %v14569_v25  ;;  %v12145_v44 = vpop.f32.mrf.mxu1 }
0x244f   :  { %v12157_v15 = vpop.f32.mrf.mxu0 }
0x2450   :  { %v6552_v11 = vpop.f32.mrf.mxu1 }
0x2451   :  { %v6461_v17 = vpop.f32.mrf.mxu0  ;;  %v6655_v49 = vmul.f32 0.35355338, %v6552_v11 }
0x2452   :  { %v14689_v62 = vadd.f32 %v6461_v17, %v14571_v10  ;;  %v12169_v60 = vpop.f32.mrf.mxu1 }
0x2453   :  { %v6661_v12 = vadd.f32 %v6655_v49, %v14355_v28  ;;  %v12160_v47 = vpop.f32.mrf.mxu0 }
0x2455   :  { %v6557_v27 = vpop.f32.mrf.mxu1  ;;  %v6667_v63 = vsel %vm5322_vm14, %v6661_v12, -inf }
0x2456   :  { %v6656_v58 = vmul.f32 0.35355338, %v6557_v27  ;;  %v6641_v51 = vpop.f32.mrf.mxu0  ;;  %6668 = vmax.xlane.f32.xlu1 %v6667_v63 }
0x2457   :  { %v6658_v25 = vmul.f32 0.35355338, %v6641_v51  ;;  %v12172_v29 = vpop.f32.mrf.mxu1 }
0x2458   :  { %v6662_v5 = vadd.f32 %v6656_v58, %v14355_v28  ;;  %v12184_v53 = vpop.f32.mrf.mxu0 }
0x2459   :  { %v6664_v42 = vadd.f32 %v6658_v25, %v14355_v28  ;;  %v6562_v26 = vpop.f32.mrf.mxu1 }
0x245a   :  { %v6657_v10 = vmul.f32 0.35355338, %v6562_v26  ;;  %v6646_v24 = vpop.f32.mrf.mxu0  ;;  %v6670_v40 = vsel %vm5322_vm14, %v6662_v5, -inf }
0x245b   :  { %v6659_v1 = vmul.f32 0.35355338, %v6646_v24  ;;  %6671 = vmax.xlane.f32.xlu0 %v6670_v40  ;;  %v12175_v32 = vpop.f32.mrf.mxu1  ;;  %v6676_v34 = vsel %vm5322_vm14, %v6664_v42, -inf }
0x245c   :  { %v6663_v35 = vadd.f32 %v6657_v10, %v14355_v28  ;;  %6677 = vmax.xlane.f32.xlu1 %v6676_v34  ;;  %v12187_v38 = vpop.f32.mrf.mxu0 }
0x245d   :  { %v6665_v59 = vadd.f32 %v6659_v1, %v14355_v28 }
0x245e   :  { %v6651_v14 = vpop.f32.mrf.mxu0  ;;  %v6673_v46 = vsel %vm5322_vm14, %v6663_v35, -inf }
0x245f   :  { %v6660_v61 = vmul.f32 0.35355338, %v6651_v14  ;;  %6674 = vmax.xlane.f32.xlu0 %v6673_v46  ;;  %v6679_v2 = vsel %vm5322_vm14, %v6665_v59, -inf }
0x2460   :  { %6680 = vmax.xlane.f32.xlu1 %v6679_v2  ;;  %v12190_v0 = vpop.f32.mrf.mxu0 }
0x2461   :  { %v6666_v55 = vadd.f32 %v6660_v61, %v14355_v28 }
0x2463   :  { %v6682_v54 = vsel %vm5322_vm14, %v6666_v55, -inf }
0x2464   :  { %6683 = vmax.xlane.f32.xlu0 %v6682_v54 }
0x24df   :  { %v6669_v20 = vpop.xlane.xlu1 %6668 }
0x24e0   :  { %v6685_v33 = vsub.f32 %v6661_v12, %v6669_v20 }
0x24e2   :  { %v6691_v3 = vmul.f32 1.442695, %v6685_v33 }
0x24e4   :  { %12868 = vpow2.f32 %v6691_v3  ;;  %v6672_v57 = vpop.xlane.xlu0 %6671 }
0x24e5   :  { %v6686_v39 = vsub.f32 %v6662_v5, %v6672_v57  ;;  %v6678_v56 = vpop.xlane.xlu1 %6677 }
0x24e6   :  { %v6688_v44 = vsub.f32 %v6664_v42, %v6678_v56 }
0x24e7   :  { %v6693_v15 = vmul.f32 1.442695, %v6686_v39 }
0x24e8   :  { %v6697_v11 = vmul.f32 1.442695, %v6688_v44  ;;  %v6675_v17 = vpop.xlane.xlu0 %6674 }
0x24e9   :  { %12870 = vpow2.f32 %v6693_v15  ;;  %v6687_v49 = vsub.f32 %v6663_v35, %v6675_v17  ;;  %v6681_v60 = vpop.xlane.xlu1 %6680  ;;  %v4671_v35 = vld [vmem:[%s15903_s15 + $0x78] sm:$0xff]  ;;  %v4670_v17 = vld [vmem:[%s15903_s15 + $0x70] sm:$0xff] }
0x24ea   :  { %12872 = vpow2.f32 %v6697_v11  ;;  %v6689_v47 = vsub.f32 %v6665_v59, %v6681_v60  ;;  %12221 = vmatprep.subr.mxu1 %v4671_v35  ;;  %v4668_v60 = vld [vmem:[%s15903_s15 + $0x60] sm:$0xff] }
0x24eb   :  { %v6695_v27 = vmul.f32 1.442695, %v6687_v49  ;;  %v4669_v49 = vld [vmem:[%s15903_s15 + $0x68] sm:$0xff] }
0x24ec   :  { %v6699_v63 = vmul.f32 1.442695, %v6689_v47 }
0x24ed   :  { %12874 = vpow2.f32 %v6695_v27  ;;  %v6684_v58 = vpop.xlane.xlu0 %6683 }
0x24ee   :  { %12876 = vpow2.f32 %v6699_v63  ;;  %v6690_v12 = vsub.f32 %v6666_v55, %v6684_v58 }
0x24f0   :  { %v6701_v51 = vmul.f32 1.442695, %v6690_v12 }
0x24f1   :  { %v12869_v25 = vpop.eup %12868 }
0x24f2   :  { %12878 = vpow2.f32 %v6701_v51  ;;  %v6703_v29 = vsel %vm5322_vm14, %v12869_v25, 0.0 }
0x24f3   :  { %6704 = vadd.xlane.f32.xlu1 %v6703_v29 }
0x24f6   :  { %v12871_v5 = vpop.eup %12870 }
0x24f7   :  { %v12873_v53 = vpop.eup %12872  ;;  %v6706_v42 = vsel %vm5322_vm14, %v12871_v5, 0.0 }
0x24f8   :  { %v6712_v26 = vsel %vm5322_vm14, %v12873_v53, 0.0  ;;  %6707 = vadd.xlane.f32.xlu0 %v6706_v42 }
0x24f9   :  { %6713 = vadd.xlane.f32.xlu1 %v6712_v26 }
0x24fa   :  { %v12875_v10 = vpop.eup %12874 }
0x24fb   :  { %v12877_v24 = vpop.eup %12876  ;;  %v6709_v40 = vsel %vm5322_vm14, %v12875_v10, 0.0 }
0x24fc   :  { %v6715_v1 = vsel %vm5322_vm14, %v12877_v24, 0.0  ;;  %6710 = vadd.xlane.f32.xlu0 %v6709_v40 }
0x24fd   :  { %6716 = vadd.xlane.f32.xlu1 %v6715_v1 }
0x24ff   :  { %v12879_v32 = vpop.eup %12878 }
0x2500   :  { %v6718_v34 = vsel %vm5322_vm14, %v12879_v32, 0.0 }
0x2501   :  { %6719 = vadd.xlane.f32.xlu0 %v6718_v34 }
0x257c   :  { %v6705_v38 = vpop.xlane.xlu1 %6704 }
0x257d   :  { %12880 = vrcp.f32 %v6705_v38 }
0x2581   :  { %v6708_v59 = vpop.xlane.xlu0 %6707 }
0x2582   :  { %v6714_v14 = vpop.xlane.xlu1 %6713  ;;  %12882 = vrcp.f32 %v6708_v59 }
0x2583   :  { %12884 = vrcp.f32 %v6714_v14 }
0x2585   :  { %v6711_v46 = vpop.xlane.xlu0 %6710 }
0x2586   :  { %v6717_v61 = vpop.xlane.xlu1 %6716  ;;  %12886 = vrcp.f32 %v6711_v46 }
0x2587   :  { %12888 = vrcp.f32 %v6717_v61 }
0x258a   :  { %v12881_v2 = vpop.eup %12880  ;;  %v6720_v0 = vpop.xlane.xlu0 %6719 }
0x258b   :  { %v6727_v55 = vmul.f32 %v12881_v2, %v12869_v25  ;;  %12890 = vrcp.f32 %v6720_v0 }
0x258d   :  { %12198 = vmatmul.mubr.msk.f32.vlgmr.msra.gmra.mxu1 %vm5322_vm14, %v6727_v55 }
0x258e   :  { %12200 = vmatprep.mubr.msk.f32.mxu1 %vm13089_vm1, %v15954_v18  ;;  %12222 = vmatpush3.msra.mxu1 %v4671_v35 }
0x258f   :  { %v12883_v54 = vpop.eup %12882  ;;  %12223 = vmatprep.subr.mxu1 %v4670_v17 }
0x2590   :  { %v12885_v20 = vpop.eup %12884  ;;  %v6728_v33 = vmul.f32 %v12883_v54, %v12871_v5  ;;  %12224 = vmatpush3.msra.mxu1 %v4670_v17 }
0x2591   :  { %v6730_v3 = vmul.f32 %v12885_v20, %v12873_v53  ;;  %12225 = vmatprep.subr.mxu1 %v4669_v49 }
0x2592   :  { %12201 = vmatmul.mubr.msk.f32.gmra.mxu1 %vm5322_vm14, %v6728_v33 }
0x2593   :  { %v12887_v57 = vpop.eup %12886  ;;  %12213 = vmatmul.mubr.msk.f32.vlgmr.msra.gmra.mxu0 %vm5322_vm14, %v6730_v3  ;;  %12203 = vmatprep.mubr.msk.f32.mxu1 %vm13089_vm1, %v15954_v18 }
0x2594   :  { %v12889_v39 = vpop.eup %12888  ;;  %12215 = vmatprep.mubr.msk.f32.mxu0 %vm13089_vm1, %v15954_v18  ;;  %v6729_v56 = vmul.f32 %v12887_v57, %v12875_v10  ;;  %12226 = vmatpush3.msra.mxu1 %v4669_v49 }
0x2595   :  { %v6731_v44 = vmul.f32 %v12889_v39, %v12877_v24  ;;  %12227 = vmatprep.subr.mxu1 %v4668_v60 }
0x2596   :  { %12204 = vmatmul.mubr.msk.f32.gmra.mxu1 %vm5322_vm14, %v6729_v56 }
0x2597   :  { %12216 = vmatmul.mubr.msk.f32.gmra.mxu0 %vm5322_vm14, %v6731_v44  ;;  %12228 = vmatpush3.msra.mxu1 %v4668_v60 }
0x2598   :  { %v12891_v15 = vpop.eup %12890  ;;  %12218 = vmatprep.mubr.msk.f32.mxu0 %vm13089_vm1, %v15954_v18 }
0x2599   :  { %v6732_v11 = vmul.f32 %v12891_v15, %v12879_v32 }
0x259b   :  { %12219 = vmatmul.mubr.msk.f32.gmra.mxu0 %vm5322_vm14, %v6732_v11 }
0x264d   :  { %v6814_v47 = vpop.f32.mrf.mxu1 }
0x264e   :  { %v6917_v27 = vadd.f32 %v6814_v47, %v14674_v16 }
0x264f   :  { %v12199_v63 = vpop.f32.mrf.mxu1 }
0x2650   :  { %12229 = vmatprep.mubr.msk.f32.mxu1 %vm428_vm6, %v6917_v27 }
0x2652   :  { %v6819_v58 = vpop.f32.mrf.mxu1 }
0x2653   :  { %v6918_v12 = vadd.f32 %v6819_v58, %v14677_v19  ;;  %v6903_v51 = vpop.f32.mrf.mxu0 }
0x2654   :  { %v12202_v25 = vpop.f32.mrf.mxu1  ;;  %v6920_v26 = vadd.f32 %v6903_v51, %v14680_v13  ;;  %v14750_v13 = vld [vmem:[%s15904_s16] sm:$0xff] }
0x2655   :  { %v12214_v29 = vpop.f32.mrf.mxu0  ;;  %12230 = vmatmul.mubr.msk.f32.vlgmr.msra.gmra.mxu1 %vm428_vm6, %v6918_v12 }
0x2656   :  { %v6824_v5 = vpop.f32.mrf.mxu1 }
0x2657   :  { %v6919_v53 = vadd.f32 %v6824_v5, %v14683_v21  ;;  %v6908_v42 = vpop.f32.mrf.mxu0  ;;  %v6926_v21 = vrot.slane %v14750_v13, %v13551_v6 }
0x2658   :  { %v12205_v10 = vpop.f32.mrf.mxu1  ;;  %v6921_v16 = vadd.f32 %v6908_v42, %v14686_v50 }
0x2659   :  { %v12217_v24 = vpop.f32.mrf.mxu0  ;;  %12232 = vmatprep.mubr.msk.f32.mxu1 %vm428_vm6, %v6919_v53 }
0x265a   :  { %12233 = vmatmul.mubr.msk.f32.gmra.mxu1 %vm428_vm6, %v6920_v26 }
0x265b   :  { %v6913_v19 = vpop.f32.mrf.mxu0  ;;  %12235 = vmatprep.mubr.msk.f32.mxu1 %vm428_vm6, %v6921_v16 }
0x265c   :  { %v6922_v40 = vadd.f32 %v6913_v19, %v14689_v62 }
0x265d   :  { %v12220_v1 = vpop.f32.mrf.mxu0 }
0x265e   :  { %12236 = vmatmul.mubr.msk.f32.gmra.mxu1 %vm428_vm6, %v6922_v40 }
0x2715   :  { %v12231_v50 = vpop.f32.mrf.mxu1 }
0x2716   :  { %v7017_v32 = vadd.f32 %v12231_v50, %v6926_v21 }
0x2717   :  { %v7011_v34 = vpop.f32.mrf.mxu1 }
0x2718   :  { %v14755_v35 = vadd.f32 %v7017_v32, %v14061_v48  ;;  %v7012_v38 = vadd.f32 %v7011_v34, %v6926_v21 }
0x271a   :  { %v14758_v62 = vadd.f32 %v7012_v38, %v14059_v52  ;;  %v12234_v59 = vpop.f32.mrf.mxu1  ;;  %v7049_v14 = vsel %vm428_vm6, %v14755_v35, 0.0  ;;  %v4677_v38 = vld [vmem:[%s15905_s17 + $0x18] sm:$0xff] }
0x271b   :  { %v7027_v46 = vadd.f32 %v12234_v59, %v6926_v21  ;;  %7050 = vadd.xlane.f32.xlu0 %v7049_v14  ;;  %12238 = vmatprep.subr.mxu0 %v4677_v38  ;;  %v4676_v59 = vld [vmem:[%s15905_s17 + $0x10] sm:$0xff]  ;;  %v4675_v14 = vld [vmem:[%s15905_s17 + $0x8] sm:$0xff] }
0x271c   :  { %v7021_v61 = vpop.f32.mrf.mxu1  ;;  %v7046_v2 = vsel %vm428_vm6, %v14758_v62, 0.0  ;;  %12239 = vmatpush3.msra.mxu0 %v4677_v38 }
0x271d   :  { %v14765_v0 = vadd.f32 %v7027_v46, %v14072_v23  ;;  %v7022_v55 = vadd.f32 %v7021_v61, %v6926_v21  ;;  %7047 = vadd.xlane.f32.xlu1 %v7046_v2  ;;  %12240 = vmatprep.subr.mxu0 %v4676_v59  ;;  %v4674_v46 = vld [vmem:[%s15905_s17] sm:$0xff] }
0x271e   :  { %v12237_v48 = vpop.f32.mrf.mxu1  ;;  %12241 = vmatpush3.msra.mxu0 %v4676_v59 }
0x271f   :  { %v14768_v54 = vadd.f32 %v7022_v55, %v14070_v22  ;;  %v7037_v52 = vadd.f32 %v12237_v48, %v6926_v21  ;;  %v7055_v20 = vsel %vm428_vm6, %v14765_v0, 0.0  ;;  %12242 = vmatprep.subr.mxu0 %v4675_v14 }
0x2720   :  { %7056 = vadd.xlane.f32.xlu0 %v7055_v20  ;;  %v7031_v33 = vpop.f32.mrf.mxu1  ;;  %12243 = vmatpush3.msra.mxu0 %v4675_v14 }
0x2721   :  { %v14773_v3 = vadd.f32 %v7037_v52, %v14082_v37  ;;  %v7032_v57 = vadd.f32 %v7031_v33, %v6926_v21  ;;  %v7052_v23 = vsel %vm428_vm6, %v14768_v54, 0.0  ;;  %12244 = vmatprep.subr.mxu0 %v4674_v46 }
0x2722   :  { %7053 = vadd.xlane.f32.xlu1 %v7052_v23  ;;  %12245 = vmatpush3.msra.mxu0 %v4674_v46 }
0x2723   :  { %v14778_v39 = vadd.f32 %v7032_v57, %v14076_v43  ;;  %v7061_v22 = vsel %vm428_vm6, %v14773_v3, 0.0 }
0x2724   :  { %7062 = vadd.xlane.f32.xlu0 %v7061_v22 }
0x2725   :  { %v7058_v56 = vsel %vm428_vm6, %v14778_v39, 0.0 }
0x2726   :  { %7059 = vadd.xlane.f32.xlu1 %v7058_v56 }
0x27a4   :  { %v7051_v44 = vpop.xlane.xlu0 %7050 }
0x27a5   :  { %v7065_v15 = vmul.f32 0.03125, %v7051_v44 }
0x27a6   :  { %v7048_v37 = vpop.xlane.xlu1 %7047 }
0x27a7   :  { %v14785_v11 = vsub.f32 %v14755_v35, %v7065_v15  ;;  %v7064_v17 = vmul.f32 0.03125, %v7048_v37 }
0x27a9   :  { %v14788_v49 = vsub.f32 %v14758_v62, %v7064_v17  ;;  %v7057_v43 = vpop.xlane.xlu0 %7056  ;;  %v7077_v60 = vmul.f32 %v14785_v11, %v14785_v11 }
0x27aa   :  { %v7067_v47 = vmul.f32 0.03125, %v7057_v43 }
0x27ab   :  { %v7054_v27 = vpop.xlane.xlu1 %7053  ;;  %v7085_v63 = vsel %vm428_vm6, %v7077_v60, 0.0  ;;  %v7076_v58 = vmul.f32 %v14788_v49, %v14788_v49 }
0x27ac   :  { %v14796_v12 = vsub.f32 %v14765_v0, %v7067_v47  ;;  %v7066_v51 = vmul.f32 0.03125, %v7054_v27  ;;  %7086 = vadd.xlane.f32.xlu0 %v7085_v63  ;;  %v7127_v63 = vrot.slane %v14750_v13, %v13582_v36 }
0x27ad   :  { %v7063_v25 = vpop.xlane.xlu0 %7062  ;;  %v7082_v29 = vsel %vm428_vm6, %v7076_v58, 0.0 }
0x27ae   :  { %v14800_v5 = vsub.f32 %v14768_v54, %v7066_v51  ;;  %v7069_v53 = vmul.f32 0.03125, %v7063_v25  ;;  %7083 = vadd.xlane.f32.xlu1 %v7082_v29  ;;  %v7079_v42 = vmul.f32 %v14796_v12, %v14796_v12  ;;  %v7137_v29 = vrot.slane %v14750_v13, %v13587_v45 }
0x27af   :  { %v7060_v26 = vpop.xlane.xlu1 %7059 }
0x27b0   :  { %v14805_v10 = vsub.f32 %v14773_v3, %v7069_v53  ;;  %v7068_v16 = vmul.f32 0.03125, %v7060_v26  ;;  %v7091_v24 = vsel %vm428_vm6, %v7079_v42, 0.0  ;;  %v7078_v19 = vmul.f32 %v14800_v5, %v14800_v5 }
0x27b1   :  { %7092 = vadd.xlane.f32.xlu0 %v7091_v24 }
0x27b2   :  { %v14811_v40 = vsub.f32 %v14778_v39, %v7068_v16  ;;  %v7088_v1 = vsel %vm428_vm6, %v7078_v19, 0.0  ;;  %v7081_v21 = vmul.f32 %v14805_v10, %v14805_v10 }
0x27b3   :  { %7089 = vadd.xlane.f32.xlu1 %v7088_v1 }
0x27b4   :  { %v7097_v50 = vsel %vm428_vm6, %v7081_v21, 0.0  ;;  %v7080_v32 = vmul.f32 %v14811_v40, %v14811_v40 }
0x27b5   :  { %7098 = vadd.xlane.f32.xlu0 %v7097_v50 }
0x27b6   :  { %v7094_v34 = vsel %vm428_vm6, %v7080_v32, 0.0 }
0x27b7   :  { %7095 = vadd.xlane.f32.xlu1 %v7094_v34 }
0x2835   :  { %v7087_v61 = vpop.xlane.xlu0 %7086 }
0x2836   :  { %v7101_v2 = vmul.f32 0.03125, %v7087_v61  ;;  %v4692_v61 = vld [vmem:[%s15907_s19 + $0x68] sm:$0xff] }
0x2837   :  { %v7084_v55 = vpop.xlane.xlu1 %7083 }
0x2838   :  { %v7107_v48 = vadd.f32 1e-05, %v7101_v2  ;;  %v7100_v52 = vmul.f32 0.03125, %v7084_v55  ;;  %v4691_v2 = vld [vmem:[%s15907_s19 + $0x60] sm:$0xff]  ;;  %v4690_v55 = vld [vmem:[%s15907_s19 + $0x58] sm:$0xff] }
0x283a   :  { %12892 = vrsqrt.f32 %v7107_v48  ;;  %v7106_v20 = vadd.f32 1e-05, %v7100_v52  ;;  %v7093_v33 = vpop.xlane.xlu0 %7092  ;;  %v4689_v48 = vld [vmem:[%s15907_s19 + $0x50] sm:$0xff]  ;;  %v4688_v52 = vld [vmem:[%s15907_s19 + $0x48] sm:$0xff] }
0x283b   :  { %v7103_v57 = vmul.f32 0.03125, %v7093_v33  ;;  %v4686_v33 = vld [vmem:[%s15907_s19 + $0x38] sm:$0xff] }
0x283c   :  { %12894 = vrsqrt.f32 %v7106_v20  ;;  %v7090_v23 = vpop.xlane.xlu1 %7089  ;;  %v4687_v20 = vld [vmem:[%s15907_s19 + $0x40] sm:$0xff] }
0x283d   :  { %v7109_v22 = vadd.f32 1e-05, %v7103_v57  ;;  %v7102_v56 = vmul.f32 0.03125, %v7090_v23  ;;  %v4685_v57 = vld [vmem:[%s15907_s19 + $0x30] sm:$0xff]  ;;  %v4684_v23 = vld [vmem:[%s15907_s19 + $0x28] sm:$0xff] }
0x283e   :  { %v7099_v44 = vpop.xlane.xlu0 %7098 }
0x283f   :  { %12896 = vrsqrt.f32 %v7109_v22  ;;  %v7108_v15 = vadd.f32 1e-05, %v7102_v56  ;;  %v7105_v37 = vmul.f32 0.03125, %v7099_v44  ;;  %v4683_v22 = vld [vmem:[%s15907_s19 + $0x20] sm:$0xff]  ;;  %v4682_v56 = vld [vmem:[%s15907_s19 + $0x18] sm:$0xff]  ;;  %v4681_v44 = vld [vmem:[%s15907_s19 + $0x10] sm:$0xff] }
0x2840   :  { %v7096_v17 = vpop.xlane.xlu1 %7095 }
0x2841   :  { %12898 = vrsqrt.f32 %v7108_v15  ;;  %v7111_v43 = vadd.f32 1e-05, %v7105_v37  ;;  %v7104_v60 = vmul.f32 0.03125, %v7096_v17  ;;  %v4680_v15 = vld [vmem:[%s15907_s19 + $0x8] sm:$0xff]  ;;  %v4679_v37 = vld [vmem:[%s15907_s19] sm:$0xff] }
0x2842   :  { %v10831_v17 = vld [vmem:[%s15906_s18] ss:$0 sm:$0xff] }
0x2843   :  { %12900 = vrsqrt.f32 %v7111_v43  ;;  %v7110_v47 = vadd.f32 1e-05, %v7104_v60 }
0x2845   :  { %12902 = vrsqrt.f32 %v7110_v47 }
0x2847   :  { %v12893_v27 = vpop.eup %12892 }
0x2848   :  { %v7119_v58 = vmul.f32 %v12893_v27, %v14785_v11 }
0x2849   :  { %v12895_v51 = vpop.eup %12894 }
0x284a   :  { %v7118_v25 = vmul.f32 %v12895_v51, %v14788_v49  ;;  %v7129_v53 = vmul.f32 %v7127_v63, %v7119_v58 }
0x284c   :  { %v12897_v42 = vpop.eup %12896  ;;  %v7128_v26 = vmul.f32 %v7127_v63, %v7118_v25  ;;  %v7139_v1 = vadd.f32 %v7137_v29, %v7129_v53 }
0x284d   :  { %v7121_v16 = vmul.f32 %v12897_v42, %v14796_v12 }
0x284e   :  { %v12899_v24 = vpop.eup %12898  ;;  %v7138_v19 = vadd.f32 %v7137_v29, %v7128_v26 }
0x284f   :  { %v7120_v21 = vmul.f32 %v12899_v24, %v14800_v5  ;;  %v7131_v11 = vmul.f32 %v7127_v63, %v7121_v16 }
0x2850   :  { %v12901_v50 = vpop.eup %12900  ;;  %12246 = vmatprep.mubr.msk.f32.mxu0 %vm428_vm6, %v7138_v19 }
0x2851   :  { %12247 = vmatmul.mubr.msk.f32.vlgmr.msra.gmra.mxu0 %vm428_vm6, %v7139_v1  ;;  %v7130_v49 = vmul.f32 %v7127_v63, %v7120_v21  ;;  %v7123_v32 = vmul.f32 %v12901_v50, %v14805_v10  ;;  %v7141_v59 = vadd.f32 %v7137_v29, %v7131_v11  ;;  %v4694_v10 = vld [vmem:[%s15907_s19 + $0x78] sm:$0xff] }
0x2852   :  { %v12903_v13 = vpop.eup %12902  ;;  %12255 = vmatprep.subr.mxu1 %v4694_v10 }
0x2853   :  { %v7140_v34 = vadd.f32 %v7137_v29, %v7130_v49  ;;  %v7122_v38 = vmul.f32 %v12903_v13, %v14811_v40  ;;  %v7133_v12 = vmul.f32 %v7127_v63, %v7123_v32  ;;  %12256 = vmatpush3.msra.mxu1 %v4694_v10  ;;  %v4693_v40 = vld [vmem:[%s15907_s19 + $0x70] sm:$0xff] }
0x2854   :  { %12257 = vmatprep.subr.mxu1 %v4693_v40 }
0x2855   :  { %12249 = vmatprep.mubr.msk.f32.mxu0 %vm428_vm6, %v7140_v34  ;;  %v7132_v14 = vmul.f32 %v7127_v63, %v7122_v38  ;;  %v7143_v46 = vadd.f32 %v7137_v29, %v7133_v12  ;;  %12258 = vmatpush3.msra.mxu1 %v4693_v40 }
0x2856   :  { %12250 = vmatmul.mubr.msk.f32.gmra.mxu0 %vm428_vm6, %v7141_v59  ;;  %12259 = vmatprep.subr.mxu1 %v4692_v61 }
0x2857   :  { %v7142_v5 = vadd.f32 %v7137_v29, %v7132_v14  ;;  %12260 = vmatpush3.msra.mxu1 %v4692_v61 }
0x2858   :  { %12261 = vmatprep.subr.mxu1 %v4691_v2 }
0x2859   :  { %12252 = vmatprep.mubr.msk.f32.mxu0 %vm428_vm6, %v7142_v5  ;;  %12262 = vmatpush3.msra.mxu1 %v4691_v2 }
0x285a   :  { %12253 = vmatmul.mubr.msk.f32.gmra.mxu0 %vm428_vm6, %v7143_v46  ;;  %12263 = vmatprep.subr.mxu1 %v4690_v55 }
0x285b   :  { %12264 = vmatpush3.msra.mxu1 %v4690_v55 }
0x285c   :  { %12265 = vmatprep.subr.mxu1 %v4689_v48 }
0x285d   :  { %12266 = vmatpush3.msra.mxu1 %v4689_v48 }
0x285e   :  { %12267 = vmatprep.subr.mxu1 %v4688_v52 }
0x285f   :  { %12268 = vmatpush3.msra.mxu1 %v4688_v52 }
0x2860   :  { %12269 = vmatprep.subr.mxu1 %v4687_v20 }
0x2861   :  { %12270 = vmatpush3.msra.mxu1 %v4687_v20 }
0x2862   :  { %12271 = vmatprep.subr.mxu1 %v4686_v33 }
0x2863   :  { %12272 = vmatpush3.msra.mxu1 %v4686_v33 }
0x2864   :  { %12273 = vmatprep.subr.mxu1 %v4685_v57 }
0x2865   :  { %12274 = vmatpush3.msra.mxu1 %v4685_v57 }
0x2866   :  { %12275 = vmatprep.subr.mxu1 %v4684_v23 }
0x2867   :  { %12276 = vmatpush3.msra.mxu1 %v4684_v23 }
0x2868   :  { %12277 = vmatprep.subr.mxu1 %v4683_v22 }
0x2869   :  { %12278 = vmatpush3.msra.mxu1 %v4683_v22 }
0x286a   :  { %12279 = vmatprep.subr.mxu1 %v4682_v56 }
0x286b   :  { %12280 = vmatpush3.msra.mxu1 %v4682_v56 }
0x286c   :  { %12281 = vmatprep.subr.mxu1 %v4681_v44 }
0x286d   :  { %12282 = vmatpush3.msra.mxu1 %v4681_v44 }
0x286e   :  { %12283 = vmatprep.subr.mxu1 %v4680_v15 }
0x286f   :  { %12284 = vmatpush3.msra.mxu1 %v4680_v15 }
0x2870   :  { %12285 = vmatprep.subr.mxu1 %v4679_v37 }
0x2871   :  { %12286 = vmatpush3.msra.mxu1 %v4679_v37 }
0x2911   :  { %v12248_v43 = vpop.f32.mrf.mxu0 }
0x2912   :  { %v7240_v60 = vadd.f32 %v12248_v43, %v10831_v17 }
0x2913   :  { %v7234_v47 = vpop.f32.mrf.mxu0 }
0x2914   :  { %v7264_v27 = vmul.f32 %v7240_v60, %v7240_v60  ;;  %v7235_v63 = vadd.f32 %v10831_v17, %v7234_v47 }
0x2916   :  { %v7270_v58 = vmul.f32 %v7264_v27, %v7240_v60  ;;  %v7263_v51 = vmul.f32 %v7235_v63, %v7235_v63  ;;  %v12251_v25 = vpop.f32.mrf.mxu0 }
0x2917   :  { %v7250_v29 = vadd.f32 %v12251_v25, %v10831_v17 }
0x2918   :  { %v7276_v53 = vmul.f32 0.044715, %v7270_v58  ;;  %v7269_v42 = vmul.f32 %v7263_v51, %v7235_v63  ;;  %v7244_v26 = vpop.f32.mrf.mxu0 }
0x2919   :  { %v7266_v16 = vmul.f32 %v7250_v29, %v7250_v29  ;;  %v7245_v24 = vadd.f32 %v10831_v17, %v7244_v26 }
0x291a   :  { %v7282_v19 = vadd.f32 %v7276_v53, %v7240_v60  ;;  %v7275_v1 = vmul.f32 0.044715, %v7269_v42  ;;  %v12254_v21 = vpop.f32.mrf.mxu0 }
0x291b   :  { %v7272_v50 = vmul.f32 %v7266_v16, %v7250_v29  ;;  %v7265_v11 = vmul.f32 %v7245_v24, %v7245_v24  ;;  %v7260_v49 = vadd.f32 %v12254_v21, %v10831_v17 }
0x291c   :  { %v7288_v32 = vmul.f32 0.7978846, %v7282_v19  ;;  %v7281_v13 = vadd.f32 %v7275_v1, %v7235_v63  ;;  %v7254_v34 = vpop.f32.mrf.mxu0 }
0x291d   :  { %v7278_v38 = vmul.f32 0.044715, %v7272_v50  ;;  %v7271_v59 = vmul.f32 %v7265_v11, %v7245_v24  ;;  %v7268_v12 = vmul.f32 %v7260_v49, %v7260_v49  ;;  %v7255_v14 = vadd.f32 %v10831_v17, %v7254_v34 }
0x291e   :  { %12904 = vtanh.f32 %v7288_v32  ;;  %v7287_v5 = vmul.f32 0.7978846, %v7281_v13 }
0x291f   :  { %v7284_v46 = vadd.f32 %v7278_v38, %v7250_v29  ;;  %v7277_v10 = vmul.f32 0.044715, %v7271_v59  ;;  %v7274_v40 = vmul.f32 %v7268_v12, %v7260_v49  ;;  %v7267_v61 = vmul.f32 %v7255_v14, %v7255_v14 }
0x2920   :  { %12906 = vtanh.f32 %v7287_v5 }
0x2921   :  { %v7290_v2 = vmul.f32 0.7978846, %v7284_v46  ;;  %v7283_v55 = vadd.f32 %v7277_v10, %v7245_v24  ;;  %v7280_v48 = vmul.f32 0.044715, %v7274_v40  ;;  %v7273_v52 = vmul.f32 %v7267_v61, %v7255_v14 }
0x2923   :  { %12908 = vtanh.f32 %v7290_v2  ;;  %v7289_v20 = vmul.f32 0.7978846, %v7283_v55  ;;  %v7286_v33 = vadd.f32 %v7280_v48, %v7260_v49  ;;  %v7279_v57 = vmul.f32 0.044715, %v7273_v52 }
0x2925   :  { %12910 = vtanh.f32 %v7289_v20  ;;  %v7292_v23 = vmul.f32 0.7978846, %v7286_v33  ;;  %v7285_v22 = vadd.f32 %v7279_v57, %v7255_v14 }
0x2927   :  { %12912 = vtanh.f32 %v7292_v23  ;;  %v7291_v56 = vmul.f32 0.7978846, %v7285_v22 }
0x2929   :  { %12914 = vtanh.f32 %v7291_v56 }
0x292b   :  { %v12905_v44 = vpop.eup %12904 }
0x292c   :  { %v7300_v15 = vadd.f32 1.0, %v12905_v44 }
0x292d   :  { %v12907_v37 = vpop.eup %12906 }
0x292e   :  { %v7299_v17 = vadd.f32 1.0, %v12907_v37  ;;  %v7306_v43 = vmul.f32 0.5, %v7300_v15 }
0x2930   :  { %v12909_v47 = vpop.eup %12908  ;;  %v7305_v27 = vmul.f32 0.5, %v7299_v17  ;;  %v7312_v53 = vmul.f32 %v7306_v43, %v7240_v60  ;;  %v10838_v60 = vld [vmem:[%s15904_s16 + $0x8] ss:$0 sm:$0xff] }
0x2931   :  { %v7302_v58 = vadd.f32 1.0, %v12909_v47 }
0x2932   :  { %v12911_v51 = vpop.eup %12910  ;;  %v7311_v25 = vmul.f32 %v7305_v27, %v7235_v63 }
0x2933   :  { %v7301_v42 = vadd.f32 1.0, %v12911_v51  ;;  %v7308_v16 = vmul.f32 0.5, %v7302_v58 }
0x2934   :  { %v12913_v26 = vpop.eup %12912  ;;  %12287 = vmatprep.mubr.f32.mxu1 %v7311_v25 }
0x2935   :  { %12288 = vmatmul.mubr.f32.vlgmr.msra.gmra.mxu1 %v7312_v53  ;;  %v7307_v19 = vmul.f32 0.5, %v7301_v42  ;;  %v7304_v1 = vadd.f32 1.0, %v12913_v26  ;;  %v7314_v32 = vmul.f32 %v7308_v16, %v7250_v29 }
0x2936   :  { %v12915_v21 = vpop.eup %12914 }
0x2937   :  { %v7313_v50 = vmul.f32 %v7307_v19, %v7245_v24  ;;  %v7303_v11 = vadd.f32 1.0, %v12915_v21  ;;  %v7310_v13 = vmul.f32 0.5, %v7304_v1 }
0x2939   :  { %12290 = vmatprep.mubr.f32.mxu1 %v7313_v50  ;;  %v7309_v34 = vmul.f32 0.5, %v7303_v11  ;;  %v7316_v59 = vmul.f32 %v7310_v13, %v7260_v49 }
0x293a   :  { %12291 = vmatmul.mubr.f32.gmra.mxu1 %v7314_v32 }
0x293b   :  { %v7315_v38 = vmul.f32 %v7309_v34, %v7255_v14 }
0x293d   :  { %12293 = vmatprep.mubr.f32.mxu1 %v7315_v38 }
0x293e   :  { %12294 = vmatmul.mubr.f32.gmra.mxu1 %v7316_v59 }
0x29f5   :  { %v12289_v63 = vpop.f32.mrf.mxu1 }
0x29f6   :  { %v7393_v12 = vadd.f32 %v12289_v63, %v10838_v60 }
0x29f7   :  { %v7387_v5 = vpop.f32.mrf.mxu1 }
0x29f8   :  { %v14903_v46 = vadd.f32 %v7393_v12, %v14755_v35  ;;  %v7388_v24 = vadd.f32 %v10838_v60, %v7387_v5  ;;  %v10842_v5 = vld [vmem:[%s15903_s15 + $0x98] sm:$0xff] }
0x29f9   :  { %12296 = vmatprep.subr.mxu0 %v10842_v5 }
0x29fa   :  { %v14906_v29 = vadd.f32 %v7388_v24, %v14758_v62  ;;  %v12292_v10 = vpop.f32.mrf.mxu1  ;;  %v7469_v49 = vsel %vm428_vm6, %v14903_v46, 0.0  ;;  %v10850_v24 = vld [vmem:[%s15903_s15 + $0xd8] sm:$0xff]  ;;  %12297 = vmatpush3.msra.mxu0 %v10842_v5 }
0x29fb   :  { %v7403_v14 = vadd.f32 %v12292_v10, %v10838_v60  ;;  %7470 = vadd.xlane.f32.xlu0 %v7469_v49  ;;  %12330 = vmatprep.subr.mxu1 %v10850_v24  ;;  %v10841_v10 = vld [vmem:[%s15903_s15 + $0x90] sm:$0xff] }
0x29fc   :  { %v7397_v40 = vpop.f32.mrf.mxu1  ;;  %v7466_v61 = vsel %vm428_vm6, %v14906_v29, 0.0  ;;  %12331 = vmatpush3.msra.mxu1 %v10850_v24  ;;  %v10849_v49 = vld [vmem:[%s15903_s15 + $0xd0] sm:$0xff]  ;;  %12298 = vmatprep.subr.mxu0 %v10841_v10 }
0x29fd   :  { %v14913_v2 = vadd.f32 %v7403_v14, %v14765_v0  ;;  %v7398_v55 = vadd.f32 %v10838_v60, %v7397_v40  ;;  %7467 = vadd.xlane.f32.xlu1 %v7466_v61  ;;  %12332 = vmatprep.subr.mxu1 %v10849_v49  ;;  %v10840_v14 = vld [vmem:[%s15903_s15 + $0x88] sm:$0xff]  ;;  %v10839_v61 = vld [vmem:[%s15903_s15 + $0x80] sm:$0xff] }
0x29fe   :  { %v12295_v35 = vpop.f32.mrf.mxu1  ;;  %12299 = vmatpush3.msra.mxu0 %v10841_v10  ;;  %12333 = vmatpush3.msra.mxu1 %v10849_v49  ;;  %v10848_v40 = vld [vmem:[%s15903_s15 + $0xc8] sm:$0xff] }
0x29ff   :  { %v14916_v48 = vadd.f32 %v7398_v55, %v14768_v54  ;;  %v7413_v62 = vadd.f32 %v12295_v35, %v10838_v60  ;;  %v7475_v52 = vsel %vm428_vm6, %v14913_v2, 0.0  ;;  %12300 = vmatprep.subr.mxu0 %v10840_v14  ;;  %12334 = vmatprep.subr.mxu1 %v10848_v40  ;;  %v10847_v55 = vld [vmem:[%s15903_s15 + $0xc0] sm:$0xff]  ;;  %v10846_v35 = vld [vmem:[%s15903_s15 + $0xb8] sm:$0xff] }
0x2a00   :  { %7476 = vadd.xlane.f32.xlu0 %v7475_v52  ;;  %v7407_v20 = vpop.f32.mrf.mxu1  ;;  %12301 = vmatpush3.msra.mxu0 %v10840_v14 }
0x2a01   :  { %v14921_v33 = vadd.f32 %v7413_v62, %v14773_v3  ;;  %v7408_v57 = vadd.f32 %v10838_v60, %v7407_v20  ;;  %v7472_v0 = vsel %vm428_vm6, %v14916_v48, 0.0  ;;  %12335 = vmatpush3.msra.mxu1 %v10848_v40  ;;  %12302 = vmatprep.subr.mxu0 %v10839_v61 }
0x2a02   :  { %7473 = vadd.xlane.f32.xlu1 %v7472_v0  ;;  %12336 = vmatprep.subr.mxu1 %v10847_v55 }
0x2a03   :  { %v14926_v23 = vadd.f32 %v7408_v57, %v14778_v39  ;;  %v7481_v54 = vsel %vm428_vm6, %v14921_v33, 0.0  ;;  %12303 = vmatpush3.msra.mxu0 %v10839_v61  ;;  %12337 = vmatpush3.msra.mxu1 %v10847_v55  ;;  %v10844_v61 = vld [vmem:[%s15903_s15 + $0xa8] sm:$0xff] }
0x2a04   :  { %7482 = vadd.xlane.f32.xlu0 %v7481_v54  ;;  %12313 = vmatprep.subr.mxu0 %v10846_v35 }
0x2a05   :  { %v7478_v22 = vsel %vm428_vm6, %v14926_v23, 0.0  ;;  %12362 = vmatprep.subr.mxu1 %v15954_v18 }
0x2a06   :  { %7479 = vadd.xlane.f32.xlu1 %v7478_v22 }
0x2a84   :  { %v7471_v56 = vpop.xlane.xlu0 %7470 }
0x2a85   :  { %v7485_v44 = vmul.f32 0.03125, %v7471_v56 }
0x2a86   :  { %v7468_v3 = vpop.xlane.xlu1 %7467 }
0x2a87   :  { %v14933_v15 = vsub.f32 %v14903_v46, %v7485_v44  ;;  %v7484_v37 = vmul.f32 0.03125, %v7468_v3 }
0x2a89   :  { %v14936_v17 = vsub.f32 %v14906_v29, %v7484_v37  ;;  %v7477_v39 = vpop.xlane.xlu0 %7476  ;;  %v7497_v43 = vmul.f32 %v14933_v15, %v14933_v15 }
0x2a8a   :  { %v7487_v47 = vmul.f32 0.03125, %v7477_v39 }
0x2a8b   :  { %v7474_v27 = vpop.xlane.xlu1 %7473  ;;  %v7505_v58 = vsel %vm428_vm6, %v7497_v43, 0.0  ;;  %v7496_v51 = vmul.f32 %v14936_v17, %v14936_v17 }
0x2a8c   :  { %v14944_v25 = vsub.f32 %v14913_v2, %v7487_v47  ;;  %v7486_v53 = vmul.f32 0.03125, %v7474_v27  ;;  %7506 = vadd.xlane.f32.xlu0 %v7505_v58 }
0x2a8d   :  { %v7483_v42 = vpop.xlane.xlu0 %7482  ;;  %v7502_v26 = vsel %vm428_vm6, %v7496_v51, 0.0 }
0x2a8e   :  { %v14948_v16 = vsub.f32 %v14916_v48, %v7486_v53  ;;  %v7489_v19 = vmul.f32 0.03125, %v7483_v42  ;;  %7503 = vadd.xlane.f32.xlu1 %v7502_v26  ;;  %v7499_v1 = vmul.f32 %v14944_v25, %v14944_v25  ;;  %v14999_v42 = vld [vmem:[%s15904_s16 + $0x10] sm:$0xff] }
0x2a8f   :  { %v7480_v21 = vpop.xlane.xlu1 %7479 }
0x2a90   :  { %v14953_v50 = vsub.f32 %v14921_v33, %v7489_v19  ;;  %v7488_v11 = vmul.f32 0.03125, %v7480_v21  ;;  %v7511_v32 = vsel %vm428_vm6, %v7499_v1, 0.0  ;;  %v7498_v13 = vmul.f32 %v14948_v16, %v14948_v16 }
0x2a91   :  { %7512 = vadd.xlane.f32.xlu0 %v7511_v32  ;;  %v7547_v19 = vrot.slane %v14999_v42, %v13235_v8  ;;  %v7557_v32 = vrot.slane %v14999_v42, %v13238_v9  ;;  %v10845_v9 = vld [vmem:[%s15903_s15 + $0xb0] sm:$0xff] }
0x2a92   :  { %v14959_v34 = vsub.f32 %v14926_v23, %v7488_v11  ;;  %v7508_v38 = vsel %vm428_vm6, %v7498_v13, 0.0  ;;  %v7501_v59 = vmul.f32 %v14953_v50, %v14953_v50 }
0x2a93   :  { %7509 = vadd.xlane.f32.xlu1 %v7508_v38 }
0x2a94   :  { %v7517_v60 = vsel %vm428_vm6, %v7501_v59, 0.0  ;;  %v7500_v63 = vmul.f32 %v14959_v34, %v14959_v34 }
0x2a95   :  { %7518 = vadd.xlane.f32.xlu0 %v7517_v60 }
0x2a96   :  { %v7514_v12 = vsel %vm428_vm6, %v7500_v63, 0.0 }
0x2a97   :  { %7515 = vadd.xlane.f32.xlu1 %v7514_v12 }
0x2b15   :  { %v7507_v62 = vpop.xlane.xlu0 %7506 }
0x2b16   :  { %v7521_v52 = vmul.f32 0.03125, %v7507_v62 }
0x2b17   :  { %v7504_v20 = vpop.xlane.xlu1 %7503 }
0x2b18   :  { %v7527_v57 = vadd.f32 1e-05, %v7521_v52  ;;  %v7520_v0 = vmul.f32 0.03125, %v7504_v20 }
0x2b1a   :  { %12916 = vrsqrt.f32 %v7527_v57  ;;  %v7526_v54 = vadd.f32 1e-05, %v7520_v0  ;;  %v7513_v22 = vpop.xlane.xlu0 %7512 }
0x2b1b   :  { %v7523_v56 = vmul.f32 0.03125, %v7513_v22 }
0x2b1c   :  { %12918 = vrsqrt.f32 %v7526_v54  ;;  %v7510_v44 = vpop.xlane.xlu1 %7509 }
0x2b1d   :  { %v7529_v3 = vadd.f32 1e-05, %v7523_v56  ;;  %v7522_v37 = vmul.f32 0.03125, %v7510_v44 }
0x2b1e   :  { %v7519_v39 = vpop.xlane.xlu0 %7518 }
0x2b1f   :  { %12920 = vrsqrt.f32 %v7529_v3  ;;  %v7528_v43 = vadd.f32 1e-05, %v7522_v37  ;;  %v7525_v47 = vmul.f32 0.03125, %v7519_v39  ;;  %v7684_v3 = vrot.slane %v14999_v42, %v13360_v31 }
0x2b20   :  { %v7516_v27 = vpop.xlane.xlu1 %7515 }
0x2b21   :  { %12922 = vrsqrt.f32 %v7528_v43  ;;  %v7531_v58 = vadd.f32 1e-05, %v7525_v47  ;;  %v7524_v51 = vmul.f32 0.03125, %v7516_v27 }
0x2b23   :  { %12924 = vrsqrt.f32 %v7531_v58  ;;  %v7530_v53 = vadd.f32 1e-05, %v7524_v51 }
0x2b25   :  { %12926 = vrsqrt.f32 %v7530_v53  ;;  %v7567_v53 = vrot.slane %v14999_v42, %v13357_v30 }
0x2b27   :  { %v12917_v26 = vpop.eup %12916 }
0x2b28   :  { %v7539_v1 = vmul.f32 %v12917_v26, %v14933_v15 }
0x2b29   :  { %v12919_v21 = vpop.eup %12918 }
0x2b2a   :  { %v7538_v11 = vmul.f32 %v12919_v21, %v14936_v17  ;;  %v7549_v13 = vmul.f32 %v7547_v19, %v7539_v1 }
0x2b2c   :  { %v12921_v38 = vpop.eup %12920  ;;  %v7548_v59 = vmul.f32 %v7547_v19, %v7538_v11  ;;  %v7559_v5 = vadd.f32 %v7557_v32, %v7549_v13 }
0x2b2d   :  { %v7541_v60 = vmul.f32 %v12921_v38, %v14944_v25 }
0x2b2e   :  { %v12923_v63 = vpop.eup %12922  ;;  %v7558_v12 = vadd.f32 %v7557_v32, %v7548_v59 }
0x2b2f   :  { %v7540_v24 = vmul.f32 %v12923_v63, %v14948_v16  ;;  %v7551_v8 = vmul.f32 %v7547_v19, %v7541_v60 }
0x2b30   :  { %v12925_v10 = vpop.eup %12924  ;;  %12304 = vmatprep.mubr.msk.f32.mxu0 %vm428_vm6, %v7558_v12  ;;  %12338 = vmatprep.mubr.msk.f32.mxu1 %vm428_vm6, %v7558_v12 }
0x2b31   :  { %v7543_v15 = vmul.f32 %v12925_v10, %v14953_v50  ;;  %12305 = vmatmul.mubr.msk.f32.vlgmr.msra.gmra.mxu0 %vm428_vm6, %v7559_v5  ;;  %12339 = vmatmul.mubr.msk.f32.vlgmr.msra.gmra.mxu1 %vm428_vm6, %v7559_v5  ;;  %v7550_v17 = vmul.f32 %v7547_v19, %v7540_v24  ;;  %v7561_v14 = vadd.f32 %v7557_v32, %v7551_v8 }
0x2b32   :  { %v12927_v25 = vpop.eup %12926  ;;  %12314 = vmatpush3.msra.mxu0 %v10846_v35 }
0x2b33   :  { %v7560_v16 = vadd.f32 %v7557_v32, %v7550_v17  ;;  %12315 = vmatprep.subr.mxu0 %v10845_v9  ;;  %v7542_v49 = vmul.f32 %v12927_v25, %v14959_v34  ;;  %v7553_v40 = vmul.f32 %v7547_v19, %v7543_v15  ;;  %v10843_v34 = vld [vmem:[%s15903_s15 + $0xa0] sm:$0xff] }
0x2b34   :  { %12316 = vmatpush3.msra.mxu0 %v10845_v9  ;;  %v15955_v9 = vld [vmem:[#allocation7_spill] sm:$0xff] }
0x2b35   :  { %12307 = vmatprep.mubr.msk.f32.mxu0 %vm428_vm6, %v7560_v16  ;;  %12341 = vmatprep.mubr.msk.f32.mxu1 %vm428_vm6, %v7560_v16  ;;  %v7552_v50 = vmul.f32 %v7547_v19, %v7542_v49  ;;  %v7563_v35 = vadd.f32 %v7557_v32, %v7553_v40  ;;  %v7783_v15 = vrot.slane %v14999_v42, %v15955_v9 }
0x2b36   :  { %12308 = vmatmul.mubr.msk.f32.gmra.mxu0 %vm428_vm6, %v7561_v14  ;;  %12342 = vmatmul.mubr.msk.f32.gmra.mxu1 %vm428_vm6, %v7561_v14 }
0x2b37   :  { %v7562_v55 = vadd.f32 %v7557_v32, %v7552_v50  ;;  %12317 = vmatprep.subr.mxu0 %v10844_v61 }
0x2b38   :  { %12318 = vmatpush3.msra.mxu0 %v10844_v61  ;;  %v15956_v61 = vld [vmem:[#allocation8_spill] sm:$0xff] }
0x2b39   :  { %12310 = vmatprep.mubr.msk.f32.mxu0 %vm428_vm6, %v7562_v55  ;;  %12344 = vmatprep.mubr.msk.f32.mxu1 %vm428_vm6, %v7562_v55 }
0x2b3a   :  { %12311 = vmatmul.mubr.msk.f32.gmra.mxu0 %vm428_vm6, %v7563_v35  ;;  %12345 = vmatmul.mubr.msk.f32.gmra.mxu1 %vm428_vm6, %v7563_v35 }
0x2b3b   :  { %12321 = vmatprep.mubr.msk.f32.mxu0 %vm428_vm6, %v7558_v12  ;;  %12319 = vmatprep.subr.mxu0 %v10843_v34 }
0x2b3c   :  { %12320 = vmatpush3.msra.mxu0 %v10843_v34  ;;  %12368 = vmatprep.mubr.msk.f32.mxu1 %vm13089_vm1, %v15954_v18 }
0x2b3d   :  { %12347 = vmatprep.subr.mxu0 %v15954_v18 }
0x2b3e   :  { %12322 = vmatmul.mubr.msk.f32.vlgmr.msra.gmra.mxu0 %vm428_vm6, %v7559_v5 }
0x2b3f   :  { %12324 = vmatprep.mubr.msk.f32.mxu0 %vm428_vm6, %v7560_v16 }
0x2b42   :  { %12325 = vmatmul.mubr.msk.f32.gmra.mxu0 %vm428_vm6, %v7561_v14 }
0x2b43   :  { %12327 = vmatprep.mubr.msk.f32.mxu0 %vm428_vm6, %v7562_v55 }
0x2b46   :  { %12328 = vmatmul.mubr.msk.f32.gmra.mxu0 %vm428_vm6, %v7563_v35 }
0x2b47   :  { %12353 = vmatprep.mubr.msk.f32.mxu0 %vm13089_vm1, %v15954_v18 }
0x2bf1   :  { %v12306_v62 = vpop.f32.mrf.mxu0  ;;  %v12340_v47 = vpop.f32.mrf.mxu1 }
0x2bf2   :  { %v15077_v38 = vadd.f32 %v12306_v62, %v7567_v53  ;;  %v15130_v49 = vadd.f32 %v12340_v47, %v7783_v15 }
0x2bf3   :  { %v7652_v52 = vpop.f32.mrf.mxu0  ;;  %v7850_v26 = vpop.f32.mrf.mxu1 }
0x2bf4   :  { %v15063_v1 = vadd.f32 %v7652_v52, %v7567_v53  ;;  %v7880_v5 = vmul.f32 %v15077_v38, %v13377_v41  ;;  %v15148_v35 = vadd.f32 %v7850_v26, %v7783_v15  ;;  %v8428_v52 = vmul.f32 %v15130_v49, %v15956_v61 }
0x2bf6   :  { %v12309_v20 = vpop.f32.mrf.mxu0  ;;  %v12343_v32 = vpop.f32.mrf.mxu1  ;;  %v7879_v59 = vmul.f32 %v15063_v1, %v13377_v41  ;;  %v8165_v50 = vmul.f32 %v15063_v1, %v15956_v61 }
0x2bf7   :  { %v15070_v11 = vadd.f32 %v12309_v20, %v7567_v53 }
0x2bf8   :  { %v7662_v57 = vpop.f32.mrf.mxu0  ;;  %v7860_v12 = vpop.f32.mrf.mxu1 }
0x2bf9   :  { %v7882_v60 = vmul.f32 %v15070_v11, %v13377_v41  ;;  %v15096_v24 = vadd.f32 %v7662_v57, %v7567_v53  ;;  %v15120_v16 = vadd.f32 %v7860_v12, %v7783_v15  ;;  %v8168_v34 = vmul.f32 %v15070_v11, %v15956_v61 }
0x2bfa   :  { %v12312_v0 = vpop.f32.mrf.mxu0  ;;  %v12346_v17 = vpop.f32.mrf.mxu1  ;;  %v8166_v57 = vmul.f32 %v15077_v38, %v15956_v61 }
0x2bfb   :  { %v15104_v10 = vadd.f32 %v12312_v0, %v7567_v53  ;;  %v7881_v25 = vmul.f32 %v15096_v24, %v13377_v41  ;;  %v15132_v14 = vadd.f32 %v12346_v17, %v7783_v15  ;;  %v8429_v55 = vmul.f32 %v15120_v16, %v15956_v61 }
0x2bfc   :  { %v7672_v54 = vpop.f32.mrf.mxu0  ;;  %v7870_v40 = vpop.f32.mrf.mxu1  ;;  %v15164_v0 = vadd.f32 %v12343_v32, %v7783_v15 }
0x2bfd   :  { %v15086_v63 = vadd.f32 %v7672_v54, %v7567_v53  ;;  %v7884_v42 = vmul.f32 %v15104_v10, %v13377_v41  ;;  %v15152_v62 = vadd.f32 %v7870_v40, %v7783_v15  ;;  %v8432_v20 = vmul.f32 %v15132_v14, %v15956_v61 }
0x2bfe   :  { %v12323_v22 = vpop.f32.mrf.mxu0  ;;  %v8427_v54 = vmul.f32 %v15148_v35, %v15956_v61 }
0x2bff   :  { %v15052_v51 = vadd.f32 %v12323_v22, %v7684_v3  ;;  %v7883_v8 = vmul.f32 %v15086_v63, %v13377_v41  ;;  %v8431_v22 = vmul.f32 %v15152_v62, %v15956_v61 }
0x2c00   :  { %v7751_v56 = vpop.f32.mrf.mxu0 }
0x2c01   :  { %v15066_v21 = vadd.f32 %v7751_v56, %v7684_v3  ;;  %v8169_v56 = vmul.f32 %v15086_v63, %v15956_v61 }
0x2c02   :  { %v12326_v44 = vpop.f32.mrf.mxu0 }
0x2c03   :  { %v15073_v13 = vadd.f32 %v12326_v44, %v7684_v3  ;;  %v8430_v44 = vmul.f32 %v15164_v0, %v15956_v61 }
0x2c04   :  { %v7761_v37 = vpop.f32.mrf.mxu0 }
0x2c05   :  { %v15045_v39 = vadd.f32 %v7761_v37, %v7684_v3  ;;  %v8170_v37 = vmul.f32 %v15104_v10, %v15956_v61 }
0x2c06   :  { %v12329_v43 = vpop.f32.mrf.mxu0 }
0x2c07   :  { %v15047_v27 = vadd.f32 %v12329_v43, %v7684_v3  ;;  %12348 = vmatpush3.xpose.msk.msra.mxu0 %vm428_vm6, %v15045_v39 }
0x2c08   :  { %v7771_v58 = vpop.f32.mrf.mxu0  ;;  %12349 = vmatprep.subr.mxu0 %v15954_v18 }
0x2c09   :  { %12363 = vmatpush3.xpose.msk.msra.mxu1 %vm428_vm6, %v15047_v27  ;;  %v15059_v19 = vadd.f32 %v7771_v58, %v7684_v3  ;;  %v8167_v3 = vmul.f32 %v15096_v24, %v15956_v61 }
0x2c0a   :  { %12364 = vmatprep.subr.mxu1 %v15954_v18 }
0x2c0b   :  { %12350 = vmatpush3.xpose.msk.msra.mxu0 %vm428_vm6, %v15052_v51 }
0x2c0c   :  { %12351 = vmatprep.subr.mxu0 %v15954_v18 }
0x2c0d   :  { %12365 = vmatpush3.xpose.msk.msra.mxu1 %vm428_vm6, %v15059_v19 }
0x2c0e   :  { %12366 = vmatprep.subr.mxu1 %v15954_v18 }
0x2c0f   :  { %12352 = vmatpush3.xpose.msk.msra.mxu0 %vm428_vm6, %v15066_v21 }
0x2c10   :  { %12377 = vmatprep.subr.mxu0 %v15954_v18 }
0x2c11   :  { %12367 = vmatpush3.xpose.msk.msra.mxu1 %vm428_vm6, %v15073_v13 }
0x2c12   :  { %12354 = vmatmul.mubr.msk.f32.vlgmr.msra.gmra.mxu0 %vm428_vm6, %v7879_v59  ;;  %12392 = vmatprep.subr.mxu1 %v15954_v18 }
0x2c13   :  { %12378 = vmatpush3.xpose.msk.msra.mxu0 %vm428_vm6, %v15045_v39  ;;  %12356 = vmatprep.mubr.msk.f32.mxu0 %vm13089_vm1, %v15954_v18 }
0x2c14   :  { %12369 = vmatmul.mubr.msk.f32.vlgmr.msra.gmra.mxu1 %vm428_vm6, %v7882_v60  ;;  %12379 = vmatprep.subr.mxu0 %v15954_v18 }
0x2c15   :  { %12393 = vmatpush3.xpose.msk.msra.mxu1 %vm428_vm6, %v15047_v27  ;;  %12371 = vmatprep.mubr.msk.f32.mxu1 %vm13089_vm1, %v15954_v18 }
0x2c16   :  { %12357 = vmatmul.mubr.msk.f32.gmra.mxu0 %vm428_vm6, %v7880_v5  ;;  %12394 = vmatprep.subr.mxu1 %v15954_v18 }
0x2c17   :  { %12380 = vmatpush3.xpose.msk.msra.mxu0 %vm428_vm6, %v15052_v51  ;;  %12359 = vmatprep.mubr.msk.f32.mxu0 %vm13089_vm1, %v15954_v18 }
0x2c18   :  { %12372 = vmatmul.mubr.msk.f32.gmra.mxu1 %vm428_vm6, %v7883_v8  ;;  %12381 = vmatprep.subr.mxu0 %v15954_v18 }
0x2c19   :  { %12395 = vmatpush3.xpose.msk.msra.mxu1 %vm428_vm6, %v15059_v19  ;;  %12374 = vmatprep.mubr.msk.f32.mxu1 %vm13089_vm1, %v15954_v18 }
0x2c1a   :  { %12360 = vmatmul.mubr.msk.f32.gmra.mxu0 %vm428_vm6, %v7881_v25  ;;  %12396 = vmatprep.subr.mxu1 %v15954_v18 }
0x2c1b   :  { %12382 = vmatpush3.xpose.msk.msra.mxu0 %vm428_vm6, %v15066_v21  ;;  %12383 = vmatprep.mubr.msk.f32.mxu0 %vm13089_vm1, %v15954_v18 }
0x2c1c   :  { %12375 = vmatmul.mubr.msk.f32.gmra.mxu1 %vm428_vm6, %v7884_v42  ;;  %12407 = vmatprep.subr.mxu0 %v15954_v18 }
0x2c1d   :  { %12397 = vmatpush3.xpose.msk.msra.mxu1 %vm428_vm6, %v15073_v13  ;;  %12398 = vmatprep.mubr.msk.f32.mxu1 %vm13089_vm1, %v15954_v18 }
0x2c1e   :  { %12384 = vmatmul.mubr.msk.f32.vlgmr.msra.gmra.mxu0 %vm428_vm6, %v8165_v50  ;;  %12422 = vmatprep.subr.mxu1 %v15954_v18 }
0x2c1f   :  { %12408 = vmatpush3.msra.mxu0 %v8429_v55  ;;  %12386 = vmatprep.mubr.msk.f32.mxu0 %vm13089_vm1, %v15954_v18 }
0x2c20   :  { %12399 = vmatmul.mubr.msk.f32.vlgmr.msra.gmra.mxu1 %vm428_vm6, %v8168_v34  ;;  %12409 = vmatprep.subr.mxu0 %v15954_v18 }
0x2c21   :  { %12410 = vmatpush3.msra.mxu0 %v8428_v52  ;;  %12423 = vmatpush3.msra.mxu1 %v8432_v20 }
0x2c22   :  { %12387 = vmatmul.mubr.msk.f32.gmra.mxu0 %vm428_vm6, %v8166_v57  ;;  %12411 = vmatprep.subr.mxu0 %v15954_v18 }
0x2c23   :  { %12424 = vmatprep.subr.mxu1 %v15954_v18  ;;  %12401 = vmatprep.mubr.msk.f32.mxu1 %vm13089_vm1, %v15954_v18 }
0x2c24   :  { %12412 = vmatpush3.msra.mxu0 %v8427_v54  ;;  %12425 = vmatpush3.msra.mxu1 %v8431_v22 }
0x2c25   :  { %12402 = vmatmul.mubr.msk.f32.gmra.mxu1 %vm428_vm6, %v8169_v56  ;;  %12426 = vmatprep.subr.mxu1 %v15954_v18 }
0x2c26   :  { %12389 = vmatprep.mubr.msk.f32.mxu0 %vm13089_vm1, %v15954_v18  ;;  %12427 = vmatpush3.msra.mxu1 %v8430_v44 }
0x2c27   :  { %12390 = vmatmul.mubr.msk.f32.gmra.mxu0 %vm428_vm6, %v8167_v3  ;;  %12404 = vmatprep.mubr.msk.f32.mxu1 %vm13089_vm1, %v15954_v18 }
0x2c28   :  { %12413 = vmatprep.mubr.msk.f32.mxu0 %vm13089_vm1, %v15954_v18  ;;  %12437 = vmatprep.subr.mxu0 %v15954_v18 }
0x2c29   :  { %12405 = vmatmul.mubr.msk.f32.gmra.mxu1 %vm428_vm6, %v8170_v37  ;;  %12452 = vmatprep.subr.mxu1 %v15954_v18 }
0x2c2a   :  { %12428 = vmatprep.mubr.msk.f32.mxu1 %vm13089_vm1, %v15954_v18 }
0x2cd2   :  { %v7969_v43 = vpop.f32.mrf.mxu0 }
0x2cd4   :  { %v12355_v47 = vpop.f32.mrf.mxu0  ;;  %v8067_v58 = vpop.f32.mrf.mxu1 }
0x2cd6   :  { %v7974_v53 = vpop.f32.mrf.mxu0  ;;  %v12370_v26 = vpop.f32.mrf.mxu1 }
0x2cd7   :  { %v8081_v26 = vmul.f32 0.35355338, %v7969_v43 }
0x2cd8   :  { %v12358_v32 = vpop.f32.mrf.mxu0  ;;  %v8072_v59 = vpop.f32.mrf.mxu1 }
0x2cda   :  { %v7979_v60 = vpop.f32.mrf.mxu0  ;;  %v12373_v12 = vpop.f32.mrf.mxu1 }
0x2cdc   :  { %v12361_v5 = vpop.f32.mrf.mxu0  ;;  %v8077_v8 = vpop.f32.mrf.mxu1 }
0x2cde   :  { %v12376_v9 = vpop.f32.mrf.mxu1  ;;  %v8246_v15 = vpop.f32.mrf.mxu0 }
0x2cdf   :  { %v8349_v17 = vmul.f32 0.35355338, %v8246_v15 }
0x2ce0   :  { %v12385_v25 = vpop.f32.mrf.mxu0  ;;  %v8335_v42 = vpop.f32.mrf.mxu1 }
0x2ce1   :  { %v8355_v40 = vadd.f32 %v8349_v17, %v14355_v28  ;;  %v8352_v61 = vmul.f32 0.35355338, %v8335_v42  ;;  %v8084_v25 = vmul.f32 0.35355338, %v8067_v58  ;;  %v8083_v58 = vmul.f32 0.35355338, %v7979_v60 }
0x2ce2   :  { %v8251_v50 = vpop.f32.mrf.mxu0  ;;  %v12400_v55 = vpop.f32.mrf.mxu1 }
0x2ce3   :  { %v8358_v34 = vadd.f32 %v8352_v61, %v14355_v28  ;;  %v8350_v52 = vmul.f32 0.35355338, %v8251_v50  ;;  %v8361_v20 = vsel %vm5322_vm14, %v8355_v40, -inf  ;;  %v8087_v50 = vadd.f32 %v8081_v26, %v14355_v28 }
0x2ce4   :  { %8362 = vmax.xlane.f32.xlu1 %v8361_v20  ;;  %v12388_v57 = vpop.f32.mrf.mxu0  ;;  %v8082_v55 = vmul.f32 0.35355338, %v7974_v53  ;;  %v8090_v20 = vadd.f32 %v8084_v25, %v14355_v28 }
0x2ce5   :  { %v8356_v54 = vadd.f32 %v8350_v52, %v14355_v28  ;;  %v8340_v22 = vpop.f32.mrf.mxu1  ;;  %v8370_v47 = vsel %vm5322_vm14, %v8358_v34, -inf  ;;  %v8085_v57 = vmul.f32 0.35355338, %v8072_v59 }
0x2ce6   :  { %v8353_v56 = vmul.f32 0.35355338, %v8340_v22 }
0x2ce7   :  { %v8256_v44 = vpop.f32.mrf.mxu0  ;;  %v12403_v3 = vpop.f32.mrf.mxu1  ;;  %v8364_v37 = vsel %vm5322_vm14, %v8356_v54, -inf  ;;  %v8091_v53 = vadd.f32 %v8085_v57, %v14355_v28 }
0x2ce8   :  { %v8359_v32 = vadd.f32 %v8353_v56, %v14355_v28  ;;  %v8351_v12 = vmul.f32 0.35355338, %v8256_v44  ;;  %8365 = vmax.xlane.f32.xlu0 %v8364_v37  ;;  %8371 = vmax.xlane.f32.xlu1 %v8370_v47  ;;  %v8088_v56 = vadd.f32 %v8082_v55, %v14355_v28  ;;  %v8093_v44 = vsel %vm5322_vm14, %v8087_v50, -inf }
0x2ce9   :  { %v12391_v5 = vpop.f32.mrf.mxu0  ;;  %v8345_v9 = vpop.f32.mrf.mxu1  ;;  %v8102_v3 = vsel %vm5322_vm14, %v8090_v20, -inf  ;;  %v8089_v37 = vadd.f32 %v8083_v58, %v14355_v28  ;;  %v8086_v47 = vmul.f32 0.35355338, %v8077_v8  ;;  %v8105_v59 = vsel %vm5322_vm14, %v8091_v53, -inf }
0x2cea   :  { %v8357_v15 = vadd.f32 %v8351_v12, %v14355_v28  ;;  %v8354_v17 = vmul.f32 0.35355338, %v8345_v9  ;;  %v8373_v61 = vsel %vm5322_vm14, %v8359_v32, -inf  ;;  %v8096_v26 = vsel %vm5322_vm14, %v8088_v56, -inf }
0x2ceb   :  { %v12406_v42 = vpop.f32.mrf.mxu1  ;;  %v15221_v12 = vadd.f32 %v8086_v47, %v14355_v28  ;;  %v8099_v60 = vsel %vm5322_vm14, %v8089_v37, -inf }
0x2cec   :  { %v8360_v52 = vadd.f32 %v8354_v17, %v14355_v28  ;;  %v8367_v43 = vsel %vm5322_vm14, %v8357_v15, -inf  ;;  %8374 = vmax.xlane.f32.xlu1 %v8373_v61 }
0x2ced   :  { %8368 = vmax.xlane.f32.xlu0 %v8367_v43  ;;  %v8108_v5 = vsel %vm5322_vm14, %v15221_v12, -inf }
0x2cee   :  { %v8376_v22 = vsel %vm5322_vm14, %v8360_v52, -inf }
0x2cf0   :  { %8377 = vmax.xlane.f32.xlu1 %v8376_v22 }
0x2cf1   :  { %8094 = vmax.xlane.f32.xlu0 %v8093_v44 }
0x2cf4   :  { %8103 = vmax.xlane.f32.xlu1 %v8102_v3 }
0x2cf5   :  { %8097 = vmax.xlane.f32.xlu0 %v8096_v26 }
0x2cf8   :  { %8106 = vmax.xlane.f32.xlu1 %v8105_v59 }
0x2cf9   :  { %8100 = vmax.xlane.f32.xlu0 %v8099_v60 }
0x2cfd   :  { %8109 = vmax.xlane.f32.xlu0 %v8108_v5 }
0x2d6d   :  { %v8363_v9 = vpop.xlane.xlu1 %8362 }
0x2d6e   :  { %v8379_v17 = vsub.f32 %v8355_v40, %v8363_v9 }
0x2d70   :  { %v8385_v8 = vmul.f32 1.442695, %v8379_v17 }
0x2d71   :  { %v8366_v25 = vpop.xlane.xlu0 %8365  ;;  %v8372_v42 = vpop.xlane.xlu1 %8371 }
0x2d72   :  { %12928 = vpow2.f32 %v8385_v8  ;;  %v8380_v61 = vsub.f32 %v8356_v54, %v8366_v25  ;;  %v8382_v55 = vsub.f32 %v8358_v34, %v8372_v42 }
0x2d74   :  { %v8387_v43 = vmul.f32 1.442695, %v8380_v61  ;;  %v8391_v57 = vmul.f32 1.442695, %v8382_v55 }
0x2d75   :  { %v8375_v22 = vpop.xlane.xlu1 %8374 }
0x2d76   :  { %12930 = vpow2.f32 %v8387_v43  ;;  %v8369_v58 = vpop.xlane.xlu0 %8368  ;;  %v8383_v44 = vsub.f32 %v8359_v32, %v8375_v22 }
0x2d77   :  { %12932 = vpow2.f32 %v8391_v57  ;;  %v8381_v3 = vsub.f32 %v8357_v15, %v8369_v58 }
0x2d78   :  { %v8393_v47 = vmul.f32 1.442695, %v8383_v44 }
0x2d79   :  { %v8389_v26 = vmul.f32 1.442695, %v8381_v3  ;;  %v8378_v59 = vpop.xlane.xlu1 %8377 }
0x2d7a   :  { %12934 = vpow2.f32 %v8393_v47  ;;  %v8095_v60 = vpop.xlane.xlu0 %8094  ;;  %v8384_v40 = vsub.f32 %v8360_v52, %v8378_v59 }
0x2d7b   :  { %12936 = vpow2.f32 %v8389_v26  ;;  %v8111_v5 = vsub.f32 %v8087_v50, %v8095_v60 }
0x2d7c   :  { %v8395_v9 = vmul.f32 1.442695, %v8384_v40 }
0x2d7d   :  { %v8117_v17 = vmul.f32 1.442695, %v8111_v5  ;;  %v8104_v54 = vpop.xlane.xlu1 %8103 }
0x2d7e   :  { %12938 = vpow2.f32 %v8395_v9  ;;  %v8098_v34 = vpop.xlane.xlu0 %8097  ;;  %v8114_v8 = vsub.f32 %v8090_v20, %v8104_v54 }
0x2d7f   :  { %v15226_v25 = vpop.eup %12928  ;;  %12940 = vpow2.f32 %v8117_v17  ;;  %v8112_v32 = vsub.f32 %v8088_v56, %v8098_v34 }
0x2d80   :  { %v8123_v42 = vmul.f32 1.442695, %v8114_v8  ;;  %v8397_v15 = vsel %vm5322_vm14, %v15226_v25, 0.0 }
0x2d81   :  { %v8119_v61 = vmul.f32 1.442695, %v8112_v32  ;;  %8398 = vadd.xlane.f32.xlu1 %v8397_v15  ;;  %v8107_v55 = vpop.xlane.xlu1 %8106 }
0x2d82   :  { %12942 = vpow2.f32 %v8123_v42  ;;  %v8101_v52 = vpop.xlane.xlu0 %8100  ;;  %v8115_v50 = vsub.f32 %v8091_v53, %v8107_v55 }
0x2d83   :  { %v15230_v43 = vpop.eup %12930  ;;  %12944 = vpow2.f32 %v8119_v61  ;;  %v8113_v57 = vsub.f32 %v8089_v37, %v8101_v52 }
0x2d84   :  { %v15232_v22 = vpop.eup %12932  ;;  %v8125_v20 = vmul.f32 1.442695, %v8115_v50  ;;  %v8400_v56 = vsel %vm5322_vm14, %v15230_v43, 0.0 }
0x2d85   :  { %v8121_v58 = vmul.f32 1.442695, %v8113_v57  ;;  %8401 = vadd.xlane.f32.xlu0 %v8400_v56  ;;  %v8406_v44 = vsel %vm5322_vm14, %v15232_v22, 0.0 }
0x2d86   :  { %12946 = vpow2.f32 %v8125_v20  ;;  %v8110_v3 = vpop.xlane.xlu0 %8109  ;;  %8407 = vadd.xlane.f32.xlu1 %v8406_v44 }
0x2d87   :  { %v15238_v47 = vpop.eup %12934  ;;  %12948 = vpow2.f32 %v8121_v58  ;;  %v8116_v53 = vsub.f32 %v15221_v12, %v8110_v3 }
0x2d88   :  { %v15241_v37 = vpop.eup %12936  ;;  %v8409_v26 = vsel %vm5322_vm14, %v15238_v47, 0.0 }
0x2d89   :  { %v8127_v59 = vmul.f32 1.442695, %v8116_v53  ;;  %v8403_v60 = vsel %vm5322_vm14, %v15241_v37, 0.0 }
0x2d8a   :  { %8404 = vadd.xlane.f32.xlu0 %v8403_v60  ;;  %8410 = vadd.xlane.f32.xlu1 %v8409_v26 }
0x2d8b   :  { %v15247_v40 = vpop.eup %12938  ;;  %12950 = vpow2.f32 %v8127_v59  ;;  %v8161_v59 = vmul.f32 %v15120_v16, %v13377_v41 }
0x2d8c   :  { %v15249_v5 = vpop.eup %12940  ;;  %v8412_v9 = vsel %vm5322_vm14, %v15247_v40, 0.0 }
0x2d8d   :  { %v8129_v12 = vsel %vm5322_vm14, %v15249_v5, 0.0 }
0x2d8e   :  { %8130 = vadd.xlane.f32.xlu0 %v8129_v12  ;;  %8413 = vadd.xlane.f32.xlu1 %v8412_v9 }
0x2d8f   :  { %v15255_v17 = vpop.eup %12942 }
0x2d90   :  { %v15257_v54 = vpop.eup %12944  ;;  %v8138_v34 = vsel %vm5322_vm14, %v15255_v17, 0.0 }
0x2d91   :  { %v8132_v8 = vsel %vm5322_vm14, %v15257_v54, 0.0 }
0x2d92   :  { %8133 = vadd.xlane.f32.xlu0 %v8132_v8  ;;  %8139 = vadd.xlane.f32.xlu1 %v8138_v34  ;;  %v8160_v34 = vmul.f32 %v15130_v49, %v13377_v41 }
0x2d93   :  { %v15263_v32 = vpop.eup %12946 }
0x2d94   :  { %v15265_v42 = vpop.eup %12948  ;;  %v8141_v15 = vsel %vm5322_vm14, %v15263_v32, 0.0 }
0x2d95   :  { %v8135_v61 = vsel %vm5322_vm14, %v15265_v42, 0.0 }
0x2d96   :  { %8136 = vadd.xlane.f32.xlu0 %v8135_v61  ;;  %8142 = vadd.xlane.f32.xlu1 %v8141_v15  ;;  %v8159_v61 = vmul.f32 %v15148_v35, %v13377_v41 }
0x2d98   :  { %v15271_v55 = vpop.eup %12950 }
0x2d99   :  { %v8144_v52 = vsel %vm5322_vm14, %v15271_v55, 0.0 }
0x2d9a   :  { %8145 = vadd.xlane.f32.xlu0 %v8144_v52 }
0x2e0a   :  { %v8399_v50 = vpop.xlane.xlu1 %8398 }
0x2e0b   :  { %12952 = vrcp.f32 %v8399_v50 }
0x2e0e   :  { %v8402_v57 = vpop.xlane.xlu0 %8401 }
0x2e0f   :  { %12954 = vrcp.f32 %v8402_v57  ;;  %v8408_v20 = vpop.xlane.xlu1 %8407  ;;  %v8164_v57 = vmul.f32 %v15132_v14, %v13377_v41 }
0x2e10   :  { %12956 = vrcp.f32 %v8408_v20 }
0x2e13   :  { %v8405_v56 = vpop.xlane.xlu0 %8404  ;;  %v8411_v58 = vpop.xlane.xlu1 %8410 }
0x2e14   :  { %12958 = vrcp.f32 %v8405_v56 }
0x2e15   :  { %12960 = vrcp.f32 %v8411_v58 }
0x2e17   :  { %v8131_v44 = vpop.xlane.xlu0 %8130  ;;  %v8414_v3 = vpop.xlane.xlu1 %8413 }
0x2e18   :  { %v12953_v53 = vpop.eup %12952  ;;  %12962 = vrcp.f32 %v8131_v44 }
0x2e19   :  { %v8421_v26 = vmul.f32 %v12953_v53, %v15226_v25  ;;  %12964 = vrcp.f32 %v8414_v3  ;;  %v8162_v3 = vmul.f32 %v15164_v0, %v13377_v41 }
0x2e1b   :  { %v8134_v60 = vpop.xlane.xlu0 %8133  ;;  %v8140_v9 = vpop.xlane.xlu1 %8139  ;;  %12414 = vmatmul.mubr.msk.f32.vlgmr.msra.gmra.mxu0 %vm5322_vm14, %v8421_v26 }
0x2e1c   :  { %v12955_v12 = vpop.eup %12954  ;;  %12966 = vrcp.f32 %v8134_v60  ;;  %12438 = vmatpush3.msra.mxu0 %v8161_v59  ;;  %12416 = vmatprep.mubr.msk.f32.mxu0 %vm13089_vm1, %v15954_v18 }
0x2e1d   :  { %v12957_v8 = vpop.eup %12956  ;;  %12968 = vrcp.f32 %v8140_v9  ;;  %12439 = vmatprep.subr.mxu0 %v15954_v18  ;;  %v8422_v25 = vmul.f32 %v12955_v12, %v15230_v43 }
0x2e1e   :  { %v8424_v15 = vmul.f32 %v12957_v8, %v15232_v22  ;;  %12440 = vmatpush3.msra.mxu0 %v8160_v34  ;;  %v8163_v22 = vmul.f32 %v15152_v62, %v13377_v41  ;;  %v9053_v34 = vmul.f32 %v15120_v16, %v13461_v7  ;;  %v9052_v8 = vmul.f32 %v15130_v49, %v13461_v7 }
0x2e1f   :  { %v8137_v52 = vpop.xlane.xlu0 %8136  ;;  %12441 = vmatprep.subr.mxu0 %v15954_v18  ;;  %v8143_v50 = vpop.xlane.xlu1 %8142  ;;  %12417 = vmatmul.mubr.msk.f32.gmra.mxu0 %vm5322_vm14, %v8422_v25  ;;  %v8792_v25 = vmul.f32 %v15070_v11, %v13461_v7 }
0x2e20   :  { %12970 = vrcp.f32 %v8137_v52  ;;  %12429 = vmatmul.mubr.msk.f32.vlgmr.msra.gmra.mxu1 %vm5322_vm14, %v8424_v15  ;;  %12442 = vmatpush3.msra.mxu0 %v8159_v61  ;;  %v9051_v15 = vmul.f32 %v15148_v35, %v13461_v7  ;;  %v9056_v61 = vmul.f32 %v15132_v14, %v13461_v7  ;;  %v8791_v52 = vmul.f32 %v15096_v24, %v13461_v7 }
0x2e21   :  { %v12959_v43 = vpop.eup %12958  ;;  %12972 = vrcp.f32 %v8143_v50  ;;  %12453 = vmatpush3.msra.mxu1 %v8164_v57  ;;  %12419 = vmatprep.mubr.msk.f32.mxu0 %vm13089_vm1, %v15954_v18  ;;  %v9055_v50 = vmul.f32 %v15152_v62, %v13461_v7  ;;  %v8793_v57 = vmul.f32 %v15086_v63, %v13461_v7 }
0x2e22   :  { %v12961_v20 = vpop.eup %12960  ;;  %12454 = vmatprep.subr.mxu1 %v15954_v18  ;;  %12431 = vmatprep.mubr.msk.f32.mxu1 %vm13089_vm1, %v15954_v18  ;;  %v8423_v56 = vmul.f32 %v12959_v43, %v15241_v37  ;;  %v9054_v43 = vmul.f32 %v15164_v0, %v13461_v7 }
0x2e23   :  { %12455 = vmatpush3.msra.mxu1 %v8163_v22  ;;  %v8146_v58 = vpop.xlane.xlu0 %8145  ;;  %v8425_v44 = vmul.f32 %v12961_v20, %v15238_v47  ;;  %12467 = vmatprep.subr.mxu0 %v15954_v18  ;;  %v8794_v22 = vmul.f32 %v15104_v10, %v13461_v7 }
0x2e24   :  { %12974 = vrcp.f32 %v8146_v58  ;;  %12456 = vmatprep.subr.mxu1 %v15954_v18  ;;  %12420 = vmatmul.mubr.msk.f32.gmra.mxu0 %vm5322_vm14, %v8423_v56 }
0x2e25   :  { %v12963_v53 = vpop.eup %12962  ;;  %12432 = vmatmul.mubr.msk.f32.gmra.mxu1 %vm5322_vm14, %v8425_v44  ;;  %12443 = vmatprep.mubr.msk.f32.mxu0 %vm13089_vm1, %v15954_v18 }
0x2e26   :  { %v12965_v37 = vpop.eup %12964  ;;  %v8153_v26 = vmul.f32 %v12963_v53, %v15249_v5  ;;  %12457 = vmatpush3.msra.mxu1 %v8162_v3  ;;  %12434 = vmatprep.mubr.msk.f32.mxu1 %vm13089_vm1, %v15954_v18 }
0x2e27   :  { %v8426_v47 = vmul.f32 %v12965_v37, %v15247_v40  ;;  %12482 = vmatprep.subr.mxu1 %v15954_v18 }
0x2e28   :  { %12444 = vmatmul.mubr.msk.f32.vlgmr.msra.gmra.mxu0 %vm5322_vm14, %v8153_v26 }
0x2e29   :  { %v12967_v41 = vpop.eup %12966  ;;  %12435 = vmatmul.mubr.msk.f32.gmra.mxu1 %vm5322_vm14, %v8426_v47  ;;  %12468 = vmatpush3.xpose.msk.msra.mxu0 %vm428_vm6, %v15045_v39 }
0x2e2a   :  { %v12969_v59 = vpop.eup %12968  ;;  %12446 = vmatprep.mubr.msk.f32.mxu0 %vm13089_vm1, %v15954_v18  ;;  %12458 = vmatprep.mubr.msk.f32.mxu1 %vm13089_vm1, %v15954_v18  ;;  %v8154_v5 = vmul.f32 %v12967_v41, %v15257_v54 }
0x2e2b   :  { %v8156_v40 = vmul.f32 %v12969_v59, %v15255_v17  ;;  %12469 = vmatprep.subr.mxu0 %v15954_v18 }
0x2e2c   :  { %12447 = vmatmul.mubr.msk.f32.gmra.mxu0 %vm5322_vm14, %v8154_v5 }
0x2e2d   :  { %v12971_v60 = vpop.eup %12970  ;;  %12459 = vmatmul.mubr.msk.f32.vlgmr.msra.gmra.mxu1 %vm5322_vm14, %v8156_v40  ;;  %12470 = vmatpush3.xpose.msk.msra.mxu0 %vm428_vm6, %v15052_v51 }
0x2e2e   :  { %v12973_v9 = vpop.eup %12972  ;;  %12483 = vmatpush3.xpose.msk.msra.mxu1 %vm428_vm6, %v15047_v27  ;;  %12449 = vmatprep.mubr.msk.f32.mxu0 %vm13089_vm1, %v15954_v18  ;;  %v8155_v54 = vmul.f32 %v12971_v60, %v15265_v42  ;;  %v8789_v42 = vmul.f32 %v15063_v1, %v13461_v7 }
0x2e2f   :  { %12461 = vmatprep.mubr.msk.f32.mxu1 %vm13089_vm1, %v15954_v18  ;;  %12471 = vmatprep.subr.mxu0 %v15954_v18  ;;  %v8157_v17 = vmul.f32 %v12973_v9, %v15263_v32 }
0x2e30   :  { %12484 = vmatprep.subr.mxu1 %v15954_v18  ;;  %12450 = vmatmul.mubr.msk.f32.gmra.mxu0 %vm5322_vm14, %v8155_v54 }
0x2e31   :  { %v12975_v12 = vpop.eup %12974  ;;  %12462 = vmatmul.mubr.msk.f32.gmra.mxu1 %vm5322_vm14, %v8157_v17  ;;  %12472 = vmatpush3.xpose.msk.msra.mxu0 %vm428_vm6, %v15066_v21 }
0x2e32   :  { %12485 = vmatpush3.xpose.msk.msra.mxu1 %vm428_vm6, %v15059_v19  ;;  %12464 = vmatprep.mubr.msk.f32.mxu1 %vm13089_vm1, %v15954_v18  ;;  %v8158_v32 = vmul.f32 %v12975_v12, %v15271_v55  ;;  %v8790_v55 = vmul.f32 %v15077_v38, %v13461_v7 }
0x2e33   :  { %12473 = vmatprep.mubr.msk.f32.mxu0 %vm13089_vm1, %v15954_v18  ;;  %12486 = vmatprep.subr.mxu1 %v15954_v18 }
0x2e34   :  { %12497 = vmatprep.subr.mxu0 %v15954_v18  ;;  %12474 = vmatmul.mubr.msk.f32.vlgmr.msra.gmra.mxu0 %vm428_vm6, %v8789_v42 }
0x2e35   :  { %12465 = vmatmul.mubr.msk.f32.gmra.mxu1 %vm5322_vm14, %v8158_v32  ;;  %12498 = vmatpush3.msra.mxu0 %v9053_v34 }
0x2e36   :  { %12487 = vmatpush3.xpose.msk.msra.mxu1 %vm428_vm6, %v15073_v13  ;;  %12499 = vmatprep.subr.mxu0 %v15954_v18 }
0x2e37   :  { %12500 = vmatpush3.msra.mxu0 %v9052_v8  ;;  %12476 = vmatprep.mubr.msk.f32.mxu0 %vm13089_vm1, %v15954_v18 }
0x2e38   :  { %12488 = vmatprep.mubr.msk.f32.mxu1 %vm13089_vm1, %v15954_v18  ;;  %12501 = vmatprep.subr.mxu0 %v15954_v18 }
0x2e39   :  { %12512 = vmatprep.subr.mxu1 %v15954_v18  ;;  %12477 = vmatmul.mubr.msk.f32.gmra.mxu0 %vm428_vm6, %v8790_v55 }
0x2e3a   :  { %12489 = vmatmul.mubr.msk.f32.vlgmr.msra.gmra.mxu1 %vm428_vm6, %v8792_v25  ;;  %12502 = vmatpush3.msra.mxu0 %v9051_v15 }
0x2e3b   :  { %12513 = vmatpush3.msra.mxu1 %v9056_v61  ;;  %12479 = vmatprep.mubr.msk.f32.mxu0 %vm13089_vm1, %v15954_v18 }
0x2e3c   :  { %12514 = vmatprep.subr.mxu1 %v15954_v18  ;;  %12491 = vmatprep.mubr.msk.f32.mxu1 %vm13089_vm1, %v15954_v18 }
0x2e3d   :  { %12515 = vmatpush3.msra.mxu1 %v9055_v50  ;;  %12480 = vmatmul.mubr.msk.f32.gmra.mxu0 %vm428_vm6, %v8791_v52 }
0x2e3e   :  { %12516 = vmatprep.subr.mxu1 %v15954_v18  ;;  %12492 = vmatmul.mubr.msk.f32.gmra.mxu1 %vm428_vm6, %v8793_v57 }
0x2e3f   :  { %12517 = vmatpush3.msra.mxu1 %v9054_v43  ;;  %12494 = vmatprep.mubr.msk.f32.mxu1 %vm13089_vm1, %v15954_v18 }
0x2e40   :  { %12503 = vmatprep.mubr.msk.f32.mxu0 %vm13089_vm1, %v15954_v18  ;;  %12527 = vmatprep.subr.mxu0 %v15954_v18 }
0x2e41   :  { %12542 = vmatprep.subr.mxu1 %v15954_v18 }
0x2e42   :  { %12495 = vmatmul.mubr.msk.f32.gmra.mxu1 %vm428_vm6, %v8794_v22 }
0x2e43   :  { %12518 = vmatprep.mubr.msk.f32.mxu1 %vm13089_vm1, %v15954_v18 }
0x2edb   :  { %v8508_v20 = vpop.f32.mrf.mxu0 }
0x2edd   :  { %v12415_v56 = vpop.f32.mrf.mxu0 }
0x2edf   :  { %v8513_v58 = vpop.f32.mrf.mxu0 }
0x2ee0   :  { %v8597_v44 = vpop.f32.mrf.mxu1 }
0x2ee1   :  { %v12418_v3 = vpop.f32.mrf.mxu0 }
0x2ee2   :  { %v12430_v53 = vpop.f32.mrf.mxu1 }
0x2ee4   :  { %v8518_v37 = vpop.f32.mrf.mxu0 }
0x2ee5   :  { %v8602_v7 = vpop.f32.mrf.mxu1 }
0x2ee6   :  { %v12421_v26 = vpop.f32.mrf.mxu0 }
0x2ee7   :  { %v12433_v47 = vpop.f32.mrf.mxu1 }
0x2ee8   :  { %v8686_v41 = vpop.f32.mrf.mxu0 }
0x2ee9   :  { %v8607_v59 = vpop.f32.mrf.mxu1  ;;  %v15407_v5 = vadd.f32 %v8686_v41, %v8508_v20 }
0x2eea   :  { %v12445_v40 = vpop.f32.mrf.mxu0 }
0x2eeb   :  { %v12436_v60 = vpop.f32.mrf.mxu1 }
0x2eec   :  { %v8691_v9 = vpop.f32.mrf.mxu0 }
0x2eed   :  { %v15409_v54 = vadd.f32 %v8691_v9, %v8513_v58  ;;  %v8775_v17 = vpop.f32.mrf.mxu1 }
0x2eee   :  { %v15411_v12 = vadd.f32 %v8775_v17, %v8597_v44  ;;  %v12448_v42 = vpop.f32.mrf.mxu0 }
0x2eef   :  { %v12460_v32 = vpop.f32.mrf.mxu1 }
0x2ef0   :  { %v8696_v34 = vpop.f32.mrf.mxu0 }
0x2ef1   :  { %v15413_v8 = vadd.f32 %v8696_v34, %v8518_v37  ;;  %v8780_v55 = vpop.f32.mrf.mxu1 }
0x2ef2   :  { %v15415_v25 = vadd.f32 %v8780_v55, %v8602_v7  ;;  %v12451_v15 = vpop.f32.mrf.mxu0 }
0x2ef3   :  { %v12463_v61 = vpop.f32.mrf.mxu1 }
0x2ef4   :  { %v8870_v52 = vpop.f32.mrf.mxu0 }
0x2ef5   :  { %v8785_v50 = vpop.f32.mrf.mxu1  ;;  %v8973_v57 = vmul.f32 0.35355338, %v8870_v52 }
0x2ef6   :  { %v15417_v43 = vadd.f32 %v8785_v50, %v8607_v59  ;;  %v12475_v22 = vpop.f32.mrf.mxu0 }
0x2ef7   :  { %v8979_v20 = vadd.f32 %v8973_v57, %v14355_v28  ;;  %v12466_v56 = vpop.f32.mrf.mxu1 }
0x2ef9   :  { %v8875_v58 = vpop.f32.mrf.mxu0  ;;  %v8985_v44 = vsel %vm5322_vm14, %v8979_v20, -inf }
0x2efa   :  { %v8974_v3 = vmul.f32 0.35355338, %v8875_v58  ;;  %v8959_v53 = vpop.f32.mrf.mxu1  ;;  %8986 = vmax.xlane.f32.xlu1 %v8985_v44 }
0x2efb   :  { %v8976_v37 = vmul.f32 0.35355338, %v8959_v53  ;;  %v12478_v7 = vpop.f32.mrf.mxu0 }
0x2efc   :  { %v8980_v26 = vadd.f32 %v8974_v3, %v14355_v28  ;;  %v12490_v47 = vpop.f32.mrf.mxu1 }
0x2efd   :  { %v8982_v41 = vadd.f32 %v8976_v37, %v14355_v28  ;;  %v8880_v40 = vpop.f32.mrf.mxu0 }
0x2efe   :  { %v8975_v59 = vmul.f32 0.35355338, %v8880_v40  ;;  %v8964_v60 = vpop.f32.mrf.mxu1  ;;  %v8988_v9 = vsel %vm5322_vm14, %v8980_v26, -inf }
0x2eff   :  { %v8977_v17 = vmul.f32 0.35355338, %v8964_v60  ;;  %8989 = vmax.xlane.f32.xlu0 %v8988_v9  ;;  %v12481_v42 = vpop.f32.mrf.mxu0  ;;  %v8994_v32 = vsel %vm5322_vm14, %v8982_v41, -inf }
0x2f00   :  { %v8981_v34 = vadd.f32 %v8975_v59, %v14355_v28  ;;  %8995 = vmax.xlane.f32.xlu1 %v8994_v32  ;;  %v12493_v55 = vpop.f32.mrf.mxu1 }
0x2f01   :  { %v8983_v15 = vadd.f32 %v8977_v17, %v14355_v28 }
0x2f02   :  { %v8969_v61 = vpop.f32.mrf.mxu1  ;;  %v8991_v52 = vsel %vm5322_vm14, %v8981_v34, -inf }
0x2f03   :  { %v8978_v50 = vmul.f32 0.35355338, %v8969_v61  ;;  %8992 = vmax.xlane.f32.xlu0 %v8991_v52  ;;  %v8997_v57 = vsel %vm5322_vm14, %v8983_v15, -inf }
0x2f04   :  { %8998 = vmax.xlane.f32.xlu1 %v8997_v57  ;;  %v12496_v22 = vpop.f32.mrf.mxu1 }
0x2f05   :  { %v8984_v56 = vadd.f32 %v8978_v50, %v14355_v28 }
0x2f07   :  { %v9000_v58 = vsel %vm5322_vm14, %v8984_v56, -inf }
0x2f08   :  { %9001 = vmax.xlane.f32.xlu0 %v9000_v58 }
0x2f83   :  { %v8987_v44 = vpop.xlane.xlu1 %8986 }
0x2f84   :  { %v9003_v3 = vsub.f32 %v8979_v20, %v8987_v44 }
0x2f86   :  { %v9009_v53 = vmul.f32 1.442695, %v9003_v3 }
0x2f88   :  { %12976 = vpow2.f32 %v9009_v53  ;;  %v8990_v37 = vpop.xlane.xlu0 %8989 }
0x2f89   :  { %v9004_v7 = vsub.f32 %v8980_v26, %v8990_v37  ;;  %v8996_v47 = vpop.xlane.xlu1 %8995 }
0x2f8a   :  { %v9006_v40 = vsub.f32 %v8982_v41, %v8996_v47 }
0x2f8b   :  { %v9011_v59 = vmul.f32 1.442695, %v9004_v7 }
0x2f8c   :  { %v9015_v60 = vmul.f32 1.442695, %v9006_v40  ;;  %v8993_v9 = vpop.xlane.xlu0 %8992 }
0x2f8d   :  { %12978 = vpow2.f32 %v9011_v59  ;;  %v9005_v17 = vsub.f32 %v8981_v34, %v8993_v9  ;;  %v8999_v42 = vpop.xlane.xlu1 %8998 }
0x2f8e   :  { %12980 = vpow2.f32 %v9015_v60  ;;  %v9007_v32 = vsub.f32 %v8983_v15, %v8999_v42 }
0x2f8f   :  { %v9013_v55 = vmul.f32 1.442695, %v9005_v17 }
0x2f90   :  { %v9017_v61 = vmul.f32 1.442695, %v9007_v32 }
0x2f91   :  { %12982 = vpow2.f32 %v9013_v55  ;;  %v9002_v52 = vpop.xlane.xlu0 %9001 }
0x2f92   :  { %12984 = vpow2.f32 %v9017_v61  ;;  %v9008_v20 = vsub.f32 %v8984_v56, %v9002_v52 }
0x2f94   :  { %v9019_v50 = vmul.f32 1.442695, %v9008_v20 }
0x2f95   :  { %v12977_v57 = vpop.eup %12976 }
0x2f96   :  { %12986 = vpow2.f32 %v9019_v50  ;;  %v9021_v26 = vsel %vm5322_vm14, %v12977_v57, 0.0 }
0x2f97   :  { %9022 = vadd.xlane.f32.xlu1 %v9021_v26 }
0x2f9a   :  { %v12979_v41 = vpop.eup %12978 }
0x2f9b   :  { %v12981_v22 = vpop.eup %12980  ;;  %v9024_v58 = vsel %vm5322_vm14, %v12979_v41, 0.0 }
0x2f9c   :  { %v9030_v34 = vsel %vm5322_vm14, %v12981_v22, 0.0  ;;  %9025 = vadd.xlane.f32.xlu0 %v9024_v58 }
0x2f9d   :  { %9031 = vadd.xlane.f32.xlu1 %v9030_v34 }
0x2f9e   :  { %v12983_v15 = vpop.eup %12982 }
0x2f9f   :  { %v12985_v44 = vpop.eup %12984  ;;  %v9027_v3 = vsel %vm5322_vm14, %v12983_v15, 0.0 }
0x2fa0   :  { %v9033_v56 = vsel %vm5322_vm14, %v12985_v44, 0.0  ;;  %9028 = vadd.xlane.f32.xlu0 %v9027_v3 }
0x2fa1   :  { %9034 = vadd.xlane.f32.xlu1 %v9033_v56 }
0x2fa3   :  { %v12987_v53 = vpop.eup %12986 }
0x2fa4   :  { %v9036_v37 = vsel %vm5322_vm14, %v12987_v53, 0.0 }
0x2fa5   :  { %9037 = vadd.xlane.f32.xlu0 %v9036_v37 }
0x3020   :  { %v9023_v7 = vpop.xlane.xlu1 %9022 }
0x3021   :  { %12988 = vrcp.f32 %v9023_v7 }
0x3025   :  { %v9026_v47 = vpop.xlane.xlu0 %9025 }
0x3026   :  { %v9032_v40 = vpop.xlane.xlu1 %9031  ;;  %12990 = vrcp.f32 %v9026_v47 }
0x3027   :  { %12992 = vrcp.f32 %v9032_v40 }
0x3029   :  { %v9029_v59 = vpop.xlane.xlu0 %9028 }
0x302a   :  { %v9035_v60 = vpop.xlane.xlu1 %9034  ;;  %12994 = vrcp.f32 %v9029_v59 }
0x302b   :  { %12996 = vrcp.f32 %v9035_v60 }
0x302e   :  { %v12989_v9 = vpop.eup %12988  ;;  %v9038_v17 = vpop.xlane.xlu0 %9037 }
0x302f   :  { %v9045_v42 = vmul.f32 %v12989_v9, %v12977_v57  ;;  %12998 = vrcp.f32 %v9038_v17 }
0x3031   :  { %12504 = vmatmul.mubr.msk.f32.vlgmr.msra.gmra.mxu0 %vm5322_vm14, %v9045_v42 }
0x3032   :  { %12528 = vmatpush3.xpose.msk.msra.mxu0 %vm428_vm6, %v15045_v39  ;;  %12506 = vmatprep.mubr.msk.f32.mxu0 %vm13089_vm1, %v15954_v18 }
0x3033   :  { %v12991_v32 = vpop.eup %12990  ;;  %12529 = vmatprep.subr.mxu0 %v15954_v18 }
0x3034   :  { %v12993_v55 = vpop.eup %12992  ;;  %v9046_v61 = vmul.f32 %v12991_v32, %v12979_v41  ;;  %v9505_v41 = vmul.f32 %v15120_v16, %v13500_v4  ;;  %v9507_v16 = vmul.f32 %v15152_v62, %v13500_v4 }
0x3035   :  { %v9048_v52 = vmul.f32 %v12993_v55, %v12981_v22 }
0x3036   :  { %12507 = vmatmul.mubr.msk.f32.gmra.mxu0 %vm5322_vm14, %v9046_v61 }
0x3037   :  { %v12995_v20 = vpop.eup %12994  ;;  %12519 = vmatmul.mubr.msk.f32.vlgmr.msra.gmra.mxu1 %vm5322_vm14, %v9048_v52  ;;  %12530 = vmatpush3.xpose.msk.msra.mxu0 %vm428_vm6, %v15052_v51  ;;  %v9241_v51 = vmul.f32 %v15063_v1, %v13500_v4  ;;  %v9242_v1 = vmul.f32 %v15077_v38, %v13500_v4  ;;  %v9508_v38 = vmul.f32 %v15132_v14, %v13500_v4 }
0x3038   :  { %v12997_v50 = vpop.eup %12996  ;;  %12543 = vmatpush3.xpose.msk.msra.mxu1 %vm428_vm6, %v15047_v27  ;;  %12509 = vmatprep.mubr.msk.f32.mxu0 %vm13089_vm1, %v15954_v18  ;;  %v9047_v39 = vmul.f32 %v12995_v20, %v12983_v15 }
0x3039   :  { %12521 = vmatprep.mubr.msk.f32.mxu1 %vm13089_vm1, %v15954_v18  ;;  %12531 = vmatprep.subr.mxu0 %v15954_v18  ;;  %v9049_v57 = vmul.f32 %v12997_v50, %v12985_v44 }
0x303a   :  { %12544 = vmatprep.subr.mxu1 %v15954_v18  ;;  %12510 = vmatmul.mubr.msk.f32.gmra.mxu0 %vm5322_vm14, %v9047_v39 }
0x303b   :  { %12522 = vmatmul.mubr.msk.f32.gmra.mxu1 %vm5322_vm14, %v9049_v57  ;;  %12532 = vmatpush3.xpose.msk.msra.mxu0 %vm428_vm6, %v15066_v21  ;;  %v9244_v21 = vmul.f32 %v15070_v11, %v13500_v4  ;;  %v9243_v11 = vmul.f32 %v15096_v24, %v13500_v4  ;;  %v9506_v24 = vmul.f32 %v15164_v0, %v13500_v4 }
0x303c   :  { %v12999_v27 = vpop.eup %12998  ;;  %12545 = vmatpush3.xpose.msk.msra.mxu1 %vm428_vm6, %v15059_v19  ;;  %12524 = vmatprep.mubr.msk.f32.mxu1 %vm13089_vm1, %v15954_v18  ;;  %v9504_v19 = vmul.f32 %v15130_v49, %v13500_v4  ;;  %v9245_v49 = vmul.f32 %v15086_v63, %v13500_v4  ;;  %v9246_v63 = vmul.f32 %v15104_v10, %v13500_v4 }
0x303d   :  { %12533 = vmatprep.mubr.msk.f32.mxu0 %vm13089_vm1, %v15954_v18  ;;  %12546 = vmatprep.subr.mxu1 %v15954_v18  ;;  %v9050_v26 = vmul.f32 %v12999_v27, %v12987_v53 }
0x303e   :  { %12557 = vmatprep.subr.mxu0 %v15954_v18  ;;  %12534 = vmatmul.mubr.msk.f32.vlgmr.msra.gmra.mxu0 %vm428_vm6, %v9241_v51 }
0x303f   :  { %12525 = vmatmul.mubr.msk.f32.gmra.mxu1 %vm5322_vm14, %v9050_v26  ;;  %12558 = vmatpush3.msra.mxu0 %v9505_v41 }
0x3040   :  { %12547 = vmatpush3.xpose.msk.msra.mxu1 %vm428_vm6, %v15073_v13  ;;  %12559 = vmatprep.subr.mxu0 %v15954_v18  ;;  %v9503_v13 = vmul.f32 %v15148_v35, %v13500_v4 }
0x3041   :  { %12560 = vmatpush3.msra.mxu0 %v9504_v19  ;;  %12536 = vmatprep.mubr.msk.f32.mxu0 %vm13089_vm1, %v15954_v18 }
0x3042   :  { %12548 = vmatprep.mubr.msk.f32.mxu1 %vm13089_vm1, %v15954_v18  ;;  %12561 = vmatprep.subr.mxu0 %v15954_v18 }
0x3043   :  { %12572 = vmatprep.subr.mxu1 %v15954_v18  ;;  %12537 = vmatmul.mubr.msk.f32.gmra.mxu0 %vm428_vm6, %v9242_v1 }
0x3044   :  { %12549 = vmatmul.mubr.msk.f32.vlgmr.msra.gmra.mxu1 %vm428_vm6, %v9244_v21  ;;  %12562 = vmatpush3.msra.mxu0 %v9503_v13 }
0x3045   :  { %12573 = vmatpush3.msra.mxu1 %v9508_v38  ;;  %12539 = vmatprep.mubr.msk.f32.mxu0 %vm13089_vm1, %v15954_v18 }
0x3046   :  { %12574 = vmatprep.subr.mxu1 %v15954_v18  ;;  %12551 = vmatprep.mubr.msk.f32.mxu1 %vm13089_vm1, %v15954_v18 }
0x3047   :  { %12575 = vmatpush3.msra.mxu1 %v9507_v16  ;;  %12540 = vmatmul.mubr.msk.f32.gmra.mxu0 %vm428_vm6, %v9243_v11 }
0x3048   :  { %12576 = vmatprep.subr.mxu1 %v15954_v18  ;;  %12552 = vmatmul.mubr.msk.f32.gmra.mxu1 %vm428_vm6, %v9245_v49 }
0x3049   :  { %12577 = vmatpush3.msra.mxu1 %v9506_v24  ;;  %12554 = vmatprep.mubr.msk.f32.mxu1 %vm13089_vm1, %v15954_v18 }
0x304a   :  { %12563 = vmatprep.mubr.msk.f32.mxu0 %vm13089_vm1, %v15954_v18 }
0x304c   :  { %12555 = vmatmul.mubr.msk.f32.gmra.mxu1 %vm428_vm6, %v9246_v63 }
0x304d   :  { %12578 = vmatprep.mubr.msk.f32.mxu1 %vm13089_vm1, %v15954_v18 }
0x30f1   :  { %v9132_v14 = vpop.f32.mrf.mxu0 }
0x30f2   :  { %v15520_v35 = vadd.f32 %v9132_v14, %v15407_v5 }
0x30f3   :  { %v12505_v62 = vpop.f32.mrf.mxu0 }
0x30f6   :  { %v9137_v0 = vpop.f32.mrf.mxu0 }
0x30f7   :  { %v15523_v22 = vadd.f32 %v9137_v0, %v15409_v54  ;;  %v9221_v58 = vpop.f32.mrf.mxu1 }
0x30f8   :  { %v15526_v4 = vadd.f32 %v9221_v58, %v15411_v12  ;;  %v12508_v10 = vpop.f32.mrf.mxu0 }
0x30f9   :  { %v12520_v34 = vpop.f32.mrf.mxu1 }
0x30fa   :  { %v9142_v15 = vpop.f32.mrf.mxu0 }
0x30fb   :  { %v15529_v44 = vadd.f32 %v9142_v15, %v15413_v8  ;;  %v9226_v3 = vpop.f32.mrf.mxu1 }
0x30fc   :  { %v15532_v56 = vadd.f32 %v9226_v3, %v15415_v25  ;;  %v12511_v5 = vpop.f32.mrf.mxu0 }
0x30fd   :  { %v12523_v53 = vpop.f32.mrf.mxu1 }
0x30fe   :  { %v9322_v37 = vpop.f32.mrf.mxu0 }
0x30ff   :  { %v9231_v7 = vpop.f32.mrf.mxu1  ;;  %v9425_v54 = vmul.f32 0.35355338, %v9322_v37 }
0x3100   :  { %v15535_v47 = vadd.f32 %v9231_v7, %v15417_v43  ;;  %v12535_v12 = vpop.f32.mrf.mxu0 }
0x3101   :  { %v9431_v40 = vadd.f32 %v9425_v54, %v14355_v28  ;;  %v12526_v59 = vpop.f32.mrf.mxu1 }
0x3103   :  { %v9327_v60 = vpop.f32.mrf.mxu0  ;;  %v9437_v8 = vsel %vm5322_vm14, %v9431_v40, -inf }
0x3104   :  { %v9426_v9 = vmul.f32 0.35355338, %v9327_v60  ;;  %v9411_v17 = vpop.f32.mrf.mxu1  ;;  %9438 = vmax.xlane.f32.xlu1 %v9437_v8 }
0x3105   :  { %v9428_v25 = vmul.f32 0.35355338, %v9411_v17  ;;  %v12538_v42 = vpop.f32.mrf.mxu0 }
0x3106   :  { %v9432_v32 = vadd.f32 %v9426_v9, %v14355_v28  ;;  %v12550_v55 = vpop.f32.mrf.mxu1 }
0x3107   :  { %v9434_v61 = vadd.f32 %v9428_v25, %v14355_v28  ;;  %v9332_v52 = vpop.f32.mrf.mxu0 }
0x3108   :  { %v9427_v43 = vmul.f32 0.35355338, %v9332_v52  ;;  %v9416_v20 = vpop.f32.mrf.mxu1  ;;  %v9440_v50 = vsel %vm5322_vm14, %v9432_v32, -inf }
0x3109   :  { %v9429_v39 = vmul.f32 0.35355338, %v9416_v20  ;;  %9441 = vmax.xlane.f32.xlu0 %v9440_v50  ;;  %v12541_v57 = vpop.f32.mrf.mxu0  ;;  %v9446_v27 = vsel %vm5322_vm14, %v9434_v61, -inf }
0x310a   :  { %v9433_v51 = vadd.f32 %v9427_v43, %v14355_v28  ;;  %9447 = vmax.xlane.f32.xlu1 %v9446_v27  ;;  %v12553_v26 = vpop.f32.mrf.mxu1  ;;  %v10854_v43 = vld [vmem:[%s15903_s15 + $0xf8] sm:$0xff] }
0x310b   :  { %v9435_v41 = vadd.f32 %v9429_v39, %v14355_v28  ;;  %12587 = vmatprep.subr.mxu0 %v10854_v43 }
0x310c   :  { %v9421_v19 = vpop.f32.mrf.mxu1  ;;  %v9443_v1 = vsel %vm5322_vm14, %v9433_v51, -inf }
0x310d   :  { %v9430_v21 = vmul.f32 0.35355338, %v9421_v19  ;;  %9444 = vmax.xlane.f32.xlu0 %v9443_v1  ;;  %v9449_v13 = vsel %vm5322_vm14, %v9435_v41, -inf }
0x310e   :  { %9450 = vmax.xlane.f32.xlu1 %v9449_v13  ;;  %v12556_v38 = vpop.f32.mrf.mxu1 }
0x310f   :  { %v9436_v11 = vadd.f32 %v9430_v21, %v14355_v28 }
0x3111   :  { %v9452_v16 = vsel %vm5322_vm14, %v9436_v11, -inf }
0x3112   :  { %9453 = vmax.xlane.f32.xlu0 %v9452_v16 }
0x318d   :  { %v9439_v49 = vpop.xlane.xlu1 %9438 }
0x318e   :  { %v9455_v24 = vsub.f32 %v9431_v40, %v9439_v49 }
0x3190   :  { %v9461_v63 = vmul.f32 1.442695, %v9455_v24 }
0x3192   :  { %13000 = vpow2.f32 %v9461_v63  ;;  %v9442_v14 = vpop.xlane.xlu0 %9441 }
0x3193   :  { %v9456_v62 = vsub.f32 %v9432_v32, %v9442_v14  ;;  %v9448_v0 = vpop.xlane.xlu1 %9447  ;;  %v10853_v14 = vld [vmem:[%s15903_s15 + $0xf0] sm:$0xff] }
0x3194   :  { %v9458_v58 = vsub.f32 %v9434_v61, %v9448_v0  ;;  %v10851_v0 = vld [vmem:[%s15903_s15 + $0xe0] sm:$0xff] }
0x3195   :  { %v9463_v10 = vmul.f32 1.442695, %v9456_v62  ;;  %v10852_v62 = vld [vmem:[%s15903_s15 + $0xe8] sm:$0xff] }
0x3196   :  { %v9467_v34 = vmul.f32 1.442695, %v9458_v58  ;;  %v9445_v15 = vpop.xlane.xlu0 %9444 }
0x3197   :  { %13002 = vpow2.f32 %v9463_v10  ;;  %v9457_v3 = vsub.f32 %v9433_v51, %v9445_v15  ;;  %v9451_v5 = vpop.xlane.xlu1 %9450 }
0x3198   :  { %13004 = vpow2.f32 %v9467_v34  ;;  %v9459_v53 = vsub.f32 %v9435_v41, %v9451_v5 }
0x3199   :  { %v9465_v28 = vmul.f32 1.442695, %v9457_v3 }
0x319a   :  { %v9469_v37 = vmul.f32 1.442695, %v9459_v53 }
0x319b   :  { %13006 = vpow2.f32 %v9465_v28  ;;  %v9454_v7 = vpop.xlane.xlu0 %9453 }
0x319c   :  { %13008 = vpow2.f32 %v9469_v37  ;;  %v9460_v54 = vsub.f32 %v9436_v11, %v9454_v7 }
0x319e   :  { %v9471_v12 = vmul.f32 1.442695, %v9460_v54 }
0x319f   :  { %v13001_v40 = vpop.eup %13000 }
0x31a0   :  { %13010 = vpow2.f32 %v9471_v12  ;;  %v9473_v59 = vsel %vm5322_vm14, %v13001_v40, 0.0 }
0x31a1   :  { %9474 = vadd.xlane.f32.xlu1 %v9473_v59 }
0x31a4   :  { %v13003_v60 = vpop.eup %13002 }
0x31a5   :  { %v13005_v8 = vpop.eup %13004  ;;  %v9476_v9 = vsel %vm5322_vm14, %v13003_v60, 0.0 }
0x31a6   :  { %v9482_v17 = vsel %vm5322_vm14, %v13005_v8, 0.0  ;;  %9477 = vadd.xlane.f32.xlu0 %v9476_v9 }
0x31a7   :  { %9483 = vadd.xlane.f32.xlu1 %v9482_v17 }
0x31a8   :  { %v13007_v25 = vpop.eup %13006 }
0x31a9   :  { %v13009_v42 = vpop.eup %13008  ;;  %v9479_v32 = vsel %vm5322_vm14, %v13007_v25, 0.0 }
0x31aa   :  { %v9485_v55 = vsel %vm5322_vm14, %v13009_v42, 0.0  ;;  %9480 = vadd.xlane.f32.xlu0 %v9479_v32 }
0x31ab   :  { %9486 = vadd.xlane.f32.xlu1 %v9485_v55 }
0x31ad   :  { %v13011_v61 = vpop.eup %13010 }
0x31ae   :  { %v9488_v52 = vsel %vm5322_vm14, %v13011_v61, 0.0 }
0x31af   :  { %9489 = vadd.xlane.f32.xlu0 %v9488_v52 }
0x322a   :  { %v9475_v20 = vpop.xlane.xlu1 %9474 }
0x322b   :  { %13012 = vrcp.f32 %v9475_v20 }
0x322f   :  { %v9478_v50 = vpop.xlane.xlu0 %9477 }
0x3230   :  { %v9484_v39 = vpop.xlane.xlu1 %9483  ;;  %13014 = vrcp.f32 %v9478_v50 }
0x3231   :  { %13016 = vrcp.f32 %v9484_v39 }
0x3233   :  { %v9481_v57 = vpop.xlane.xlu0 %9480 }
0x3234   :  { %v9487_v27 = vpop.xlane.xlu1 %9486  ;;  %13018 = vrcp.f32 %v9481_v57 }
0x3235   :  { %13020 = vrcp.f32 %v9487_v27 }
0x3238   :  { %v13013_v51 = vpop.eup %13012  ;;  %v9490_v26 = vpop.xlane.xlu0 %9489 }
0x3239   :  { %v9497_v41 = vmul.f32 %v13013_v51, %v13001_v40  ;;  %13022 = vrcp.f32 %v9490_v26 }
0x323b   :  { %12564 = vmatmul.mubr.msk.f32.vlgmr.msra.gmra.mxu0 %vm5322_vm14, %v9497_v41 }
0x323c   :  { %12566 = vmatprep.mubr.msk.f32.mxu0 %vm13089_vm1, %v15954_v18  ;;  %12588 = vmatpush3.msra.mxu0 %v10854_v43 }
0x323d   :  { %v13015_v19 = vpop.eup %13014  ;;  %12589 = vmatprep.subr.mxu0 %v10853_v14 }
0x323e   :  { %v13017_v1 = vpop.eup %13016  ;;  %v9498_v21 = vmul.f32 %v13015_v19, %v13003_v60  ;;  %12590 = vmatpush3.msra.mxu0 %v10853_v14 }
0x323f   :  { %v9500_v13 = vmul.f32 %v13017_v1, %v13005_v8  ;;  %12591 = vmatprep.subr.mxu0 %v10852_v62 }
0x3240   :  { %12567 = vmatmul.mubr.msk.f32.gmra.mxu0 %vm5322_vm14, %v9498_v21 }
0x3241   :  { %v13019_v38 = vpop.eup %13018  ;;  %12579 = vmatmul.mubr.msk.f32.vlgmr.msra.gmra.mxu1 %vm5322_vm14, %v9500_v13  ;;  %12569 = vmatprep.mubr.msk.f32.mxu0 %vm13089_vm1, %v15954_v18 }
0x3242   :  { %v13021_v11 = vpop.eup %13020  ;;  %12581 = vmatprep.mubr.msk.f32.mxu1 %vm13089_vm1, %v15954_v18  ;;  %v9499_v16 = vmul.f32 %v13019_v38, %v13007_v25  ;;  %12592 = vmatpush3.msra.mxu0 %v10852_v62 }
0x3243   :  { %v9501_v49 = vmul.f32 %v13021_v11, %v13009_v42  ;;  %12593 = vmatprep.subr.mxu0 %v10851_v0 }
0x3244   :  { %12570 = vmatmul.mubr.msk.f32.gmra.mxu0 %vm5322_vm14, %v9499_v16 }
0x3245   :  { %12582 = vmatmul.mubr.msk.f32.gmra.mxu1 %vm5322_vm14, %v9501_v49  ;;  %12594 = vmatpush3.msra.mxu0 %v10851_v0 }
0x3246   :  { %v13023_v24 = vpop.eup %13022  ;;  %12584 = vmatprep.mubr.msk.f32.mxu1 %vm13089_vm1, %v15954_v18  ;;  %vm10539_vm1 = vcmask 130112  }
0x3247   :  { %v9502_v63 = vmul.f32 %v13023_v24, %v13011_v61 }
0x3249   :  { %12585 = vmatmul.mubr.msk.f32.gmra.mxu1 %vm5322_vm14, %v9502_v63 }
0x32fb   :  { %v9584_v18 = vpop.f32.mrf.mxu0 }
0x32fc   :  { %v9687_v58 = vadd.f32 %v9584_v18, %v15520_v35 }
0x32fd   :  { %v12565_v10 = vpop.f32.mrf.mxu0 }
0x32fe   :  { %12595 = vmatprep.mubr.msk.f32.mxu0 %vm428_vm6, %v9687_v58 }
0x3300   :  { %v9589_v34 = vpop.f32.mrf.mxu0 }
0x3301   :  { %v9688_v15 = vadd.f32 %v9589_v34, %v15523_v22  ;;  %v9673_v3 = vpop.f32.mrf.mxu1 }
0x3302   :  { %v12568_v5 = vpop.f32.mrf.mxu0  ;;  %v9690_v54 = vadd.f32 %v9673_v3, %v15526_v4  ;;  %v15596_v4 = vld [vmem:[%s15904_s16 + $0x10] sm:$0xff] }
0x3303   :  { %v12580_v53 = vpop.f32.mrf.mxu1  ;;  %12596 = vmatmul.mubr.msk.f32.vlgmr.msra.gmra.mxu0 %vm428_vm6, %v9688_v15 }
0x3304   :  { %v9594_v28 = vpop.f32.mrf.mxu0 }
0x3305   :  { %v9689_v37 = vadd.f32 %v9594_v28, %v15529_v44  ;;  %v9678_v7 = vpop.f32.mrf.mxu1  ;;  %v9696_v44 = vrot.slane %v15596_v4, %v13551_v6 }
0x3306   :  { %v12571_v12 = vpop.f32.mrf.mxu0  ;;  %v9691_v35 = vadd.f32 %v9678_v7, %v15532_v56 }
0x3307   :  { %v12583_v40 = vpop.f32.mrf.mxu1  ;;  %12598 = vmatprep.mubr.msk.f32.mxu0 %vm428_vm6, %v9689_v37 }
0x3308   :  { %12599 = vmatmul.mubr.msk.f32.gmra.mxu0 %vm428_vm6, %v9690_v54  ;;  %v10860_v40 = vld [vmem:[%s15905_s17 + $0x38] sm:$0xff] }
0x3309   :  { %v9683_v22 = vpop.f32.mrf.mxu1  ;;  %12601 = vmatprep.mubr.msk.f32.mxu0 %vm428_vm6, %v9691_v35  ;;  %12604 = vmatprep.subr.mxu1 %v10860_v40 }
0x330a   :  { %v9692_v59 = vadd.f32 %v9683_v22, %v15535_v47  ;;  %12605 = vmatpush3.msra.mxu1 %v10860_v40  ;;  %v10859_v22 = vld [vmem:[%s15905_s17 + $0x30] sm:$0xff]  ;;  %v10869_v40 = vld [vmem:[%s15907_s19 + $0xb8] sm:$0xff] }
0x330b   :  { %v12586_v60 = vpop.f32.mrf.mxu1  ;;  %12606 = vmatprep.subr.mxu1 %v10859_v22 }
0x330c   :  { %12602 = vmatmul.mubr.msk.f32.gmra.mxu0 %vm428_vm6, %v9692_v59  ;;  %v10858_v59 = vld [vmem:[%s15905_s17 + $0x28] sm:$0xff]  ;;  %12607 = vmatpush3.msra.mxu1 %v10859_v22  ;;  %v10857_v60 = vld [vmem:[%s15905_s17 + $0x20] sm:$0xff]  ;;  %v10868_v22 = vld [vmem:[%s15907_s19 + $0xb0] sm:$0xff] }
0x330d   :  { %12608 = vmatprep.subr.mxu1 %v10858_v59 }
0x330e   :  { %12609 = vmatpush3.msra.mxu1 %v10858_v59  ;;  %v10867_v59 = vld [vmem:[%s15907_s19 + $0xa8] sm:$0xff] }
0x330f   :  { %12610 = vmatprep.subr.mxu1 %v10857_v60 }
0x3310   :  { %12611 = vmatpush3.msra.mxu1 %v10857_v60  ;;  %v10866_v60 = vld [vmem:[%s15907_s19 + $0xa0] sm:$0xff] }
0x33c3   :  { %v12597_v56 = vpop.f32.mrf.mxu0 }
0x33c4   :  { %v9787_v8 = vadd.f32 %v12597_v56, %v9696_v44 }
0x33c5   :  { %v9781_v9 = vpop.f32.mrf.mxu0 }
0x33c6   :  { %v15601_v17 = vadd.f32 %v9787_v8, %v14903_v46  ;;  %v9782_v25 = vadd.f32 %v9781_v9, %v9696_v44 }
0x33c8   :  { %v15604_v47 = vadd.f32 %v9782_v25, %v14906_v29  ;;  %v12600_v42 = vpop.f32.mrf.mxu0  ;;  %v9819_v32 = vsel %vm428_vm6, %v15601_v17, 0.0 }
0x33c9   :  { %v9797_v55 = vadd.f32 %v12600_v42, %v9696_v44  ;;  %9820 = vadd.xlane.f32.xlu0 %v9819_v32 }
0x33ca   :  { %v9791_v61 = vpop.f32.mrf.mxu0  ;;  %v9816_v6 = vsel %vm428_vm6, %v15604_v47, 0.0 }
0x33cb   :  { %v15611_v52 = vadd.f32 %v9797_v55, %v14913_v2  ;;  %v9792_v43 = vadd.f32 %v9791_v61, %v9696_v44  ;;  %9817 = vadd.xlane.f32.xlu1 %v9816_v6 }
0x33cc   :  { %v12603_v46 = vpop.f32.mrf.mxu0 }
0x33cd   :  { %v15614_v20 = vadd.f32 %v9792_v43, %v14916_v48  ;;  %v9807_v29 = vadd.f32 %v12603_v46, %v9696_v44  ;;  %v9825_v50 = vsel %vm428_vm6, %v15611_v52, 0.0 }
0x33ce   :  { %9826 = vadd.xlane.f32.xlu0 %v9825_v50  ;;  %v9801_v39 = vpop.f32.mrf.mxu0 }
0x33cf   :  { %v15619_v57 = vadd.f32 %v9807_v29, %v14921_v33  ;;  %v9802_v27 = vadd.f32 %v9801_v39, %v9696_v44  ;;  %v9822_v2 = vsel %vm428_vm6, %v15614_v20, 0.0 }
0x33d0   :  { %9823 = vadd.xlane.f32.xlu1 %v9822_v2 }
0x33d1   :  { %v15624_v51 = vadd.f32 %v9802_v27, %v14926_v23  ;;  %v9831_v48 = vsel %vm428_vm6, %v15619_v57, 0.0 }
0x33d2   :  { %9832 = vadd.xlane.f32.xlu0 %v9831_v48 }
0x33d3   :  { %v9828_v26 = vsel %vm428_vm6, %v15624_v51, 0.0 }
0x33d4   :  { %9829 = vadd.xlane.f32.xlu1 %v9828_v26 }
0x3452   :  { %v9821_v41 = vpop.xlane.xlu0 %9820 }
0x3453   :  { %v9835_v19 = vmul.f32 0.03125, %v9821_v41  ;;  %v9897_v41 = vrot.slane %v15596_v4, %v13582_v36 }
0x3454   :  { %v9818_v33 = vpop.xlane.xlu1 %9817 }
0x3455   :  { %v15631_v1 = vsub.f32 %v15601_v17, %v9835_v19  ;;  %v9834_v21 = vmul.f32 0.03125, %v9818_v33 }
0x3457   :  { %v15634_v13 = vsub.f32 %v15604_v47, %v9834_v21  ;;  %v9827_v23 = vpop.xlane.xlu0 %9826  ;;  %v9847_v38 = vmul.f32 %v15631_v1, %v15631_v1 }
0x3458   :  { %v9837_v11 = vmul.f32 0.03125, %v9827_v23  ;;  %v9907_v23 = vrot.slane %v15596_v4, %v13587_v45 }
0x3459   :  { %v9824_v16 = vpop.xlane.xlu1 %9823  ;;  %v9855_v49 = vsel %vm428_vm6, %v9847_v38, 0.0  ;;  %v9846_v24 = vmul.f32 %v15634_v13, %v15634_v13 }
0x345a   :  { %v15642_v63 = vsub.f32 %v15611_v52, %v9837_v11  ;;  %v9836_v14 = vmul.f32 0.03125, %v9824_v16  ;;  %9856 = vadd.xlane.f32.xlu0 %v9855_v49 }
0x345b   :  { %v9833_v62 = vpop.xlane.xlu0 %9832  ;;  %v9852_v0 = vsel %vm428_vm6, %v9846_v24, 0.0 }
0x345c   :  { %v15646_v18 = vsub.f32 %v15614_v20, %v9836_v14  ;;  %v9839_v58 = vmul.f32 0.03125, %v9833_v62  ;;  %9853 = vadd.xlane.f32.xlu1 %v9852_v0  ;;  %v9849_v10 = vmul.f32 %v15642_v63, %v15642_v63 }
0x345d   :  { %v9830_v34 = vpop.xlane.xlu1 %9829 }
0x345e   :  { %v15651_v15 = vsub.f32 %v15619_v57, %v9839_v58  ;;  %v9838_v3 = vmul.f32 0.03125, %v9830_v34  ;;  %v9861_v5 = vsel %vm428_vm6, %v9849_v10, 0.0  ;;  %v9848_v53 = vmul.f32 %v15646_v18, %v15646_v18 }
0x345f   :  { %9862 = vadd.xlane.f32.xlu0 %v9861_v5 }
0x3460   :  { %v15657_v28 = vsub.f32 %v15624_v51, %v9838_v3  ;;  %v9858_v37 = vsel %vm428_vm6, %v9848_v53, 0.0  ;;  %v9851_v7 = vmul.f32 %v15651_v15, %v15651_v15  ;;  %v10876_v53 = vld [vmem:[%s15907_s19 + $0xf0] sm:$0xff] }
0x3461   :  { %9859 = vadd.xlane.f32.xlu1 %v9858_v37  ;;  %v10874_v37 = vld [vmem:[%s15907_s19 + $0xe0] sm:$0xff] }
0x3462   :  { %v9867_v54 = vsel %vm428_vm6, %v9851_v7, 0.0  ;;  %v9850_v12 = vmul.f32 %v15657_v28, %v15657_v28  ;;  %v10873_v7 = vld [vmem:[%s15907_s19 + $0xd8] sm:$0xff] }
0x3463   :  { %9868 = vadd.xlane.f32.xlu0 %v9867_v54  ;;  %v10872_v54 = vld [vmem:[%s15907_s19 + $0xd0] sm:$0xff] }
0x3464   :  { %v9864_v35 = vsel %vm428_vm6, %v9850_v12, 0.0  ;;  %v10871_v12 = vld [vmem:[%s15907_s19 + $0xc8] sm:$0xff] }
0x3465   :  { %9865 = vadd.xlane.f32.xlu1 %v9864_v35  ;;  %v10870_v35 = vld [vmem:[%s15907_s19 + $0xc0] sm:$0xff] }
0x34e3   :  { %v9857_v44 = vpop.xlane.xlu0 %9856 }
0x34e4   :  { %v9871_v56 = vmul.f32 0.03125, %v9857_v44  ;;  %v10865_v44 = vld [vmem:[%s15907_s19 + $0x98] sm:$0xff] }
0x34e5   :  { %v9854_v8 = vpop.xlane.xlu1 %9853 }
0x34e6   :  { %v9877_v9 = vadd.f32 1e-05, %v9871_v56  ;;  %v9870_v25 = vmul.f32 0.03125, %v9854_v8  ;;  %v10864_v56 = vld [vmem:[%s15907_s19 + $0x90] sm:$0xff]  ;;  %v10863_v8 = vld [vmem:[%s15907_s19 + $0x88] sm:$0xff] }
0x34e8   :  { %13024 = vrsqrt.f32 %v9877_v9  ;;  %v9876_v42 = vadd.f32 1e-05, %v9870_v25  ;;  %v9863_v32 = vpop.xlane.xlu0 %9862  ;;  %v10862_v9 = vld [vmem:[%s15907_s19 + $0x80] sm:$0xff] }
0x34e9   :  { %v9873_v55 = vmul.f32 0.03125, %v9863_v32  ;;  %v10974_v25 = vld [vmem:[%s15906_s18 + $0x1] ss:$0 sm:$0xff] }
0x34ea   :  { %13026 = vrsqrt.f32 %v9876_v42  ;;  %v9860_v61 = vpop.xlane.xlu1 %9859 }
0x34eb   :  { %v9879_v6 = vadd.f32 1e-05, %v9873_v55  ;;  %v9872_v43 = vmul.f32 0.03125, %v9860_v61 }
0x34ec   :  { %v9869_v46 = vpop.xlane.xlu0 %9868 }
0x34ed   :  { %13028 = vrsqrt.f32 %v9879_v6  ;;  %v9878_v29 = vadd.f32 1e-05, %v9872_v43  ;;  %v9875_v50 = vmul.f32 0.03125, %v9869_v46 }
0x34ee   :  { %v9866_v39 = vpop.xlane.xlu1 %9865 }
0x34ef   :  { %13030 = vrsqrt.f32 %v9878_v29  ;;  %v9881_v27 = vadd.f32 1e-05, %v9875_v50  ;;  %v9874_v2 = vmul.f32 0.03125, %v9866_v39 }
0x34f1   :  { %13032 = vrsqrt.f32 %v9881_v27  ;;  %v9880_v48 = vadd.f32 1e-05, %v9874_v2 }
0x34f3   :  { %13034 = vrsqrt.f32 %v9880_v48 }
0x34f5   :  { %v13025_v26 = vpop.eup %13024 }
0x34f6   :  { %v9889_v19 = vmul.f32 %v13025_v26, %v15631_v1 }
0x34f7   :  { %v13027_v33 = vpop.eup %13026 }
0x34f8   :  { %v9888_v21 = vmul.f32 %v13027_v33, %v15634_v13  ;;  %v9899_v38 = vmul.f32 %v9897_v41, %v9889_v19 }
0x34fa   :  { %v13029_v11 = vpop.eup %13028  ;;  %v9898_v16 = vmul.f32 %v9897_v41, %v9888_v21  ;;  %v9909_v62 = vadd.f32 %v9907_v23, %v9899_v38 }
0x34fb   :  { %v9891_v49 = vmul.f32 %v13029_v11, %v15642_v63 }
0x34fc   :  { %v13031_v24 = vpop.eup %13030  ;;  %v9908_v14 = vadd.f32 %v9907_v23, %v9898_v16 }
0x34fd   :  { %v9890_v0 = vmul.f32 %v13031_v24, %v15646_v18  ;;  %v9901_v36 = vmul.f32 %v9897_v41, %v9891_v49 }
0x34fe   :  { %v13033_v58 = vpop.eup %13032  ;;  %12612 = vmatprep.mubr.msk.f32.mxu1 %vm428_vm6, %v9908_v14 }
0x34ff   :  { %v9893_v1 = vmul.f32 %v13033_v58, %v15651_v15  ;;  %12613 = vmatmul.mubr.msk.f32.vlgmr.msra.gmra.mxu1 %vm428_vm6, %v9909_v62  ;;  %v9900_v13 = vmul.f32 %v9897_v41, %v9890_v0  ;;  %v9911_v34 = vadd.f32 %v9907_v23, %v9901_v36  ;;  %v10877_v15 = vld [vmem:[%s15907_s19 + $0xf8] sm:$0xff] }
0x3500   :  { %v13035_v45 = vpop.eup %13034  ;;  %12621 = vmatprep.subr.mxu0 %v10877_v15 }
0x3501   :  { %v9910_v4 = vadd.f32 %v9907_v23, %v9900_v13  ;;  %v9892_v10 = vmul.f32 %v13035_v45, %v15657_v28  ;;  %v9903_v63 = vmul.f32 %v9897_v41, %v9893_v1  ;;  %12622 = vmatpush3.msra.mxu0 %v10877_v15  ;;  %v10875_v28 = vld [vmem:[%s15907_s19 + $0xe8] sm:$0xff] }
0x3502   :  { %12623 = vmatprep.subr.mxu0 %v10876_v53 }
0x3503   :  { %12615 = vmatprep.mubr.msk.f32.mxu1 %vm428_vm6, %v9910_v4  ;;  %v9902_v3 = vmul.f32 %v9897_v41, %v9892_v10  ;;  %v9913_v5 = vadd.f32 %v9907_v23, %v9903_v63  ;;  %12624 = vmatpush3.msra.mxu0 %v10876_v53 }
0x3504   :  { %12616 = vmatmul.mubr.msk.f32.gmra.mxu1 %vm428_vm6, %v9911_v34  ;;  %12625 = vmatprep.subr.mxu0 %v10875_v28 }
0x3505   :  { %v9912_v18 = vadd.f32 %v9907_v23, %v9902_v3  ;;  %12626 = vmatpush3.msra.mxu0 %v10875_v28 }
0x3506   :  { %12627 = vmatprep.subr.mxu0 %v10874_v37 }
0x3507   :  { %12618 = vmatprep.mubr.msk.f32.mxu1 %vm428_vm6, %v9912_v18  ;;  %12628 = vmatpush3.msra.mxu0 %v10874_v37 }
0x3508   :  { %12619 = vmatmul.mubr.msk.f32.gmra.mxu1 %vm428_vm6, %v9913_v5  ;;  %12629 = vmatprep.subr.mxu0 %v10873_v7 }
0x3509   :  { %12630 = vmatpush3.msra.mxu0 %v10873_v7 }
0x350a   :  { %12631 = vmatprep.subr.mxu0 %v10872_v54 }
0x350b   :  { %12632 = vmatpush3.msra.mxu0 %v10872_v54 }
0x350c   :  { %12633 = vmatprep.subr.mxu0 %v10871_v12 }
0x350d   :  { %12634 = vmatpush3.msra.mxu0 %v10871_v12 }
0x350e   :  { %12635 = vmatprep.subr.mxu0 %v10870_v35 }
0x350f   :  { %12636 = vmatpush3.msra.mxu0 %v10870_v35 }
0x3510   :  { %12637 = vmatprep.subr.mxu0 %v10869_v40 }
0x3511   :  { %12638 = vmatpush3.msra.mxu0 %v10869_v40 }
0x3512   :  { %12639 = vmatprep.subr.mxu0 %v10868_v22 }
0x3513   :  { %12640 = vmatpush3.msra.mxu0 %v10868_v22 }
0x3514   :  { %12641 = vmatprep.subr.mxu0 %v10867_v59 }
0x3515   :  { %12642 = vmatpush3.msra.mxu0 %v10867_v59 }
0x3516   :  { %12643 = vmatprep.subr.mxu0 %v10866_v60 }
0x3517   :  { %12644 = vmatpush3.msra.mxu0 %v10866_v60 }
0x3518   :  { %12645 = vmatprep.subr.mxu0 %v10865_v44 }
0x3519   :  { %12646 = vmatpush3.msra.mxu0 %v10865_v44 }
0x351a   :  { %12647 = vmatprep.subr.mxu0 %v10864_v56 }
0x351b   :  { %12648 = vmatpush3.msra.mxu0 %v10864_v56 }
0x351c   :  { %12649 = vmatprep.subr.mxu0 %v10863_v8 }
0x351d   :  { %12650 = vmatpush3.msra.mxu0 %v10863_v8 }
0x351e   :  { %12651 = vmatprep.subr.mxu0 %v10862_v9 }
0x351f   :  { %12652 = vmatpush3.msra.mxu0 %v10862_v9 }
0x35bf   :  { %v12614_v42 = vpop.f32.mrf.mxu1 }
0x35c0   :  { %v10010_v32 = vadd.f32 %v12614_v42, %v10974_v25 }
0x35c1   :  { %v10004_v55 = vpop.f32.mrf.mxu1 }
0x35c2   :  { %v10034_v61 = vmul.f32 %v10010_v32, %v10010_v32  ;;  %v10005_v6 = vadd.f32 %v10974_v25, %v10004_v55 }
0x35c4   :  { %v10040_v43 = vmul.f32 %v10034_v61, %v10010_v32  ;;  %v10033_v46 = vmul.f32 %v10005_v6, %v10005_v6  ;;  %v12617_v29 = vpop.f32.mrf.mxu1 }
0x35c5   :  { %v10020_v50 = vadd.f32 %v12617_v29, %v10974_v25 }
0x35c6   :  { %v10046_v39 = vmul.f32 0.044715, %v10040_v43  ;;  %v10039_v27 = vmul.f32 %v10033_v46, %v10005_v6  ;;  %v10014_v2 = vpop.f32.mrf.mxu1 }
0x35c7   :  { %v10036_v48 = vmul.f32 %v10020_v50, %v10020_v50  ;;  %v10015_v26 = vadd.f32 %v10974_v25, %v10014_v2 }
0x35c8   :  { %v10052_v41 = vadd.f32 %v10046_v39, %v10010_v32  ;;  %v10045_v19 = vmul.f32 0.044715, %v10039_v27  ;;  %v12620_v33 = vpop.f32.mrf.mxu1 }
0x35c9   :  { %v10042_v21 = vmul.f32 %v10036_v48, %v10020_v50  ;;  %v10035_v23 = vmul.f32 %v10015_v26, %v10015_v26  ;;  %v10030_v38 = vadd.f32 %v12620_v33, %v10974_v25 }
0x35ca   :  { %v10058_v11 = vmul.f32 0.7978846, %v10052_v41  ;;  %v10051_v16 = vadd.f32 %v10045_v19, %v10005_v6  ;;  %v10024_v49 = vpop.f32.mrf.mxu1 }
0x35cb   :  { %v10048_v24 = vmul.f32 0.044715, %v10042_v21  ;;  %v10041_v14 = vmul.f32 %v10035_v23, %v10015_v26  ;;  %v10038_v62 = vmul.f32 %v10030_v38, %v10030_v38  ;;  %v10025_v0 = vadd.f32 %v10974_v25, %v10024_v49 }
0x35cc   :  { %13036 = vtanh.f32 %v10058_v11  ;;  %v10057_v58 = vmul.f32 0.7978846, %v10051_v16 }
0x35cd   :  { %v10054_v36 = vadd.f32 %v10048_v24, %v10020_v50  ;;  %v10047_v1 = vmul.f32 0.044715, %v10041_v14  ;;  %v10044_v13 = vmul.f32 %v10038_v62, %v10030_v38  ;;  %v10037_v45 = vmul.f32 %v10025_v0, %v10025_v0 }
0x35ce   :  { %13038 = vtanh.f32 %v10057_v58 }
0x35cf   :  { %v10060_v4 = vmul.f32 0.7978846, %v10054_v36  ;;  %v10053_v10 = vadd.f32 %v10047_v1, %v10015_v26  ;;  %v10050_v34 = vmul.f32 0.044715, %v10044_v13  ;;  %v10043_v63 = vmul.f32 %v10037_v45, %v10025_v0 }
0x35d1   :  { %13040 = vtanh.f32 %v10060_v4  ;;  %v10059_v3 = vmul.f32 0.7978846, %v10053_v10  ;;  %v10056_v18 = vadd.f32 %v10050_v34, %v10030_v38  ;;  %v10049_v5 = vmul.f32 0.044715, %v10043_v63 }
0x35d3   :  { %13042 = vtanh.f32 %v10059_v3  ;;  %v10062_v15 = vmul.f32 0.7978846, %v10056_v18  ;;  %v10055_v53 = vadd.f32 %v10049_v5, %v10025_v0 }
0x35d5   :  { %13044 = vtanh.f32 %v10062_v15  ;;  %v10061_v28 = vmul.f32 0.7978846, %v10055_v53 }
0x35d7   :  { %13046 = vtanh.f32 %v10061_v28 }
0x35d9   :  { %v13037_v37 = vpop.eup %13036 }
0x35da   :  { %v10070_v7 = vadd.f32 1.0, %v13037_v37 }
0x35db   :  { %v13039_v54 = vpop.eup %13038 }
0x35dc   :  { %v10069_v12 = vadd.f32 1.0, %v13039_v54  ;;  %v10076_v35 = vmul.f32 0.5, %v10070_v7 }
0x35de   :  { %v13041_v40 = vpop.eup %13040  ;;  %v10075_v22 = vmul.f32 0.5, %v10069_v12  ;;  %v10082_v56 = vmul.f32 %v10076_v35, %v10010_v32  ;;  %v10981_v32 = vld [vmem:[%s15904_s16 + $0x18] ss:$0 sm:$0xff] }
0x35df   :  { %v10072_v59 = vadd.f32 1.0, %v13041_v40 }
0x35e0   :  { %v13043_v60 = vpop.eup %13042  ;;  %v10081_v44 = vmul.f32 %v10075_v22, %v10005_v6 }
0x35e1   :  { %v10071_v8 = vadd.f32 1.0, %v13043_v60  ;;  %v10078_v25 = vmul.f32 0.5, %v10072_v59 }
0x35e2   :  { %v13045_v9 = vpop.eup %13044  ;;  %12653 = vmatprep.mubr.f32.mxu0 %v10081_v44 }
0x35e3   :  { %12654 = vmatmul.mubr.f32.vlgmr.msra.gmra.mxu0 %v10082_v56  ;;  %v10077_v42 = vmul.f32 0.5, %v10071_v8  ;;  %v10074_v55 = vadd.f32 1.0, %v13045_v9  ;;  %v10084_v29 = vmul.f32 %v10078_v25, %v10020_v50 }
0x35e4   :  { %v13047_v61 = vpop.eup %13046 }
0x35e5   :  { %v10083_v43 = vmul.f32 %v10077_v42, %v10015_v26  ;;  %v10073_v46 = vadd.f32 1.0, %v13047_v61  ;;  %v10080_v39 = vmul.f32 0.5, %v10074_v55 }
0x35e7   :  { %12656 = vmatprep.mubr.f32.mxu0 %v10083_v43  ;;  %v10079_v27 = vmul.f32 0.5, %v10073_v46  ;;  %v10086_v48 = vmul.f32 %v10080_v39, %v10030_v38  ;;  %v15957_v43 = vld [vmem:[#allocation10_spill] sm:$0xff]  ;;  %v15958_v46 = vld [vmem:[#allocation11_spill] sm:$0xff] }
0x35e8   :  { %12657 = vmatmul.mubr.f32.gmra.mxu0 %v10084_v29  ;;  %v10293_v29 = vld [vmem:[%s15908_s20 + $0x18] sm:$0xff]  ;;  %v10292_v39 = vld [vmem:[%s15908_s20 + $0x10] sm:$0xff] }
0x35e9   :  { %v10085_v2 = vmul.f32 %v10079_v27, %v10025_v0  ;;  %12662 = vmatprep.subr.mxu1 %v10293_v29  ;;  %v10291_v27 = vld [vmem:[%s15908_s20 + $0x8] sm:$0xff] }
0x35ea   :  { %12663 = vmatpush3.msra.mxu1 %v10293_v29 }
0x35eb   :  { %12659 = vmatprep.mubr.f32.mxu0 %v10085_v2  ;;  %12664 = vmatprep.subr.mxu1 %v10292_v39  ;;  %v10290_v2 = vld [vmem:[%s15908_s20] sm:$0xff] }
0x35ec   :  { %12660 = vmatmul.mubr.f32.gmra.mxu0 %v10086_v48  ;;  %12665 = vmatpush3.msra.mxu1 %v10292_v39 }
0x35ed   :  { %12666 = vmatprep.subr.mxu1 %v10291_v27 }
0x35ee   :  { %12667 = vmatpush3.msra.mxu1 %v10291_v27  ;;  %v10422_v27 = vld [vmem:[%s15959_s24 + $0x10] sm:$0xff] }
0x35ef   :  { %12668 = vmatprep.subr.mxu1 %v10290_v2 }
0x35f0   :  { %12669 = vmatpush3.msra.mxu1 %v10290_v2 }
0x36a3   :  { %v12655_v6 = vpop.f32.mrf.mxu0 }
0x36a4   :  { %v10163_v41 = vadd.f32 %v12655_v6, %v10981_v32 }
0x36a5   :  { %v10157_v19 = vpop.f32.mrf.mxu0 }
0x36a6   :  { %v10187_v33 = vadd.f32 %v10163_v41, %v15601_v17  ;;  %v10158_v26 = vadd.f32 %v10981_v32, %v10157_v19 }
0x36a8   :  { %v10186_v50 = vadd.f32 %v10158_v26, %v15604_v47  ;;  %v12658_v21 = vpop.f32.mrf.mxu0  ;;  %v10195_v23 = vsel %vm428_vm6, %v10187_v33, 0.0 }
0x36a9   :  { %v10173_v11 = vadd.f32 %v12658_v21, %v10981_v32  ;;  %10196 = vadd.xlane.f32.xlu0 %v10195_v23 }
0x36aa   :  { %v10167_v38 = vpop.f32.mrf.mxu0  ;;  %v10192_v16 = vsel %vm428_vm6, %v10186_v50, 0.0 }
0x36ab   :  { %v10189_v49 = vadd.f32 %v10173_v11, %v15611_v52  ;;  %v10168_v24 = vadd.f32 %v10981_v32, %v10167_v38  ;;  %10193 = vadd.xlane.f32.xlu1 %v10192_v16 }
0x36ac   :  { %v12661_v14 = vpop.f32.mrf.mxu0 }
0x36ad   :  { %v10188_v62 = vadd.f32 %v10168_v24, %v15614_v20  ;;  %v10183_v0 = vadd.f32 %v12661_v14, %v10981_v32  ;;  %v10201_v17 = vsel %vm428_vm6, %v10189_v49, 0.0 }
0x36ae   :  { %10202 = vadd.xlane.f32.xlu0 %v10201_v17  ;;  %v10177_v47 = vpop.f32.mrf.mxu0 }
0x36af   :  { %v10191_v58 = vadd.f32 %v10183_v0, %v15619_v57  ;;  %v10178_v36 = vadd.f32 %v10981_v32, %v10177_v47  ;;  %v10198_v1 = vsel %vm428_vm6, %v10188_v62, 0.0  ;;  %v13065_v47 = vld [vmem:[%s15901_s13] sm:$0xf]  ;;  %s10600_s13 = sshll.u32 %s13092_s3, 4  ;;  %s10601_s13 = int_to_ptr.vmem [resolvable:$true] %s10600_s13 }
0x36b0   :  { %10199 = vadd.xlane.f32.xlu1 %v10198_v1  ;;  %s13066_s9 = scalar_lea.vmem %s10601_s13, 16  ;;  %s13070_s2 = scalar_lea.vmem %s10601_s13, 32 }
0x36b1   :  { %v10190_v13 = vadd.f32 %v10178_v36, %v15624_v51  ;;  %v10207_v52 = vsel %vm428_vm6, %v10191_v58, 0.0  ;;  %p13067_p0 = scmp.ne.s32.totalorder %s10601_s13, %s13066_s9  ;;  %p13071_p1 = scmp.lt.s32.totalorder %s10601_s13, %s10601_s13 }
0x36b2   :  { %10208 = vadd.xlane.f32.xlu0 %v10207_v52  ;;  %v10283_v52 = vrot.slane %v13065_v47, %v13360_v31  ;;  %p13072_p2 = scmp.lt.s32.totalorder %s13070_s2, %s13066_s9 }
0x36b3   :  { %v10204_v45 = vsel %vm428_vm6, %v10190_v13, 0.0 }
0x36b4   :  { %10205 = vadd.xlane.f32.xlu1 %v10204_v45  ;;  %p13073_p3 = por %p13072_p2, %p13071_p1 }
0x36b6   :  { %p13074_p4 = pnand %p13073_p3, %p13067_p0 }
0x3732   :  { %v10197_v20 = vpop.xlane.xlu0 %10196 }
0x3733   :  { %v10211_v4 = vmul.f32 0.03125, %v10197_v20 }
0x3734   :  { %v10194_v10 = vpop.xlane.xlu1 %10193 }
0x3735   :  { %v15760_v34 = vsub.f32 %v10187_v33, %v10211_v4  ;;  %v10210_v63 = vmul.f32 0.03125, %v10194_v10 }
0x3737   :  { %v15762_v3 = vsub.f32 %v10186_v50, %v10210_v63  ;;  %v10203_v57 = vpop.xlane.xlu0 %10202  ;;  %v10223_v18 = vmul.f32 %v15760_v34, %v15760_v34 }
0x3738   :  { %v10213_v5 = vmul.f32 0.03125, %v10203_v57 }
0x3739   :  { %v10200_v51 = vpop.xlane.xlu1 %10199  ;;  %v10231_v15 = vsel %vm428_vm6, %v10223_v18, 0.0  ;;  %v10222_v53 = vmul.f32 %v15762_v3, %v15762_v3 }
0x373a   :  { %v15769_v28 = vsub.f32 %v10189_v49, %v10213_v5  ;;  %v10212_v37 = vmul.f32 0.03125, %v10200_v51  ;;  %10232 = vadd.xlane.f32.xlu0 %v10231_v15 }
0x373b   :  { %v10209_v7 = vpop.xlane.xlu0 %10208  ;;  %v10228_v54 = vsel %vm428_vm6, %v10222_v53, 0.0 }
0x373c   :  { %v15772_v12 = vsub.f32 %v10188_v62, %v10212_v37  ;;  %v10215_v35 = vmul.f32 0.03125, %v10209_v7  ;;  %10229 = vadd.xlane.f32.xlu1 %v10228_v54  ;;  %v10225_v40 = vmul.f32 %v15769_v28, %v15769_v28 }
0x373d   :  { %v10206_v22 = vpop.xlane.xlu1 %10205 }
0x373e   :  { %v15776_v59 = vsub.f32 %v10191_v58, %v10215_v35  ;;  %v10214_v60 = vmul.f32 0.03125, %v10206_v22  ;;  %v10237_v44 = vsel %vm428_vm6, %v10225_v40, 0.0  ;;  %v10224_v56 = vmul.f32 %v15772_v12, %v15772_v12  ;;  %v10982_v35 = vld [vmem:[%s15909_s21] ss:$0 sm:$0xff]  ;;  %v10421_v22 = vld [vmem:[%s15959_s24 + $0x8] sm:$0xff] }
0x373f   :  { %10238 = vadd.xlane.f32.xlu0 %v10237_v44  ;;  %v10273_v58 = vrot.slane %v13065_v47, %v13357_v30  ;;  %v10420_v44 = vld [vmem:[%s15959_s24] sm:$0xff] }
0x3740   :  { %v15781_v8 = vsub.f32 %v10190_v13, %v10214_v60  ;;  %v10234_v9 = vsel %vm428_vm6, %v10224_v56, 0.0  ;;  %v10227_v25 = vmul.f32 %v15776_v59, %v15776_v59 }
0x3741   :  { %10235 = vadd.xlane.f32.xlu1 %v10234_v9 }
0x3742   :  { %v10243_v42 = vsel %vm428_vm6, %v10227_v25, 0.0  ;;  %v10226_v55 = vmul.f32 %v15781_v8, %v15781_v8 }
0x3743   :  { %10244 = vadd.xlane.f32.xlu0 %v10243_v42 }
0x3744   :  { %v10240_v61 = vsel %vm428_vm6, %v10226_v55, 0.0  ;;  %v10423_v55 = vld [vmem:[%s15959_s24 + $0x18] sm:$0xff] }
0x3745   :  { %10241 = vadd.xlane.f32.xlu1 %v10240_v61 }
0x3756   :  { %10469 = vbcast.lane.b32.xlu1 %v15957_v43, 256 }
0x3759   :  { %10473 = vbcast.lane.b32.xlu0 %v15957_v43, 264 }
0x375a   :  { %10484 = vbcast.lane.b32.xlu1 %v15958_v46, 256 }
0x375e   :  { %10488 = vbcast.lane.b32.xlu1 %v15958_v46, 264 }
0x37c3   :  { %v10233_v48 = vpop.xlane.xlu0 %10232 }
0x37c4   :  { %v10247_v32 = vmul.f32 0.03125, %v10233_v48 }
0x37c5   :  { %v10230_v6 = vpop.xlane.xlu1 %10229 }
0x37c6   :  { %v10253_v41 = vadd.f32 1e-05, %v10247_v32  ;;  %v10246_v19 = vmul.f32 0.03125, %v10230_v6 }
0x37c8   :  { %13048 = vrsqrt.f32 %v10253_v41  ;;  %v10252_v33 = vadd.f32 1e-05, %v10246_v19  ;;  %v10239_v26 = vpop.xlane.xlu0 %10238  ;;  %v10425_v41 = vld [vmem:[%s15959_s24 + $0x28] sm:$0xff] }
0x37c9   :  { %v10249_v50 = vmul.f32 0.03125, %v10239_v26 }
0x37ca   :  { %13050 = vrsqrt.f32 %v10252_v33  ;;  %v10236_v21 = vpop.xlane.xlu1 %10235 }
0x37cb   :  { %v10255_v23 = vadd.f32 1e-05, %v10249_v50  ;;  %v10248_v11 = vmul.f32 0.03125, %v10236_v21 }
0x37cc   :  { %v10245_v38 = vpop.xlane.xlu0 %10244 }
0x37cd   :  { %13052 = vrsqrt.f32 %v10255_v23  ;;  %v10254_v16 = vadd.f32 1e-05, %v10248_v11  ;;  %v10251_v49 = vmul.f32 0.03125, %v10245_v38  ;;  %v10424_v23 = vld [vmem:[%s15959_s24 + $0x20] sm:$0xff] }
0x37ce   :  { %v10242_v24 = vpop.xlane.xlu1 %10241 }
0x37cf   :  { %13054 = vrsqrt.f32 %v10254_v16  ;;  %v10257_v14 = vadd.f32 1e-05, %v10251_v49  ;;  %v10250_v62 = vmul.f32 0.03125, %v10242_v24 }
0x37d1   :  { %13056 = vrsqrt.f32 %v10257_v14  ;;  %v10256_v0 = vadd.f32 1e-05, %v10250_v62 }
0x37d3   :  { %13058 = vrsqrt.f32 %v10256_v0 }
0x37d5   :  { %v13049_v17 = vpop.eup %13048 }
0x37d6   :  { %v10265_v36 = vmul.f32 %v13049_v17, %v15760_v34 }
0x37d7   :  { %v13051_v1 = vpop.eup %13050 }
0x37d8   :  { %v10264_v13 = vmul.f32 %v13051_v1, %v15762_v3  ;;  %v10275_v45 = vmul.f32 %v10273_v58, %v10265_v36  ;;  %v10470_v36 = vpop.permute.xlu1 %10469 }
0x37da   :  { %v13053_v20 = vpop.eup %13052  ;;  %v10274_v4 = vmul.f32 %v10273_v58, %v10264_v13  ;;  %v10285_v18 = vadd.f32 %v10283_v52, %v10275_v45  ;;  %v10474_v13 = vpop.permute.xlu0 %10473 }
0x37db   :  { %v10267_v10 = vmul.f32 %v13053_v20, %v15769_v28 }
0x37dc   :  { %v13055_v63 = vpop.eup %13054  ;;  %v10284_v57 = vadd.f32 %v10283_v52, %v10274_v4  ;;  %v10485_v1 = vpop.permute.xlu1 %10484 }
0x37dd   :  { %v10266_v5 = vmul.f32 %v13055_v63, %v15772_v12  ;;  %v10277_v30 = vmul.f32 %v10273_v58, %v10267_v10 }
0x37de   :  { %v13057_v51 = vpop.eup %13056  ;;  %12670 = vmatprep.mubr.msk.f32.mxu1 %vm428_vm6, %v10284_v57 }
0x37df   :  { %v10269_v34 = vmul.f32 %v13057_v51, %v15776_v59  ;;  %12671 = vmatmul.mubr.msk.f32.vlgmr.msra.gmra.mxu1 %vm428_vm6, %v10285_v18  ;;  %v10276_v3 = vmul.f32 %v10273_v58, %v10266_v5  ;;  %v10287_v37 = vadd.f32 %v10283_v52, %v10277_v30 }
0x37e0   :  { %v13059_v31 = vpop.eup %13058 }
0x37e1   :  { %v10286_v15 = vadd.f32 %v10283_v52, %v10276_v3  ;;  %v10268_v53 = vmul.f32 %v13059_v31, %v15781_v8  ;;  %v10279_v28 = vmul.f32 %v10273_v58, %v10269_v34 }
0x37e3   :  { %12673 = vmatprep.mubr.msk.f32.mxu1 %vm428_vm6, %v10286_v15  ;;  %v10278_v7 = vmul.f32 %v10273_v58, %v10268_v53  ;;  %v10289_v12 = vadd.f32 %v10283_v52, %v10279_v28  ;;  %v13091_v58 = vmov 0  }
0x37e4   :  { %12674 = vmatmul.mubr.msk.f32.gmra.mxu1 %vm428_vm6, %v10287_v37  ;;  %12690 = vset.pattern.permute.xlu1 %v13091_v58 }
0x37e5   :  { %v10288_v54 = vadd.f32 %v10283_v52, %v10278_v7  ;;  %12691 = vset.pattern.permute.xlu0 %v13091_v58  ;;  %v10489_v52 = vpop.permute.xlu1 %10488 }
0x37e7   :  { %12676 = vmatprep.mubr.msk.f32.mxu1 %vm428_vm6, %v10288_v54  ;;  %v15960_v54 = vld [vmem:[#allocation9_spill] sm:$0xff] }
0x37e8   :  { %12677 = vmatmul.mubr.msk.f32.gmra.mxu1 %vm428_vm6, %v10289_v12  ;;  %vm10546_vm6 = vcmask 195712  }
0x389f   :  { %v12672_v40 = vpop.f32.mrf.mxu1 }
0x38a0   :  { %v10391_v59 = vadd.f32 %v12672_v40, %v10982_v35  ;;  %v15961_v40 = vld [vmem:[#allocation6_spill] sm:$0xff] }
0x38a1   :  { %v10385_v60 = vpop.f32.mrf.mxu1 }
0x38a2   :  { %10415 = vst.msk [vmem:[%s15910_s22 + $0x8] sm:$0xff] %vm90_vm0, %v10391_v59  ;;  %v10427_v56 = vsub.f32 %v10391_v59, %v10421_v22  ;;  %v10386_v8 = vadd.f32 %v10982_v35, %v10385_v60  ;;  %v10541_v22 = vadd.s32 4294967280, %v15961_v40  ;;  %v10534_v59 = vadd.s32 4294967288, %v15961_v40 }
0x38a4   :  { %v10433_v9 = vmul.f32 %v10427_v56, %v10427_v56  ;;  %10414 = vst.msk [vmem:[%s15910_s22] sm:$0xff] %vm90_vm0, %v10386_v8  ;;  %v10426_v25 = vsub.f32 %v10386_v8, %v10420_v44  ;;  %v12675_v42 = vpop.f32.mrf.mxu1  ;;  %v15962_v44 = vld [vmem:[#allocation5_spill] sm:$0xff] }
0x38a5   :  { %v10401_v61 = vadd.f32 %v12675_v42, %v10982_v35  ;;  %v10532_v56 = vsub.s32 %v15961_v40, %v15962_v44 }
0x38a6   :  { %v10432_v29 = vmul.f32 %v10426_v25, %v10426_v25  ;;  %v10395_v39 = vpop.f32.mrf.mxu1  ;;  %v10441_v2 = vsel %vm90_vm0, %v10433_v9, 0.0  ;;  %v10544_v9 = vsub.s32 %v10541_v22, %v15962_v44  ;;  %v10537_v25 = vsub.s32 %v10534_v59, %v15962_v44 }
0x38a7   :  { %10417 = vst.msk [vmem:[%s15910_s22 + $0x18] sm:$0xff] %vm90_vm0, %v10401_v61  ;;  %v10429_v48 = vsub.f32 %v10401_v61, %v10423_v55  ;;  %v10396_v32 = vadd.f32 %v10982_v35, %v10395_v39  ;;  %10442 = vadd.xlane.f32.xlu0 %v10441_v2 }
0x38a8   :  { %v12678_v6 = vpop.f32.mrf.mxu1  ;;  %v10438_v19 = vsel %vm90_vm0, %v10432_v29, 0.0 }
0x38a9   :  { %v10435_v33 = vmul.f32 %v10429_v48, %v10429_v48  ;;  %10416 = vst.msk [vmem:[%s15910_s22 + $0x10] sm:$0xff] %vm90_vm0, %v10396_v32  ;;  %v10428_v26 = vsub.f32 %v10396_v32, %v10422_v27  ;;  %v10411_v50 = vadd.f32 %v12678_v6, %v10982_v35  ;;  %10439 = vadd.xlane.f32.xlu1 %v10438_v19 }
0x38aa   :  { %v10405_v21 = vpop.f32.mrf.mxu1 }
0x38ab   :  { %10419 = vst.msk [vmem:[%s15910_s22 + $0x28] sm:$0xff] %vm90_vm0, %v10411_v50  ;;  %v10431_v11 = vsub.f32 %v10411_v50, %v10425_v41  ;;  %v10406_v38 = vadd.f32 %v10982_v35, %v10405_v21  ;;  %v10447_v16 = vsel %vm90_vm0, %v10435_v33, 0.0  ;;  %v10434_v49 = vmul.f32 %v10428_v26, %v10428_v26 }
0x38ad   :  { %v10437_v24 = vmul.f32 %v10431_v11, %v10431_v11  ;;  %10418 = vst.msk [vmem:[%s15910_s22 + $0x20] sm:$0xff] %vm90_vm0, %v10406_v38  ;;  %v10430_v14 = vsub.f32 %v10406_v38, %v10424_v23  ;;  %10448 = vadd.xlane.f32.xlu1 %v10447_v16  ;;  %v10444_v17 = vsel %vm90_vm0, %v10434_v49, 0.0 }
0x38af   :  { %v10436_v62 = vmul.f32 %v10430_v14, %v10430_v14  ;;  %v10453_v0 = vsel %vm90_vm0, %v10437_v24, 0.0 }
0x38b0   :  { %10454 = vadd.xlane.f32.xlu0 %v10453_v0 }
0x38b1   :  { %10445 = vadd.xlane.f32.xlu1 %v10444_v17  ;;  %v10450_v47 = vsel %vm90_vm0, %v10436_v62, 0.0  ;;  %vm10565_vm0 = vcmask 189440  }
0x38b2   :  { %v10577_v12 = vsel %vm10565_vm0, %v15960_v54, 0.0 }
0x38b4   :  { %10451 = vadd.xlane.f32.xlu0 %v10450_v47 }
0x38c2   :  { %10492 = vbcast.lane.b32.xlu1 %v15958_v46, 272 }
0x38ca   :  { %10477 = vbcast.lane.b32.xlu0 %v15957_v43, 272 }
0x3930   :  { %v10443_v45 = vpop.xlane.xlu0 %10442 }
0x3931   :  { %v10458_v20 = vmul.f32 0.020833334, %v10443_v45 }
0x3932   :  { %v10440_v4 = vpop.xlane.xlu1 %10439 }
0x3933   :  { %v10501_v10 = vmul.f32 %v10474_v13, %v10458_v20  ;;  %v10457_v63 = vmul.f32 0.020833334, %v10440_v4 }
0x3935   :  { %v10500_v57 = vmul.f32 %v10470_v36, %v10457_v63  ;;  %10516 = vperm.xlu1 %12690, %v10501_v10  }
0x3936   :  { %v10449_v18 = vpop.xlane.xlu1 %10448 }
0x3937   :  { %v10460_v5 = vmul.f32 0.020833334, %v10449_v18  ;;  %10513 = vperm.xlu0 %12691, %v10500_v57  }
0x3939   :  { %v10503_v51 = vmul.f32 %v10485_v1, %v10460_v5  ;;  %v10455_v30 = vpop.xlane.xlu0 %10454 }
0x393a   :  { %v10446_v34 = vpop.xlane.xlu1 %10445  ;;  %v10462_v37 = vmul.f32 0.020833334, %v10455_v30 }
0x393b   :  { %10522 = vperm.xlu1 %12690, %v10503_v51   ;;  %v10459_v3 = vmul.f32 0.020833334, %v10446_v34 }
0x393d   :  { %v10452_v46 = vpop.xlane.xlu0 %10451 }
0x393e   :  { %v10461_v43 = vmul.f32 0.020833334, %v10452_v46  ;;  %v10493_v15 = vpop.permute.xlu1 %10492 }
0x393f   :  { %v10505_v7 = vmul.f32 %v10493_v15, %v10462_v37 }
0x3940   :  { %v10504_v31 = vmul.f32 %v10489_v52, %v10461_v43 }
0x3941   :  { %v10478_v53 = vpop.permute.xlu0 %10477 }
0x3942   :  { %v10502_v28 = vmul.f32 %v10478_v53, %v10459_v3  ;;  %10525 = vperm.xlu0 %12691, %v10504_v31  }
0x3944   :  { %10519 = vperm.xlu1 %12690, %v10502_v28  }
0x3946   :  { %10528 = vperm.xlu0 %12691, %v10505_v7  }
0x3965   :  { %10578 = vadd.xlane.f32.xlu0 %v10577_v12 }
0x39b0   :  { %v10517_v35 = vpop.permute.xlu1 %10516 }
0x39b1   :  { %v10538_v27 = vrot.slane %v10517_v35, %v10537_v25 }
0x39b2   :  { %v10514_v60 = vpop.permute.xlu0 %10513 }
0x39b3   :  { %v10533_v55 = vrot.slane %v10514_v60, %v10532_v56 }
0x39b5   :  { %v10540_v6 = vsel %vm10539_vm1, %v10538_v27, %v10533_v55 }
0x39b6   :  { %v10523_v8 = vpop.permute.xlu1 %10522 }
0x39b7   :  { %v10551_v2 = vrot.slane %v10523_v8, %v10532_v56 }
0x39bd   :  { %v10526_v42 = vpop.permute.xlu0 %10525 }
0x39be   :  { %v10555_v61 = vrot.slane %v10526_v42, %v10537_v25 }
0x39bf   :  { %v10520_v29 = vpop.permute.xlu1 %10519 }
0x39c0   :  { %v10545_v39 = vrot.slane %v10520_v29, %v10544_v9  ;;  %v10556_v41 = vsel %vm10539_vm1, %v10555_v61, %v10551_v2 }
0x39c1   :  { %v10529_v48 = vpop.permute.xlu0 %10528 }
0x39c2   :  { %v10560_v32 = vrot.slane %v10529_v48, %v10544_v9  ;;  %v10547_v19 = vsel %vm10546_vm6, %v10545_v39, %v10540_v6 }
0x39c4   :  { %v10561_v33 = vsel %vm10546_vm6, %v10560_v32, %v10556_v41 }
0x39c5   :  { %v10563_v26 = vsel %vm10562_vm15, %v10561_v33, %v10547_v19 }
0x39c6   :  { %v10566_v50 = vsel %vm10565_vm0, %v10563_v26, 0.0 }
0x39c7   :  { %10567 = vadd.xlane.f32.xlu1 %v10566_v50 }
0x39ee   :  { %v10579_v21 = vpop.xlane.xlu0 %10578 }
0x39ef   :  { %v10580_v23 = vrot.slane %v10579_v21, 4 }
0x39f1   :  { %v10581_v11 = vadd.f32 %v10580_v23, %v10579_v21 }
0x39f3   :  { %v10582_v38 = vrot.slane %v10581_v11, 2 }
0x39f5   :  { %v10583_v14 = vadd.f32 %v10582_v38, %v10581_v11 }
0x39f7   :  { %v10584_v17 = vrot.slane %v10583_v14, 1 }
0x39f9   :  { %v10585_v36 = vadd.f32 %v10584_v17, %v10583_v14 }
0x3a50   :  { %v10568_v16 = vpop.xlane.xlu1 %10567 }
0x3a51   :  { %v10569_v49 = vrot.slane %v10568_v16, 4 }
0x3a53   :  { %v10570_v24 = vadd.f32 %v10569_v49, %v10568_v16 }
0x3a55   :  { %v10571_v62 = vrot.slane %v10570_v24, 2 }
0x3a57   :  { %v10572_v0 = vadd.f32 %v10571_v62, %v10570_v24 }
0x3a59   :  { %v10573_v47 = vrot.slane %v10572_v0, 1 }
0x3a5b   :  { %v10574_v58 = vadd.f32 %v10573_v47, %v10572_v0 }
0x3a5d   :  { %12681 = vpush %v10574_v58 }
0x3a5e   :  { %12683 = vpush %v10585_v36 }
0x3a8e   :  { %s12682_s22 = spop %12681 }
0x3a8f   :  { %s12684_s20 = spop %12683  ;;  %v10576_v52 = vstv %s12682_s22 }
0x3a90   :  { %v10587_v1 = vstv %s12684_s20 }
0x3a91   :  { %13060 = vrcp.f32 %v10587_v1 }
0x3a9e   :  { %v13061_v13 = vpop.eup %13060 }
0x3a9f   :  { %v10589_v45 = vmul.f32 %v13061_v13, %v10576_v52 }
0x3aa1   :  { %10591 = vst.msk [vmem:[#allocation2] sm:$0x1] %vm10590_vm2, %v10589_v45 }
0x3aa2   :  { %13077 = shalt.err (!%p13074_p4)
}
0x3aa3   :  { %10603 = dma.vmem_to_hbm [thread:$0]  %s10601_s13, 16, %s15911_s23, [#allocation3]  }
0x3aa4   :  { %13086 = dma.done.wait [#allocation3], 16  }
0x3aa5   :  { %13087 = vsyncadd [#allocation3], 4294967280 }
0x3aa6   :  { %10609 = vsyncpa [#allocation3], 1 }

</bundles_post_ra>
